<compile_context>
chip_gen: v5e
topology: v5e:2x2
jax: 0.10.0
libtpu: 0.0.40
codegen_flags: <defaults>
</compile_context>

<pallas_src>
import numpy as np
import jax
import jax.numpy as jnp
from jax.experimental import pallas as pl
from jax.experimental.pallas import tpu as pltpu

BOARD_X, BOARD_Y = 6, 7            # standard Connect4 board
NPOS = BOARD_X * BOARD_Y           # 42 spatial positions
ACTION_SIZE = 7                    # one action per column
FLAT = 64 * NPOS                   # 2688
HEAD_N = 128                       # policy(7) + value(1), zero-padded to 128 lanes
TAPS = [(kh, kw) for kh in range(3) for kw in range(3)]
MAX_TB = 128                       # max boards per grid step (power of two)


def _round_up(x, m):
    return (x + m - 1) // m * m


# --------------------------------------------------------------------------
# Fused kernel: conv1 -> conv2 -> FC heads -> log_softmax / tanh.
# Row layout inside a tile: row = p * tb + b  (position-major, board-minor),
# lanes = channels.  All conv shifts are therefore multiples of tb rows and
# never mix boards for valid taps; wrapped / cross-position rows are exactly
# the off-board taps, which are zeroed by the masks.
# --------------------------------------------------------------------------

def _fused_kernel(x9_ref, w1_ref, b1_ref, w2_ref, b2_ref, wh_ref, bh_ref, o_ref):
    tb = o_ref.shape[0]              # boards in this tile (power of two, >= 8)
    M = x9_ref.shape[0]              # tb * 42 rows
    tb_shift = tb.bit_length() - 1   # log2(tb)

    # ---- conv1 (1 -> 32): 9-tap im2col was pre-expanded in the wrapper.
    y1 = jnp.dot(x9_ref[...], w1_ref[...], preferred_element_type=jnp.float32)
    y1 = jnp.maximum(y1 + b1_ref[...], 0.0)                        # (M, 32)

    # ---- tap validity from the row index:  p = row >> log2(tb)  (no division).
    row = jax.lax.broadcasted_iota(jnp.int32, (M, 1), 0)
    p = jnp.right_shift(row, tb_shift)                             # position 0..41
    left = (p == 0)                                                # w == 0
    right = (p == BOARD_Y - 1)                                     # w == 6
    for k in range(1, BOARD_X):
        left = left | (p == BOARD_Y * k)
        right = right | (p == BOARD_Y * k + BOARD_Y - 1)

    # ---- conv2 (32 -> 64): 9 rolled/masked K=32 MXU matmuls, VMEM-resident.
    acc2 = jnp.zeros((M, 64), jnp.float32)
    for t, (kh, kw) in enumerate(TAPS):
        dh, dw = kh - 1, kw - 1
        off = (dh * BOARD_Y + dw) * tb                             # row shift
        tap = y1 if off == 0 else pltpu.roll(y1, shift=(-off) % M, axis=0)
        conds = []
        if dh == -1:
            conds.append(p >= BOARD_Y)                             # h - 1 >= 0
        elif dh == 1:
            conds.append(p < BOARD_Y * (BOARD_X - 1))              # h + 1 <= 5
        if dw == -1:
            conds.append(jnp.logical_not(left))                    # w - 1 >= 0
        elif dw == 1:
            conds.append(jnp.logical_not(right))                   # w + 1 <= 6
        if conds:
            m = conds[0]
            for c in conds[1:]:
                m = m & c
            tap = jnp.where(m, tap, 0.0)
        acc2 = acc2 + jnp.dot(tap, w2_ref[t], preferred_element_type=jnp.float32)
    y2 = jnp.maximum(acc2 + b2_ref[...], 0.0)                      # (M, 64)

    # ---- FC heads fused: logits[b] = sum_p y2[p*tb + b, :] @ wh[p]
    # (42 aligned static slices, K=64 MXU matmuls -- no flatten needed).
    logits = jnp.zeros((tb, HEAD_N), jnp.float32)
    for pp in range(NPOS):
        logits = logits + jnp.dot(y2[pp * tb:(pp + 1) * tb, :], wh_ref[pp],
                                  preferred_element_type=jnp.float32)
    logits = logits + bh_ref[...]

    # ---- masked log_softmax over lanes 0..6, tanh(value) in lane 7, zeros after.
    col = jax.lax.broadcasted_iota(jnp.int32, (tb, HEAD_N), 1)
    is_pi = col < ACTION_SIZE
    neg = jnp.float32(-1e30)
    zmax = jnp.max(jnp.where(is_pi, logits, neg), axis=1, keepdims=True)
    z = logits - zmax
    sumexp = jnp.sum(jnp.exp(jnp.where(is_pi, z, neg)), axis=1, keepdims=True)
    log_pi = z - jnp.log(sumexp)
    o_ref[...] = jnp.where(is_pi, log_pi,
                           jnp.where(col == ACTION_SIZE, jnp.tanh(logits), 0.0))


# ------------------------------- glue ---------------------------------------

def _prepare_params(params):
    # conv weights in (kh, kw, cin) x cout order.
    w1 = jnp.transpose(params["conv1_w"], (2, 3, 1, 0)).reshape(9, 32)
    b1 = params["conv1_b"].reshape(1, 32)
    w2 = jnp.transpose(params["conv2_w"], (2, 3, 1, 0)).reshape(9, 32, 64)
    b2 = params["conv2_b"].reshape(1, 64)

    def head_w(w):  # torch flatten order is (c, h, w); re-index to [p, c, out]
        o = w.shape[0]
        return jnp.transpose(w.reshape(o, 64, BOARD_X, BOARD_Y),
                             (2, 3, 1, 0)).reshape(NPOS, 64, o)

    pad_n = HEAD_N - ACTION_SIZE - 1
    wh = jnp.concatenate([head_w(params["fc_pi_w"]), head_w(params["fc_v_w"]),
                          jnp.zeros((NPOS, 64, pad_n), jnp.float32)], axis=2)
    bh = jnp.concatenate([params["fc_pi_b"], params["fc_v_b"],
                          jnp.zeros((pad_n,), jnp.float32)]).reshape(1, HEAD_N)
    return w1, b1, w2, b2, wh, bh


def connect4_forward(s, params):
    """s: (B, 6, 7) board states -> (log_pi (B, 7), v (B, 1)).  Eval-mode."""
    B = s.shape[0]
    w1, b1, w2, b2, wh, bh = _prepare_params(params)

    # Boards per grid step: power of two (needed for the in-kernel p = row>>k
    # trick and 8-aligned head slices), large enough to amortize per-step
    # overhead and fill the MXU rows, capped to keep VMEM comfortable.
    tb = min(MAX_TB, max(8, pl.next_power_of_2(B)))
    b_pad = _round_up(B, tb)
    n_tiles = b_pad // tb
    M = NPOS * tb

    x = s.reshape(B, BOARD_X, BOARD_Y).astype(jnp.float32)
    x = jnp.pad(x, ((0, b_pad - B), (0, 0), (0, 0)))
    # conv1 im2col (tiny, plain XLA): x9[b, p, t] = board value at tap t (0 off-board)
    xp = jnp.pad(x, ((0, 0), (1, 1), (1, 1)))
    taps = [xp[:, kh:kh + BOARD_X, kw:kw + BOARD_Y] for kh, kw in TAPS]
    x9 = jnp.stack(taps, axis=-1).reshape(b_pad, NPOS, 9)
    # position-major / board-minor rows inside each tile: row = p*tb + b
    x9 = (x9.reshape(n_tiles, tb, NPOS, 9)
             .transpose(0, 2, 1, 3)
             .reshape(n_tiles * M, 9))

    out = pl.pallas_call(
        _fused_kernel,
        out_shape=jax.ShapeDtypeStruct((b_pad, HEAD_N), jnp.float32),
        grid=(n_tiles,),
        in_specs=[
            pl.BlockSpec((M, 9), lambda i: (i, 0)),                 # conv1 im2col tile
            pl.BlockSpec((9, 32), lambda i: (0, 0)),                # conv1 weight
            pl.BlockSpec((1, 32), lambda i: (0, 0)),                # conv1 bias
            pl.BlockSpec((9, 32, 64), lambda i: (0, 0, 0)),         # conv2 weight / tap
            pl.BlockSpec((1, 64), lambda i: (0, 0)),                # conv2 bias
            pl.BlockSpec((NPOS, 64, HEAD_N), lambda i: (0, 0, 0)),  # head weights [p,c,o]
            pl.BlockSpec((1, HEAD_N), lambda i: (0, 0)),            # head bias
        ],
        out_specs=pl.BlockSpec((tb, HEAD_N), lambda i: (i, 0)),     # lane-dense output
        compiler_params=pltpu.CompilerParams(
            dimension_semantics=("parallel",),
            vmem_limit_bytes=48 * 1024 * 1024),
    )(x9, w1, b1, w2, b2, wh, bh)

    # TODO(synk): F.dropout under training=True not implemented; eval-mode
    # identity is used, matching eval-mode PyTorch exactly.
    return out[:B, :ACTION_SIZE], out[:B, ACTION_SIZE:ACTION_SIZE + 1]


# ----------------------- pure-JAX reference (checking) ----------------------

def reference_forward(s, params):
    x = s.reshape(-1, 1, BOARD_X, BOARD_Y).astype(jnp.float32)
    y = jax.lax.conv_general_dilated(
        x, params["conv1_w"], (1, 1), ((1, 1), (1, 1)),
        dimension_numbers=("NCHW", "OIHW", "NCHW")) + params["conv1_b"].reshape(1, -1, 1, 1)
    y = jnp.maximum(y, 0.0)
    y = jax.lax.conv_general_dilated(
        y, params["conv2_w"], (1, 1), ((1, 1), (1, 1)),
        dimension_numbers=("NCHW", "OIHW", "NCHW")) + params["conv2_b"].reshape(1, -1, 1, 1)
    y = jnp.maximum(y, 0.0)
    feat = y.reshape(y.shape[0], FLAT)
    pi = feat @ params["fc_pi_w"].T + params["fc_pi_b"]
    v = jnp.tanh(feat @ params["fc_v_w"].T + params["fc_v_b"])
    return jax.nn.log_softmax(pi, axis=1), v


# ------------------------------- params ------------------------------------

def init_params(key):
    ks = jax.random.split(key, 8)
    return {
        "conv1_w": 0.10 * jax.random.normal(ks[0], (32, 1, 3, 3), jnp.float32),
        "conv1_b": 0.10 * jax.random.normal(ks[1], (32,), jnp.float32),
        "conv2_w": 0.05 * jax.random.normal(ks[2], (64, 32, 3, 3), jnp.float32),
        "conv2_b": 0.05 * jax.random.normal(ks[3], (64,), jnp.float32),
        "fc_pi_w": 0.02 * jax.random.normal(ks[4], (ACTION_SIZE, FLAT), jnp.float32),
        "fc_pi_b": 0.02 * jax.random.normal(ks[5], (ACTION_SIZE,), jnp.float32),
        "fc_v_w": 0.02 * jax.random.normal(ks[6], (1, FLAT), jnp.float32),
        "fc_v_b": 0.02 * jax.random.normal(ks[7], (1,), jnp.float32),
    }


if __name__ == "__main__":
    key = jax.random.PRNGKey(0)
    pkey, skey = jax.random.split(key)
    params = init_params(pkey)
    fwd = jax.jit(connect4_forward)

    # small demo batch (B=2 boards): single tile, tb=8
    s = jax.random.normal(skey, (2, BOARD_X, BOARD_Y), jnp.float32)
    log_pi, v = jax.block_until_ready(fwd(s, params))
    assert log_pi.shape == (2, ACTION_SIZE) and log_pi.dtype == jnp.float32
    assert v.shape == (2, 1) and v.dtype == jnp.float32
    ref_log_pi, ref_v = reference_forward(s, params)
    assert jnp.allclose(log_pi, ref_log_pi, atol=1e-3, rtol=1e-3)
    assert jnp.allclose(v, ref_v, atol=1e-3, rtol=1e-3)

    # larger batch: exercises tb=128, a 2-step "parallel" grid and batch padding
    s2 = jax.random.normal(jax.random.PRNGKey(1), (200, BOARD_X, BOARD_Y), jnp.float32)
    log_pi2, v2 = jax.block_until_ready(fwd(s2, params))
    ref_log_pi2, ref_v2 = reference_forward(s2, params)
    assert jnp.allclose(log_pi2, ref_log_pi2, atol=1e-3, rtol=1e-3)
    assert jnp.allclose(v2, ref_v2, atol=1e-3, rtol=1e-3)

    print("KERNEL_OK")
</pallas_src>

<mosaic_0001>
module attributes {stable_mosaic.version = 11 : i64} {
  func.func @_fused_kernel(%arg0: i32, %arg1: memref<336x9xf32, #tpu.memory_space<vmem>>, %arg2: memref<9x32xf32, #tpu.memory_space<vmem>>, %arg3: memref<1x32xf32, #tpu.memory_space<vmem>>, %arg4: memref<9x32x64xf32, #tpu.memory_space<vmem>>, %arg5: memref<1x64xf32, #tpu.memory_space<vmem>>, %arg6: memref<42x64x128xf32, #tpu.memory_space<vmem>>, %arg7: memref<1x128xf32, #tpu.memory_space<vmem>>, %arg8: memref<8x128xf32, #tpu.memory_space<vmem>>) attributes {dimension_semantics = [#tpu.dimension_semantics<parallel>], iteration_bounds = array<i64: 1>, scalar_prefetch = 0 : i64, scratch_operands = 0 : i64, tpu.core_type = #tpu.core_type<tc>, window_params = [{transform_indices = @transform_0, window_bounds = array<i64: 336, 9>}, {pipeline_mode = #tpu.pipeline_mode<synchronous>, transform_indices = @transform_1, window_bounds = array<i64: 9, 32>}, {pipeline_mode = #tpu.pipeline_mode<synchronous>, transform_indices = @transform_2, window_bounds = array<i64: 1, 32>}, {pipeline_mode = #tpu.pipeline_mode<synchronous>, transform_indices = @transform_3, window_bounds = array<i64: 9, 32, 64>}, {pipeline_mode = #tpu.pipeline_mode<synchronous>, transform_indices = @transform_4, window_bounds = array<i64: 1, 64>}, {pipeline_mode = #tpu.pipeline_mode<synchronous>, transform_indices = @transform_5, window_bounds = array<i64: 42, 64, 128>}, {pipeline_mode = #tpu.pipeline_mode<synchronous>, transform_indices = @transform_6, window_bounds = array<i64: 1, 128>}, {transform_indices = @transform_7, window_bounds = array<i64: 8, 128>}]} {
    %c0 = arith.constant 0 : index
    %c0_0 = arith.constant 0 : index
    %0 = vector.load %arg1[%c0, %c0_0] : memref<336x9xf32, #tpu.memory_space<vmem>>, vector<336x9xf32>
    %c0_1 = arith.constant 0 : index
    %c0_2 = arith.constant 0 : index
    %1 = vector.load %arg2[%c0_1, %c0_2] : memref<9x32xf32, #tpu.memory_space<vmem>>, vector<9x32xf32>
    %cst = arith.constant dense<0.000000e+00> : vector<336x32xf32>
    %2 = tpu.matmul %0, %1, %cst {dimension_numbers = #tpu.dot_dimension_numbers<[1], [0], [0], [1], [0, 0, 1, 1], [], []>} : vector<336x9xf32>, vector<9x32xf32>, vector<336x32xf32> -> vector<336x32xf32>
    %c0_3 = arith.constant 0 : index
    %c0_4 = arith.constant 0 : index
    %3 = vector.load %arg3[%c0_3, %c0_4] : memref<1x32xf32, #tpu.memory_space<vmem>>, vector<1x32xf32>
    %4 = vector.broadcast %3 : vector<1x32xf32> to vector<336x32xf32>
    %5 = arith.addf %2, %4 : vector<336x32xf32>
    %cst_5 = arith.constant 0.000000e+00 : f32
    %6 = vector.broadcast %cst_5 : f32 to vector<336x32xf32>
    %7 = arith.maximumf %5, %6 : vector<336x32xf32>
    %8 = tpu.iota {dimensions = array<i32: 0>} : vector<336x1xi32>
    %c3_i32 = arith.constant 3 : i32
    %9 = vector.broadcast %c3_i32 : i32 to vector<336x1xi32>
    %10 = arith.shrsi %8, %9 : vector<336x1xi32>
    %c0_i32 = arith.constant 0 : i32
    %11 = vector.broadcast %c0_i32 : i32 to vector<336x1xi32>
    %12 = arith.cmpi eq, %10, %11 : vector<336x1xi32>
    %c6_i32 = arith.constant 6 : i32
    %13 = vector.broadcast %c6_i32 : i32 to vector<336x1xi32>
    %14 = arith.cmpi eq, %10, %13 : vector<336x1xi32>
    %c7_i32 = arith.constant 7 : i32
    %15 = vector.broadcast %c7_i32 : i32 to vector<336x1xi32>
    %16 = arith.cmpi eq, %10, %15 : vector<336x1xi32>
    %17 = arith.ori %12, %16 : vector<336x1xi1>
    %c13_i32 = arith.constant 13 : i32
    %18 = vector.broadcast %c13_i32 : i32 to vector<336x1xi32>
    %19 = arith.cmpi eq, %10, %18 : vector<336x1xi32>
    %20 = arith.ori %14, %19 : vector<336x1xi1>
    %c14_i32 = arith.constant 14 : i32
    %21 = vector.broadcast %c14_i32 : i32 to vector<336x1xi32>
    %22 = arith.cmpi eq, %10, %21 : vector<336x1xi32>
    %23 = arith.ori %17, %22 : vector<336x1xi1>
    %c20_i32 = arith.constant 20 : i32
    %24 = vector.broadcast %c20_i32 : i32 to vector<336x1xi32>
    %25 = arith.cmpi eq, %10, %24 : vector<336x1xi32>
    %26 = arith.ori %20, %25 : vector<336x1xi1>
    %c21_i32 = arith.constant 21 : i32
    %27 = vector.broadcast %c21_i32 : i32 to vector<336x1xi32>
    %28 = arith.cmpi eq, %10, %27 : vector<336x1xi32>
    %29 = arith.ori %23, %28 : vector<336x1xi1>
    %c27_i32 = arith.constant 27 : i32
    %30 = vector.broadcast %c27_i32 : i32 to vector<336x1xi32>
    %31 = arith.cmpi eq, %10, %30 : vector<336x1xi32>
    %32 = arith.ori %26, %31 : vector<336x1xi1>
    %c28_i32 = arith.constant 28 : i32
    %33 = vector.broadcast %c28_i32 : i32 to vector<336x1xi32>
    %34 = arith.cmpi eq, %10, %33 : vector<336x1xi32>
    %35 = arith.ori %29, %34 : vector<336x1xi1>
    %c34_i32 = arith.constant 34 : i32
    %36 = vector.broadcast %c34_i32 : i32 to vector<336x1xi32>
    %37 = arith.cmpi eq, %10, %36 : vector<336x1xi32>
    %38 = arith.ori %32, %37 : vector<336x1xi1>
    %c35_i32 = arith.constant 35 : i32
    %39 = vector.broadcast %c35_i32 : i32 to vector<336x1xi32>
    %40 = arith.cmpi eq, %10, %39 : vector<336x1xi32>
    %41 = arith.ori %35, %40 : vector<336x1xi1>
    %c41_i32 = arith.constant 41 : i32
    %42 = vector.broadcast %c41_i32 : i32 to vector<336x1xi32>
    %43 = arith.cmpi eq, %10, %42 : vector<336x1xi32>
    %44 = arith.ori %38, %43 : vector<336x1xi1>
    %cst_6 = arith.constant 0.000000e+00 : f32
    %45 = vector.broadcast %cst_6 : f32 to vector<336x64xf32>
    %c64_i32 = arith.constant 64 : i32
    %46 = tpu.dynamic_rotate %7 by %c64_i32 dim 0 : vector<336x32xf32>, i32 -> vector<336x32xf32>
    %c7_i32_7 = arith.constant 7 : i32
    %47 = vector.broadcast %c7_i32_7 : i32 to vector<336x1xi32>
    %48 = arith.cmpi sge, %10, %47 : vector<336x1xi32>
    %cst_8 = arith.constant dense<true> : vector<336x1xi1>
    %49 = arith.xori %41, %cst_8 : vector<336x1xi1>
    %50 = arith.andi %48, %49 : vector<336x1xi1>
    %cst_9 = arith.constant 0.000000e+00 : f32
    %51 = vector.shape_cast %50 : vector<336x1xi1> to vector<336x1xi1>
    %52 = vector.broadcast %51 : vector<336x1xi1> to vector<336x32xi1>
    %53 = vector.broadcast %cst_9 : f32 to vector<336x32xf32>
    %54 = arith.select %52, %46, %53 : vector<336x32xi1>, vector<336x32xf32>
    %c0_10 = arith.constant 0 : index
    %c0_11 = arith.constant 0 : index
    %c0_12 = arith.constant 0 : index
    %55 = vector.load %arg4[%c0_10, %c0_11, %c0_12] : memref<9x32x64xf32, #tpu.memory_space<vmem>>, vector<1x32x64xf32>
    %56 = vector.shape_cast %55 : vector<1x32x64xf32> to vector<32x64xf32>
    %cst_13 = arith.constant dense<0.000000e+00> : vector<336x64xf32>
    %57 = tpu.matmul %54, %56, %cst_13 {dimension_numbers = #tpu.dot_dimension_numbers<[1], [0], [0], [1], [0, 0, 1, 1], [], []>} : vector<336x32xf32>, vector<32x64xf32>, vector<336x64xf32> -> vector<336x64xf32>
    %58 = arith.addf %45, %57 : vector<336x64xf32>
    %c56_i32 = arith.constant 56 : i32
    %59 = tpu.dynamic_rotate %7 by %c56_i32 dim 0 : vector<336x32xf32>, i32 -> vector<336x32xf32>
    %c7_i32_14 = arith.constant 7 : i32
    %60 = vector.broadcast %c7_i32_14 : i32 to vector<336x1xi32>
    %61 = arith.cmpi sge, %10, %60 : vector<336x1xi32>
    %cst_15 = arith.constant 0.000000e+00 : f32
    %62 = vector.shape_cast %61 : vector<336x1xi1> to vector<336x1xi1>
    %63 = vector.broadcast %62 : vector<336x1xi1> to vector<336x32xi1>
    %64 = vector.broadcast %cst_15 : f32 to vector<336x32xf32>
    %65 = arith.select %63, %59, %64 : vector<336x32xi1>, vector<336x32xf32>
    %c1 = arith.constant 1 : index
    %c0_16 = arith.constant 0 : index
    %c0_17 = arith.constant 0 : index
    %66 = vector.load %arg4[%c1, %c0_16, %c0_17] : memref<9x32x64xf32, #tpu.memory_space<vmem>>, vector<1x32x64xf32>
    %67 = vector.shape_cast %66 : vector<1x32x64xf32> to vector<32x64xf32>
    %cst_18 = arith.constant dense<0.000000e+00> : vector<336x64xf32>
    %68 = tpu.matmul %65, %67, %cst_18 {dimension_numbers = #tpu.dot_dimension_numbers<[1], [0], [0], [1], [0, 0, 1, 1], [], []>} : vector<336x32xf32>, vector<32x64xf32>, vector<336x64xf32> -> vector<336x64xf32>
    %69 = arith.addf %58, %68 : vector<336x64xf32>
    %c48_i32 = arith.constant 48 : i32
    %70 = tpu.dynamic_rotate %7 by %c48_i32 dim 0 : vector<336x32xf32>, i32 -> vector<336x32xf32>
    %c7_i32_19 = arith.constant 7 : i32
    %71 = vector.broadcast %c7_i32_19 : i32 to vector<336x1xi32>
    %72 = arith.cmpi sge, %10, %71 : vector<336x1xi32>
    %cst_20 = arith.constant dense<true> : vector<336x1xi1>
    %73 = arith.xori %44, %cst_20 : vector<336x1xi1>
    %74 = arith.andi %72, %73 : vector<336x1xi1>
    %cst_21 = arith.constant 0.000000e+00 : f32
    %75 = vector.shape_cast %74 : vector<336x1xi1> to vector<336x1xi1>
    %76 = vector.broadcast %75 : vector<336x1xi1> to vector<336x32xi1>
    %77 = vector.broadcast %cst_21 : f32 to vector<336x32xf32>
    %78 = arith.select %76, %70, %77 : vector<336x32xi1>, vector<336x32xf32>
    %c2 = arith.constant 2 : index
    %c0_22 = arith.constant 0 : index
    %c0_23 = arith.constant 0 : index
    %79 = vector.load %arg4[%c2, %c0_22, %c0_23] : memref<9x32x64xf32, #tpu.memory_space<vmem>>, vector<1x32x64xf32>
    %80 = vector.shape_cast %79 : vector<1x32x64xf32> to vector<32x64xf32>
    %cst_24 = arith.constant dense<0.000000e+00> : vector<336x64xf32>
    %81 = tpu.matmul %78, %80, %cst_24 {dimension_numbers = #tpu.dot_dimension_numbers<[1], [0], [0], [1], [0, 0, 1, 1], [], []>} : vector<336x32xf32>, vector<32x64xf32>, vector<336x64xf32> -> vector<336x64xf32>
    %82 = arith.addf %69, %81 : vector<336x64xf32>
    %c8_i32 = arith.constant 8 : i32
    %83 = tpu.dynamic_rotate %7 by %c8_i32 dim 0 : vector<336x32xf32>, i32 -> vector<336x32xf32>
    %cst_25 = arith.constant dense<true> : vector<336x1xi1>
    %84 = arith.xori %41, %cst_25 : vector<336x1xi1>
    %cst_26 = arith.constant 0.000000e+00 : f32
    %85 = vector.shape_cast %84 : vector<336x1xi1> to vector<336x1xi1>
    %86 = vector.broadcast %85 : vector<336x1xi1> to vector<336x32xi1>
    %87 = vector.broadcast %cst_26 : f32 to vector<336x32xf32>
    %88 = arith.select %86, %83, %87 : vector<336x32xi1>, vector<336x32xf32>
    %c3 = arith.constant 3 : index
    %c0_27 = arith.constant 0 : index
    %c0_28 = arith.constant 0 : index
    %89 = vector.load %arg4[%c3, %c0_27, %c0_28] : memref<9x32x64xf32, #tpu.memory_space<vmem>>, vector<1x32x64xf32>
    %90 = vector.shape_cast %89 : vector<1x32x64xf32> to vector<32x64xf32>
    %cst_29 = arith.constant dense<0.000000e+00> : vector<336x64xf32>
    %91 = tpu.matmul %88, %90, %cst_29 {dimension_numbers = #tpu.dot_dimension_numbers<[1], [0], [0], [1], [0, 0, 1, 1], [], []>} : vector<336x32xf32>, vector<32x64xf32>, vector<336x64xf32> -> vector<336x64xf32>
    %92 = arith.addf %82, %91 : vector<336x64xf32>
    %c4 = arith.constant 4 : index
    %c0_30 = arith.constant 0 : index
    %c0_31 = arith.constant 0 : index
    %93 = vector.load %arg4[%c4, %c0_30, %c0_31] : memref<9x32x64xf32, #tpu.memory_space<vmem>>, vector<1x32x64xf32>
    %94 = vector.shape_cast %93 : vector<1x32x64xf32> to vector<32x64xf32>
    %cst_32 = arith.constant dense<0.000000e+00> : vector<336x64xf32>
    %95 = tpu.matmul %7, %94, %cst_32 {dimension_numbers = #tpu.dot_dimension_numbers<[1], [0], [0], [1], [0, 0, 1, 1], [], []>} : vector<336x32xf32>, vector<32x64xf32>, vector<336x64xf32> -> vector<336x64xf32>
    %96 = arith.addf %92, %95 : vector<336x64xf32>
    %c328_i32 = arith.constant 328 : i32
    %97 = tpu.dynamic_rotate %7 by %c328_i32 dim 0 : vector<336x32xf32>, i32 -> vector<336x32xf32>
    %cst_33 = arith.constant dense<true> : vector<336x1xi1>
    %98 = arith.xori %44, %cst_33 : vector<336x1xi1>
    %cst_34 = arith.constant 0.000000e+00 : f32
    %99 = vector.shape_cast %98 : vector<336x1xi1> to vector<336x1xi1>
    %100 = vector.broadcast %99 : vector<336x1xi1> to vector<336x32xi1>
    %101 = vector.broadcast %cst_34 : f32 to vector<336x32xf32>
    %102 = arith.select %100, %97, %101 : vector<336x32xi1>, vector<336x32xf32>
    %c5 = arith.constant 5 : index
    %c0_35 = arith.constant 0 : index
    %c0_36 = arith.constant 0 : index
    %103 = vector.load %arg4[%c5, %c0_35, %c0_36] : memref<9x32x64xf32, #tpu.memory_space<vmem>>, vector<1x32x64xf32>
    %104 = vector.shape_cast %103 : vector<1x32x64xf32> to vector<32x64xf32>
    %cst_37 = arith.constant dense<0.000000e+00> : vector<336x64xf32>
    %105 = tpu.matmul %102, %104, %cst_37 {dimension_numbers = #tpu.dot_dimension_numbers<[1], [0], [0], [1], [0, 0, 1, 1], [], []>} : vector<336x32xf32>, vector<32x64xf32>, vector<336x64xf32> -> vector<336x64xf32>
    %106 = arith.addf %96, %105 : vector<336x64xf32>
    %c288_i32 = arith.constant 288 : i32
    %107 = tpu.dynamic_rotate %7 by %c288_i32 dim 0 : vector<336x32xf32>, i32 -> vector<336x32xf32>
    %c35_i32_38 = arith.constant 35 : i32
    %108 = vector.broadcast %c35_i32_38 : i32 to vector<336x1xi32>
    %109 = arith.cmpi slt, %10, %108 : vector<336x1xi32>
    %cst_39 = arith.constant dense<true> : vector<336x1xi1>
    %110 = arith.xori %41, %cst_39 : vector<336x1xi1>
    %111 = arith.andi %109, %110 : vector<336x1xi1>
    %cst_40 = arith.constant 0.000000e+00 : f32
    %112 = vector.shape_cast %111 : vector<336x1xi1> to vector<336x1xi1>
    %113 = vector.broadcast %112 : vector<336x1xi1> to vector<336x32xi1>
    %114 = vector.broadcast %cst_40 : f32 to vector<336x32xf32>
    %115 = arith.select %113, %107, %114 : vector<336x32xi1>, vector<336x32xf32>
    %c6 = arith.constant 6 : index
    %c0_41 = arith.constant 0 : index
    %c0_42 = arith.constant 0 : index
    %116 = vector.load %arg4[%c6, %c0_41, %c0_42] : memref<9x32x64xf32, #tpu.memory_space<vmem>>, vector<1x32x64xf32>
    %117 = vector.shape_cast %116 : vector<1x32x64xf32> to vector<32x64xf32>
    %cst_43 = arith.constant dense<0.000000e+00> : vector<336x64xf32>
    %118 = tpu.matmul %115, %117, %cst_43 {dimension_numbers = #tpu.dot_dimension_numbers<[1], [0], [0], [1], [0, 0, 1, 1], [], []>} : vector<336x32xf32>, vector<32x64xf32>, vector<336x64xf32> -> vector<336x64xf32>
    %119 = arith.addf %106, %118 : vector<336x64xf32>
    %c280_i32 = arith.constant 280 : i32
    %120 = tpu.dynamic_rotate %7 by %c280_i32 dim 0 : vector<336x32xf32>, i32 -> vector<336x32xf32>
    %c35_i32_44 = arith.constant 35 : i32
    %121 = vector.broadcast %c35_i32_44 : i32 to vector<336x1xi32>
    %122 = arith.cmpi slt, %10, %121 : vector<336x1xi32>
    %cst_45 = arith.constant 0.000000e+00 : f32
    %123 = vector.shape_cast %122 : vector<336x1xi1> to vector<336x1xi1>
    %124 = vector.broadcast %123 : vector<336x1xi1> to vector<336x32xi1>
    %125 = vector.broadcast %cst_45 : f32 to vector<336x32xf32>
    %126 = arith.select %124, %120, %125 : vector<336x32xi1>, vector<336x32xf32>
    %c7 = arith.constant 7 : index
    %c0_46 = arith.constant 0 : index
    %c0_47 = arith.constant 0 : index
    %127 = vector.load %arg4[%c7, %c0_46, %c0_47] : memref<9x32x64xf32, #tpu.memory_space<vmem>>, vector<1x32x64xf32>
    %128 = vector.shape_cast %127 : vector<1x32x64xf32> to vector<32x64xf32>
    %cst_48 = arith.constant dense<0.000000e+00> : vector<336x64xf32>
    %129 = tpu.matmul %126, %128, %cst_48 {dimension_numbers = #tpu.dot_dimension_numbers<[1], [0], [0], [1], [0, 0, 1, 1], [], []>} : vector<336x32xf32>, vector<32x64xf32>, vector<336x64xf32> -> vector<336x64xf32>
    %130 = arith.addf %119, %129 : vector<336x64xf32>
    %c272_i32 = arith.constant 272 : i32
    %131 = tpu.dynamic_rotate %7 by %c272_i32 dim 0 : vector<336x32xf32>, i32 -> vector<336x32xf32>
    %c35_i32_49 = arith.constant 35 : i32
    %132 = vector.broadcast %c35_i32_49 : i32 to vector<336x1xi32>
    %133 = arith.cmpi slt, %10, %132 : vector<336x1xi32>
    %cst_50 = arith.constant dense<true> : vector<336x1xi1>
    %134 = arith.xori %44, %cst_50 : vector<336x1xi1>
    %135 = arith.andi %133, %134 : vector<336x1xi1>
    %cst_51 = arith.constant 0.000000e+00 : f32
    %136 = vector.shape_cast %135 : vector<336x1xi1> to vector<336x1xi1>
    %137 = vector.broadcast %136 : vector<336x1xi1> to vector<336x32xi1>
    %138 = vector.broadcast %cst_51 : f32 to vector<336x32xf32>
    %139 = arith.select %137, %131, %138 : vector<336x32xi1>, vector<336x32xf32>
    %c8 = arith.constant 8 : index
    %c0_52 = arith.constant 0 : index
    %c0_53 = arith.constant 0 : index
    %140 = vector.load %arg4[%c8, %c0_52, %c0_53] : memref<9x32x64xf32, #tpu.memory_space<vmem>>, vector<1x32x64xf32>
    %141 = vector.shape_cast %140 : vector<1x32x64xf32> to vector<32x64xf32>
    %cst_54 = arith.constant dense<0.000000e+00> : vector<336x64xf32>
    %142 = tpu.matmul %139, %141, %cst_54 {dimension_numbers = #tpu.dot_dimension_numbers<[1], [0], [0], [1], [0, 0, 1, 1], [], []>} : vector<336x32xf32>, vector<32x64xf32>, vector<336x64xf32> -> vector<336x64xf32>
    %143 = arith.addf %130, %142 : vector<336x64xf32>
    %c0_55 = arith.constant 0 : index
    %c0_56 = arith.constant 0 : index
    %144 = vector.load %arg5[%c0_55, %c0_56] : memref<1x64xf32, #tpu.memory_space<vmem>>, vector<1x64xf32>
    %145 = vector.broadcast %144 : vector<1x64xf32> to vector<336x64xf32>
    %146 = arith.addf %143, %145 : vector<336x64xf32>
    %cst_57 = arith.constant 0.000000e+00 : f32
    %147 = vector.broadcast %cst_57 : f32 to vector<336x64xf32>
    %148 = arith.maximumf %146, %147 : vector<336x64xf32>
    %cst_58 = arith.constant 0.000000e+00 : f32
    %149 = vector.broadcast %cst_58 : f32 to vector<8x128xf32>
    %150 = vector.extract_strided_slice %148 {offsets = [0, 0], sizes = [8, 64], strides = [1, 1]} : vector<336x64xf32> to vector<8x64xf32>
    %c0_59 = arith.constant 0 : index
    %c0_60 = arith.constant 0 : index
    %c0_61 = arith.constant 0 : index
    %151 = vector.load %arg6[%c0_59, %c0_60, %c0_61] : memref<42x64x128xf32, #tpu.memory_space<vmem>>, vector<1x64x128xf32>
    %152 = vector.shape_cast %151 : vector<1x64x128xf32> to vector<64x128xf32>
    %cst_62 = arith.constant dense<0.000000e+00> : vector<8x128xf32>
    %153 = tpu.matmul %150, %152, %cst_62 {dimension_numbers = #tpu.dot_dimension_numbers<[1], [0], [0], [1], [0, 0, 1, 1], [], []>} : vector<8x64xf32>, vector<64x128xf32>, vector<8x128xf32> -> vector<8x128xf32>
    %154 = arith.addf %149, %153 : vector<8x128xf32>
    %155 = vector.extract_strided_slice %148 {offsets = [8, 0], sizes = [8, 64], strides = [1, 1]} : vector<336x64xf32> to vector<8x64xf32>
    %c1_63 = arith.constant 1 : index
    %c0_64 = arith.constant 0 : index
    %c0_65 = arith.constant 0 : index
    %156 = vector.load %arg6[%c1_63, %c0_64, %c0_65] : memref<42x64x128xf32, #tpu.memory_space<vmem>>, vector<1x64x128xf32>
    %157 = vector.shape_cast %156 : vector<1x64x128xf32> to vector<64x128xf32>
    %cst_66 = arith.constant dense<0.000000e+00> : vector<8x128xf32>
    %158 = tpu.matmul %155, %157, %cst_66 {dimension_numbers = #tpu.dot_dimension_numbers<[1], [0], [0], [1], [0, 0, 1, 1], [], []>} : vector<8x64xf32>, vector<64x128xf32>, vector<8x128xf32> -> vector<8x128xf32>
    %159 = arith.addf %154, %158 : vector<8x128xf32>
    %160 = vector.extract_strided_slice %148 {offsets = [16, 0], sizes = [8, 64], strides = [1, 1]} : vector<336x64xf32> to vector<8x64xf32>
    %c2_67 = arith.constant 2 : index
    %c0_68 = arith.constant 0 : index
    %c0_69 = arith.constant 0 : index
    %161 = vector.load %arg6[%c2_67, %c0_68, %c0_69] : memref<42x64x128xf32, #tpu.memory_space<vmem>>, vector<1x64x128xf32>
    %162 = vector.shape_cast %161 : vector<1x64x128xf32> to vector<64x128xf32>
    %cst_70 = arith.constant dense<0.000000e+00> : vector<8x128xf32>
    %163 = tpu.matmul %160, %162, %cst_70 {dimension_numbers = #tpu.dot_dimension_numbers<[1], [0], [0], [1], [0, 0, 1, 1], [], []>} : vector<8x64xf32>, vector<64x128xf32>, vector<8x128xf32> -> vector<8x128xf32>
    %164 = arith.addf %159, %163 : vector<8x128xf32>
    %165 = vector.extract_strided_slice %148 {offsets = [24, 0], sizes = [8, 64], strides = [1, 1]} : vector<336x64xf32> to vector<8x64xf32>
    %c3_71 = arith.constant 3 : index
    %c0_72 = arith.constant 0 : index
    %c0_73 = arith.constant 0 : index
    %166 = vector.load %arg6[%c3_71, %c0_72, %c0_73] : memref<42x64x128xf32, #tpu.memory_space<vmem>>, vector<1x64x128xf32>
    %167 = vector.shape_cast %166 : vector<1x64x128xf32> to vector<64x128xf32>
    %cst_74 = arith.constant dense<0.000000e+00> : vector<8x128xf32>
    %168 = tpu.matmul %165, %167, %cst_74 {dimension_numbers = #tpu.dot_dimension_numbers<[1], [0], [0], [1], [0, 0, 1, 1], [], []>} : vector<8x64xf32>, vector<64x128xf32>, vector<8x128xf32> -> vector<8x128xf32>
    %169 = arith.addf %164, %168 : vector<8x128xf32>
    %170 = vector.extract_strided_slice %148 {offsets = [32, 0], sizes = [8, 64], strides = [1, 1]} : vector<336x64xf32> to vector<8x64xf32>
    %c4_75 = arith.constant 4 : index
    %c0_76 = arith.constant 0 : index
    %c0_77 = arith.constant 0 : index
    %171 = vector.load %arg6[%c4_75, %c0_76, %c0_77] : memref<42x64x128xf32, #tpu.memory_space<vmem>>, vector<1x64x128xf32>
    %172 = vector.shape_cast %171 : vector<1x64x128xf32> to vector<64x128xf32>
    %cst_78 = arith.constant dense<0.000000e+00> : vector<8x128xf32>
    %173 = tpu.matmul %170, %172, %cst_78 {dimension_numbers = #tpu.dot_dimension_numbers<[1], [0], [0], [1], [0, 0, 1, 1], [], []>} : vector<8x64xf32>, vector<64x128xf32>, vector<8x128xf32> -> vector<8x128xf32>
    %174 = arith.addf %169, %173 : vector<8x128xf32>
    %175 = vector.extract_strided_slice %148 {offsets = [40, 0], sizes = [8, 64], strides = [1, 1]} : vector<336x64xf32> to vector<8x64xf32>
    %c5_79 = arith.constant 5 : index
    %c0_80 = arith.constant 0 : index
    %c0_81 = arith.constant 0 : index
    %176 = vector.load %arg6[%c5_79, %c0_80, %c0_81] : memref<42x64x128xf32, #tpu.memory_space<vmem>>, vector<1x64x128xf32>
    %177 = vector.shape_cast %176 : vector<1x64x128xf32> to vector<64x128xf32>
    %cst_82 = arith.constant dense<0.000000e+00> : vector<8x128xf32>
    %178 = tpu.matmul %175, %177, %cst_82 {dimension_numbers = #tpu.dot_dimension_numbers<[1], [0], [0], [1], [0, 0, 1, 1], [], []>} : vector<8x64xf32>, vector<64x128xf32>, vector<8x128xf32> -> vector<8x128xf32>
    %179 = arith.addf %174, %178 : vector<8x128xf32>
    %180 = vector.extract_strided_slice %148 {offsets = [48, 0], sizes = [8, 64], strides = [1, 1]} : vector<336x64xf32> to vector<8x64xf32>
    %c6_83 = arith.constant 6 : index
    %c0_84 = arith.constant 0 : index
    %c0_85 = arith.constant 0 : index
    %181 = vector.load %arg6[%c6_83, %c0_84, %c0_85] : memref<42x64x128xf32, #tpu.memory_space<vmem>>, vector<1x64x128xf32>
    %182 = vector.shape_cast %181 : vector<1x64x128xf32> to vector<64x128xf32>
    %cst_86 = arith.constant dense<0.000000e+00> : vector<8x128xf32>
    %183 = tpu.matmul %180, %182, %cst_86 {dimension_numbers = #tpu.dot_dimension_numbers<[1], [0], [0], [1], [0, 0, 1, 1], [], []>} : vector<8x64xf32>, vector<64x128xf32>, vector<8x128xf32> -> vector<8x128xf32>
    %184 = arith.addf %179, %183 : vector<8x128xf32>
    %185 = vector.extract_strided_slice %148 {offsets = [56, 0], sizes = [8, 64], strides = [1, 1]} : vector<336x64xf32> to vector<8x64xf32>
    %c7_87 = arith.constant 7 : index
    %c0_88 = arith.constant 0 : index
    %c0_89 = arith.constant 0 : index
    %186 = vector.load %arg6[%c7_87, %c0_88, %c0_89] : memref<42x64x128xf32, #tpu.memory_space<vmem>>, vector<1x64x128xf32>
    %187 = vector.shape_cast %186 : vector<1x64x128xf32> to vector<64x128xf32>
    %cst_90 = arith.constant dense<0.000000e+00> : vector<8x128xf32>
    %188 = tpu.matmul %185, %187, %cst_90 {dimension_numbers = #tpu.dot_dimension_numbers<[1], [0], [0], [1], [0, 0, 1, 1], [], []>} : vector<8x64xf32>, vector<64x128xf32>, vector<8x128xf32> -> vector<8x128xf32>
    %189 = arith.addf %184, %188 : vector<8x128xf32>
    %190 = vector.extract_strided_slice %148 {offsets = [64, 0], sizes = [8, 64], strides = [1, 1]} : vector<336x64xf32> to vector<8x64xf32>
    %c8_91 = arith.constant 8 : index
    %c0_92 = arith.constant 0 : index
    %c0_93 = arith.constant 0 : index
    %191 = vector.load %arg6[%c8_91, %c0_92, %c0_93] : memref<42x64x128xf32, #tpu.memory_space<vmem>>, vector<1x64x128xf32>
    %192 = vector.shape_cast %191 : vector<1x64x128xf32> to vector<64x128xf32>
    %cst_94 = arith.constant dense<0.000000e+00> : vector<8x128xf32>
    %193 = tpu.matmul %190, %192, %cst_94 {dimension_numbers = #tpu.dot_dimension_numbers<[1], [0], [0], [1], [0, 0, 1, 1], [], []>} : vector<8x64xf32>, vector<64x128xf32>, vector<8x128xf32> -> vector<8x128xf32>
    %194 = arith.addf %189, %193 : vector<8x128xf32>
    %195 = vector.extract_strided_slice %148 {offsets = [72, 0], sizes = [8, 64], strides = [1, 1]} : vector<336x64xf32> to vector<8x64xf32>
    %c9 = arith.constant 9 : index
    %c0_95 = arith.constant 0 : index
    %c0_96 = arith.constant 0 : index
    %196 = vector.load %arg6[%c9, %c0_95, %c0_96] : memref<42x64x128xf32, #tpu.memory_space<vmem>>, vector<1x64x128xf32>
    %197 = vector.shape_cast %196 : vector<1x64x128xf32> to vector<64x128xf32>
    %cst_97 = arith.constant dense<0.000000e+00> : vector<8x128xf32>
    %198 = tpu.matmul %195, %197, %cst_97 {dimension_numbers = #tpu.dot_dimension_numbers<[1], [0], [0], [1], [0, 0, 1, 1], [], []>} : vector<8x64xf32>, vector<64x128xf32>, vector<8x128xf32> -> vector<8x128xf32>
    %199 = arith.addf %194, %198 : vector<8x128xf32>
    %200 = vector.extract_strided_slice %148 {offsets = [80, 0], sizes = [8, 64], strides = [1, 1]} : vector<336x64xf32> to vector<8x64xf32>
    %c10 = arith.constant 10 : index
    %c0_98 = arith.constant 0 : index
    %c0_99 = arith.constant 0 : index
    %201 = vector.load %arg6[%c10, %c0_98, %c0_99] : memref<42x64x128xf32, #tpu.memory_space<vmem>>, vector<1x64x128xf32>
    %202 = vector.shape_cast %201 : vector<1x64x128xf32> to vector<64x128xf32>
    %cst_100 = arith.constant dense<0.000000e+00> : vector<8x128xf32>
    %203 = tpu.matmul %200, %202, %cst_100 {dimension_numbers = #tpu.dot_dimension_numbers<[1], [0], [0], [1], [0, 0, 1, 1], [], []>} : vector<8x64xf32>, vector<64x128xf32>, vector<8x128xf32> -> vector<8x128xf32>
    %204 = arith.addf %199, %203 : vector<8x128xf32>
    %205 = vector.extract_strided_slice %148 {offsets = [88, 0], sizes = [8, 64], strides = [1, 1]} : vector<336x64xf32> to vector<8x64xf32>
    %c11 = arith.constant 11 : index
    %c0_101 = arith.constant 0 : index
    %c0_102 = arith.constant 0 : index
    %206 = vector.load %arg6[%c11, %c0_101, %c0_102] : memref<42x64x128xf32, #tpu.memory_space<vmem>>, vector<1x64x128xf32>
    %207 = vector.shape_cast %206 : vector<1x64x128xf32> to vector<64x128xf32>
    %cst_103 = arith.constant dense<0.000000e+00> : vector<8x128xf32>
    %208 = tpu.matmul %205, %207, %cst_103 {dimension_numbers = #tpu.dot_dimension_numbers<[1], [0], [0], [1], [0, 0, 1, 1], [], []>} : vector<8x64xf32>, vector<64x128xf32>, vector<8x128xf32> -> vector<8x128xf32>
    %209 = arith.addf %204, %208 : vector<8x128xf32>
    %210 = vector.extract_strided_slice %148 {offsets = [96, 0], sizes = [8, 64], strides = [1, 1]} : vector<336x64xf32> to vector<8x64xf32>
    %c12 = arith.constant 12 : index
    %c0_104 = arith.constant 0 : index
    %c0_105 = arith.constant 0 : index
    %211 = vector.load %arg6[%c12, %c0_104, %c0_105] : memref<42x64x128xf32, #tpu.memory_space<vmem>>, vector<1x64x128xf32>
    %212 = vector.shape_cast %211 : vector<1x64x128xf32> to vector<64x128xf32>
    %cst_106 = arith.constant dense<0.000000e+00> : vector<8x128xf32>
    %213 = tpu.matmul %210, %212, %cst_106 {dimension_numbers = #tpu.dot_dimension_numbers<[1], [0], [0], [1], [0, 0, 1, 1], [], []>} : vector<8x64xf32>, vector<64x128xf32>, vector<8x128xf32> -> vector<8x128xf32>
    %214 = arith.addf %209, %213 : vector<8x128xf32>
    %215 = vector.extract_strided_slice %148 {offsets = [104, 0], sizes = [8, 64], strides = [1, 1]} : vector<336x64xf32> to vector<8x64xf32>
    %c13 = arith.constant 13 : index
    %c0_107 = arith.constant 0 : index
    %c0_108 = arith.constant 0 : index
    %216 = vector.load %arg6[%c13, %c0_107, %c0_108] : memref<42x64x128xf32, #tpu.memory_space<vmem>>, vector<1x64x128xf32>
    %217 = vector.shape_cast %216 : vector<1x64x128xf32> to vector<64x128xf32>
    %cst_109 = arith.constant dense<0.000000e+00> : vector<8x128xf32>
    %218 = tpu.matmul %215, %217, %cst_109 {dimension_numbers = #tpu.dot_dimension_numbers<[1], [0], [0], [1], [0, 0, 1, 1], [], []>} : vector<8x64xf32>, vector<64x128xf32>, vector<8x128xf32> -> vector<8x128xf32>
    %219 = arith.addf %214, %218 : vector<8x128xf32>
    %220 = vector.extract_strided_slice %148 {offsets = [112, 0], sizes = [8, 64], strides = [1, 1]} : vector<336x64xf32> to vector<8x64xf32>
    %c14 = arith.constant 14 : index
    %c0_110 = arith.constant 0 : index
    %c0_111 = arith.constant 0 : index
    %221 = vector.load %arg6[%c14, %c0_110, %c0_111] : memref<42x64x128xf32, #tpu.memory_space<vmem>>, vector<1x64x128xf32>
    %222 = vector.shape_cast %221 : vector<1x64x128xf32> to vector<64x128xf32>
    %cst_112 = arith.constant dense<0.000000e+00> : vector<8x128xf32>
    %223 = tpu.matmul %220, %222, %cst_112 {dimension_numbers = #tpu.dot_dimension_numbers<[1], [0], [0], [1], [0, 0, 1, 1], [], []>} : vector<8x64xf32>, vector<64x128xf32>, vector<8x128xf32> -> vector<8x128xf32>
    %224 = arith.addf %219, %223 : vector<8x128xf32>
    %225 = vector.extract_strided_slice %148 {offsets = [120, 0], sizes = [8, 64], strides = [1, 1]} : vector<336x64xf32> to vector<8x64xf32>
    %c15 = arith.constant 15 : index
    %c0_113 = arith.constant 0 : index
    %c0_114 = arith.constant 0 : index
    %226 = vector.load %arg6[%c15, %c0_113, %c0_114] : memref<42x64x128xf32, #tpu.memory_space<vmem>>, vector<1x64x128xf32>
    %227 = vector.shape_cast %226 : vector<1x64x128xf32> to vector<64x128xf32>
    %cst_115 = arith.constant dense<0.000000e+00> : vector<8x128xf32>
    %228 = tpu.matmul %225, %227, %cst_115 {dimension_numbers = #tpu.dot_dimension_numbers<[1], [0], [0], [1], [0, 0, 1, 1], [], []>} : vector<8x64xf32>, vector<64x128xf32>, vector<8x128xf32> -> vector<8x128xf32>
    %229 = arith.addf %224, %228 : vector<8x128xf32>
    %230 = vector.extract_strided_slice %148 {offsets = [128, 0], sizes = [8, 64], strides = [1, 1]} : vector<336x64xf32> to vector<8x64xf32>
    %c16 = arith.constant 16 : index
    %c0_116 = arith.constant 0 : index
    %c0_117 = arith.constant 0 : index
    %231 = vector.load %arg6[%c16, %c0_116, %c0_117] : memref<42x64x128xf32, #tpu.memory_space<vmem>>, vector<1x64x128xf32>
    %232 = vector.shape_cast %231 : vector<1x64x128xf32> to vector<64x128xf32>
    %cst_118 = arith.constant dense<0.000000e+00> : vector<8x128xf32>
    %233 = tpu.matmul %230, %232, %cst_118 {dimension_numbers = #tpu.dot_dimension_numbers<[1], [0], [0], [1], [0, 0, 1, 1], [], []>} : vector<8x64xf32>, vector<64x128xf32>, vector<8x128xf32> -> vector<8x128xf32>
    %234 = arith.addf %229, %233 : vector<8x128xf32>
    %235 = vector.extract_strided_slice %148 {offsets = [136, 0], sizes = [8, 64], strides = [1, 1]} : vector<336x64xf32> to vector<8x64xf32>
    %c17 = arith.constant 17 : index
    %c0_119 = arith.constant 0 : index
    %c0_120 = arith.constant 0 : index
    %236 = vector.load %arg6[%c17, %c0_119, %c0_120] : memref<42x64x128xf32, #tpu.memory_space<vmem>>, vector<1x64x128xf32>
    %237 = vector.shape_cast %236 : vector<1x64x128xf32> to vector<64x128xf32>
    %cst_121 = arith.constant dense<0.000000e+00> : vector<8x128xf32>
    %238 = tpu.matmul %235, %237, %cst_121 {dimension_numbers = #tpu.dot_dimension_numbers<[1], [0], [0], [1], [0, 0, 1, 1], [], []>} : vector<8x64xf32>, vector<64x128xf32>, vector<8x128xf32> -> vector<8x128xf32>
    %239 = arith.addf %234, %238 : vector<8x128xf32>
    %240 = vector.extract_strided_slice %148 {offsets = [144, 0], sizes = [8, 64], strides = [1, 1]} : vector<336x64xf32> to vector<8x64xf32>
    %c18 = arith.constant 18 : index
    %c0_122 = arith.constant 0 : index
    %c0_123 = arith.constant 0 : index
    %241 = vector.load %arg6[%c18, %c0_122, %c0_123] : memref<42x64x128xf32, #tpu.memory_space<vmem>>, vector<1x64x128xf32>
    %242 = vector.shape_cast %241 : vector<1x64x128xf32> to vector<64x128xf32>
    %cst_124 = arith.constant dense<0.000000e+00> : vector<8x128xf32>
    %243 = tpu.matmul %240, %242, %cst_124 {dimension_numbers = #tpu.dot_dimension_numbers<[1], [0], [0], [1], [0, 0, 1, 1], [], []>} : vector<8x64xf32>, vector<64x128xf32>, vector<8x128xf32> -> vector<8x128xf32>
    %244 = arith.addf %239, %243 : vector<8x128xf32>
    %245 = vector.extract_strided_slice %148 {offsets = [152, 0], sizes = [8, 64], strides = [1, 1]} : vector<336x64xf32> to vector<8x64xf32>
    %c19 = arith.constant 19 : index
    %c0_125 = arith.constant 0 : index
    %c0_126 = arith.constant 0 : index
    %246 = vector.load %arg6[%c19, %c0_125, %c0_126] : memref<42x64x128xf32, #tpu.memory_space<vmem>>, vector<1x64x128xf32>
    %247 = vector.shape_cast %246 : vector<1x64x128xf32> to vector<64x128xf32>
    %cst_127 = arith.constant dense<0.000000e+00> : vector<8x128xf32>
    %248 = tpu.matmul %245, %247, %cst_127 {dimension_numbers = #tpu.dot_dimension_numbers<[1], [0], [0], [1], [0, 0, 1, 1], [], []>} : vector<8x64xf32>, vector<64x128xf32>, vector<8x128xf32> -> vector<8x128xf32>
    %249 = arith.addf %244, %248 : vector<8x128xf32>
    %250 = vector.extract_strided_slice %148 {offsets = [160, 0], sizes = [8, 64], strides = [1, 1]} : vector<336x64xf32> to vector<8x64xf32>
    %c20 = arith.constant 20 : index
    %c0_128 = arith.constant 0 : index
    %c0_129 = arith.constant 0 : index
    %251 = vector.load %arg6[%c20, %c0_128, %c0_129] : memref<42x64x128xf32, #tpu.memory_space<vmem>>, vector<1x64x128xf32>
    %252 = vector.shape_cast %251 : vector<1x64x128xf32> to vector<64x128xf32>
    %cst_130 = arith.constant dense<0.000000e+00> : vector<8x128xf32>
    %253 = tpu.matmul %250, %252, %cst_130 {dimension_numbers = #tpu.dot_dimension_numbers<[1], [0], [0], [1], [0, 0, 1, 1], [], []>} : vector<8x64xf32>, vector<64x128xf32>, vector<8x128xf32> -> vector<8x128xf32>
    %254 = arith.addf %249, %253 : vector<8x128xf32>
    %255 = vector.extract_strided_slice %148 {offsets = [168, 0], sizes = [8, 64], strides = [1, 1]} : vector<336x64xf32> to vector<8x64xf32>
    %c21 = arith.constant 21 : index
    %c0_131 = arith.constant 0 : index
    %c0_132 = arith.constant 0 : index
    %256 = vector.load %arg6[%c21, %c0_131, %c0_132] : memref<42x64x128xf32, #tpu.memory_space<vmem>>, vector<1x64x128xf32>
    %257 = vector.shape_cast %256 : vector<1x64x128xf32> to vector<64x128xf32>
    %cst_133 = arith.constant dense<0.000000e+00> : vector<8x128xf32>
    %258 = tpu.matmul %255, %257, %cst_133 {dimension_numbers = #tpu.dot_dimension_numbers<[1], [0], [0], [1], [0, 0, 1, 1], [], []>} : vector<8x64xf32>, vector<64x128xf32>, vector<8x128xf32> -> vector<8x128xf32>
    %259 = arith.addf %254, %258 : vector<8x128xf32>
    %260 = vector.extract_strided_slice %148 {offsets = [176, 0], sizes = [8, 64], strides = [1, 1]} : vector<336x64xf32> to vector<8x64xf32>
    %c22 = arith.constant 22 : index
    %c0_134 = arith.constant 0 : index
    %c0_135 = arith.constant 0 : index
    %261 = vector.load %arg6[%c22, %c0_134, %c0_135] : memref<42x64x128xf32, #tpu.memory_space<vmem>>, vector<1x64x128xf32>
    %262 = vector.shape_cast %261 : vector<1x64x128xf32> to vector<64x128xf32>
    %cst_136 = arith.constant dense<0.000000e+00> : vector<8x128xf32>
    %263 = tpu.matmul %260, %262, %cst_136 {dimension_numbers = #tpu.dot_dimension_numbers<[1], [0], [0], [1], [0, 0, 1, 1], [], []>} : vector<8x64xf32>, vector<64x128xf32>, vector<8x128xf32> -> vector<8x128xf32>
    %264 = arith.addf %259, %263 : vector<8x128xf32>
    %265 = vector.extract_strided_slice %148 {offsets = [184, 0], sizes = [8, 64], strides = [1, 1]} : vector<336x64xf32> to vector<8x64xf32>
    %c23 = arith.constant 23 : index
    %c0_137 = arith.constant 0 : index
    %c0_138 = arith.constant 0 : index
    %266 = vector.load %arg6[%c23, %c0_137, %c0_138] : memref<42x64x128xf32, #tpu.memory_space<vmem>>, vector<1x64x128xf32>
    %267 = vector.shape_cast %266 : vector<1x64x128xf32> to vector<64x128xf32>
    %cst_139 = arith.constant dense<0.000000e+00> : vector<8x128xf32>
    %268 = tpu.matmul %265, %267, %cst_139 {dimension_numbers = #tpu.dot_dimension_numbers<[1], [0], [0], [1], [0, 0, 1, 1], [], []>} : vector<8x64xf32>, vector<64x128xf32>, vector<8x128xf32> -> vector<8x128xf32>
    %269 = arith.addf %264, %268 : vector<8x128xf32>
    %270 = vector.extract_strided_slice %148 {offsets = [192, 0], sizes = [8, 64], strides = [1, 1]} : vector<336x64xf32> to vector<8x64xf32>
    %c24 = arith.constant 24 : index
    %c0_140 = arith.constant 0 : index
    %c0_141 = arith.constant 0 : index
    %271 = vector.load %arg6[%c24, %c0_140, %c0_141] : memref<42x64x128xf32, #tpu.memory_space<vmem>>, vector<1x64x128xf32>
    %272 = vector.shape_cast %271 : vector<1x64x128xf32> to vector<64x128xf32>
    %cst_142 = arith.constant dense<0.000000e+00> : vector<8x128xf32>
    %273 = tpu.matmul %270, %272, %cst_142 {dimension_numbers = #tpu.dot_dimension_numbers<[1], [0], [0], [1], [0, 0, 1, 1], [], []>} : vector<8x64xf32>, vector<64x128xf32>, vector<8x128xf32> -> vector<8x128xf32>
    %274 = arith.addf %269, %273 : vector<8x128xf32>
    %275 = vector.extract_strided_slice %148 {offsets = [200, 0], sizes = [8, 64], strides = [1, 1]} : vector<336x64xf32> to vector<8x64xf32>
    %c25 = arith.constant 25 : index
    %c0_143 = arith.constant 0 : index
    %c0_144 = arith.constant 0 : index
    %276 = vector.load %arg6[%c25, %c0_143, %c0_144] : memref<42x64x128xf32, #tpu.memory_space<vmem>>, vector<1x64x128xf32>
    %277 = vector.shape_cast %276 : vector<1x64x128xf32> to vector<64x128xf32>
    %cst_145 = arith.constant dense<0.000000e+00> : vector<8x128xf32>
    %278 = tpu.matmul %275, %277, %cst_145 {dimension_numbers = #tpu.dot_dimension_numbers<[1], [0], [0], [1], [0, 0, 1, 1], [], []>} : vector<8x64xf32>, vector<64x128xf32>, vector<8x128xf32> -> vector<8x128xf32>
    %279 = arith.addf %274, %278 : vector<8x128xf32>
    %280 = vector.extract_strided_slice %148 {offsets = [208, 0], sizes = [8, 64], strides = [1, 1]} : vector<336x64xf32> to vector<8x64xf32>
    %c26 = arith.constant 26 : index
    %c0_146 = arith.constant 0 : index
    %c0_147 = arith.constant 0 : index
    %281 = vector.load %arg6[%c26, %c0_146, %c0_147] : memref<42x64x128xf32, #tpu.memory_space<vmem>>, vector<1x64x128xf32>
    %282 = vector.shape_cast %281 : vector<1x64x128xf32> to vector<64x128xf32>
    %cst_148 = arith.constant dense<0.000000e+00> : vector<8x128xf32>
    %283 = tpu.matmul %280, %282, %cst_148 {dimension_numbers = #tpu.dot_dimension_numbers<[1], [0], [0], [1], [0, 0, 1, 1], [], []>} : vector<8x64xf32>, vector<64x128xf32>, vector<8x128xf32> -> vector<8x128xf32>
    %284 = arith.addf %279, %283 : vector<8x128xf32>
    %285 = vector.extract_strided_slice %148 {offsets = [216, 0], sizes = [8, 64], strides = [1, 1]} : vector<336x64xf32> to vector<8x64xf32>
    %c27 = arith.constant 27 : index
    %c0_149 = arith.constant 0 : index
    %c0_150 = arith.constant 0 : index
    %286 = vector.load %arg6[%c27, %c0_149, %c0_150] : memref<42x64x128xf32, #tpu.memory_space<vmem>>, vector<1x64x128xf32>
    %287 = vector.shape_cast %286 : vector<1x64x128xf32> to vector<64x128xf32>
    %cst_151 = arith.constant dense<0.000000e+00> : vector<8x128xf32>
    %288 = tpu.matmul %285, %287, %cst_151 {dimension_numbers = #tpu.dot_dimension_numbers<[1], [0], [0], [1], [0, 0, 1, 1], [], []>} : vector<8x64xf32>, vector<64x128xf32>, vector<8x128xf32> -> vector<8x128xf32>
    %289 = arith.addf %284, %288 : vector<8x128xf32>
    %290 = vector.extract_strided_slice %148 {offsets = [224, 0], sizes = [8, 64], strides = [1, 1]} : vector<336x64xf32> to vector<8x64xf32>
    %c28 = arith.constant 28 : index
    %c0_152 = arith.constant 0 : index
    %c0_153 = arith.constant 0 : index
    %291 = vector.load %arg6[%c28, %c0_152, %c0_153] : memref<42x64x128xf32, #tpu.memory_space<vmem>>, vector<1x64x128xf32>
    %292 = vector.shape_cast %291 : vector<1x64x128xf32> to vector<64x128xf32>
    %cst_154 = arith.constant dense<0.000000e+00> : vector<8x128xf32>
    %293 = tpu.matmul %290, %292, %cst_154 {dimension_numbers = #tpu.dot_dimension_numbers<[1], [0], [0], [1], [0, 0, 1, 1], [], []>} : vector<8x64xf32>, vector<64x128xf32>, vector<8x128xf32> -> vector<8x128xf32>
    %294 = arith.addf %289, %293 : vector<8x128xf32>
    %295 = vector.extract_strided_slice %148 {offsets = [232, 0], sizes = [8, 64], strides = [1, 1]} : vector<336x64xf32> to vector<8x64xf32>
    %c29 = arith.constant 29 : index
    %c0_155 = arith.constant 0 : index
    %c0_156 = arith.constant 0 : index
    %296 = vector.load %arg6[%c29, %c0_155, %c0_156] : memref<42x64x128xf32, #tpu.memory_space<vmem>>, vector<1x64x128xf32>
    %297 = vector.shape_cast %296 : vector<1x64x128xf32> to vector<64x128xf32>
    %cst_157 = arith.constant dense<0.000000e+00> : vector<8x128xf32>
    %298 = tpu.matmul %295, %297, %cst_157 {dimension_numbers = #tpu.dot_dimension_numbers<[1], [0], [0], [1], [0, 0, 1, 1], [], []>} : vector<8x64xf32>, vector<64x128xf32>, vector<8x128xf32> -> vector<8x128xf32>
    %299 = arith.addf %294, %298 : vector<8x128xf32>
    %300 = vector.extract_strided_slice %148 {offsets = [240, 0], sizes = [8, 64], strides = [1, 1]} : vector<336x64xf32> to vector<8x64xf32>
    %c30 = arith.constant 30 : index
    %c0_158 = arith.constant 0 : index
    %c0_159 = arith.constant 0 : index
    %301 = vector.load %arg6[%c30, %c0_158, %c0_159] : memref<42x64x128xf32, #tpu.memory_space<vmem>>, vector<1x64x128xf32>
    %302 = vector.shape_cast %301 : vector<1x64x128xf32> to vector<64x128xf32>
    %cst_160 = arith.constant dense<0.000000e+00> : vector<8x128xf32>
    %303 = tpu.matmul %300, %302, %cst_160 {dimension_numbers = #tpu.dot_dimension_numbers<[1], [0], [0], [1], [0, 0, 1, 1], [], []>} : vector<8x64xf32>, vector<64x128xf32>, vector<8x128xf32> -> vector<8x128xf32>
    %304 = arith.addf %299, %303 : vector<8x128xf32>
    %305 = vector.extract_strided_slice %148 {offsets = [248, 0], sizes = [8, 64], strides = [1, 1]} : vector<336x64xf32> to vector<8x64xf32>
    %c31 = arith.constant 31 : index
    %c0_161 = arith.constant 0 : index
    %c0_162 = arith.constant 0 : index
    %306 = vector.load %arg6[%c31, %c0_161, %c0_162] : memref<42x64x128xf32, #tpu.memory_space<vmem>>, vector<1x64x128xf32>
    %307 = vector.shape_cast %306 : vector<1x64x128xf32> to vector<64x128xf32>
    %cst_163 = arith.constant dense<0.000000e+00> : vector<8x128xf32>
    %308 = tpu.matmul %305, %307, %cst_163 {dimension_numbers = #tpu.dot_dimension_numbers<[1], [0], [0], [1], [0, 0, 1, 1], [], []>} : vector<8x64xf32>, vector<64x128xf32>, vector<8x128xf32> -> vector<8x128xf32>
    %309 = arith.addf %304, %308 : vector<8x128xf32>
    %310 = vector.extract_strided_slice %148 {offsets = [256, 0], sizes = [8, 64], strides = [1, 1]} : vector<336x64xf32> to vector<8x64xf32>
    %c32 = arith.constant 32 : index
    %c0_164 = arith.constant 0 : index
    %c0_165 = arith.constant 0 : index
    %311 = vector.load %arg6[%c32, %c0_164, %c0_165] : memref<42x64x128xf32, #tpu.memory_space<vmem>>, vector<1x64x128xf32>
    %312 = vector.shape_cast %311 : vector<1x64x128xf32> to vector<64x128xf32>
    %cst_166 = arith.constant dense<0.000000e+00> : vector<8x128xf32>
    %313 = tpu.matmul %310, %312, %cst_166 {dimension_numbers = #tpu.dot_dimension_numbers<[1], [0], [0], [1], [0, 0, 1, 1], [], []>} : vector<8x64xf32>, vector<64x128xf32>, vector<8x128xf32> -> vector<8x128xf32>
    %314 = arith.addf %309, %313 : vector<8x128xf32>
    %315 = vector.extract_strided_slice %148 {offsets = [264, 0], sizes = [8, 64], strides = [1, 1]} : vector<336x64xf32> to vector<8x64xf32>
    %c33 = arith.constant 33 : index
    %c0_167 = arith.constant 0 : index
    %c0_168 = arith.constant 0 : index
    %316 = vector.load %arg6[%c33, %c0_167, %c0_168] : memref<42x64x128xf32, #tpu.memory_space<vmem>>, vector<1x64x128xf32>
    %317 = vector.shape_cast %316 : vector<1x64x128xf32> to vector<64x128xf32>
    %cst_169 = arith.constant dense<0.000000e+00> : vector<8x128xf32>
    %318 = tpu.matmul %315, %317, %cst_169 {dimension_numbers = #tpu.dot_dimension_numbers<[1], [0], [0], [1], [0, 0, 1, 1], [], []>} : vector<8x64xf32>, vector<64x128xf32>, vector<8x128xf32> -> vector<8x128xf32>
    %319 = arith.addf %314, %318 : vector<8x128xf32>
    %320 = vector.extract_strided_slice %148 {offsets = [272, 0], sizes = [8, 64], strides = [1, 1]} : vector<336x64xf32> to vector<8x64xf32>
    %c34 = arith.constant 34 : index
    %c0_170 = arith.constant 0 : index
    %c0_171 = arith.constant 0 : index
    %321 = vector.load %arg6[%c34, %c0_170, %c0_171] : memref<42x64x128xf32, #tpu.memory_space<vmem>>, vector<1x64x128xf32>
    %322 = vector.shape_cast %321 : vector<1x64x128xf32> to vector<64x128xf32>
    %cst_172 = arith.constant dense<0.000000e+00> : vector<8x128xf32>
    %323 = tpu.matmul %320, %322, %cst_172 {dimension_numbers = #tpu.dot_dimension_numbers<[1], [0], [0], [1], [0, 0, 1, 1], [], []>} : vector<8x64xf32>, vector<64x128xf32>, vector<8x128xf32> -> vector<8x128xf32>
    %324 = arith.addf %319, %323 : vector<8x128xf32>
    %325 = vector.extract_strided_slice %148 {offsets = [280, 0], sizes = [8, 64], strides = [1, 1]} : vector<336x64xf32> to vector<8x64xf32>
    %c35 = arith.constant 35 : index
    %c0_173 = arith.constant 0 : index
    %c0_174 = arith.constant 0 : index
    %326 = vector.load %arg6[%c35, %c0_173, %c0_174] : memref<42x64x128xf32, #tpu.memory_space<vmem>>, vector<1x64x128xf32>
    %327 = vector.shape_cast %326 : vector<1x64x128xf32> to vector<64x128xf32>
    %cst_175 = arith.constant dense<0.000000e+00> : vector<8x128xf32>
    %328 = tpu.matmul %325, %327, %cst_175 {dimension_numbers = #tpu.dot_dimension_numbers<[1], [0], [0], [1], [0, 0, 1, 1], [], []>} : vector<8x64xf32>, vector<64x128xf32>, vector<8x128xf32> -> vector<8x128xf32>
    %329 = arith.addf %324, %328 : vector<8x128xf32>
    %330 = vector.extract_strided_slice %148 {offsets = [288, 0], sizes = [8, 64], strides = [1, 1]} : vector<336x64xf32> to vector<8x64xf32>
    %c36 = arith.constant 36 : index
    %c0_176 = arith.constant 0 : index
    %c0_177 = arith.constant 0 : index
    %331 = vector.load %arg6[%c36, %c0_176, %c0_177] : memref<42x64x128xf32, #tpu.memory_space<vmem>>, vector<1x64x128xf32>
    %332 = vector.shape_cast %331 : vector<1x64x128xf32> to vector<64x128xf32>
    %cst_178 = arith.constant dense<0.000000e+00> : vector<8x128xf32>
    %333 = tpu.matmul %330, %332, %cst_178 {dimension_numbers = #tpu.dot_dimension_numbers<[1], [0], [0], [1], [0, 0, 1, 1], [], []>} : vector<8x64xf32>, vector<64x128xf32>, vector<8x128xf32> -> vector<8x128xf32>
    %334 = arith.addf %329, %333 : vector<8x128xf32>
    %335 = vector.extract_strided_slice %148 {offsets = [296, 0], sizes = [8, 64], strides = [1, 1]} : vector<336x64xf32> to vector<8x64xf32>
    %c37 = arith.constant 37 : index
    %c0_179 = arith.constant 0 : index
    %c0_180 = arith.constant 0 : index
    %336 = vector.load %arg6[%c37, %c0_179, %c0_180] : memref<42x64x128xf32, #tpu.memory_space<vmem>>, vector<1x64x128xf32>
    %337 = vector.shape_cast %336 : vector<1x64x128xf32> to vector<64x128xf32>
    %cst_181 = arith.constant dense<0.000000e+00> : vector<8x128xf32>
    %338 = tpu.matmul %335, %337, %cst_181 {dimension_numbers = #tpu.dot_dimension_numbers<[1], [0], [0], [1], [0, 0, 1, 1], [], []>} : vector<8x64xf32>, vector<64x128xf32>, vector<8x128xf32> -> vector<8x128xf32>
    %339 = arith.addf %334, %338 : vector<8x128xf32>
    %340 = vector.extract_strided_slice %148 {offsets = [304, 0], sizes = [8, 64], strides = [1, 1]} : vector<336x64xf32> to vector<8x64xf32>
    %c38 = arith.constant 38 : index
    %c0_182 = arith.constant 0 : index
    %c0_183 = arith.constant 0 : index
    %341 = vector.load %arg6[%c38, %c0_182, %c0_183] : memref<42x64x128xf32, #tpu.memory_space<vmem>>, vector<1x64x128xf32>
    %342 = vector.shape_cast %341 : vector<1x64x128xf32> to vector<64x128xf32>
    %cst_184 = arith.constant dense<0.000000e+00> : vector<8x128xf32>
    %343 = tpu.matmul %340, %342, %cst_184 {dimension_numbers = #tpu.dot_dimension_numbers<[1], [0], [0], [1], [0, 0, 1, 1], [], []>} : vector<8x64xf32>, vector<64x128xf32>, vector<8x128xf32> -> vector<8x128xf32>
    %344 = arith.addf %339, %343 : vector<8x128xf32>
    %345 = vector.extract_strided_slice %148 {offsets = [312, 0], sizes = [8, 64], strides = [1, 1]} : vector<336x64xf32> to vector<8x64xf32>
    %c39 = arith.constant 39 : index
    %c0_185 = arith.constant 0 : index
    %c0_186 = arith.constant 0 : index
    %346 = vector.load %arg6[%c39, %c0_185, %c0_186] : memref<42x64x128xf32, #tpu.memory_space<vmem>>, vector<1x64x128xf32>
    %347 = vector.shape_cast %346 : vector<1x64x128xf32> to vector<64x128xf32>
    %cst_187 = arith.constant dense<0.000000e+00> : vector<8x128xf32>
    %348 = tpu.matmul %345, %347, %cst_187 {dimension_numbers = #tpu.dot_dimension_numbers<[1], [0], [0], [1], [0, 0, 1, 1], [], []>} : vector<8x64xf32>, vector<64x128xf32>, vector<8x128xf32> -> vector<8x128xf32>
    %349 = arith.addf %344, %348 : vector<8x128xf32>
    %350 = vector.extract_strided_slice %148 {offsets = [320, 0], sizes = [8, 64], strides = [1, 1]} : vector<336x64xf32> to vector<8x64xf32>
    %c40 = arith.constant 40 : index
    %c0_188 = arith.constant 0 : index
    %c0_189 = arith.constant 0 : index
    %351 = vector.load %arg6[%c40, %c0_188, %c0_189] : memref<42x64x128xf32, #tpu.memory_space<vmem>>, vector<1x64x128xf32>
    %352 = vector.shape_cast %351 : vector<1x64x128xf32> to vector<64x128xf32>
    %cst_190 = arith.constant dense<0.000000e+00> : vector<8x128xf32>
    %353 = tpu.matmul %350, %352, %cst_190 {dimension_numbers = #tpu.dot_dimension_numbers<[1], [0], [0], [1], [0, 0, 1, 1], [], []>} : vector<8x64xf32>, vector<64x128xf32>, vector<8x128xf32> -> vector<8x128xf32>
    %354 = arith.addf %349, %353 : vector<8x128xf32>
    %355 = vector.extract_strided_slice %148 {offsets = [328, 0], sizes = [8, 64], strides = [1, 1]} : vector<336x64xf32> to vector<8x64xf32>
    %c41 = arith.constant 41 : index
    %c0_191 = arith.constant 0 : index
    %c0_192 = arith.constant 0 : index
    %356 = vector.load %arg6[%c41, %c0_191, %c0_192] : memref<42x64x128xf32, #tpu.memory_space<vmem>>, vector<1x64x128xf32>
    %357 = vector.shape_cast %356 : vector<1x64x128xf32> to vector<64x128xf32>
    %cst_193 = arith.constant dense<0.000000e+00> : vector<8x128xf32>
    %358 = tpu.matmul %355, %357, %cst_193 {dimension_numbers = #tpu.dot_dimension_numbers<[1], [0], [0], [1], [0, 0, 1, 1], [], []>} : vector<8x64xf32>, vector<64x128xf32>, vector<8x128xf32> -> vector<8x128xf32>
    %359 = arith.addf %354, %358 : vector<8x128xf32>
    %c0_194 = arith.constant 0 : index
    %c0_195 = arith.constant 0 : index
    %360 = vector.load %arg7[%c0_194, %c0_195] : memref<1x128xf32, #tpu.memory_space<vmem>>, vector<1x128xf32>
    %361 = vector.broadcast %360 : vector<1x128xf32> to vector<8x128xf32>
    %362 = arith.addf %359, %361 : vector<8x128xf32>
    %363 = tpu.iota {dimensions = array<i32: 1>} : vector<8x128xi32>
    %c7_i32_196 = arith.constant 7 : i32
    %364 = vector.broadcast %c7_i32_196 : i32 to vector<8x128xi32>
    %365 = arith.cmpi slt, %363, %364 : vector<8x128xi32>
    %cst_197 = arith.constant -1.000000e+30 : f32
    %366 = vector.broadcast %cst_197 : f32 to vector<8x128xf32>
    %367 = arith.select %365, %362, %366 : vector<8x128xi1>, vector<8x128xf32>
    %cst_198 = arith.constant dense<0xFF800000> : vector<8xf32>
    %368 = vector.multi_reduction <maximumf>, %367, %cst_198 [1] : vector<8x128xf32> to vector<8xf32>
    %369 = vector.shape_cast %368 : vector<8xf32> to vector<8x1xf32>
    %370 = vector.broadcast %369 : vector<8x1xf32> to vector<8x128xf32>
    %371 = arith.subf %362, %370 : vector<8x128xf32>
    %cst_199 = arith.constant -1.000000e+30 : f32
    %372 = vector.broadcast %cst_199 : f32 to vector<8x128xf32>
    %373 = arith.select %365, %371, %372 : vector<8x128xi1>, vector<8x128xf32>
    %374 = math.exp %373 : vector<8x128xf32>
    %cst_200 = arith.constant dense<0.000000e+00> : vector<8xf32>
    %375 = vector.multi_reduction <add>, %374, %cst_200 [1] : vector<8x128xf32> to vector<8xf32>
    %376 = vector.shape_cast %375 : vector<8xf32> to vector<8x1xf32>
    %377 = math.log %376 : vector<8x1xf32>
    %378 = vector.broadcast %377 : vector<8x1xf32> to vector<8x128xf32>
    %379 = arith.subf %371, %378 : vector<8x128xf32>
    %c7_i32_201 = arith.constant 7 : i32
    %380 = vector.broadcast %c7_i32_201 : i32 to vector<8x128xi32>
    %381 = arith.cmpi eq, %363, %380 : vector<8x128xi32>
    %382 = math.tanh %362 : vector<8x128xf32>
    %cst_202 = arith.constant 0.000000e+00 : f32
    %383 = vector.broadcast %cst_202 : f32 to vector<8x128xf32>
    %384 = arith.select %381, %382, %383 : vector<8x128xi1>, vector<8x128xf32>
    %385 = arith.select %365, %379, %384 : vector<8x128xi1>, vector<8x128xf32>
    %c0_203 = arith.constant 0 : index
    %c0_204 = arith.constant 0 : index
    %386 = vector.load %arg8[%c0_203, %c0_204] : memref<8x128xf32, #tpu.memory_space<vmem>>, vector<8x128xf32>
    tpu.vector_store %arg8[%c0_203, %c0_204], %385 {strides = array<i32>} : memref<8x128xf32, #tpu.memory_space<vmem>>, vector<8x128xf32>,
    return
  }
  func.func @transform_0(%arg0: i32) -> (i32, i32) {
    %c0_i32 = arith.constant 0 : i32
    %c0_i32_0 = arith.constant 0 : i32
    return %arg0, %c0_i32 : i32, i32
  }
  func.func @transform_1(%arg0: i32) -> (i32, i32) {
    %c0_i32 = arith.constant 0 : i32
    %c0_i32_0 = arith.constant 0 : i32
    %c0_i32_1 = arith.constant 0 : i32
    return %c0_i32, %c0_i32_0 : i32, i32
  }
  func.func @transform_2(%arg0: i32) -> (i32, i32) {
    %c0_i32 = arith.constant 0 : i32
    %c0_i32_0 = arith.constant 0 : i32
    %c0_i32_1 = arith.constant 0 : i32
    return %c0_i32, %c0_i32_0 : i32, i32
  }
  func.func @transform_3(%arg0: i32) -> (i32, i32, i32) {
    %c0_i32 = arith.constant 0 : i32
    %c0_i32_0 = arith.constant 0 : i32
    %c0_i32_1 = arith.constant 0 : i32
    %c0_i32_2 = arith.constant 0 : i32
    return %c0_i32, %c0_i32_0, %c0_i32_1 : i32, i32, i32
  }
  func.func @transform_4(%arg0: i32) -> (i32, i32) {
    %c0_i32 = arith.constant 0 : i32
    %c0_i32_0 = arith.constant 0 : i32
    %c0_i32_1 = arith.constant 0 : i32
    return %c0_i32, %c0_i32_0 : i32, i32
  }
  func.func @transform_5(%arg0: i32) -> (i32, i32, i32) {
    %c0_i32 = arith.constant 0 : i32
    %c0_i32_0 = arith.constant 0 : i32
    %c0_i32_1 = arith.constant 0 : i32
    %c0_i32_2 = arith.constant 0 : i32
    return %c0_i32, %c0_i32_0, %c0_i32_1 : i32, i32, i32
  }
  func.func @transform_6(%arg0: i32) -> (i32, i32) {
    %c0_i32 = arith.constant 0 : i32
    %c0_i32_0 = arith.constant 0 : i32
    %c0_i32_1 = arith.constant 0 : i32
    return %c0_i32, %c0_i32_0 : i32, i32
  }
  func.func @transform_7(%arg0: i32) -> (i32, i32) {
    %c0_i32 = arith.constant 0 : i32
    %c0_i32_0 = arith.constant 0 : i32
    return %arg0, %c0_i32 : i32, i32
  }
}

</mosaic_0001>

<bundles_post_ra>
// kernel: connect4_forward.1
= control target key start
LH: loop header
LB: loop body
LE: loop exit
PB: predicated region body
PF: predicated region fallthrough
CT: control target
= control target key end

     0   :  { %vm201_vm0 = vcmask 1040384   ;;  %vm74_vm1 = vcmask 72704   ;;  %s17058_s1 = inlined_call_operand.vmem [shape: f32[9,32], index: 1, kind: input, shape index: {}]   ;;  %s17059_s0 = inlined_call_operand.vmem [shape: f32[336,9], index: 0, kind: input, shape index: {}]   ;;  %s17060_s2 = inlined_call_operand.vmem [shape: f32[1,32], index: 2, kind: input, shape index: {}]   ;;  %s17061_s3 = inlined_call_operand.vmem [shape: f32[9,32,64], index: 3, kind: input, shape index: {}]   ;;  %s17062_s5 = inlined_call_operand.vmem [shape: f32[42,64,128], index: 5, kind: input, shape index: {}]   ;;  %s17063_s4 = inlined_call_operand.vmem [shape: f32[1,64], index: 4, kind: input, shape index: {}]   ;;  %s17064_s6 = inlined_call_operand.vmem [shape: f32[1,128], index: 6, kind: input, shape index: {}]   ;;  %s17065_s7 = inlined_call_operand.vmem [shape: f32[8,128], index: 7, kind: output, shape index: {}]  }
   0x1   :  { %v69_v0 = vld [vmem:[%s17058_s1 + $0x8] sm:$0x1]  ;;  %v68_v1 = vld [vmem:[%s17058_s1] sm:$0xff]  ;;  %v28_v4 = vld [vmem:[%s17059_s0 + $0x10] sm:$0xff] }
   0x2   :  { %7004 = vmatpush.msk.msra.mxu0 %vm201_vm0, %v69_v0  ;;  %v26_v2 = vld [vmem:[%s17059_s0] sm:$0xff]  ;;  %v27_v3 = vld [vmem:[%s17059_s0 + $0x8] sm:$0xff]  ;;  %v29_v5 = vld [vmem:[%s17059_s0 + $0x18] sm:$0xff] }
   0x3   :  { %v30_v6 = vld [vmem:[%s17059_s0 + $0x20] sm:$0xff]  ;;  %v31_v7 = vld [vmem:[%s17059_s0 + $0x28] sm:$0xff]  ;;  %v32_v8 = vld [vmem:[%s17059_s0 + $0x30] sm:$0xff] }
   0x4   :  { %220 = vmatpush.msra.mxu0 %v68_v1  ;;  %v33_v9 = vld [vmem:[%s17059_s0 + $0x38] sm:$0xff]  ;;  %v34_v10 = vld [vmem:[%s17059_s0 + $0x40] sm:$0xff]  ;;  %v35_v11 = vld [vmem:[%s17059_s0 + $0x48] sm:$0xff] }
   0x5   :  { %7005 = vmatmul.msk.f32.vlgmr.msra.gmra.mxu0 %vm74_vm1, %v26_v2  ;;  %v36_v12 = vld [vmem:[%s17059_s0 + $0x50] sm:$0xff]  ;;  %v37_v13 = vld [vmem:[%s17059_s0 + $0x58] sm:$0xff]  ;;  %v38_v14 = vld [vmem:[%s17059_s0 + $0x60] sm:$0xff] }
   0x6   :  { %v39_v15 = vld [vmem:[%s17059_s0 + $0x68] sm:$0xff]  ;;  %v40_v16 = vld [vmem:[%s17059_s0 + $0x70] sm:$0xff]  ;;  %v41_v17 = vld [vmem:[%s17059_s0 + $0x78] sm:$0xff] }
   0x7   :  { %v42_v19 = vld [vmem:[%s17059_s0 + $0x80] sm:$0xff]  ;;  %v43_v21 = vld [vmem:[%s17059_s0 + $0x88] sm:$0xff]  ;;  %v44_v23 = vld [vmem:[%s17059_s0 + $0x90] sm:$0xff] }
   0x8   :  { %v45_v25 = vld [vmem:[%s17059_s0 + $0x98] sm:$0xff]  ;;  %v46_v27 = vld [vmem:[%s17059_s0 + $0xa0] sm:$0xff]  ;;  %v47_v29 = vld [vmem:[%s17059_s0 + $0xa8] sm:$0xff] }
   0x9   :  { %v48_v31 = vld [vmem:[%s17059_s0 + $0xb0] sm:$0xff]  ;;  %v49_v33 = vld [vmem:[%s17059_s0 + $0xb8] sm:$0xff]  ;;  %v50_v35 = vld [vmem:[%s17059_s0 + $0xc0] sm:$0xff] }
   0xa   :  { %v51_v37 = vld [vmem:[%s17059_s0 + $0xc8] sm:$0xff]  ;;  %v52_v39 = vld [vmem:[%s17059_s0 + $0xd0] sm:$0xff]  ;;  %v53_v41 = vld [vmem:[%s17059_s0 + $0xd8] sm:$0xff] }
   0xb   :  { %v54_v43 = vld [vmem:[%s17059_s0 + $0xe0] sm:$0xff]  ;;  %v55_v45 = vld [vmem:[%s17059_s0 + $0xe8] sm:$0xff]  ;;  %v56_v47 = vld [vmem:[%s17059_s0 + $0xf0] sm:$0xff] }
   0xc   :  { %v57_v49 = vld [vmem:[%s17059_s0 + $0xf8] sm:$0xff]  ;;  %v58_v51 = vld [vmem:[%s17059_s0 + $0x100] sm:$0xff]  ;;  %v59_v53 = vld [vmem:[%s17059_s0 + $0x108] sm:$0xff] }
   0xd   :  { %7006 = vmatmul.msk.f32.gmra.mxu0 %vm74_vm1, %v27_v3  ;;  %v60_v55 = vld [vmem:[%s17059_s0 + $0x110] sm:$0xff]  ;;  %v61_v57 = vld [vmem:[%s17059_s0 + $0x118] sm:$0xff]  ;;  %v62_v59 = vld [vmem:[%s17059_s0 + $0x120] sm:$0xff] }
   0xe   :  { %v63_v61 = vld [vmem:[%s17059_s0 + $0x128] sm:$0xff]  ;;  %v64_v63 = vld [vmem:[%s17059_s0 + $0x130] sm:$0xff]  ;;  %v65_v1 = vld [vmem:[%s17059_s0 + $0x138] sm:$0xff] }
   0xf   :  { %v66_v3 = vld [vmem:[%s17059_s0 + $0x140] sm:$0xff] }
  0x15   :  { %7007 = vmatmul.msk.f32.gmra.mxu0 %vm74_vm1, %v28_v4 }
  0x1d   :  { %7008 = vmatmul.msk.f32.gmra.mxu0 %vm74_vm1, %v29_v5  ;;  %v67_v5 = vld [vmem:[%s17059_s0 + $0x148] sm:$0xff] }
  0x25   :  { %7009 = vmatmul.msk.f32.gmra.mxu0 %vm74_vm1, %v30_v6 }
  0x2d   :  { %7010 = vmatmul.msk.f32.gmra.mxu0 %vm74_vm1, %v31_v7  ;;  %v17070_v7 = vlaneseq }
  0x35   :  { %7011 = vmatmul.msk.f32.gmra.mxu0 %vm74_vm1, %v32_v8 }
  0x3d   :  { %7012 = vmatmul.msk.f32.gmra.mxu0 %vm74_vm1, %v33_v9  ;;  %v8116_v9 = vshrl.u32 %v17070_v7, 7 }
  0x45   :  { %7013 = vmatmul.msk.f32.gmra.mxu0 %vm74_vm1, %v34_v10  ;;  %v392_v10 = vadd.s32 8, %v8116_v9 }
  0x4d   :  { %7014 = vmatmul.msk.f32.gmra.mxu0 %vm74_vm1, %v35_v11 }
  0x55   :  { %7015 = vmatmul.msk.f32.gmra.mxu0 %vm74_vm1, %v36_v12  ;;  %v8121_v12 = vshra.s32 %v392_v10, 3  ;;  %v7138_v10 = vld [vmem:[%s17061_s3 + $0x58] sm:$0xff] }
  0x56   :  { %2678 = vmatpush.msra.mxu3 %v7138_v10  ;;  %v17597_v10 = vmov 0 }
  0x57   :  { %17528 = vst [vmem:[#allocation10_spill] sm:$0xff] %v8121_v12  ;;  %vm476_vm2 = vcmp.eq.s32.totalorder %v8121_v12, 0  ;;  %vm560_vm3 = vcmp.eq.s32.totalorder %v8121_v12, 7  ;;  %vm728_vm5 = vcmp.eq.s32.totalorder %v8121_v12, 14  ;;  %vm896_vm9 = vcmp.eq.s32.totalorder %v8121_v12, 21 }
  0x58   :  { %vm602_vm4 = vmor %vm476_vm2, %vm560_vm3  ;;  %vm1064_vm3 = vcmp.eq.s32.totalorder %v8121_v12, 28 }
  0x59   :  { %vm770_vm8 = vmor %vm602_vm4, %vm728_vm5 }
  0x5a   :  { %vm8151_vm14 = vmor %vm770_vm8, %vm896_vm9 }
  0x5d   :  { %7016 = vmatmul.msk.f32.gmra.mxu0 %vm74_vm1, %v37_v13  ;;  %v393_v13 = vadd.s32 16, %v8116_v9 }
  0x65   :  { %7017 = vmatmul.msk.f32.gmra.mxu0 %vm74_vm1, %v38_v14 }
  0x6d   :  { %7018 = vmatmul.msk.f32.gmra.mxu0 %vm74_vm1, %v39_v15  ;;  %v8128_v15 = vshra.s32 %v393_v13, 3  ;;  %v17600_v13 = vmov 0 }
  0x6f   :  { %17530 = vst [vmem:[#allocation12_spill] sm:$0xff] %v8128_v15  ;;  %vm477_vm6 = vcmp.eq.s32.totalorder %v8128_v15, 0  ;;  %vm561_vm7 = vcmp.eq.s32.totalorder %v8128_v15, 7  ;;  %vm729_vm13 = vcmp.eq.s32.totalorder %v8128_v15, 14  ;;  %vm897_vm5 = vcmp.eq.s32.totalorder %v8128_v15, 21 }
  0x70   :  { %vm603_vm12 = vmor %vm477_vm6, %vm561_vm7 }
  0x71   :  { %vm771_vm4 = vmor %vm603_vm12, %vm729_vm13  ;;  %vm518_vm12 = vcmp.eq.s32.totalorder %v8121_v12, 6  ;;  %vm644_vm13 = vcmp.eq.s32.totalorder %v8121_v12, 13 }
  0x75   :  { %7019 = vmatmul.msk.f32.gmra.mxu0 %vm74_vm1, %v40_v16  ;;  %v394_v16 = vadd.s32 24, %v8116_v9 }
  0x7d   :  { %7020 = vmatmul.msk.f32.gmra.mxu0 %vm74_vm1, %v41_v17  ;;  %v8132_v17 = vshra.s32 %v8116_v9, 3 }
  0x7f   :  { %17531 = vst [vmem:[#allocation13_spill] sm:$0xff] %v8132_v17  ;;  %vm517_vm10 = vcmp.eq.s32.totalorder %v8132_v17, 6  ;;  %vm643_vm11 = vcmp.eq.s32.totalorder %v8132_v17, 13  ;;  %vm811_vm2 = vcmp.eq.s32.totalorder %v8132_v17, 20  ;;  %vm979_vm9 = vcmp.eq.s32.totalorder %v8132_v17, 27 }
  0x82   :  { %v7955_v18 = vpop.f32.mrf.mxu0 }
  0x85   :  { %7021 = vmatmul.msk.f32.gmra.mxu0 %vm74_vm1, %v42_v19  ;;  %v1654_v19 = vld [vmem:[%s17061_s3 + $0x18] sm:$0xff] }
  0x86   :  { %2194 = vmatpush.msra.mxu2 %v1654_v19  ;;  %v399_v19 = vadd.s32 64, %v8116_v9 }
  0x8a   :  { %v7961_v20 = vpop.f32.mrf.mxu0 }
  0x8d   :  { %7022 = vmatmul.msk.f32.gmra.mxu0 %vm74_vm1, %v43_v21  ;;  %v8140_v21 = vshra.s32 %v394_v16, 3 }
  0x8f   :  { %17532 = vst [vmem:[#allocation14_spill] sm:$0xff] %v8140_v21  ;;  %vm478_vm15 = vcmp.eq.s32.totalorder %v8140_v21, 0  ;;  %vm562_vm0 = vcmp.eq.s32.totalorder %v8140_v21, 7  ;;  %vm730_vm7 = vcmp.eq.s32.totalorder %v8140_v21, 14 }
  0x90   :  { %vm604_vm6 = vmor %vm478_vm15, %vm562_vm0  ;;  %vm475_vm0 = vcmp.eq.s32.totalorder %v8132_v17, 0 }
  0x91   :  { %vm772_vm15 = vmor %vm604_vm6, %vm730_vm7 }
  0x92   :  { %v7967_v22 = vpop.f32.mrf.mxu0 }
  0x95   :  { %7023 = vmatmul.msk.f32.gmra.mxu0 %vm74_vm1, %v44_v23 }
  0x9a   :  { %v7973_v24 = vpop.f32.mrf.mxu0 }
  0x9d   :  { %7024 = vmatmul.msk.f32.gmra.mxu0 %vm74_vm1, %v45_v25  ;;  %v1653_v25 = vld [vmem:[%s17061_s3 + $0x10] sm:$0xff] }
  0x9e   :  { %2195 = vmatpush.msra.mxu2 %v1653_v25 }
  0xa2   :  { %v7979_v26 = vpop.f32.mrf.mxu0 }
  0xa5   :  { %7025 = vmatmul.msk.f32.gmra.mxu0 %vm74_vm1, %v46_v27  ;;  %v17608_v27 = vmov 0 }
  0xaa   :  { %v7985_v28 = vpop.f32.mrf.mxu0 }
  0xad   :  { %7026 = vmatmul.msk.f32.gmra.mxu0 %vm74_vm1, %v47_v29  ;;  %v395_v29 = vadd.s32 32, %v8116_v9 }
  0xb2   :  { %v7991_v30 = vpop.f32.mrf.mxu0 }
  0xb5   :  { %7027 = vmatmul.msk.f32.gmra.mxu0 %vm74_vm1, %v48_v31  ;;  %v1652_v31 = vld [vmem:[%s17061_s3 + $0x8] sm:$0xff] }
  0xb6   :  { %2196 = vmatpush.msra.mxu2 %v1652_v31  ;;  %v7137_v31 = vld [vmem:[%s17061_s3 + $0x50] sm:$0xff] }
  0xb7   :  { %2679 = vmatpush.msra.mxu3 %v7137_v31 }
  0xba   :  { %v7997_v32 = vpop.f32.mrf.mxu0 }
  0xbd   :  { %7028 = vmatmul.msk.f32.gmra.mxu0 %vm74_vm1, %v49_v33  ;;  %v1651_v33 = vld [vmem:[%s17061_s3] sm:$0xff] }
  0xbe   :  { %2197 = vmatpush.msra.mxu2 %v1651_v33  ;;  %v17636_v33 = vmov 0 }
  0xc2   :  { %v8003_v34 = vpop.f32.mrf.mxu0 }
  0xc5   :  { %7029 = vmatmul.msk.f32.gmra.mxu0 %vm74_vm1, %v50_v35  ;;  %v17536_v35 = vmov 0 }
  0xca   :  { %v8009_v36 = vpop.f32.mrf.mxu0 }
  0xcd   :  { %7030 = vmatmul.msk.f32.gmra.mxu0 %vm74_vm1, %v51_v37  ;;  %v7136_v37 = vld [vmem:[%s17061_s3 + $0x48] sm:$0xff] }
  0xce   :  { %2680 = vmatpush.msra.mxu3 %v7136_v37  ;;  %v17072_v37 = vmov 0  }
  0xd2   :  { %v8015_v38 = vpop.f32.mrf.mxu0 }
  0xd5   :  { %7031 = vmatmul.msk.f32.gmra.mxu0 %vm74_vm1, %v52_v39  ;;  %v8181_v39 = vshra.s32 %v395_v29, 3  ;;  %v17564_v29 = vmov 0 }
  0xd7   :  { %17540 = vst [vmem:[#allocation16_spill] sm:$0xff] %v8181_v39  ;;  %vm479_vm7 = vcmp.eq.s32.totalorder %v8181_v39, 0 }
  0xda   :  { %v8021_v40 = vpop.f32.mrf.mxu0 }
  0xdd   :  { %7032 = vmatmul.msk.f32.gmra.mxu0 %vm74_vm1, %v53_v41  ;;  %v7050_v41 = vld [vmem:[%s17061_s3 + $0x38] sm:$0xff] }
  0xde   :  { %1925 = vmatpush.msra.mxu1 %v7050_v41  ;;  %v17569_v41 = vmov 0 }
  0xe2   :  { %v8027_v42 = vpop.f32.mrf.mxu0 }
  0xe5   :  { %7033 = vmatmul.msk.f32.gmra.mxu0 %vm74_vm1, %v54_v43  ;;  %v8313_v43 = vshra.s32 %v399_v19, 3  ;;  %v17678_v19 = vmov 0 }
  0xe7   :  { %17571 = vst [vmem:[#allocation20_spill] sm:$0xff] %v8313_v43 }
  0xea   :  { %v8033_v44 = vpop.f32.mrf.mxu0 }
  0xed   :  { %7034 = vmatmul.msk.f32.gmra.mxu0 %vm74_vm1, %v55_v45 }
  0xf2   :  { %v8039_v46 = vpop.f32.mrf.mxu0 }
  0xf5   :  { %7035 = vmatmul.msk.f32.gmra.mxu0 %vm74_vm1, %v56_v47  ;;  %v7049_v47 = vld [vmem:[%s17061_s3 + $0x30] sm:$0xff] }
  0xf6   :  { %1926 = vmatpush.msra.mxu1 %v7049_v47  ;;  %v7135_v47 = vld [vmem:[%s17061_s3 + $0x40] sm:$0xff] }
  0xf7   :  { %2681 = vmatpush.msra.mxu3 %v7135_v47  ;;  %v17616_v47 = vmov 0 }
  0xfa   :  { %v8045_v48 = vpop.f32.mrf.mxu0 }
  0xfd   :  { %7036 = vmatmul.msk.f32.gmra.mxu0 %vm74_vm1, %v57_v49  ;;  %v17573_v49 = vmov 0 }
 0x102   :  { %v8051_v50 = vpop.f32.mrf.mxu0 }
 0x105   :  { %7037 = vmatmul.msk.f32.gmra.mxu0 %vm74_vm1, %v58_v51  ;;  %v17663_v51 = vmov 0 }
 0x10a   :  { %v8057_v52 = vpop.f32.mrf.mxu0 }
 0x10d   :  { %7038 = vmatmul.msk.f32.gmra.mxu0 %vm74_vm1, %v59_v53  ;;  %v7048_v53 = vld [vmem:[%s17061_s3 + $0x28] sm:$0xff] }
 0x10e   :  { %1927 = vmatpush.msra.mxu1 %v7048_v53  ;;  %v17576_v53 = vmov 0 }
 0x112   :  { %v8063_v54 = vpop.f32.mrf.mxu0 }
 0x115   :  { %7039 = vmatmul.msk.f32.gmra.mxu0 %vm74_vm1, %v60_v55  ;;  %v396_v55 = vadd.s32 40, %v8116_v9 }
 0x117   :  { %v8264_v16 = vshra.s32 %v396_v55, 3 }
 0x119   :  { %17559 = vst [vmem:[#allocation18_spill] sm:$0xff] %v8264_v16 }
 0x11a   :  { %v8069_v56 = vpop.f32.mrf.mxu0 }
 0x11d   :  { %7040 = vmatmul.msk.f32.gmra.mxu0 %vm74_vm1, %v61_v57  ;;  %v7184_v57 = vld [vmem:[%s17061_s3 + $0x78] sm:$0xff] }
 0x11e   :  { %3120 = vmatpush.msrb.mxu0 %v7184_v57  ;;  %v17582_v57 = vmov 0 }
 0x122   :  { %v8075_v58 = vpop.f32.mrf.mxu0 }
 0x125   :  { %7041 = vmatmul.msk.f32.gmra.mxu0 %vm74_vm1, %v62_v59  ;;  %v7047_v59 = vld [vmem:[%s17061_s3 + $0x20] sm:$0xff] }
 0x126   :  { %1928 = vmatpush.msra.mxu1 %v7047_v59  ;;  %v17584_v59 = vmov 0 }
 0x12a   :  { %v8081_v60 = vpop.f32.mrf.mxu0 }
 0x12b   :  { %17520 = vst [vmem:[#allocation2_spill] sm:$0xff] %v8081_v60 }
 0x12d   :  { %7042 = vmatmul.msk.f32.gmra.mxu0 %vm74_vm1, %v63_v61  ;;  %v17548_v61 = vmov 0 }
 0x132   :  { %v8087_v62 = vpop.f32.mrf.mxu0 }
 0x133   :  { %17521 = vst [vmem:[#allocation3_spill] sm:$0xff] %v8087_v62 }
 0x135   :  { %7043 = vmatmul.msk.f32.gmra.mxu0 %vm74_vm1, %v64_v63 }
 0x13a   :  { %v8093_v0 = vpop.f32.mrf.mxu0 }
 0x13b   :  { %17522 = vst [vmem:[#allocation4_spill] sm:$0xff] %v8093_v0  ;;  %v18057_v0 = vmov 0 }
 0x13d   :  { %7044 = vmatmul.msk.f32.gmra.mxu0 %vm74_vm1, %v65_v1  ;;  %v17588_v1 = vmov 0 }
 0x142   :  { %v8099_v2 = vpop.f32.mrf.mxu0 }
 0x143   :  { %17523 = vst [vmem:[#allocation5_spill] sm:$0xff] %v8099_v2  ;;  %v17851_v2 = vmov 0 }
 0x145   :  { %7045 = vmatmul.msk.f32.gmra.mxu0 %vm74_vm1, %v66_v3  ;;  %v17555_v3 = vmov 0 }
 0x14a   :  { %v8105_v4 = vpop.f32.mrf.mxu0 }
 0x14b   :  { %17524 = vst [vmem:[#allocation6_spill] sm:$0xff] %v8105_v4  ;;  %v7181_v4 = vld [vmem:[%s17061_s3 + $0x60] sm:$0xff] }
 0x14d   :  { %7046 = vmatmul.msk.f32.gmra.mxu0 %vm74_vm1, %v67_v5  ;;  %vm685_vm1 = vmor %vm517_vm10, %vm643_vm11  ;;  %v7230_v5 = vld [vmem:[%s17061_s3 + $0x98] sm:$0xff] }
 0x14e   :  { %vm853_vm8 = vmor %vm685_vm1, %vm811_vm2  ;;  %vm559_vm1 = vcmp.eq.s32.totalorder %v8132_v17, 7  ;;  %3436 = vmatpush.msrb.mxu1 %v7230_v5  ;;  %v398_v5 = vadd.s32 56, %v8116_v9 }
 0x14f   :  { %vm8171_vm10 = vmor %vm8151_vm14, %vm1064_vm3  ;;  %vm898_vm14 = vcmp.eq.s32.totalorder %v8140_v21, 21 }
 0x150   :  { %v17537_v35 = vsel %vm8171_vm10, 4294967295, %v17536_v35  ;;  %vm8175_vm11 = vmor %vm771_vm4, %vm897_vm5  ;;  %vm812_vm4 = vcmp.eq.s32.totalorder %v8121_v12, 20  ;;  %vm1065_vm5 = vcmp.eq.s32.totalorder %v8128_v15, 28  ;;  %vm727_vm10 = vcmp.eq.s32.totalorder %v8132_v17, 14 }
 0x151   :  { %vm8189_vm2 = vmor %vm853_vm8, %vm979_vm9  ;;  %vm563_vm8 = vcmp.eq.s32.totalorder %v8181_v39, 7  ;;  %v8429_v31 = vshra.s32 %v398_v5, 3 }
 0x152   :  { %v8111_v6 = vpop.f32.mrf.mxu0  ;;  %vm8198_vm3 = vmor %vm518_vm12, %vm644_vm13 }
 0x153   :  { %17525 = vst [vmem:[#allocation7_spill] sm:$0xff] %v8111_v6  ;;  %vm8204_vm6 = vmor %vm772_vm15, %vm898_vm14  ;;  %vm980_vm15 = vcmp.eq.s32.totalorder %v8121_v12, 27 }
 0x154   :  { %vm601_vm9 = vmor %vm475_vm0, %vm559_vm1  ;;  %vm731_vm1 = vcmp.eq.s32.totalorder %v8181_v39, 14  ;;  %17612 = vst [vmem:[#allocation24_spill] sm:$0xff] %v8429_v31 }
 0x155   :  { %vm854_vm13 = vmor %vm8198_vm3, %vm812_vm4  ;;  %vm895_vm3 = vcmp.eq.s32.totalorder %v8132_v17, 21  ;;  %vm1232_vm4 = vcmp.eq.s32.totalorder %v8121_v12, 35 }
 0x156   :  { %vm8229_vm14 = vmor %vm8175_vm11, %vm1065_vm5  ;;  %vm17554_vm11 = vcmp.eq.s32.totalorder %v8132_v17, 34 }
 0x157   :  { %v17549_v61 = vsel %vm8229_vm14, 4294967295, %v17548_v61  ;;  %vm8233_vm0 = vmor %vm479_vm7, %vm563_vm8  ;;  %vm645_vm8 = vcmp.eq.s32.totalorder %v8128_v15, 13 }
 0x158   :  { %vm8238_vm12 = vmor %vm601_vm9, %vm727_vm10  ;;  %vm899_vm9 = vcmp.eq.s32.totalorder %v8181_v39, 21 }
 0x159   :  { %vm8248_vm5 = vmor %vm8189_vm2, %vm17554_vm11  ;;  %vm17563_vm11 = vnez %v17537_v35  ;;  %v397_v35 = vadd.s32 48, %v8116_v9 }
 0x15a   :  { %v8113_v8 = vpop.f32.mrf.mxu0  ;;  %v17556_v3 = vsel %vm8248_vm5, 4294967295, %v17555_v3  ;;  %vm8258_vm10 = vmor %vm854_vm13, %vm980_vm15  ;;  %vm1063_vm15 = vcmp.eq.s32.totalorder %v8132_v17, 28  ;;  %vm17575_vm5 = vcmp.eq.s32.totalorder %v8121_v12, 34 }
 0x15b   :  { %17526 = vst [vmem:[#allocation8_spill] sm:$0xff] %v8113_v8  ;;  %vm773_vm2 = vmor %vm8233_vm0, %vm731_vm1  ;;  %vm17566_vm0 = vcmp.eq.s32.totalorder %v8128_v15, 6  ;;  %v8347_v55 = vshra.s32 %v397_v35, 3  ;;  %v8441_v35 = vld [vmem:[%s17060_s2] ss:$0 sm:$0xff]  ;;  %v17752_v8 = vmov 0 }
 0x15c   :  { %vm8278_vm13 = vmor %vm8238_vm12, %vm895_vm3  ;;  %vm813_vm3 = vcmp.eq.s32.totalorder %v8128_v15, 20  ;;  %vm480_vm12 = vcmp.eq.s32.totalorder %v8264_v16, 0 }
 0x15d   :  { %vm8287_vm7 = vmor %vm17563_vm11, %vm1232_vm4  ;;  %17580 = vst [vmem:[#allocation21_spill] sm:$0xff] %v8347_v55 }
 0x15e   :  { %v17565_v29 = vsel %vm8287_vm7, 4294967295, %v17564_v29  ;;  %vm8297_vm1 = vmor %vm17566_vm0, %vm645_vm8  ;;  %vm564_vm8 = vcmp.eq.s32.totalorder %v8264_v16, 7  ;;  %vm1231_vm7 = vcmp.eq.s32.totalorder %v8132_v17, 35 }
 0x15f   :  { %vm8307_vm11 = vmor %vm773_vm2, %vm899_vm9  ;;  %vm1233_vm2 = vcmp.eq.s32.totalorder %v8128_v15, 35  ;;  %vm17572_vm9 = vcmp.eq.s32.totalorder %v8140_v21, 28 }
 0x160   :  { %v17570_v41 = vsel %vm8307_vm11, 4294967295, %v17569_v41  ;;  %vm1105_vm0 = vmor %vm8278_vm13, %vm1063_vm15  ;;  %vm981_vm15 = vcmp.eq.s32.totalorder %v8128_v15, 27  ;;  %vm1315_vm11 = vcmp.eq.s32.totalorder %v8132_v17, 41 }
 0x161   :  { %vm8326_vm4 = vmor %vm8204_vm6, %vm17572_vm9  ;;  %vm732_vm9 = vcmp.eq.s32.totalorder %v8264_v16, 14 }
 0x162   :  { %v8119_v11 = vpop.f32.mrf.mxu0  ;;  %v17574_v49 = vsel %vm8326_vm4, 4294967295, %v17573_v49  ;;  %vm855_vm13 = vmor %vm8297_vm1, %vm813_vm3  ;;  %vm17067_vm1 = vmmov 1  }
 0x163   :  { %17527 = vst [vmem:[#allocation9_spill] sm:$0xff] %v8119_v11  ;;  %vm8338_vm14 = vmor %vm8258_vm10, %vm17575_vm5  ;;  %vm17581_vm5 = vnez %v17549_v61  ;;  %v17590_v61 = vmov 0  ;;  %v17740_v11 = vmov 0 }
 0x164   :  { %v17577_v53 = vsel %vm8338_vm14, 4294967295, %v17576_v53  ;;  %vm606_vm6 = vmor %vm480_vm12, %vm564_vm8  ;;  %vm646_vm12 = vcmp.eq.s32.totalorder %v8140_v21, 13  ;;  %vm17587_vm8 = vnez %v17556_v3  ;;  %v17592_v3 = vmov 0 }
 0x165   :  { %vm8343_vm4 = vmor %vm1105_vm0, %vm1231_vm7  ;;  %vm520_vm7 = vcmp.eq.s32.totalorder %v8140_v21, 6 }
 0x166   :  { %vm8353_vm10 = vmor %vm17581_vm5, %vm1233_vm2  ;;  %vm1149_vm5 = vcmp.eq.s32.totalorder %v8128_v15, 34 }
 0x167   :  { %v17583_v57 = vsel %vm8353_vm10, 4294967295, %v17582_v57  ;;  %vm8357_vm14 = vmor %vm855_vm13, %vm981_vm15  ;;  %vm481_vm13 = vcmp.eq.s32.totalorder %v8347_v55, 0  ;;  %vm565_vm15 = vcmp.eq.s32.totalorder %v8347_v55, 7  ;;  %vm17599_vm10 = vnez %v17565_v29 }
 0x168   :  { %v17585_v59 = vsel %vm8357_vm14, 4294967295, %v17584_v59  ;;  %vm8367_vm0 = vmor %vm17587_vm8, %vm1315_vm11  ;;  %vm1067_vm11 = vcmp.eq.s32.totalorder %v8181_v39, 28 }
 0x169   :  { %v17589_v1 = vsel %vm8367_vm0, 4294967295, %v17588_v1  ;;  %vm8371_vm2 = vmor %vm606_vm6, %vm732_vm9  ;;  %vm17595_vm6 = vcmp.eq.s32.totalorder %v8313_v43, 7  ;;  %vm17596_vm9 = vcmp.eq.s32.totalorder %v8313_v43, 0 }
 0x16a   :  { %v8126_v14 = vpop.f32.mrf.mxu0  ;;  %v17591_v61 = vsel %vm8371_vm2, 4294967295, %v17590_v61  ;;  %vm8381_vm3 = vmxor %vm8343_vm4, %vm17067_vm1  ;;  %vm814_vm4 = vcmp.eq.s32.totalorder %v8140_v21, 20 }
 0x16b   :  { %17529 = vst [vmem:[#allocation11_spill] sm:$0xff] %v8126_v14  ;;  %v17593_v3 = vsel %vm8381_vm3, 4294967295, %v17592_v3  ;;  %vm8391_vm8 = vmor %vm17596_vm9, %vm17595_vm6  ;;  %vm733_vm3 = vcmp.eq.s32.totalorder %v8347_v55, 14  ;;  %vm17603_vm9 = vcmp.ge.s32.totalorder %v8132_v17, 7 }
 0x16c   :  { %17594 = vst [vmem:[#allocation23_spill] sm:$0xff] %v17593_v3  ;;  %v17598_v10 = vsel %vm8391_vm8, 4294967295, %v17597_v10  ;;  %vm688_vm0 = vmor %vm520_vm7, %vm646_vm12  ;;  %vm17602_vm6 = vnez %v17593_v3  ;;  %vm1234_vm7 = vcmp.eq.s32.totalorder %v8140_v21, 35  ;;  %vm17604_vm12 = vnez %v17570_v41 }
 0x16d   :  { %vm8400_vm2 = vmxor %vm17599_vm10, %vm17067_vm1  ;;  %vm900_vm10 = vcmp.eq.s32.totalorder %v8264_v16, 21 }
 0x16e   :  { %v17601_v13 = vsel %vm8400_vm2, 4294967295, %v17600_v13  ;;  %vm607_vm14 = vmor %vm481_vm13, %vm565_vm15  ;;  %vm17607_vm13 = vnez %v17585_v59  ;;  %vm17635_vm2 = vnez %v17583_v57  ;;  %v17645_v57 = vmov 0 }
 0x16f   :  { %vm1483_vm8 = vmand %vm17603_vm9, %vm17602_vm6  ;;  %vm982_vm9 = vcmp.eq.s32.totalorder %v8140_v21, 27 }
 0x170   :  { %vm8412_vm1 = vmor %vm17604_vm12, %vm1067_vm11  ;;  %v1525_v41 = vsel %vm1483_vm8, 1, %v17072_v37  ;;  %vm17621_vm8 = vcmp.eq.s32.totalorder %v8121_v12, 41  ;;  %v17650_v37 = vmov 0 }
 0x171   :  { %vm8420_vm15 = vmor %vm17607_vm13, %vm1149_vm5  ;;  %vm17622_vm5 = vnez %v17577_v53  ;;  %v17628_v53 = vmov 0 }
 0x172   :  { %v8146_v23 = vpop.f32.mrf.mxu0  ;;  %v17609_v27 = vsel %vm8420_vm15, 4294967295, %v17608_v27  ;;  %vm8424_vm6 = vmor %vm688_vm0, %vm814_vm4  ;;  %vm17618_vm0 = vnez %v17591_v61  ;;  %vm17658_vm15 = vnez %v17598_v10  ;;  %v17671_v61 = vmov 0  }
 0x173   :  { %17533 = vst [vmem:[#allocation15_spill] sm:$0xff] %v8146_v23  ;;  %vm8431_vm11 = vmor %vm607_vm14, %vm733_vm3  ;;  %vm17615_vm14 = vnez %v17574_v49  ;;  %v17623_v49 = vmov 0  ;;  %v17690_v10 = vmov 0  ;;  %v17700_v23 = vmov 0 }
 0x174   :  { %vm8448_vm3 = vmor %vm17615_vm14, %vm1234_vm7  ;;  %vm17653_vm14 = vcmp.ge.s32.totalorder %v8121_v12, 7 }
 0x175   :  { %v17617_v47 = vsel %vm8448_vm3, 4294967295, %v17616_v47  ;;  %vm8454_vm4 = vmor %vm17618_vm0, %vm900_vm10  ;;  %vm1235_vm3 = vcmp.eq.s32.totalorder %v8181_v39, 35 }
 0x176   :  { %vm8464_vm12 = vmor %vm17622_vm5, %vm17621_vm8  ;;  %vm17627_vm8 = vcmp.eq.s32.totalorder %v8347_v55, 21  ;;  %vm17634_vm5 = vmmov 1  }
 0x177   :  { %v17624_v49 = vsel %vm8464_vm12, 4294967295, %v17623_v49  ;;  %vm8472_vm7 = vmor %vm8424_vm6, %vm982_vm9  ;;  %vm17630_vm6 = vcmp.eq.s32.totalorder %v8181_v39, 13  ;;  %vm17631_vm9 = vcmp.eq.s32.totalorder %v8181_v39, 6 }
 0x178   :  { %vm8485_vm13 = vmor %vm8431_vm11, %vm17627_vm8  ;;  %vm734_vm8 = vcmp.eq.s32.totalorder %v8429_v31, 14  ;;  %vm17648_vm11 = vcmp.eq.s32.totalorder %v8264_v16, 13 }
 0x179   :  { %v17629_v53 = vsel %vm8485_vm13, 4294967295, %v17628_v53  ;;  %vm8493_vm10 = vmor %vm17631_vm9, %vm17630_vm6  ;;  %vm17639_vm13 = vcmp.eq.s32.totalorder %v8429_v31, 7  ;;  %vm17640_vm6 = vcmp.eq.s32.totalorder %v8429_v31, 0 }
 0x17a   :  { %v8193_v45 = vpop.f32.mrf.mxu0  ;;  %vm8501_vm12 = vmxor %vm17635_vm2, %vm17634_vm5  ;;  %vm17644_vm2 = vnez %v17589_v1  ;;  %v17655_v1 = vmov 0 }
 0x17b   :  { %17543 = vst [vmem:[#allocation17_spill] sm:$0xff] %v8193_v45  ;;  %v17637_v33 = vsel %vm8501_vm12, 4294967295, %v17636_v33  ;;  %vm8511_vm9 = vmor %vm17640_vm6, %vm17639_vm13  ;;  %vm17649_vm12 = vcmp.eq.s32.totalorder %v8264_v16, 6  ;;  %vm17652_vm6 = vnez %v17601_v13  ;;  %v17682_v45 = vmov 0 }
 0x17c   :  { %17638 = vst [vmem:[#allocation25_spill] sm:$0xff] %v17637_v33  ;;  %vm8520_vm0 = vmxor %vm17644_vm2, %vm17634_vm5 }
 0x17d   :  { %v17646_v57 = vsel %vm8520_vm0, 4294967295, %v17645_v57  ;;  %vm8529_vm13 = vmor %vm17649_vm12, %vm17648_vm11  ;;  %vm17654_vm0 = vcmp.eq.s32.totalorder %v8264_v16, 28  ;;  %vm816_vm12 = vcmp.eq.s32.totalorder %v8264_v16, 20  ;;  %vm17657_vm11 = vcmp.eq.s32.totalorder %v8313_v43, 14 }
 0x17e   :  { %17647 = vst [vmem:[#allocation27_spill] sm:$0xff] %v17646_v57  ;;  %v17651_v37 = vsel %vm8529_vm13, 4294967295, %v17650_v37  ;;  %vm1484_vm2 = vmand %vm17653_vm14, %vm17652_vm6  ;;  %vm17661_vm14 = vcmp.eq.s32.totalorder %v1525_v41, 1 }
 0x17f   :  { %vm8543_vm5 = vmor %vm8454_vm4, %vm17654_vm0  ;;  %vm17662_vm4 = vcmp.eq.s32.totalorder %v8140_v21, 34  ;;  %v1526_v29 = vsel %vm1484_vm2, 1, %v17671_v61  ;;  %vm17676_vm2 = vcmp.eq.s32.totalorder %v8128_v15, 41 }
 0x180   :  { %v17656_v1 = vsel %vm8543_vm5, 4294967295, %v17655_v1  ;;  %vm8552_vm13 = vmor %vm17658_vm15, %vm17657_vm11  ;;  %vm17665_vm5 = vcmp.eq.s32.totalorder %v8181_v39, 20  ;;  %vm983_vm11 = vcmp.eq.s32.totalorder %v8181_v39, 27 }
 0x181   :  { %vm8563_vm0 = vmor %vm8472_vm7, %vm17662_vm4  ;;  %vm902_vm7 = vcmp.eq.s32.totalorder %v8429_v31, 21  ;;  %vm17685_vm4 = vnez %v17617_v47 }
 0x182   :  { %v8272_v25 = vpop.f32.mrf.mxu0  ;;  %v17664_v51 = vsel %vm8563_vm0, 4294967295, %v17663_v51  ;;  %vm8571_vm15 = vmor %vm8493_vm10, %vm17665_vm5  ;;  %vm17674_vm5 = vnez %v17651_v37  ;;  %vm17677_vm0 = vnez %v17609_v27  ;;  %v17686_v27 = vmov 0 }
 0x183   :  { %17560 = vst [vmem:[#allocation19_spill] sm:$0xff] %v8272_v25  ;;  %vm8579_vm6 = vmor %vm8511_vm9, %vm734_vm8  ;;  %vm523_vm8 = vcmp.eq.s32.totalorder %v8347_v55, 6  ;;  %vm649_vm9 = vcmp.eq.s32.totalorder %v8347_v55, 13  ;;  %v401_v37 = vadd.s32 80, %v8116_v9 }
 0x184   :  { %vm8588_vm10 = vmor %vm8412_vm1, %vm1235_vm3 }
 0x185   :  { %vm8603_vm1 = vmor %vm17677_vm0, %vm17676_vm2  ;;  %vm17684_vm2 = vmmov 1   ;;  %vm17696_vm0 = vcmp.ge.s32.totalorder %v8128_v15, 7 }
 0x186   :  { %v17679_v19 = vsel %vm8603_vm1, 4294967295, %v17678_v19  ;;  %vm8609_vm3 = vmor %vm8571_vm15, %vm983_vm11  ;;  %vm17689_vm11 = vcmp.eq.s32.totalorder %v8264_v16, 27  ;;  %vm17703_vm15 = vnez %v17646_v57 }
 0x187   :  { %vm8624_vm1 = vmxor %vm17685_vm4, %vm17684_vm2  ;;  %vm17695_vm4 = vnez %v17637_v33 }
 0x188   :  { %v17687_v27 = vsel %vm8624_vm1, 4294967295, %v17686_v27 }
 0x189   :  { %17688 = vst [vmem:[#allocation29_spill] sm:$0xff] %v17687_v27 }
 0x18a   :  { %v8363_v63 = vpop.f32.mrf.mxu0 }
 0x18b   :  { %17586 = vst [vmem:[#allocation22_spill] sm:$0xff] %v8363_v63  ;;  %v17659_v63 = vmov 0 }
 0x18c   :  { %v17660_v63 = vsel %vm8552_vm13, 4294967295, %v17659_v63 }
 0x192   :  { %v324_v59 = vpop.f32.mrf.mxu0 }
 0x193   :  { %v325_v5 = vadd.f32 %v8441_v35, %v324_v59 }
 0x195   :  { %v8515_v7 = vmax.f32 %v325_v5, 0.0  ;;  %v400_v5 = vadd.s32 72, %v8116_v9 }
 0x197   :  { %17643 = vst [vmem:[#allocation26_spill] sm:$0xff] %v8515_v7  ;;  %v1609_v25 = vsel %vm17661_vm14, %v8515_v7, 0.0  ;;  %vm17668_vm14 = vcmask 261120   ;;  %v17672_v7 = vmov 0 }
 0x198   :  { %7093 = vmatmul.msk.f32.vlgmr.msra.gmra.mxu2 %vm17668_vm14, %v1609_v25  ;;  %v17673_v7 = vsel %vm8588_vm10, 4294967295, %v17672_v7  ;;  %vm858_vm14 = vmor %vm17674_vm5, %vm816_vm12  ;;  %v8596_v25 = vshra.s32 %v400_v5, 3 }
 0x199   :  { %vm8617_vm5 = vmor %vm8579_vm6, %vm902_vm7  ;;  %vm817_vm7 = vcmp.eq.s32.totalorder %v8347_v55, 20 }
 0x19a   :  { %17675 = vst [vmem:[#allocation28_spill] sm:$0xff] %v8596_v25  ;;  %v327_v59 = vpop.f32.mrf.mxu0  ;;  %v17683_v45 = vsel %vm8617_vm5, 4294967295, %v17682_v45  ;;  %vm8631_vm10 = vmor %vm858_vm14, %vm17689_vm11  ;;  %vm17699_vm14 = vnez %v17624_v49  ;;  %v17788_v49 = vmov 0 }
 0x19b   :  { %v328_v5 = vadd.f32 %v8441_v35, %v327_v59  ;;  %v17691_v10 = vsel %vm8631_vm10, 4294967295, %v17690_v10  ;;  %vm8635_vm6 = vmor %vm523_vm8, %vm649_vm9  ;;  %vm484_vm8 = vcmp.eq.s32.totalorder %v8596_v25, 0  ;;  %vm568_vm9 = vcmp.eq.s32.totalorder %v8596_v25, 7 }
 0x19c   :  { %vm8646_vm12 = vmand %vm17696_vm0, %vm17695_vm4  ;;  %vm17704_vm10 = vcmp.ge.s32.totalorder %v8132_v17, 7  ;;  %vm17707_vm4 = vcmp.eq.s32.totalorder %v8347_v55, 28  ;;  %vm17713_vm0 = vcmp.eq.s32.totalorder %v8181_v39, 34 }
 0x19d   :  { %v8640_v59 = vmax.f32 %v328_v5, 0.0  ;;  %vm8653_vm11 = vmxor %vm17699_vm14, %vm17684_vm2  ;;  %vm17708_vm14 = vnez %v17629_v53  ;;  %v17714_v53 = vmov 0  ;;  %v1527_v41 = vsel %vm8646_vm12, 1, %v17671_v61 }
 0x19e   :  { %v17701_v23 = vsel %vm8653_vm11, 4294967295, %v17700_v23  ;;  %vm8663_vm5 = vmand %vm17704_vm10, %vm17703_vm15  ;;  %vm903_vm11 = vcmp.eq.s32.totalorder %v8313_v43, 21  ;;  %vm524_vm12 = vcmp.eq.s32.totalorder %v8429_v31, 6 }
 0x19f   :  { %17694 = vst [vmem:[#allocation30_spill] sm:$0xff] %v8640_v59  ;;  %vm8672_vm1 = vmor %vm17708_vm14, %vm17707_vm4  ;;  %vm17718_vm14 = vcmask 261120  }
 0x1a0   :  { %17702 = vst [vmem:[#allocation31_spill] sm:$0xff] %v17701_v23  ;;  %vm17711_vm2 = vmmov %vm17704_vm10  ;;  %vm17712_vm10 = vcmp.eq.s32.totalorder %v1526_v29, 1  ;;  %v8771_v29 = vshra.s32 %v401_v37, 3  ;;  %v17756_v37 = vmov 0 }
 0x1a1   :  { %v1739_v57 = vsel %vm17711_vm2, %v8640_v59, 0.0  ;;  %v1610_v14 = vsel %vm17712_vm10, %v8640_v59, 0.0  ;;  %vm8687_vm13 = vmor %vm8609_vm3, %vm17713_vm0  ;;  %vm985_vm2 = vcmp.eq.s32.totalorder %v8347_v55, 27  ;;  %v2409_v59 = vsel %vm8663_vm5, 1, %v17671_v61 }
 0x1a2   :  { %v17715_v53 = vsel %vm8687_vm13, 4294967295, %v17714_v53  ;;  %vm8693_vm4 = vmor %vm8635_vm6, %vm817_vm7  ;;  %7051 = vmatmul.msk.f32.vlgmr.msra.gmra.mxu1 %vm17718_vm14, %v1739_v57  ;;  %vm17722_vm6 = vcmp.eq.s32.totalorder %v8264_v16, 35  ;;  %vm17723_vm7 = vnez %v17656_v1  ;;  %vm650_vm5 = vcmp.eq.s32.totalorder %v8429_v31, 13  ;;  %v330_v47 = vpop.f32.mrf.mxu0  ;;  %17745 = vst [vmem:[#allocation33_spill] sm:$0xff] %v8771_v29 }
 0x1a3   :  { %vm17719_vm10 = vmmov %vm17718_vm14  ;;  %v17731_v1 = vmov 0  ;;  %v331_v5 = vadd.f32 %v8441_v35, %v330_v47  ;;  %vm17769_vm13 = vnez %v17691_v10  ;;  %v403_v57 = vadd.s32 96, %v8116_v9 }
 0x1a4   :  { %7094 = vmatmul.msk.f32.gmra.mxu2 %vm17719_vm10, %v1610_v14  ;;  %vm8700_vm15 = vmor %vm484_vm8, %vm568_vm9  ;;  %v17724_v14 = vmov 0  ;;  %vm17726_vm9 = vnez %v17660_v63  ;;  %vm17729_vm10 = vcmp.eq.s32.totalorder %v8140_v21, 41  ;;  %v17781_v63 = vmov 0 }
 0x1a5   :  { %vm8716_vm8 = vmor %vm17723_vm7, %vm17722_vm6  ;;  %vm17730_vm6 = vnez %v17664_v51  ;;  %v8773_v17 = vmax.f32 %v331_v5, 0.0  ;;  %v17845_v10 = vmov 0 }
 0x1a6   :  { %v17725_v14 = vsel %vm8716_vm8, 4294967295, %v17724_v14  ;;  %vm8724_vm0 = vmor %vm17726_vm9, %vm903_vm11  ;;  %vm17758_vm11 = vnez %v17701_v23 }
 0x1a7   :  { %vm8735_vm7 = vmor %vm17730_vm6, %vm17729_vm10  ;;  %vm17735_vm10 = vcmp.eq.s32.totalorder %v8596_v25, 14  ;;  %17746 = vst [vmem:[#allocation34_spill] sm:$0xff] %v8773_v17 }
 0x1a8   :  { %v17732_v1 = vsel %vm8735_vm7, 4294967295, %v17731_v1  ;;  %vm8744_vm9 = vmor %vm8693_vm4, %vm985_vm2  ;;  %vm17738_vm4 = vmmov 1   ;;  %vm17739_vm2 = vnez %v17673_v7 }
 0x1a9   :  { %vm8755_vm6 = vmor %vm8700_vm15, %vm17735_vm10  ;;  %vm17747_vm15 = vnez %v17687_v27  ;;  %vm17748_vm10 = vcmp.ge.s32.totalorder %v8140_v21, 7 }
 0x1aa   :  { %vm8762_vm8 = vmxor %vm17739_vm2, %vm17738_vm4  ;;  %vm17755_vm2 = vcmp.eq.s32.totalorder %v8313_v43, 28  ;;  %v333_v47 = vpop.f32.mrf.mxu0 }
 0x1ab   :  { %v17741_v11 = vsel %vm8762_vm8, 4294967295, %v17740_v11  ;;  %vm8766_vm14 = vmor %vm524_vm12, %vm650_vm5  ;;  %vm17751_vm12 = vnez %v17679_v19  ;;  %v334_v7 = vadd.f32 %v8441_v35, %v333_v47  ;;  %v17835_v19 = vmov 0 }
 0x1ac   :  { %17742 = vst [vmem:[#allocation32_spill] sm:$0xff] %v17741_v11  ;;  %vm8779_vm7 = vmand %vm17748_vm10, %vm17747_vm15  ;;  %vm1153_vm10 = vcmp.eq.s32.totalorder %v8347_v55, 34  ;;  %vm17759_vm15 = vcmp.ge.s32.totalorder %v8121_v12, 7  ;;  %v17796_v12 = vmov 0 }
 0x1ad   :  { %vm8786_vm5 = vmxor %vm17751_vm12, %vm17738_vm4  ;;  %vm17762_vm4 = vcmp.eq.s32.totalorder %v8429_v31, 28  ;;  %v1740_v5 = vsel %vm17759_vm15, %v8773_v17, 0.0  ;;  %vm17767_vm12 = vcmp.eq.s32.totalorder %v2409_v59, 1  ;;  %v402_v59 = vadd.s32 88, %v8116_v9 }
 0x1ae   :  { %v17753_v8 = vsel %vm8786_vm5, 4294967295, %v17752_v8  ;;  %vm8794_vm3 = vmor %vm8724_vm0, %vm17755_vm2  ;;  %vm17763_vm0 = vnez %v17683_v45  ;;  %v2493_v6 = vsel %vm17767_vm12, %v8773_v17, 0.0  ;;  %vm17768_vm5 = vcmp.eq.s32.totalorder %v8264_v16, 34 }
 0x1af   :  { %17754 = vst [vmem:[#allocation35_spill] sm:$0xff] %v17753_v8  ;;  %v17757_v37 = vsel %vm8794_vm3, 4294967295, %v17756_v37  ;;  %vm8803_vm8 = vmand %vm17759_vm15, %vm17758_vm11  ;;  %vm17766_vm11 = vcmp.eq.s32.totalorder %v1527_v41, 1  ;;  %v17770_v45 = vmov 0  ;;  %vm17775_vm15 = vcmask 261120  }
 0x1b0   :  { %vm8813_vm2 = vmor %vm17763_vm0, %vm17762_vm4  ;;  %v1611_v23 = vsel %vm17766_vm11, %v8773_v17, 0.0  ;;  %vm17772_vm0 = vcmp.eq.s32.totalorder %v8429_v31, 20  ;;  %vm986_vm11 = vcmp.eq.s32.totalorder %v8429_v31, 27  ;;  %7052 = vmatmul.msk.f32.gmra.mxu1 %vm17775_vm15, %v1740_v5  ;;  %v1528_v41 = vsel %vm8779_vm7, 1, %v17671_v61 }
 0x1b1   :  { %vm8829_vm4 = vmor %vm17769_vm13, %vm17768_vm5  ;;  %vm485_vm5 = vcmp.eq.s32.totalorder %v8771_v29, 0  ;;  %v8922_v47 = vshra.s32 %v402_v59, 3  ;;  %v8924_v17 = vmax.f32 %v334_v7, 0.0  ;;  %vm17808_vm7 = vnez %v17732_v1  ;;  %v7182_v59 = vld [vmem:[%s17061_s3 + $0x68] sm:$0xff] }
 0x1b2   :  { %v17771_v45 = vsel %vm8829_vm4, 4294967295, %v17770_v45  ;;  %vm8837_vm3 = vmor %vm8766_vm14, %vm17772_vm0  ;;  %vm569_vm4 = vcmp.eq.s32.totalorder %v8771_v29, 7  ;;  %vm17783_vm0 = vcmp.eq.s32.totalorder %v8596_v25, 21  ;;  %v17813_v7 = vmov 0 }
 0x1b3   :  { %vm17776_vm12 = vmmov %vm17775_vm15  ;;  %17802 = vst [vmem:[#allocation37_spill] sm:$0xff] %v8922_v47  ;;  %v17838_v5 = vmov 0  ;;  %v17893_v1 = vmov 0 }
 0x1b4   :  { %7095 = vmatmul.msk.f32.gmra.mxu2 %vm17776_vm12, %v1611_v23  ;;  %vm8846_vm13 = vmor %vm8744_vm9, %vm1153_vm10  ;;  %v2410_v23 = vsel %vm8803_vm8, 1, %v17671_v61  ;;  %vm17780_vm9 = vcmp.eq.s32.totalorder %v8347_v55, 35  ;;  %vm651_vm8 = vcmp.eq.s32.totalorder %v8313_v43, 13  ;;  %17803 = vst [vmem:[#allocation38_spill] sm:$0xff] %v8924_v17 }
 0x1b5   :  { %vm17779_vm14 = vmmov %vm17776_vm12 }
 0x1b6   :  { %7139 = vmatmul.msk.f32.vlgmr.msra.gmra.mxu3 %vm17779_vm14, %v2493_v6  ;;  %vm8864_vm10 = vmor %vm8672_vm1, %vm17780_vm9  ;;  %vm17786_vm1 = vcmp.eq.s32.totalorder %v8181_v39, 41  ;;  %vm17787_vm14 = vnez %v17715_v53  ;;  %v7183_v53 = vld [vmem:[%s17061_s3 + $0x70] sm:$0xff] }
 0x1b7   :  { %v17782_v63 = vsel %vm8864_vm10, 4294967295, %v17781_v63  ;;  %vm8872_vm15 = vmor %vm8755_vm6, %vm17783_vm0  ;;  %3121 = vmatpush.msrb.mxu0 %v7183_v53  ;;  %v17809_v53 = vmov 0 }
 0x1b8   :  { %vm8883_vm9 = vmor %vm17787_vm14, %vm17786_vm1  ;;  %vm17825_vm14 = vcmask 261120  }
 0x1b9   :  { %v17789_v49 = vsel %vm8883_vm9, 4294967295, %v17788_v49  ;;  %vm8892_vm0 = vmor %vm8837_vm3, %vm986_vm11  ;;  %vm17794_vm3 = vmmov 1   ;;  %vm17795_vm11 = vnez %v17725_v14  ;;  %vm17799_vm9 = vcmp.eq.s32.totalorder %v8313_v43, 6  ;;  %3122 = vmatpush.msrb.mxu0 %v7182_v59  ;;  %v336_v14 = vpop.f32.mrf.mxu0 }
 0x1ba   :  { %vm8904_vm1 = vmor %vm485_vm5, %vm569_vm4  ;;  %vm17804_vm4 = vnez %v17741_v11  ;;  %vm17805_vm5 = vcmp.ge.s32.totalorder %v8181_v39, 7  ;;  %v337_v51 = vadd.f32 %v8441_v35, %v336_v14  ;;  %v9099_v14 = vshra.s32 %v403_v57, 3 }
 0x1bb   :  { %vm8911_vm12 = vmxor %vm17795_vm11, %vm17794_vm3  ;;  %3123 = vmatpush.msrb.mxu0 %v7181_v4  ;;  %v17889_v4 = vmov 0 }
 0x1bc   :  { %v17797_v12 = vsel %vm8911_vm12, 4294967295, %v17796_v12  ;;  %vm8918_vm10 = vmor %vm17799_vm9, %vm651_vm8  ;;  %vm17812_vm9 = vcmp.eq.s32.totalorder %v8596_v25, 28  ;;  %vm17822_vm12 = vcmp.eq.s32.totalorder %v8771_v29, 14  ;;  %17868 = vst [vmem:[#allocation43_spill] sm:$0xff] %v9099_v14 }
 0x1bd   :  { %17798 = vst [vmem:[#allocation36_spill] sm:$0xff] %v17797_v12  ;;  %vm8930_vm11 = vmand %vm17805_vm5, %vm17804_vm4  ;;  %vm17816_vm4 = vcmp.ge.s32.totalorder %v8128_v15, 7 }
 0x1be   :  { %vm8937_vm6 = vmxor %vm17808_vm7, %vm17794_vm3  ;;  %vm17815_vm7 = vnez %v17753_v8 }
 0x1bf   :  { %v17810_v53 = vsel %vm8937_vm6, 4294967295, %v17809_v53  ;;  %vm8949_vm5 = vmor %vm8872_vm15, %vm17812_vm9  ;;  %vm905_vm9 = vcmp.eq.s32.totalorder %v8771_v29, 21 }
 0x1c0   :  { %17811 = vst [vmem:[#allocation39_spill] sm:$0xff] %v17810_v53  ;;  %v17814_v7 = vsel %vm8949_vm5, 4294967295, %v17813_v7  ;;  %vm8958_vm6 = vmand %vm17816_vm4, %vm17815_vm7  ;;  %vm17821_vm7 = vcmp.eq.s32.totalorder %v2410_v23, 1  ;;  %v17866_v23 = vmov 0 }
 0x1c1   :  { %vm17819_vm5 = vmmov %vm17816_vm4  ;;  %vm17820_vm4 = vcmp.eq.s32.totalorder %v1528_v41, 1  ;;  %v2494_v59 = vsel %vm17821_vm7, %v8924_v17, 0.0  ;;  %v17829_v41 = vmov 0  ;;  %vm17831_vm7 = vcmp.eq.s32.totalorder %v8313_v43, 20 }
 0x1c2   :  { %v1741_v6 = vsel %vm17819_vm5, %v8924_v17, 0.0  ;;  %v1612_v8 = vsel %vm17820_vm4, %v8924_v17, 0.0  ;;  %vm8980_vm15 = vmor %vm8904_vm1, %vm17822_vm12  ;;  %vm17827_vm5 = vcmp.eq.s32.totalorder %v8313_v43, 35  ;;  %vm17828_vm4 = vnez %v17757_v37 }
 0x1c3   :  { %7053 = vmatmul.msk.f32.gmra.mxu1 %vm17825_vm14, %v1741_v6  ;;  %vm17826_vm8 = vmmov %vm17825_vm14  ;;  %vm987_vm1 = vcmp.eq.s32.totalorder %v8313_v43, 27  ;;  %v2411_v37 = vsel %vm8958_vm6, 1, %v17671_v61  ;;  %vm17849_vm14 = vmmov 1   ;;  %v9076_v6 = vmax.f32 %v337_v51, 0.0 }
 0x1c4   :  { %7096 = vmatmul.msk.f32.gmra.mxu2 %vm17826_vm8, %v1612_v8  ;;  %vm8991_vm3 = vmor %vm17828_vm4, %vm17827_vm5  ;;  %7140 = vmatmul.msk.f32.gmra.mxu3 %vm17826_vm8, %v2494_v59  ;;  %v1529_v8 = vsel %vm8930_vm11, 1, %v17671_v61  ;;  %vm17837_vm4 = vcmp.eq.s32.totalorder %v8347_v55, 41  ;;  %vm17840_vm11 = vcmp.eq.s32.totalorder %v8429_v31, 34  ;;  %v17863_v59 = vmov 0 }
 0x1c5   :  { %v17830_v41 = vsel %vm8991_vm3, 4294967295, %v17829_v41  ;;  %vm8999_vm12 = vmor %vm8918_vm10, %vm17831_vm7  ;;  %vm17834_vm10 = vcmp.eq.s32.totalorder %v8429_v31, 35  ;;  %17857 = vst [vmem:[#allocation41_spill] sm:$0xff] %v9076_v6  ;;  %v17899_v17 = vmov 0 }
 0x1c6   :  { %vm9016_vm5 = vmor %vm8813_vm2, %vm17834_vm10  ;;  %vm570_vm2 = vcmp.eq.s32.totalorder %v8922_v47, 7  ;;  %vm17844_vm10 = vnez %v17771_v45 }
 0x1c7   :  { %v17836_v19 = vsel %vm9016_vm5, 4294967295, %v17835_v19  ;;  %vm9024_vm7 = vmor %vm8846_vm13, %vm17837_vm4  ;;  %vm17843_vm13 = vcmp.eq.s32.totalorder %v8264_v16, 41 }
 0x1c8   :  { %v17839_v5 = vsel %vm9024_vm7, 4294967295, %v17838_v5  ;;  %vm9032_vm6 = vmor %vm8892_vm0, %vm17840_vm11  ;;  %vm1073_vm11 = vcmp.eq.s32.totalorder %v8771_v29, 28 }
 0x1c9   :  { %vm9043_vm4 = vmor %vm17844_vm10, %vm17843_vm13  ;;  %vm17859_vm10 = vcmp.ge.s32.totalorder %v8264_v16, 7 }
 0x1ca   :  { %v17846_v10 = vsel %vm9043_vm4, 4294967295, %v17845_v10  ;;  %vm947_vm0 = vmor %vm8980_vm15, %vm905_vm9  ;;  %vm17850_vm4 = vnez %v17782_v63  ;;  %vm17854_vm9 = vcmp.eq.s32.totalorder %v8922_v47, 0  ;;  %vm17862_vm15 = vnez %v17789_v49  ;;  %v339_v63 = vpop.f32.mrf.mxu0 }
 0x1cb   :  { %vm9057_vm8 = vmor %vm8999_vm12, %vm987_vm1  ;;  %vm738_vm12 = vcmp.eq.s32.totalorder %v8922_v47, 14  ;;  %vm17858_vm1 = vnez %v17797_v12 }
 0x1cc   :  { %vm9064_vm7 = vmxor %vm17850_vm4, %vm17849_vm14 }
 0x1cd   :  { %v17852_v2 = vsel %vm9064_vm7, 4294967295, %v17851_v2  ;;  %vm9071_vm5 = vmor %vm17854_vm9, %vm570_vm2  ;;  %vm526_vm9 = vcmp.eq.s32.totalorder %v8596_v25, 6  ;;  %vm652_vm7 = vcmp.eq.s32.totalorder %v8596_v25, 13 }
 0x1ce   :  { %17853 = vst [vmem:[#allocation40_spill] sm:$0xff] %v17852_v2  ;;  %vm9082_vm4 = vmand %vm17859_vm10, %vm17858_vm1  ;;  %vm17869_vm10 = vnez %v17810_v53  ;;  %vm17870_vm1 = vcmp.ge.s32.totalorder %v8140_v21, 7  ;;  %v17988_v53 = vmov 0 }
 0x1cf   :  { %vm9089_vm13 = vmxor %vm17862_vm15, %vm17849_vm14  ;;  %vm17876_vm15 = vcmask 261120  }
 0x1d0   :  { %v17864_v59 = vsel %vm9089_vm13, 4294967295, %v17863_v59  ;;  %vm9093_vm2 = vmor %vm947_vm0, %vm1073_vm11  ;;  %vm17872_vm11 = vcmp.eq.s32.totalorder %v1529_v8, 1  ;;  %v17880_v8 = vmov 0 }
 0x1d1   :  { %17865 = vst [vmem:[#allocation42_spill] sm:$0xff] %v17864_v59  ;;  %v17867_v23 = vsel %vm9093_vm2, 4294967295, %v17866_v23  ;;  %vm2370_vm3 = vmand %vm17870_vm1, %vm17869_vm10  ;;  %v1613_v51 = vsel %vm17872_vm11, %v9076_v6, 0.0  ;;  %vm17873_vm2 = vcmp.eq.s32.totalorder %v2411_v37, 1  ;;  %vm17879_vm10 = vnez %v17814_v7 }
 0x1d2   :  { %vm17871_vm0 = vmmov %vm17870_vm1  ;;  %v2495_v57 = vsel %vm17873_vm2, %v9076_v6, 0.0  ;;  %vm906_vm1 = vcmp.eq.s32.totalorder %v8922_v47, 21  ;;  %v1530_v37 = vsel %vm9082_vm4, 1, %v17671_v61  ;;  %v2412_v45 = vsel %vm2370_vm3, 1, %v17671_v61 }
 0x1d3   :  { %v1742_v49 = vsel %vm17871_vm0, %v9076_v6, 0.0  ;;  %vm9116_vm13 = vmor %vm9071_vm5, %vm738_vm12  ;;  %vm17878_vm0 = vcmp.eq.s32.totalorder %v8596_v25, 35  ;;  %vm820_vm5 = vcmp.eq.s32.totalorder %v8596_v25, 20  ;;  %v17884_v7 = vmov 0 }
 0x1d4   :  { %7054 = vmatmul.msk.f32.gmra.mxu1 %vm17876_vm15, %v1742_v49  ;;  %vm17877_vm14 = vmmov %vm17876_vm15  ;;  %vm487_vm4 = vcmp.eq.s32.totalorder %v9099_v14, 0  ;;  %vm571_vm3 = vcmp.eq.s32.totalorder %v9099_v14, 7  ;;  %v18071_v49 = vmov 0 }
 0x1d5   :  { %7097 = vmatmul.msk.f32.gmra.mxu2 %vm17877_vm14, %v1613_v51  ;;  %vm9127_vm11 = vmor %vm17879_vm10, %vm17878_vm0  ;;  %v340_v51 = vadd.f32 %v8441_v35, %v339_v63  ;;  %vm17892_vm0 = vnez %v17830_v41  ;;  %v17903_v41 = vmov 0 }
 0x1d6   :  { %v17881_v8 = vsel %vm9127_vm11, 4294967295, %v17880_v8  ;;  %vm694_vm2 = vmor %vm526_vm9, %vm652_vm7  ;;  %vm17886_vm7 = vcmp.eq.s32.totalorder %v8313_v43, 34 }
 0x1d7   :  { %vm17882_vm12 = vmmov %vm17877_vm14  ;;  %vm17883_vm14 = vcmp.eq.s32.totalorder %v8429_v31, 41  ;;  %v9193_v6 = vmax.f32 %v340_v51, 0.0  ;;  %v17951_v51 = vmov 0 }
 0x1d8   :  { %7141 = vmatmul.msk.f32.gmra.mxu3 %vm17882_vm12, %v2495_v57  ;;  %vm9141_vm15 = vmor %vm9032_vm6, %vm17883_vm14  ;;  %vm17891_vm6 = vmmov 1   ;;  %v342_v57 = vpop.f32.mrf.mxu0 }
 0x1d9   :  { %v17885_v7 = vsel %vm9141_vm15, 4294967295, %v17884_v7  ;;  %vm9149_vm9 = vmor %vm9057_vm8, %vm17886_vm7  ;;  %17908 = vst [vmem:[#allocation47_spill] sm:$0xff] %v9193_v6 }
 0x1da   :  { %vm9157_vm10 = vmor %vm9116_vm13, %vm906_vm1  ;;  %vm17111_vm13 = vcmp.ge.s32.totalorder %v8347_v55, 7  ;;  %vm17898_vm1 = vnez %v17836_v19  ;;  %v343_v19 = vadd.f32 %v8441_v35, %v342_v57 }
 0x1db   :  { %v17890_v4 = vsel %vm9157_vm10, 4294967295, %v17889_v4  ;;  %vm9165_vm8 = vmxor %vm17892_vm0, %vm17891_vm6  ;;  %vm17902_vm0 = vnez %v17839_v5  ;;  %v17913_v5 = vmov 0 }
 0x1dc   :  { %v17894_v1 = vsel %vm9165_vm8, 4294967295, %v17893_v1  ;;  %vm9169_vm12 = vmor %vm694_vm2, %vm820_vm5  ;;  %vm988_vm2 = vcmp.eq.s32.totalorder %v8596_v25, 27  ;;  %vm17917_vm8 = vcmp.ge.s32.totalorder %v8181_v39, 7 }
 0x1dd   :  { %17895 = vst [vmem:[#allocation44_spill] sm:$0xff] %v17894_v1  ;;  %vm9177_vm15 = vmxor %vm17898_vm1, %vm17891_vm6  ;;  %vm17909_vm1 = vnez %v17852_v2 }
 0x1de   :  { %v17900_v17 = vsel %vm9177_vm15, 4294967295, %v17899_v17  ;;  %vm9184_vm11 = vmxor %vm17902_vm0, %vm17891_vm6  ;;  %vm17912_vm0 = vnez %v17846_v10  ;;  %v404_v10 = vadd.s32 104, %v8116_v9 }
 0x1df   :  { %17901 = vst [vmem:[#allocation45_spill] sm:$0xff] %v17900_v17  ;;  %v17904_v41 = vsel %vm9184_vm11, 4294967295, %v17903_v41  ;;  %vm9189_vm5 = vmor %vm487_vm4, %vm571_vm3  ;;  %vm1241_vm4 = vcmp.eq.s32.totalorder %v8771_v29, 35  ;;  %vm739_vm3 = vcmp.eq.s32.totalorder %v9099_v14, 14  ;;  %vm17916_vm11 = vnez %v17864_v59 }
 0x1e0   :  { %17905 = vst [vmem:[#allocation46_spill] sm:$0xff] %v17904_v41  ;;  %vm9199_vm7 = vmand %vm17111_vm13, %vm17909_vm1  ;;  %vm1156_vm1 = vcmp.eq.s32.totalorder %v8596_v25, 34  ;;  %vm17925_vm13 = vcmask 261120   ;;  %v9283_v63 = vshra.s32 %v404_v10, 3  ;;  %v9313_v10 = vmax.f32 %v343_v19, 0.0 }
 0x1e1   :  { %vm9206_vm14 = vmxor %vm17912_vm0, %vm17891_vm6  ;;  %vm17922_vm6 = vcmp.eq.s32.totalorder %v2412_v45, 1  ;;  %v17966_v19 = vmov 0  ;;  %v345_v45 = vpop.f32.mrf.mxu0 }
 0x1e2   :  { %v17914_v5 = vsel %vm9206_vm14, 4294967295, %v17913_v5  ;;  %vm9216_vm15 = vmand %vm17917_vm8, %vm17916_vm11  ;;  %vm17921_vm14 = vcmp.eq.s32.totalorder %v1530_v37, 1  ;;  %v2496_v59 = vsel %vm17922_vm6, %v9193_v6, 0.0  ;;  %v17928_v37 = vmov 0  ;;  %17942 = vst [vmem:[#allocation49_spill] sm:$0xff] %v9283_v63 }
 0x1e3   :  { %17915 = vst [vmem:[#allocation48_spill] sm:$0xff] %v17914_v5  ;;  %vm17920_vm0 = vmmov %vm17917_vm8  ;;  %v1614_v15 = vsel %vm17921_vm14, %v9193_v6, 0.0  ;;  %v346_v57 = vadd.f32 %v8441_v35, %v345_v45 }
 0x1e4   :  { %v1743_v21 = vsel %vm17920_vm0, %v9193_v6, 0.0  ;;  %vm9232_vm8 = vmor %vm9169_vm12, %vm988_vm2  ;;  %vm17927_vm0 = vnez %v17867_v23  ;;  %vm907_vm12 = vcmp.eq.s32.totalorder %v9099_v14, 21  ;;  %v17934_v23 = vmov 0  ;;  %17956 = vst [vmem:[#allocation52_spill] sm:$0xff] %v9313_v10 }
 0x1e5   :  { %7055 = vmatmul.msk.f32.gmra.mxu1 %vm17925_vm13, %v1743_v21  ;;  %vm17926_vm11 = vmmov %vm17925_vm13  ;;  %v2413_v21 = vsel %vm9216_vm15, 1, %v17671_v61  ;;  %vm17936_vm2 = vcmp.eq.s32.totalorder %v8922_v47, 28  ;;  %vm653_vm15 = vcmp.eq.s32.totalorder %v8771_v29, 13 }
 0x1e6   :  { %7098 = vmatmul.msk.f32.gmra.mxu2 %vm17926_vm11, %v1614_v15  ;;  %vm9241_vm10 = vmor %vm17927_vm0, %vm1241_vm4  ;;  %v1531_v15 = vsel %vm9199_vm7, 1, %v17671_v61  ;;  %vm527_vm7 = vcmp.eq.s32.totalorder %v8771_v29, 6  ;;  %vm17943_vm0 = vmmov 1  }
 0x1e7   :  { %v17929_v37 = vsel %vm9241_vm10, 4294967295, %v17928_v37  ;;  %vm9247_vm6 = vmor %vm9189_vm5, %vm739_vm3  ;;  %vm17937_vm5 = vnez %v17890_v4  ;;  %v17945_v4 = vmov 0  ;;  %vm17969_vm10 = vcmp.eq.s32.totalorder %v2413_v21, 1  ;;  %v7229_v21 = vld [vmem:[%s17061_s3 + $0x90] sm:$0xff] }
 0x1e8   :  { %vm17932_vm14 = vmmov %vm17926_vm11  ;;  %vm17933_vm11 = vcmp.eq.s32.totalorder %v8313_v43, 41  ;;  %3437 = vmatpush.msrb.mxu1 %v7229_v21  ;;  %v226_v21 = vadd.f32 %v8441_v35, %v7961_v20 }
 0x1e9   :  { %7142 = vmatmul.msk.f32.gmra.mxu3 %vm17932_vm14, %v2496_v59  ;;  %vm9263_vm13 = vmor %vm9149_vm9, %vm17933_vm11  ;;  %vm17944_vm14 = vnez %v17881_v8  ;;  %vm17950_vm9 = vnez %v17885_v7  ;;  %v405_v7 = vadd.s32 112, %v8116_v9 }
 0x1ea   :  { %v17935_v23 = vsel %vm9263_vm13, 4294967295, %v17934_v23  ;;  %vm9271_vm4 = vmor %vm17937_vm5, %vm17936_vm2  ;;  %vm17123_vm5 = vcmp.ge.s32.totalorder %v8429_v31, 7 }
 0x1eb   :  { %vm9279_vm3 = vmor %vm9232_vm8, %vm1156_vm1  ;;  %vm17979_vm1 = vcmp.eq.s32.totalorder %v8922_v47, 35  ;;  %v9416_v8 = vshra.s32 %v405_v7, 3  ;;  %v17999_v7 = vmov 0 }
 0x1ec   :  { %vm9290_vm11 = vmxor %vm17944_vm14, %vm17943_vm0 }
 0x1ed   :  { %v17946_v4 = vsel %vm9290_vm11, 4294967295, %v17945_v4  ;;  %vm9296_vm2 = vmor %vm9247_vm6, %vm907_vm12  ;;  %vm17957_vm12 = vnez %v17900_v17  ;;  %17994 = vst [vmem:[#allocation53_spill] sm:$0xff] %v9416_v8 }
 0x1ee   :  { %17947 = vst [vmem:[#allocation50_spill] sm:$0xff] %v17946_v4  ;;  %vm9304_vm13 = vmxor %vm17950_vm9, %vm17943_vm0  ;;  %vm17974_vm9 = vcmp.eq.s32.totalorder %v8771_v29, 20 }
 0x1ef   :  { %v17952_v51 = vsel %vm9304_vm13, 4294967295, %v17951_v51  ;;  %vm9308_vm14 = vmor %vm527_vm7, %vm653_vm15  ;;  %vm17960_vm7 = vnez %v17914_v5  ;;  %vm17961_vm15 = vcmp.ge.s32.totalorder %v8264_v16, 7  ;;  %vm17964_vm13 = vnez %v17894_v1 }
 0x1f0   :  { %17953 = vst [vmem:[#allocation51_spill] sm:$0xff] %v17952_v51  ;;  %vm9319_vm8 = vmand %vm17123_vm5, %vm17957_vm12  ;;  %vm17965_vm5 = vcmp.ge.s32.totalorder %v8313_v43, 7  ;;  %v1744_v6 = vsel %vm17961_vm15, %v9313_v10, 0.0  ;;  %v2497_v5 = vsel %vm17969_vm10, %v9313_v10, 0.0  ;;  %v18028_v16 = vmov 0 }
 0x1f1   :  { %vm9330_vm6 = vmand %vm17961_vm15, %vm17960_vm7  ;;  %vm17968_vm7 = vcmp.eq.s32.totalorder %v1531_v15, 1  ;;  %vm17977_vm15 = vcmask 261120   ;;  %v17980_v15 = vmov 0 }
 0x1f2   :  { %vm9338_vm12 = vmand %vm17965_vm5, %vm17964_vm13  ;;  %v1615_v39 = vsel %vm17968_vm7, %v9313_v10, 0.0  ;;  %vm17970_vm5 = vnez %v17904_v41  ;;  %vm17971_vm13 = vcmp.ge.s32.totalorder %v8347_v55, 7  ;;  %7056 = vmatmul.msk.f32.gmra.mxu1 %vm17977_vm15, %v1744_v6  ;;  %v2414_v6 = vsel %vm9330_vm6, 1, %v17671_v61 }
 0x1f3   :  { %v17967_v19 = vsel %vm9338_vm12, 4294967295, %v17966_v19  ;;  %vm9356_vm12 = vmand %vm17971_vm13, %vm17970_vm5  ;;  %vm17982_vm5 = vcmp.eq.s32.totalorder %v9099_v14, 28  ;;  %vm17995_vm6 = vcmp.eq.s32.totalorder %v8771_v29, 27  ;;  %v406_v10 = vadd.s32 120, %v8116_v9 }
 0x1f4   :  { %vm9364_vm11 = vmor %vm9308_vm14, %vm17974_vm9  ;;  %v9462_v41 = vmax.f32 %v346_v57, 0.0  ;;  %v18018_v57 = vmov 0 }
 0x1f5   :  { %vm17978_vm10 = vmmov %vm17977_vm15  ;;  %v9540_v45 = vshra.s32 %v406_v10, 3 }
 0x1f6   :  { %7099 = vmatmul.msk.f32.gmra.mxu2 %vm17978_vm10, %v1615_v39  ;;  %vm9375_vm13 = vmor %vm9271_vm4, %vm17979_vm1  ;;  %vm654_vm10 = vcmp.eq.s32.totalorder %v8922_v47, 13  ;;  %v1532_v39 = vsel %vm9319_vm8, 1, %v17671_v61  ;;  %vm17986_vm4 = vnez %v17593_v3  ;;  %vm17991_vm8 = vcmp.eq.s32.totalorder %v9283_v63, 0  ;;  %18012 = vst [vmem:[#allocation56_spill] sm:$0xff] %v9462_v41 }
 0x1f7   :  { %v17981_v15 = vsel %vm9375_vm13, 4294967295, %v17980_v15  ;;  %vm9383_vm14 = vmor %vm9296_vm2, %vm17982_vm5  ;;  %v2851_v59 = vsel %vm17986_vm4, 1, %v17671_v61  ;;  %vm17987_vm2 = vcmp.eq.s32.totalorder %v8596_v25, 41  ;;  %vm17990_vm5 = vcmp.eq.s32.totalorder %v9283_v63, 7  ;;  %18042 = vst [vmem:[#allocation57_spill] sm:$0xff] %v9540_v45 }
 0x1f8   :  { %vm17985_vm7 = vmmov %vm17977_vm15  ;;  %vm18009_vm15 = vcmp.eq.s32.totalorder %v9283_v63, 14 }
 0x1f9   :  { %7143 = vmatmul.msk.f32.gmra.mxu3 %vm17985_vm7, %v2497_v5  ;;  %vm9404_vm1 = vmor %vm9279_vm3, %vm17987_vm2  ;;  %vm822_vm3 = vcmp.eq.s32.totalorder %v8922_v47, 20  ;;  %v223_v5 = vadd.f32 %v8441_v35, %v7955_v18  ;;  %vm18017_vm2 = vcmp.ge.s32.totalorder %v8596_v25, 7 }
 0x1fa   :  { %v17989_v53 = vsel %vm9404_vm1, 4294967295, %v17988_v53  ;;  %vm9412_vm7 = vmor %vm17991_vm8, %vm17990_vm5  ;;  %vm17998_vm5 = vnez %v17929_v37  ;;  %v18006_v37 = vmov 0  ;;  %vm18013_vm1 = vcmp.eq.s32.totalorder %v8771_v29, 34 }
 0x1fb   :  { %vm9422_vm9 = vmor %vm9364_vm11, %vm17995_vm6  ;;  %vm18002_vm11 = vcmp.eq.s32.totalorder %v8922_v47, 6 }
 0x1fc   :  { %vm9432_vm8 = vmxor %vm17998_vm5, %vm17943_vm0  ;;  %vm18005_vm5 = vnez %v17935_v23  ;;  %v9583_v23 = vmax.f32 %v223_v5, 0.0  ;;  %v18062_v5 = vmov 0 }
 0x1fd   :  { %v18000_v7 = vsel %vm9432_vm8, 4294967295, %v17999_v7  ;;  %vm9441_vm6 = vmor %vm18002_vm11, %vm654_vm10 }
 0x1fe   :  { %18001 = vst [vmem:[#allocation54_spill] sm:$0xff] %v18000_v7  ;;  %vm9449_vm13 = vmxor %vm18005_vm5, %vm17943_vm0 }
 0x1ff   :  { %v18007_v37 = vsel %vm9449_vm13, 4294967295, %v18006_v37  ;;  %vm9457_vm10 = vmor %vm9412_vm7, %vm18009_vm15  ;;  %vm18016_vm7 = vnez %v17946_v4  ;;  %vm18030_vm15 = vcmp.eq.s32.totalorder %v9283_v63, 21  ;;  %18055 = vst [vmem:[#allocation58_spill] sm:$0xff] %v9583_v23  ;;  %vm18067_vm13 = vcmp.eq.s32.totalorder %v9099_v14, 6 }
 0x200   :  { %18008 = vst [vmem:[#allocation55_spill] sm:$0xff] %v18007_v37  ;;  %vm9469_vm5 = vmor %vm9422_vm9, %vm18013_vm1  ;;  %vm18024_vm9 = vcmp.eq.s32.totalorder %v2414_v6, 1  ;;  %vm18025_vm1 = vcmp.eq.s32.totalorder %v2851_v59, 1  ;;  %v18036_v6 = vmov 0  ;;  %v407_v59 = vadd.s32 128, %v8116_v9 }
 0x201   :  { %vm9481_vm11 = vmand %vm18017_vm2, %vm18016_vm7  ;;  %vm18022_vm2 = vcmp.ge.s32.totalorder %v8347_v55, 7  ;;  %vm18023_vm7 = vcmp.eq.s32.totalorder %v1532_v39, 1  ;;  %v2498_v62 = vsel %vm18024_vm9, %v9462_v41, 0.0  ;;  %v2935_v60 = vsel %vm18025_vm1, %v9462_v41, 0.0 }
 0x202   :  { %v18019_v57 = vsel %vm9481_vm11, 4294967295, %v18018_v57  ;;  %vm9491_vm4 = vmor %vm9441_vm6, %vm822_vm3  ;;  %v1745_v18 = vsel %vm18022_vm2, %v9462_v41, 0.0  ;;  %v1616_v3 = vsel %vm18023_vm7, %v9462_v41, 0.0  ;;  %vm18026_vm3 = vnez %v17952_v51 }
 0x203   :  { %vm18027_vm6 = vcmp.ge.s32.totalorder %v8429_v31, 7  ;;  %vm9517_vm2 = vmor %vm9457_vm10, %vm18030_vm15  ;;  %vm18033_vm7 = vcmask 261120   ;;  %vm18035_vm1 = vcmp.eq.s32.totalorder %v9099_v14, 35  ;;  %vm18056_vm15 = vnez %v17981_v15 }
 0x204   :  { %vm9509_vm11 = vmand %vm18027_vm6, %vm18026_vm3  ;;  %7057 = vmatmul.msk.f32.gmra.mxu1 %vm18033_vm7, %v1745_v18  ;;  %vm18038_vm3 = vcmp.eq.s32.totalorder %v9416_v8, 7  ;;  %7144 = vmatmul.msk.f32.gmra.mxu3 %vm18033_vm7, %v2498_v62  ;;  %v18046_v18 = vmov 0  ;;  %v2415_v62 = vsel %vm9356_vm12, 1, %v17671_v61  ;;  %vm490_vm12 = vcmp.eq.s32.totalorder %v9540_v45, 0 }
 0x205   :  { %v18029_v16 = vsel %vm9509_vm11, 4294967295, %v18028_v16  ;;  %vm18034_vm9 = vmmov %vm18033_vm7  ;;  %vm18039_vm11 = vcmp.eq.s32.totalorder %v9416_v8, 0  ;;  %v18079_v55 = vmov 0  ;;  %v9723_v39 = vmax.f32 %v226_v21, 0.0 }
 0x206   :  { %7100 = vmatmul.msk.f32.gmra.mxu2 %vm18034_vm9, %v1616_v3  ;;  %vm9527_vm6 = vmor %vm9383_vm14, %vm18035_vm1  ;;  %vm18044_vm14 = vnez %v17967_v19  ;;  %vm18048_vm1 = vcmp.eq.s32.totalorder %v8922_v47, 27  ;;  %v18053_v19 = vmov 0  ;;  %v18131_v51 = vmov 0 }
 0x207   :  { %v18037_v6 = vsel %vm9527_vm6, 4294967295, %v18036_v6  ;;  %vm9535_vm10 = vmor %vm18039_vm11, %vm18038_vm3  ;;  %v1533_v3 = vsel %vm18044_vm14, 1, %v17671_v61  ;;  %vm18045_vm11 = vcmp.eq.s32.totalorder %v8771_v29, 41  ;;  %vm18052_vm14 = vcmp.eq.s32.totalorder %v9283_v63, 28  ;;  %18108 = vst [vmem:[#allocation62_spill] sm:$0xff] %v9723_v39 }
 0x208   :  { %vm18043_vm9 = vmmov %vm18033_vm7  ;;  %vm18061_vm6 = vnez %v17989_v53  ;;  %v9721_v53 = vshra.s32 %v407_v59, 3  ;;  %v18115_v59 = vmov 0  ;;  %v232_v21 = vadd.f32 %v8441_v35, %v7973_v24 }
 0x209   :  { %7185 = vmatmul.msk.f32.vlgmr.msrb.gmra.mxu0 %vm18043_vm9, %v2935_v60  ;;  %vm9554_vm3 = vmor %vm9469_vm5, %vm18045_vm11  ;;  %vm1158_vm9 = vcmp.eq.s32.totalorder %v8922_v47, 34  ;;  %vm18051_vm5 = vnez %v17601_v13  ;;  %v410_v24 = vadd.s32 152, %v8116_v9 }
 0x20a   :  { %v18047_v18 = vsel %vm9554_vm3, 4294967295, %v18046_v18  ;;  %vm9562_vm7 = vmor %vm9491_vm4, %vm18048_vm1  ;;  %v2852_v10 = vsel %vm18051_vm5, 1, %v17671_v61  ;;  %vm655_vm1 = vcmp.eq.s32.totalorder %v9099_v14, 13  ;;  %vm909_vm4 = vcmp.eq.s32.totalorder %v9416_v8, 21  ;;  %18107 = vst [vmem:[#allocation61_spill] sm:$0xff] %v9721_v53 }
 0x20b   :  { %vm9577_vm11 = vmor %vm9517_vm2, %vm18052_vm14  ;;  %vm18060_vm2 = vcmp.eq.s32.totalorder %v9416_v8, 14  ;;  %vm18085_vm3 = vcmp.eq.s32.totalorder %v2415_v62, 1 }
 0x20c   :  { %v18054_v19 = vsel %vm9577_vm11, 4294967295, %v18053_v19  ;;  %vm9589_vm5 = vmxor %vm18056_vm15, %vm17943_vm0 }
 0x20d   :  { %v18058_v0 = vsel %vm9589_vm5, 4294967295, %v18057_v0  ;;  %vm783_vm14 = vmor %vm9535_vm10, %vm18060_vm2  ;;  %vm574_vm10 = vcmp.eq.s32.totalorder %v9540_v45, 7  ;;  %vm18077_vm5 = vnez %v18007_v37  ;;  %v18089_v37 = vmov 0 }
 0x20e   :  { %18059 = vst [vmem:[#allocation59_spill] sm:$0xff] %v18058_v0  ;;  %vm9601_vm11 = vmxor %vm18061_vm6, %vm17943_vm0 }
 0x20f   :  { %v18063_v5 = vsel %vm9601_vm11, 4294967295, %v18062_v5  ;;  %vm9607_vm15 = vmor %vm9562_vm7, %vm1158_vm9  ;;  %vm18070_vm7 = vcmp.ge.s32.totalorder %v8771_v29, 7  ;;  %vm18083_vm11 = vcmask 261120  }
 0x210   :  { %18064 = vst [vmem:[#allocation60_spill] sm:$0xff] %v18063_v5  ;;  %vm9616_vm6 = vmor %vm18067_vm13, %vm655_vm1  ;;  %vm18075_vm1 = vcmp.ge.s32.totalorder %v8429_v31, 7 }
 0x211   :  { %vm9625_vm9 = vmand %vm18070_vm7, %vm9432_vm8  ;;  %v1746_v60 = vsel %vm18075_vm1, %v9583_v23, 0.0  ;;  %vm18076_vm7 = vcmp.eq.s32.totalorder %v1533_v3, 1  ;;  %v2499_v3 = vsel %vm18085_vm3, %v9583_v23, 0.0  ;;  %vm18088_vm8 = vnez %v18054_v19 }
 0x212   :  { %v18072_v49 = vsel %vm9625_vm9, 4294967295, %v18071_v49  ;;  %vm9630_vm2 = vmor %vm783_vm14, %vm909_vm4  ;;  %v1617_v41 = vsel %vm18076_vm7, %v9583_v23, 0.0  ;;  %vm18078_vm4 = vcmp.ge.s32.totalorder %v8313_v43, 7  ;;  %7058 = vmatmul.msk.f32.gmra.mxu1 %vm18083_vm11, %v1746_v60  ;;  %vm18097_vm1 = vcmp.eq.s32.totalorder %v8922_v47, 41 }
 0x213   :  { %vm9647_vm14 = vmand %vm18078_vm4, %vm18077_vm5  ;;  %vm18086_vm4 = vcmp.eq.s32.totalorder %v2852_v10, 1  ;;  %vm18087_vm5 = vcmp.eq.s32.totalorder %v9283_v63, 35  ;;  %v18098_v19 = vmov 0  ;;  %vm18103_vm3 = vnez %v18029_v16 }
 0x214   :  { %v18080_v55 = vsel %vm9647_vm14, 4294967295, %v18079_v55  ;;  %vm9655_vm13 = vmor %vm490_vm12, %vm574_vm10  ;;  %v2936_v31 = vsel %vm18086_vm4, %v9583_v23, 0.0  ;;  %vm18091_vm10 = vcmp.eq.s32.totalorder %v9099_v14, 20  ;;  %v18110_v16 = vmov 0 }
 0x215   :  { %vm18084_vm7 = vmmov %vm18083_vm11  ;;  %vm18114_vm9 = vnez %v18047_v18  ;;  %v408_v18 = vadd.s32 136, %v8116_v9  ;;  %v18124_v60 = vmov 0 }
 0x216   :  { %7101 = vmatmul.msk.f32.gmra.mxu2 %vm18084_vm7, %v1617_v41  ;;  %vm9670_vm12 = vmor %vm18088_vm8, %vm18087_vm5  ;;  %7145 = vmatmul.msk.f32.gmra.mxu3 %vm18084_vm7, %v2499_v3  ;;  %vm18095_vm8 = vnez %v18019_v57  ;;  %vm18096_vm5 = vnez %v17637_v33  ;;  %v2416_v57 = vsel %vm18103_vm3, 1, %v17671_v61  ;;  %v229_v3 = vadd.f32 %v8441_v35, %v7967_v22 }
 0x217   :  { %v18090_v37 = vsel %vm9670_vm12, 4294967295, %v18089_v37  ;;  %vm9678_vm11 = vmor %vm9616_vm6, %vm18091_vm10  ;;  %v1534_v62 = vsel %vm18095_vm8, 1, %v17671_v61  ;;  %v2853_v10 = vsel %vm18096_vm5, 1, %v17671_v61  ;;  %vm18100_vm10 = vcmp.eq.s32.totalorder %v9416_v8, 28 }
 0x218   :  { %vm18094_vm4 = vmmov %vm18084_vm7  ;;  %vm656_vm8 = vcmp.eq.s32.totalorder %v9283_v63, 13  ;;  %vm18109_vm5 = vnez %v18037_v6  ;;  %vm1576_vm12 = vcmp.eq.s32.totalorder %v1534_v62, 1  ;;  %v18141_v6 = vmov 0 }
 0x219   :  { %7186 = vmatmul.msk.f32.gmra.mxu0 %vm18094_vm4, %v2936_v31  ;;  %vm9695_vm6 = vmor %vm9607_vm15, %vm18097_vm1  ;;  %v18101_v31 = vmov 0  ;;  %vm530_vm4 = vcmp.eq.s32.totalorder %v9283_v63, 6  ;;  %vm18104_vm15 = vcmp.eq.s32.totalorder %v9540_v45, 14  ;;  %v1618_v15 = vsel %vm1576_vm12, %v9723_v39, 0.0 }
 0x21a   :  { %v18099_v19 = vsel %vm9695_vm6, 4294967295, %v18098_v19  ;;  %vm9703_vm7 = vmor %vm9630_vm2, %vm18100_vm10  ;;  %vm910_vm2 = vcmp.eq.s32.totalorder %v9540_v45, 21  ;;  %vm1159_vm6 = vcmp.eq.s32.totalorder %v9099_v14, 34  ;;  %v9857_v20 = vmax.f32 %v229_v3, 0.0 }
 0x21b   :  { %v18102_v31 = vsel %vm9703_vm7, 4294967295, %v18101_v31  ;;  %vm9716_vm1 = vmor %vm9655_vm13, %vm18104_vm15  ;;  %vm18113_vm13 = vcmp.eq.s32.totalorder %v9099_v14, 27  ;;  %v18196_v3 = vmov 0  ;;  %v18220_v22 = vmov 0 }
 0x21c   :  { %vm9729_vm3 = vmxor %vm18109_vm5, %vm17943_vm0  ;;  %18160 = vst [vmem:[#allocation66_spill] sm:$0xff] %v9857_v20  ;;  %v18276_v33 = vmov 0 }
 0x21d   :  { %v18111_v16 = vsel %vm9729_vm3, 4294967295, %v18110_v16  ;;  %vm1033_vm15 = vmor %vm9678_vm11, %vm18113_vm13  ;;  %vm824_vm3 = vcmp.eq.s32.totalorder %v9283_v63, 20  ;;  %vm18128_vm11 = vcmp.ge.s32.totalorder %v8313_v43, 7 }
 0x21e   :  { %18112 = vst [vmem:[#allocation63_spill] sm:$0xff] %v18111_v16  ;;  %vm9741_vm10 = vmxor %vm18114_vm9, %vm17943_vm0  ;;  %v1747_v41 = vsel %vm18128_vm11, %v9723_v39, 0.0  ;;  %vm18135_vm9 = vcmask 261120  }
 0x21f   :  { %v18116_v59 = vsel %vm9741_vm10, 4294967295, %v18115_v59  ;;  %vm9745_vm5 = vmor %vm530_vm4, %vm656_vm8  ;;  %vm18122_vm4 = vnez %v18058_v0  ;;  %vm18123_vm8 = vcmp.ge.s32.totalorder %v8922_v47, 7  ;;  %7059 = vmatmul.msk.f32.gmra.mxu1 %vm18135_vm9, %v1747_v41  ;;  %v18144_v41 = vmov 0 }
 0x220   :  { %18117 = vst [vmem:[#allocation64_spill] sm:$0xff] %v18116_v59  ;;  %vm9753_vm13 = vmor %vm9716_vm1, %vm910_vm2  ;;  %vm18137_vm1 = vcmp.eq.s32.totalorder %v2416_v57, 1  ;;  %v18151_v57 = vmov 0 }
 0x221   :  { %vm9763_vm14 = vmand %vm18123_vm8, %vm18122_vm4  ;;  %v2500_v62 = vsel %vm18137_vm1, %v9723_v39, 0.0  ;;  %vm18140_vm4 = vnez %v18102_v31 }
 0x222   :  { %v18125_v60 = vsel %vm9763_vm14, 4294967295, %v18124_v60  ;;  %vm9767_vm7 = vmor %vm1033_vm15, %vm1159_vm6  ;;  %vm18129_vm6 = vnez %v18063_v5  ;;  %vm18130_vm15 = vcmp.ge.s32.totalorder %v8596_v25, 7 }
 0x223   :  { %vm9785_vm8 = vmand %vm18130_vm15, %vm18129_vm6  ;;  %vm18138_vm15 = vcmp.eq.s32.totalorder %v2853_v10, 1  ;;  %vm18139_vm6 = vcmp.eq.s32.totalorder %v9416_v8, 35 }
 0x224   :  { %v18132_v51 = vsel %vm9785_vm8, 4294967295, %v18131_v51  ;;  %vm9793_vm2 = vmor %vm9745_vm5, %vm824_vm3  ;;  %v2937_v43 = vsel %vm18138_vm15, %v9723_v39, 0.0  ;;  %vm18143_vm5 = vcmp.eq.s32.totalorder %v9540_v45, 28  ;;  %vm18178_vm8 = vcmp.ge.s32.totalorder %v9099_v14, 7 }
 0x225   :  { %vm18136_vm12 = vmmov %vm18135_vm9 }
 0x226   :  { %7102 = vmatmul.msk.f32.gmra.mxu2 %vm18136_vm12, %v1618_v15  ;;  %vm9808_vm3 = vmor %vm18140_vm4, %vm18139_vm6  ;;  %vm18148_vm4 = vnez %v18072_v49  ;;  %vm18149_vm6 = vnez %v17687_v27  ;;  %v409_v15 = vadd.s32 144, %v8116_v9 }
 0x227   :  { %v18142_v6 = vsel %vm9808_vm3, 4294967295, %v18141_v6  ;;  %vm9816_vm9 = vmor %vm9753_vm13, %vm18143_vm5  ;;  %v1535_v10 = vsel %vm18148_vm4, 1, %v17671_v61  ;;  %v2854_v31 = vsel %vm18149_vm6, 1, %v17671_v61  ;;  %vm18150_vm13 = vcmp.eq.s32.totalorder %v9099_v14, 41 }
 0x228   :  { %v18145_v41 = vsel %vm9816_vm9, 4294967295, %v18144_v41  ;;  %vm18146_vm15 = vmmov %vm18136_vm12  ;;  %vm18156_vm4 = vnez %v18080_v55  ;;  %vm18157_vm6 = vcmp.eq.s32.totalorder %v9283_v63, 27  ;;  %v18162_v55 = vmov 0 }
 0x229   :  { %7146 = vmatmul.msk.f32.gmra.mxu3 %vm18146_vm15, %v2500_v62  ;;  %vm18147_vm11 = vmmov %vm18136_vm12  ;;  %vm18153_vm15 = vcmp.eq.s32.totalorder %v9721_v53, 7  ;;  %vm743_vm12 = vcmp.eq.s32.totalorder %v9721_v53, 14  ;;  %v2417_v49 = vsel %vm18156_vm4, 1, %v17671_v61  ;;  %vm18165_vm4 = vcmp.eq.s32.totalorder %v9416_v8, 13 }
 0x22a   :  { %7187 = vmatmul.msk.f32.gmra.mxu0 %vm18147_vm11, %v2937_v43  ;;  %vm9834_vm5 = vmor %vm9767_vm7, %vm18150_vm13  ;;  %vm18154_vm11 = vcmp.eq.s32.totalorder %v9721_v53, 0  ;;  %v9843_v43 = vshra.s32 %v408_v18, 3  ;;  %vm1160_vm13 = vcmp.eq.s32.totalorder %v9283_v63, 34  ;;  %vm825_vm3 = vcmp.eq.s32.totalorder %v9416_v8, 20 }
 0x22b   :  { %v18152_v57 = vsel %vm9834_vm5, 4294967295, %v18151_v57  ;;  %vm617_vm1 = vmor %vm18154_vm11, %vm18153_vm15  ;;  %vm18161_vm11 = vnez %v18090_v37  ;;  %vm18169_vm15 = vnez %v18099_v19  ;;  %v18170_v37 = vmov 0 }
 0x22c   :  { %18155 = vst [vmem:[#allocation65_spill] sm:$0xff] %v9843_v43  ;;  %vm9852_vm7 = vmor %vm9793_vm2, %vm18157_vm6  ;;  %vm18166_vm2 = vcmp.eq.s32.totalorder %v9416_v8, 6  ;;  %v18179_v19 = vmov 0  ;;  %v18186_v18 = vmov 0  ;;  %v18231_v62 = vmov 0 }
 0x22d   :  { %vm9863_vm5 = vmxor %vm18161_vm11, %vm17943_vm0 }
 0x22e   :  { %v18163_v55 = vsel %vm9863_vm5, 4294967295, %v18162_v55  ;;  %vm9871_vm6 = vmor %vm18166_vm2, %vm18165_vm4  ;;  %vm2459_vm2 = vcmp.eq.s32.totalorder %v2417_v49, 1  ;;  %vm18185_vm5 = vcmp.ge.s32.totalorder %v8771_v29, 7  ;;  %v18207_v49 = vmov 0 }
 0x22f   :  { %18164 = vst [vmem:[#allocation67_spill] sm:$0xff] %v18163_v55  ;;  %vm9879_vm9 = vmxor %vm18169_vm15, %vm17943_vm0  ;;  %vm18183_vm15 = vcmp.ge.s32.totalorder %v8596_v25, 7 }
 0x230   :  { %v18171_v37 = vsel %vm9879_vm9, 4294967295, %v18170_v37  ;;  %vm9883_vm11 = vmor %vm617_vm1, %vm743_vm12  ;;  %vm18177_vm12 = vnez %v18111_v16  ;;  %v1748_v5 = vsel %vm18183_vm15, %v9857_v20, 0.0  ;;  %vm18191_vm1 = vcmask 261120  }
 0x231   :  { %18172 = vst [vmem:[#allocation68_spill] sm:$0xff] %v18171_v37  ;;  %vm9892_vm14 = vmor %vm9852_vm7, %vm1160_vm13  ;;  %7060 = vmatmul.msk.f32.gmra.mxu1 %vm18191_vm1, %v1748_v5  ;;  %v9961_v5 = vshra.s32 %v409_v15, 3  ;;  %v9997_v15 = vmax.f32 %v232_v21, 0.0  ;;  %v10133_v21 = vshra.s32 %v410_v24, 3  ;;  %v18292_v37 = vmov 0 }
 0x232   :  { %vm9902_vm4 = vmand %vm18178_vm8, %vm18177_vm12  ;;  %vm18184_vm8 = vcmp.eq.s32.totalorder %v1535_v10, 1  ;;  %v2501_v10 = vsel %vm2459_vm2, %v9857_v20, 0.0  ;;  %vm18195_vm12 = vnez %v18145_v41  ;;  %vm1161_vm2 = vcmp.eq.s32.totalorder %v9416_v8, 34 }
 0x233   :  { %v18180_v19 = vsel %vm9902_vm4, 4294967295, %v18179_v19  ;;  %vm9909_vm7 = vmor %vm9871_vm6, %vm825_vm3  ;;  %v1619_v27 = vsel %vm18184_vm8, %v9857_v20, 0.0  ;;  %vm18188_vm6 = vcmp.eq.s32.totalorder %v9721_v53, 21  ;;  %18202 = vst [vmem:[#allocation69_spill] sm:$0xff] %v9961_v5  ;;  %vm577_vm4 = vcmp.eq.s32.totalorder %v9961_v5, 7 }
 0x234   :  { %vm9925_vm3 = vmand %vm18185_vm5, %vm9741_vm10  ;;  %vm18193_vm5 = vcmp.eq.s32.totalorder %v2854_v31, 1  ;;  %vm18194_vm10 = vcmp.eq.s32.totalorder %v9540_v45, 35  ;;  %18214 = vst [vmem:[#allocation70_spill] sm:$0xff] %v9997_v15 }
 0x235   :  { %v18187_v18 = vsel %vm9925_vm3, 4294967295, %v18186_v18  ;;  %vm9933_vm13 = vmor %vm9883_vm11, %vm18188_vm6  ;;  %v2938_v25 = vsel %vm18193_vm5, %v9857_v20, 0.0  ;;  %vm18198_vm6 = vcmp.eq.s32.totalorder %v9843_v43, 7  ;;  %vm18219_vm3 = vnez %v18152_v57  ;;  %18267 = vst [vmem:[#allocation72_spill] sm:$0xff] %v10133_v21 }
 0x236   :  { %vm18192_vm8 = vmmov %vm18191_vm1  ;;  %vm18199_vm1 = vcmp.eq.s32.totalorder %v9843_v43, 0 }
 0x237   :  { %7103 = vmatmul.msk.f32.gmra.mxu2 %vm18192_vm8, %v1619_v27  ;;  %vm9948_vm11 = vmor %vm18195_vm12, %vm18194_vm10  ;;  %7147 = vmatmul.msk.f32.gmra.mxu3 %vm18192_vm8, %v2501_v10  ;;  %vm18204_vm10 = vnez %v18125_v60  ;;  %vm18205_vm12 = vnez %v17741_v11  ;;  %v235_v10 = vadd.f32 %v8441_v35, %v7979_v26  ;;  %v18238_v11 = vmov 0 }
 0x238   :  { %v18197_v3 = vsel %vm9948_vm11, 4294967295, %v18196_v3  ;;  %vm9956_vm15 = vmor %vm18199_vm1, %vm18198_vm6  ;;  %v1536_v41 = vsel %vm18204_vm10, 1, %v17671_v61  ;;  %v2855_v31 = vsel %vm18205_vm12, 1, %v17671_v61  ;;  %vm18206_vm6 = vcmp.eq.s32.totalorder %v9283_v63, 41 }
 0x239   :  { %vm18203_vm5 = vmmov %vm18192_vm8  ;;  %vm18209_vm8 = vcmp.eq.s32.totalorder %v9416_v8, 27  ;;  %vm18210_vm10 = vnez %v18132_v51  ;;  %vm18211_vm12 = vcmp.eq.s32.totalorder %v9721_v53, 28  ;;  %v18216_v51 = vmov 0 }
 0x23a   :  { %7188 = vmatmul.msk.f32.gmra.mxu0 %vm18203_vm5, %v2938_v25  ;;  %vm9975_vm1 = vmor %vm9892_vm14, %vm18206_vm6  ;;  %v2418_v25 = vsel %vm18210_vm10, 1, %v17671_v61  ;;  %vm912_vm14 = vcmp.eq.s32.totalorder %v9843_v43, 21 }
 0x23b   :  { %v18208_v49 = vsel %vm9975_vm1, 4294967295, %v18207_v49  ;;  %vm1035_vm5 = vmor %vm9909_vm7, %vm18209_vm8  ;;  %vm18215_vm8 = vnez %v18142_v6  ;;  %vm18225_vm1 = vcmp.eq.s32.totalorder %v9540_v45, 13  ;;  %v18261_v6 = vmov 0 }
 0x23c   :  { %vm9991_vm11 = vmor %vm9933_vm13, %vm18211_vm12  ;;  %vm18218_vm13 = vcmp.eq.s32.totalorder %v9843_v43, 14 }
 0x23d   :  { %vm10003_vm10 = vmxor %vm18215_vm8, %vm17943_vm0 }
 0x23e   :  { %v18217_v51 = vsel %vm10003_vm10, 4294967295, %v18216_v51  ;;  %vm786_vm12 = vmor %vm9956_vm15, %vm18218_vm13  ;;  %vm18230_vm10 = vcmp.ge.s32.totalorder %v9283_v63, 7 }
 0x23f   :  { %vm10015_vm7 = vmxor %vm18219_vm3, %vm17943_vm0  ;;  %vm18226_vm3 = vcmp.eq.s32.totalorder %v9540_v45, 6 }
 0x240   :  { %v18221_v22 = vsel %vm10015_vm7, 4294967295, %v18220_v22  ;;  %vm10019_vm8 = vmor %vm1035_vm5, %vm1161_vm2  ;;  %vm18229_vm5 = vnez %v18163_v55  ;;  %vm18260_vm2 = vcmp.eq.s32.totalorder %v9843_v43, 28 }
 0x241   :  { %18222 = vst [vmem:[#allocation71_spill] sm:$0xff] %v18221_v22  ;;  %vm10031_vm0 = vmor %vm18226_vm3, %vm18225_vm1  ;;  %vm18235_vm1 = vcmp.ge.s32.totalorder %v8771_v29, 7  ;;  %vm18240_vm3 = vcmp.eq.s32.totalorder %v9961_v5, 0 }
 0x242   :  { %vm10040_vm7 = vmand %vm18230_vm10, %vm18229_vm5  ;;  %v1749_v27 = vsel %vm18235_vm1, %v9997_v15, 0.0  ;;  %vm18236_vm10 = vcmp.eq.s32.totalorder %v1536_v41, 1  ;;  %vm18243_vm1 = vcmask 261120   ;;  %v18248_v41 = vmov 0 }
 0x243   :  { %v18232_v62 = vsel %vm10040_vm7, 4294967295, %v18231_v62  ;;  %vm10044_vm13 = vmor %vm786_vm12, %vm912_vm14  ;;  %v1620_v59 = vsel %vm18236_vm10, %v9997_v15, 0.0  ;;  %vm18237_vm14 = vcmp.ge.s32.totalorder %v8922_v47, 7  ;;  %7061 = vmatmul.msk.f32.gmra.mxu1 %vm18243_vm1, %v1749_v27  ;;  %vm18245_vm10 = vcmp.eq.s32.totalorder %v2418_v25, 1 }
 0x244   :  { %vm10061_vm12 = vmand %vm18237_vm14, %vm9879_vm9  ;;  %v2502_v26 = vsel %vm18245_vm10, %v9997_v15, 0.0  ;;  %vm18246_vm14 = vcmp.eq.s32.totalorder %v2855_v31, 1  ;;  %vm18247_vm9 = vcmp.eq.s32.totalorder %v9721_v53, 35  ;;  %v10135_v27 = vmax.f32 %v235_v10, 0.0 }
 0x245   :  { %v18239_v11 = vsel %vm10061_vm12, 4294967295, %v18238_v11  ;;  %vm10067_vm6 = vmor %vm18240_vm3, %vm577_vm4  ;;  %v2939_v35 = vsel %vm18246_vm14, %v9997_v15, 0.0  ;;  %vm18250_vm3 = vcmp.eq.s32.totalorder %v9416_v8, 41  ;;  %vm18270_vm5 = vnez %v18197_v3 }
 0x246   :  { %vm18244_vm15 = vmmov %vm18243_vm1  ;;  %18268 = vst [vmem:[#allocation73_spill] sm:$0xff] %v10135_v27  ;;  %vm18275_vm7 = vnez %v18208_v49  ;;  %v411_v49 = vadd.s32 160, %v8116_v9  ;;  %v18285_v10 = vmov 0  ;;  %v18302_v3 = vmov 0 }
 0x247   :  { %7104 = vmatmul.msk.f32.gmra.mxu2 %vm18244_vm15, %v1620_v59  ;;  %vm10082_vm4 = vmor %vm9991_vm11, %vm18247_vm9  ;;  %v18251_v59 = vmov 0  ;;  %vm18253_vm15 = vcmp.eq.s32.totalorder %v9540_v45, 20  ;;  %vm18256_vm11 = vcmask 261120  }
 0x248   :  { %v18249_v41 = vsel %vm10082_vm4, 4294967295, %v18248_v41  ;;  %vm10090_vm1 = vmor %vm10019_vm8, %vm18250_vm3  ;;  %7148 = vmatmul.msk.f32.gmra.mxu3 %vm18256_vm11, %v2502_v26  ;;  %vm18258_vm8 = vnez %v18180_v19  ;;  %vm18259_vm3 = vnez %v17797_v12 }
 0x249   :  { %v18252_v59 = vsel %vm10090_vm1, 4294967295, %v18251_v59  ;;  %vm10098_vm10 = vmor %vm10031_vm0, %vm18253_vm15  ;;  %v1537_v25 = vsel %vm18258_vm8, 1, %v17671_v61  ;;  %v2856_v60 = vsel %vm18259_vm3, 1, %v17671_v61  ;;  %vm533_vm15 = vcmp.eq.s32.totalorder %v9721_v53, 6 }
 0x24a   :  { %vm18257_vm14 = vmmov %vm18256_vm11  ;;  %vm659_vm11 = vcmp.eq.s32.totalorder %v9721_v53, 13  ;;  %vm18264_vm8 = vcmp.eq.s32.totalorder %v9961_v5, 14  ;;  %vm18269_vm3 = vmmov 1   ;;  %vm1162_vm1 = vcmp.eq.s32.totalorder %v9540_v45, 34 }
 0x24b   :  { %7189 = vmatmul.msk.f32.gmra.mxu0 %vm18257_vm14, %v2939_v35  ;;  %vm10115_vm0 = vmor %vm10044_vm13, %vm18260_vm2  ;;  %vm18263_vm14 = vnez %v18187_v18  ;;  %vm913_vm13 = vcmp.eq.s32.totalorder %v9961_v5, 21  ;;  %v18271_v18 = vmov 0  ;;  %vm1579_vm4 = vcmp.eq.s32.totalorder %v1537_v25, 1  ;;  %v10189_v35 = vld [vmem:[%s17060_s2] ss:$0 sm:$0xff] }
 0x24c   :  { %v18262_v6 = vsel %vm10115_vm0, 4294967295, %v18261_v6  ;;  %v2419_v19 = vsel %vm18263_vm14, 1, %v17671_v61  ;;  %vm10128_vm9 = vmor %vm10067_vm6, %vm18264_vm8  ;;  %vm18274_vm6 = vcmp.eq.s32.totalorder %v9540_v45, 27  ;;  %v238_v31 = vadd.f32 %v10189_v35, %v7985_v28 }
 0x24d   :  { %vm10141_vm14 = vmxor %vm18270_vm5, %vm18269_vm3  ;;  %v1621_v29 = vsel %vm1579_vm4, %v10135_v27, 0.0 }
 0x24e   :  { %v18272_v18 = vsel %vm10141_vm14, 4294967295, %v18271_v18  ;;  %vm1036_vm8 = vmor %vm10098_vm10, %vm18274_vm6  ;;  %vm827_vm14 = vcmp.eq.s32.totalorder %v9721_v53, 20  ;;  %vm18298_vm10 = vcmp.eq.s32.totalorder %v2419_v19, 1  ;;  %v18312_v19 = vmov 0 }
 0x24f   :  { %18273 = vst [vmem:[#allocation74_spill] sm:$0xff] %v18272_v18  ;;  %vm10153_vm2 = vmxor %vm18275_vm7, %vm18269_vm3  ;;  %v2503_v25 = vsel %vm18298_vm10, %v10135_v27, 0.0  ;;  %v10274_v26 = vmax.f32 %v238_v31, 0.0  ;;  %v18446_v31 = vmov 0 }
 0x250   :  { %v18277_v33 = vsel %vm10153_vm2, 4294967295, %v18276_v33  ;;  %vm10157_vm5 = vmor %vm533_vm15, %vm659_vm11  ;;  %vm18283_vm15 = vnez %v18217_v51  ;;  %vm18284_vm11 = vcmp.ge.s32.totalorder %v9416_v8, 7 }
 0x251   :  { %18278 = vst [vmem:[#allocation75_spill] sm:$0xff] %v18277_v33  ;;  %vm10165_vm6 = vmor %vm10128_vm9, %vm913_vm13  ;;  %vm18296_vm9 = vcmask 261120   ;;  %v244_v33 = vadd.f32 %v10189_v35, %v7997_v32 }
 0x252   :  { %vm10175_vm12 = vmand %vm18284_vm11, %vm18283_vm15  ;;  %vm18291_vm11 = vcmp.ge.s32.totalorder %v9099_v14, 7  ;;  %vm18301_vm15 = vnez %v18262_v6  ;;  %18321 = vst [vmem:[#allocation77_spill] sm:$0xff] %v10274_v26 }
 0x253   :  { %v18286_v10 = vsel %vm10175_vm12, 4294967295, %v18285_v10  ;;  %vm10179_vm0 = vmor %vm1036_vm8, %vm1162_vm1  ;;  %vm18289_vm1 = vcmp.ge.s32.totalorder %v8922_v47, 7  ;;  %vm18290_vm8 = vnez %v18221_v22 }
 0x254   :  { %v1750_v57 = vsel %vm18289_vm1, %v10135_v27, 0.0  ;;  %vm10202_vm13 = vmand %vm18291_vm11, %vm18290_vm8  ;;  %vm18299_vm11 = vcmp.eq.s32.totalorder %v2856_v60, 1  ;;  %vm18300_vm8 = vcmp.eq.s32.totalorder %v9843_v43, 35 }
 0x255   :  { %v18293_v37 = vsel %vm10202_vm13, 4294967295, %v18292_v37  ;;  %vm10210_vm7 = vmor %vm10157_vm5, %vm827_vm14  ;;  %7062 = vmatmul.msk.f32.gmra.mxu1 %vm18296_vm9, %v1750_v57  ;;  %v2940_v47 = vsel %vm18299_vm11, %v10135_v27, 0.0  ;;  %vm18304_vm5 = vcmp.eq.s32.totalorder %v9961_v5, 28 }
 0x256   :  { %vm18297_vm4 = vmmov %vm18296_vm9 }
 0x257   :  { %7105 = vmatmul.msk.f32.gmra.mxu2 %vm18297_vm4, %v1621_v29  ;;  %vm10225_vm14 = vmor %vm18301_vm15, %vm18300_vm8  ;;  %v18305_v29 = vmov 0  ;;  %vm18309_vm15 = vnez %v18232_v62  ;;  %vm18310_vm8 = vnez %v17852_v2  ;;  %v18344_v2 = vmov 0 }
 0x258   :  { %v18303_v3 = vsel %vm10225_vm14, 4294967295, %v18302_v3  ;;  %vm10233_vm9 = vmor %vm10165_vm6, %vm18304_vm5  ;;  %v1538_v60 = vsel %vm18309_vm15, 1, %v17671_v61  ;;  %v2857_v6 = vsel %vm18310_vm8, 1, %v17671_v61  ;;  %vm18311_vm6 = vcmp.eq.s32.totalorder %v9540_v45, 41 }
 0x259   :  { %v18306_v29 = vsel %vm10233_vm9, 4294967295, %v18305_v29  ;;  %vm18307_vm11 = vmmov %vm18297_vm4  ;;  %vm18317_vm15 = vnez %v18239_v11  ;;  %vm18318_vm8 = vcmp.eq.s32.totalorder %v9721_v53, 27  ;;  %v18323_v11 = vmov 0 }
 0x25a   :  { %7149 = vmatmul.msk.f32.gmra.mxu3 %vm18307_vm11, %v2503_v25  ;;  %vm18308_vm1 = vmmov %vm18297_vm4  ;;  %vm18314_vm11 = vcmp.eq.s32.totalorder %v10133_v21, 7  ;;  %vm746_vm4 = vcmp.eq.s32.totalorder %v10133_v21, 14  ;;  %v2420_v62 = vsel %vm18317_vm15, 1, %v17671_v61  ;;  %vm18326_vm15 = vnez %v18252_v59 }
 0x25b   :  { %7190 = vmatmul.msk.f32.gmra.mxu0 %vm18308_vm1, %v2940_v47  ;;  %vm10251_vm5 = vmor %vm10179_vm0, %vm18311_vm6  ;;  %vm18315_vm1 = vcmp.eq.s32.totalorder %v10133_v21, 0  ;;  %v10260_v47 = vshra.s32 %v411_v49, 3  ;;  %vm1163_vm6 = vcmp.eq.s32.totalorder %v9721_v53, 34  ;;  %v18327_v49 = vmov 0 }
 0x25c   :  { %v18313_v19 = vsel %vm10251_vm5, 4294967295, %v18312_v19  ;;  %vm620_vm10 = vmor %vm18315_vm1, %vm18314_vm11  ;;  %vm18322_vm1 = vnez %v18249_v41  ;;  %vm18331_vm14 = vcmp.eq.s32.totalorder %v9843_v43, 6  ;;  %vm828_vm11 = vcmp.eq.s32.totalorder %v9843_v43, 20 }
 0x25d   :  { %18316 = vst [vmem:[#allocation76_spill] sm:$0xff] %v10260_v47  ;;  %vm10269_vm0 = vmor %vm10210_vm7, %vm18318_vm8  ;;  %vm18330_vm8 = vcmp.eq.s32.totalorder %v9843_v43, 13  ;;  %vm1580_vm12 = vcmp.eq.s32.totalorder %v1538_v60, 1  ;;  %v412_v59 = vadd.s32 168, %v8116_v9  ;;  %v241_v25 = vadd.f32 %v10189_v35, %v7991_v30 }
 0x25e   :  { %vm10280_vm5 = vmxor %vm18322_vm1, %vm18269_vm3  ;;  %v1622_v22 = vsel %vm1580_vm12, %v10274_v26, 0.0  ;;  %v18354_v41 = vmov 0  ;;  %v18397_v30 = vmov 0 }
 0x25f   :  { %v18324_v11 = vsel %vm10280_vm5, 4294967295, %v18323_v11  ;;  %vm10287_vm7 = vmxor %vm18326_vm15, %vm18269_vm3  ;;  %vm914_vm5 = vcmp.eq.s32.totalorder %v10133_v21, 21 }
 0x260   :  { %18325 = vst [vmem:[#allocation78_spill] sm:$0xff] %v18324_v11  ;;  %v18328_v49 = vsel %vm10287_vm7, 4294967295, %v18327_v49  ;;  %vm702_vm13 = vmor %vm18331_vm14, %vm18330_vm8  ;;  %vm18337_vm8 = vcmp.ge.s32.totalorder %v9540_v45, 7  ;;  %vm18350_vm7 = vcmp.eq.s32.totalorder %v2420_v62, 1  ;;  %vm18352_vm14 = vcmp.eq.s32.totalorder %v9961_v5, 35 }
 0x261   :  { %18329 = vst [vmem:[#allocation79_spill] sm:$0xff] %v18328_v49  ;;  %vm10296_vm1 = vmor %vm620_vm10, %vm746_vm4  ;;  %vm18336_vm4 = vnez %v18272_v18  ;;  %v2504_v60 = vsel %vm18350_vm7, %v10274_v26, 0.0  ;;  %vm18353_vm10 = vnez %v18306_v29  ;;  %vm1164_vm7 = vcmp.eq.s32.totalorder %v9843_v43, 34 }
 0x262   :  { %vm10305_vm3 = vmor %vm10269_vm0, %vm1163_vm6  ;;  %vm18342_vm6 = vcmp.ge.s32.totalorder %v9099_v14, 7  ;;  %vm18348_vm0 = vcmask 261120  }
 0x263   :  { %vm10315_vm9 = vmand %vm18337_vm8, %vm18336_vm4  ;;  %v1751_v24 = vsel %vm18342_vm6, %v10274_v26, 0.0  ;;  %vm18343_vm8 = vcmp.ge.s32.totalorder %v9283_v63, 7  ;;  %vm18374_vm4 = vnez %v18303_v3  ;;  %v18382_v3 = vmov 0 }
 0x264   :  { %vm10320_vm15 = vmor %vm702_vm13, %vm828_vm11  ;;  %7063 = vmatmul.msk.f32.gmra.mxu1 %vm18348_vm0, %v1751_v24  ;;  %v18365_v24 = vmov 0 }
 0x265   :  { %vm10336_vm13 = vmand %vm18343_vm8, %vm10153_vm2  ;;  %vm18351_vm8 = vcmp.eq.s32.totalorder %v2857_v6, 1  ;;  %v10372_v6 = vshra.s32 %v412_v59, 3  ;;  %vm18369_vm2 = vcmp.eq.s32.totalorder %v10133_v21, 28  ;;  %v10408_v59 = vmax.f32 %v241_v25, 0.0 }
 0x266   :  { %v18345_v2 = vsel %vm10336_vm13, 4294967295, %v18344_v2  ;;  %vm10344_vm11 = vmor %vm10296_vm1, %vm914_vm5  ;;  %v2941_v14 = vsel %vm18351_vm8, %v10274_v26, 0.0  ;;  %vm18356_vm1 = vcmp.eq.s32.totalorder %v10260_v47, 7  ;;  %v18393_v25 = vmov 0 }
 0x267   :  { %vm18349_vm12 = vmmov %vm18348_vm0  ;;  %vm18357_vm0 = vcmp.eq.s32.totalorder %v10260_v47, 0  ;;  %18360 = vst [vmem:[#allocation80_spill] sm:$0xff] %v10372_v6  ;;  %vm18396_vm13 = vcmp.ge.s32.totalorder %v9416_v8, 7  ;;  %v18708_v26 = vmov 0 }
 0x268   :  { %7106 = vmatmul.msk.f32.gmra.mxu2 %vm18349_vm12, %v1622_v22  ;;  %vm10359_vm5 = vmor %vm18353_vm10, %vm18352_vm14  ;;  %7150 = vmatmul.msk.f32.gmra.mxu3 %vm18349_vm12, %v2504_v60  ;;  %vm18362_vm14 = vnez %v18286_v10  ;;  %vm18363_vm10 = vnez %v17900_v17  ;;  %18372 = vst [vmem:[#allocation81_spill] sm:$0xff] %v10408_v59  ;;  %v413_v22 = vadd.s32 176, %v8116_v9  ;;  %v18423_v10 = vmov 0 }
 0x269   :  { %v18355_v41 = vsel %vm10359_vm5, 4294967295, %v18354_v41  ;;  %vm10367_vm6 = vmor %vm18357_vm0, %vm18356_vm1  ;;  %v1539_v29 = vsel %vm18362_vm14, 1, %v17671_v61  ;;  %v2858_v62 = vsel %vm18363_vm10, 1, %v17671_v61  ;;  %vm18364_vm1 = vcmp.eq.s32.totalorder %v9721_v53, 41 }
 0x26a   :  { %vm18361_vm8 = vmmov %vm18349_vm12  ;;  %vm18367_vm12 = vcmp.eq.s32.totalorder %v9843_v43, 27  ;;  %vm18368_vm14 = vnez %v18293_v37  ;;  %v18375_v37 = vmov 0  ;;  %v10550_v28 = vshra.s32 %v413_v22, 3 }
 0x26b   :  { %7191 = vmatmul.msk.f32.gmra.mxu0 %vm18361_vm8, %v2941_v14  ;;  %vm10386_vm0 = vmor %vm10305_vm3, %vm18364_vm1  ;;  %v2421_v14 = vsel %vm18368_vm14, 1, %v17671_v61  ;;  %vm915_vm3 = vcmp.eq.s32.totalorder %v10260_v47, 21  ;;  %vm18387_vm1 = vcmp.eq.s32.totalorder %v9961_v5, 13  ;;  %v247_v22 = vadd.f32 %v10189_v35, %v8003_v34 }
 0x26c   :  { %v18366_v24 = vsel %vm10386_vm0, 4294967295, %v18365_v24  ;;  %vm1038_vm8 = vmor %vm10320_vm15, %vm18367_vm12  ;;  %vm18373_vm12 = vmmov 1   ;;  %vm18381_vm15 = vnez %v18313_v19  ;;  %vm18395_vm0 = vnez %v18328_v49  ;;  %18428 = vst [vmem:[#allocation84_spill] sm:$0xff] %v10550_v28 }
 0x26d   :  { %vm10402_vm10 = vmor %vm10344_vm11, %vm18369_vm2  ;;  %vm18378_vm2 = vcmp.eq.s32.totalorder %v10260_v47, 14  ;;  %v10552_v19 = vmax.f32 %v244_v33, 0.0  ;;  %v18437_v33 = vmov 0  ;;  %v18474_v60 = vmov 0 }
 0x26e   :  { %vm10414_vm14 = vmxor %vm18374_vm4, %vm18373_vm12 }
 0x26f   :  { %v18376_v37 = vsel %vm10414_vm14, 4294967295, %v18375_v37  ;;  %vm10422_vm11 = vmor %vm10367_vm6, %vm18378_vm2  ;;  %vm580_vm2 = vcmp.eq.s32.totalorder %v10372_v6, 7  ;;  %vm18392_vm6 = vcmp.ge.s32.totalorder %v9721_v53, 7  ;;  %18429 = vst [vmem:[#allocation85_spill] sm:$0xff] %v10552_v19 }
 0x270   :  { %18377 = vst [vmem:[#allocation82_spill] sm:$0xff] %v18376_v37  ;;  %vm10430_vm5 = vmxor %vm18381_vm15, %vm18373_vm12  ;;  %vm18388_vm15 = vcmp.eq.s32.totalorder %v9961_v5, 6 }
 0x271   :  { %v18383_v3 = vsel %vm10430_vm5, 4294967295, %v18382_v3  ;;  %vm10434_vm4 = vmor %vm1038_vm8, %vm1164_vm7  ;;  %vm18391_vm8 = vnez %v18324_v11  ;;  %vm18403_vm7 = vcmp.eq.s32.totalorder %v10372_v6, 0 }
 0x272   :  { %18384 = vst [vmem:[#allocation83_spill] sm:$0xff] %v18383_v3  ;;  %vm10446_vm12 = vmor %vm18388_vm15, %vm18387_vm1  ;;  %vm18406_vm15 = vcmask 261120  }
 0x273   :  { %vm10455_vm5 = vmand %vm18392_vm6, %vm18391_vm8  ;;  %vm18401_vm6 = vcmp.ge.s32.totalorder %v9283_v63, 7  ;;  %vm18408_vm8 = vcmp.eq.s32.totalorder %v2421_v14, 1 }
 0x274   :  { %v18394_v25 = vsel %vm10455_vm5, 4294967295, %v18393_v25  ;;  %vm10463_vm14 = vmand %vm18396_vm13, %vm18395_vm0  ;;  %v1752_v49 = vsel %vm18401_vm6, %v10408_v59, 0.0  ;;  %vm18402_vm13 = vcmp.eq.s32.totalorder %v1539_v29, 1  ;;  %v2505_v32 = vsel %vm18408_vm8, %v10408_v59, 0.0 }
 0x275   :  { %v18398_v30 = vsel %vm10463_vm14, 4294967295, %v18397_v30  ;;  %vm10469_vm1 = vmor %vm10422_vm11, %vm915_vm3  ;;  %v1623_v17 = vsel %vm18402_vm13, %v10408_v59, 0.0  ;;  %vm748_vm11 = vcmp.eq.s32.totalorder %v10372_v6, 14  ;;  %7064 = vmatmul.msk.f32.gmra.mxu1 %vm18406_vm15, %v1752_v49  ;;  %vm18409_vm6 = vcmp.eq.s32.totalorder %v2858_v62, 1 }
 0x276   :  { %vm10484_vm3 = vmor %vm18403_vm7, %vm580_vm2  ;;  %v2942_v63 = vsel %vm18409_vm6, %v10408_v59, 0.0  ;;  %vm18410_vm13 = vcmp.eq.s32.totalorder %v10133_v21, 35  ;;  %v18411_v29 = vmov 0  ;;  %vm18413_vm7 = vcmp.eq.s32.totalorder %v9843_v43, 41 }
 0x277   :  { %vm18407_vm0 = vmmov %vm18406_vm15  ;;  %vm18419_vm6 = vcmask 261120   ;;  %v1540_v62 = vsel %vm10315_vm9, 1, %v17671_v61  ;;  %vm18436_vm5 = vnez %v18366_v24  ;;  %v414_v24 = vadd.s32 184, %v8116_v9 }
 0x278   :  { %7107 = vmatmul.msk.f32.gmra.mxu2 %vm18407_vm0, %v1623_v17  ;;  %vm10499_vm2 = vmor %vm10402_vm10, %vm18410_vm13  ;;  %v18414_v17 = vmov 0  ;;  %vm18416_vm0 = vcmp.eq.s32.totalorder %v9961_v5, 20  ;;  %7151 = vmatmul.msk.f32.gmra.mxu3 %vm18419_vm6, %v2505_v32  ;;  %vm18430_vm10 = vmmov 1   ;;  %v10686_v32 = vmax.f32 %v247_v22, 0.0 }
 0x279   :  { %v18412_v29 = vsel %vm10499_vm2, 4294967295, %v18411_v29  ;;  %vm10507_vm15 = vmor %vm10434_vm4, %vm18413_vm7  ;;  %vm18421_vm4 = vnez %v17894_v1  ;;  %vm18422_vm7 = vcmp.eq.s32.totalorder %v10260_v47, 28  ;;  %vm1582_vm2 = vcmp.eq.s32.totalorder %v1540_v62, 1 }
 0x27a   :  { %v18415_v17 = vsel %vm10507_vm15, 4294967295, %v18414_v17  ;;  %vm10515_vm8 = vmor %vm10446_vm12, %vm18416_vm0  ;;  %v2859_v14 = vsel %vm18421_vm4, 1, %v17671_v61  ;;  %vm536_vm0 = vcmp.eq.s32.totalorder %v10133_v21, 6  ;;  %vm18431_vm4 = vnez %v18355_v41  ;;  %18482 = vst [vmem:[#allocation89_spill] sm:$0xff] %v10686_v32 }
 0x27b   :  { %vm18420_vm13 = vmmov %vm18419_vm6  ;;  %vm662_vm6 = vcmp.eq.s32.totalorder %v10133_v21, 13  ;;  %vm1165_vm15 = vcmp.eq.s32.totalorder %v9961_v5, 34  ;;  %vm2901_vm14 = vcmp.eq.s32.totalorder %v2859_v14, 1  ;;  %v1624_v49 = vsel %vm1582_vm2, %v10552_v19, 0.0 }
 0x27c   :  { %7192 = vmatmul.msk.f32.gmra.mxu0 %vm18420_vm13, %v2942_v63  ;;  %vm10532_vm12 = vmor %vm10469_vm1, %vm18422_vm7  ;;  %vm18425_vm13 = vnez %v18345_v2  ;;  %vm916_vm1 = vcmp.eq.s32.totalorder %v10372_v6, 21  ;;  %v18432_v2 = vmov 0  ;;  %v2943_v57 = vsel %vm2901_vm14, %v10552_v19, 0.0 }
 0x27d   :  { %v18424_v10 = vsel %vm10532_vm12, 4294967295, %v18423_v10  ;;  %v2422_v63 = vsel %vm18425_vm13, 1, %v17671_v61  ;;  %vm10545_vm9 = vmor %vm10484_vm3, %vm748_vm11  ;;  %vm18435_vm3 = vcmp.eq.s32.totalorder %v9961_v5, 27  ;;  %v18453_v1 = vmov 0 }
 0x27e   :  { %vm10558_vm13 = vmxor %vm18431_vm4, %vm18430_vm10  ;;  %v18464_v41 = vmov 0  ;;  %vm18466_vm2 = vcmp.eq.s32.totalorder %v10372_v6, 28 }
 0x27f   :  { %v18433_v2 = vsel %vm10558_vm13, 4294967295, %v18432_v2  ;;  %vm1039_vm11 = vmor %vm10515_vm8, %vm18435_vm3  ;;  %vm18450_vm13 = vcmp.ge.s32.totalorder %v9416_v8, 7  ;;  %v18488_v8 = vmov 0 }
 0x280   :  { %18434 = vst [vmem:[#allocation86_spill] sm:$0xff] %v18433_v2  ;;  %vm10570_vm7 = vmxor %vm18436_vm5, %vm18430_vm10  ;;  %v1753_v34 = vsel %vm18450_vm13, %v10552_v19, 0.0  ;;  %vm18458_vm13 = vcmask 261120  }
 0x281   :  { %v18438_v33 = vsel %vm10570_vm7, 4294967295, %v18437_v33  ;;  %vm10574_vm4 = vmor %vm536_vm0, %vm662_vm6  ;;  %vm18444_vm0 = vnez %v18376_v37  ;;  %vm18445_vm6 = vcmp.ge.s32.totalorder %v9843_v43, 7  ;;  %7065 = vmatmul.msk.f32.gmra.mxu1 %vm18458_vm13, %v1753_v34  ;;  %v18467_v34 = vmov 0 }
 0x282   :  { %18439 = vst [vmem:[#allocation87_spill] sm:$0xff] %v18438_v33  ;;  %vm10582_vm3 = vmor %vm10545_vm9, %vm916_vm1  ;;  %vm18455_vm1 = vcmp.eq.s32.totalorder %v10133_v21, 20  ;;  %vm18460_vm9 = vcmp.eq.s32.totalorder %v2422_v63, 1 }
 0x283   :  { %vm10594_vm12 = vmand %vm18445_vm6, %vm18444_vm0  ;;  %v2506_v62 = vsel %vm18460_vm9, %v10552_v19, 0.0 }
 0x284   :  { %v18447_v31 = vsel %vm10594_vm12, 4294967295, %v18446_v31  ;;  %vm10598_vm8 = vmor %vm1039_vm11, %vm1165_vm15  ;;  %vm18451_vm15 = vnez %v18383_v3  ;;  %vm18452_vm11 = vcmp.ge.s32.totalorder %v9540_v45, 7  ;;  %v18595_v3 = vmov 0 }
 0x285   :  { %vm10616_vm6 = vmand %vm18452_vm11, %vm18451_vm15  ;;  %vm18461_vm11 = vnez %v17946_v4  ;;  %vm18462_vm15 = vcmp.eq.s32.totalorder %v10260_v47, 35  ;;  %v18599_v4 = vmov 0 }
 0x286   :  { %v18454_v1 = vsel %vm10616_vm6, 4294967295, %v18453_v1  ;;  %vm10624_vm5 = vmor %vm10574_vm4, %vm18455_vm1  ;;  %v2860_v14 = vsel %vm18461_vm11, 1, %v17671_v61  ;;  %vm18463_vm4 = vnez %v18424_v10 }
 0x287   :  { %vm18459_vm14 = vmmov %vm18458_vm13 }
 0x288   :  { %7108 = vmatmul.msk.f32.gmra.mxu2 %vm18459_vm14, %v1624_v49  ;;  %vm10640_vm1 = vmor %vm18463_vm4, %vm18462_vm15  ;;  %vm18471_vm15 = vnez %v18394_v25  ;;  %vm18472_vm4 = vnez %v18398_v30  ;;  %v10675_v25 = vshra.s32 %v414_v24, 3  ;;  %v18484_v24 = vmov 0 }
 0x289   :  { %v18465_v41 = vsel %vm10640_vm1, 4294967295, %v18464_v41  ;;  %vm10648_vm13 = vmor %vm10582_vm3, %vm18466_vm2  ;;  %v1541_v10 = vsel %vm18471_vm15, 1, %v17671_v61  ;;  %v2423_v63 = vsel %vm18472_vm4, 1, %v17671_v61  ;;  %vm18473_vm3 = vcmp.eq.s32.totalorder %v9961_v5, 41 }
 0x28a   :  { %v18468_v34 = vsel %vm10648_vm13, 4294967295, %v18467_v34  ;;  %vm18469_vm11 = vmmov %vm18459_vm14  ;;  %vm749_vm14 = vcmp.eq.s32.totalorder %v10550_v28, 14  ;;  %18478 = vst [vmem:[#allocation88_spill] sm:$0xff] %v10675_v25  ;;  %vm18479_vm15 = vcmp.eq.s32.totalorder %v10133_v21, 27  ;;  %vm18491_vm1 = vcmp.eq.s32.totalorder %v10260_v47, 13 }
 0x28b   :  { %7152 = vmatmul.msk.f32.gmra.mxu3 %vm18469_vm11, %v2506_v62  ;;  %vm18470_vm0 = vmmov %vm18469_vm11  ;;  %vm18476_vm11 = vcmp.eq.s32.totalorder %v10550_v28, 7  ;;  %vm1583_vm12 = vcmp.eq.s32.totalorder %v1541_v10, 1  ;;  %vm18498_vm13 = vcmp.ge.s32.totalorder %v9961_v5, 7  ;;  %v250_v62 = vadd.f32 %v10189_v35, %v8009_v36 }
 0x28c   :  { %7193 = vmatmul.msk.f32.gmra.mxu0 %vm18470_vm0, %v2943_v57  ;;  %vm10666_vm2 = vmor %vm10598_vm8, %vm18473_vm3  ;;  %vm18477_vm0 = vcmp.eq.s32.totalorder %v10550_v28, 0  ;;  %vm1166_vm8 = vcmp.eq.s32.totalorder %v10133_v21, 34  ;;  %vm18492_vm3 = vcmp.eq.s32.totalorder %v10260_v47, 6  ;;  %v1625_v30 = vsel %vm1583_vm12, %v10686_v32, 0.0  ;;  %v10823_v57 = vpop.f32.mrf.mxu2 }
 0x28d   :  { %v18475_v60 = vsel %vm10666_vm2, 4294967295, %v18474_v60  ;;  %vm623_vm9 = vmor %vm18477_vm0, %vm18476_vm11  ;;  %vm18483_vm11 = vnez %v18412_v29  ;;  %vm831_vm2 = vcmp.eq.s32.totalorder %v10260_v47, 20  ;;  %vm18511_vm12 = vcmp.eq.s32.totalorder %v2423_v63, 1 }
 0x28e   :  { %vm10681_vm4 = vmor %vm10624_vm5, %vm18479_vm15  ;;  %vm18487_vm5 = vnez %v18415_v17  ;;  %v415_v17 = vadd.s32 192, %v8116_v9  ;;  %v2507_v36 = vsel %vm18511_vm12, %v10686_v32, 0.0  ;;  %v18515_v29 = vmov 0 }
 0x28f   :  { %vm10692_vm0 = vmxor %vm18483_vm11, %vm18430_vm10  ;;  %vm18521_vm12 = vcmp.eq.s32.totalorder %v10675_v25, 0 }
 0x290   :  { %v18485_v24 = vsel %vm10692_vm0, 4294967295, %v18484_v24  ;;  %vm10699_vm15 = vmxor %vm18487_vm5, %vm18430_vm10  ;;  %vm917_vm0 = vcmp.eq.s32.totalorder %v10550_v28, 21 }
 0x291   :  { %18486 = vst [vmem:[#allocation90_spill] sm:$0xff] %v18485_v24  ;;  %v18489_v8 = vsel %vm10699_vm15, 4294967295, %v18488_v8  ;;  %vm705_vm6 = vmor %vm18492_vm3, %vm18491_vm1  ;;  %vm18514_vm1 = vnez %v18468_v34  ;;  %v10789_v34 = vshra.s32 %v415_v17, 3  ;;  %v10821_v17 = vmax.f32 %v250_v62, 0.0 }
 0x292   :  { %18490 = vst [vmem:[#allocation91_spill] sm:$0xff] %v18489_v8  ;;  %vm10708_vm11 = vmor %vm623_vm9, %vm749_vm14  ;;  %vm18497_vm14 = vnez %v18433_v2  ;;  %vm18513_vm9 = vcmp.eq.s32.totalorder %v10372_v6, 35  ;;  %v18673_v62 = vmov 0 }
 0x293   :  { %vm10717_vm15 = vmor %vm10681_vm4, %vm1166_vm8  ;;  %vm18503_vm8 = vcmp.ge.s32.totalorder %v9540_v45, 7  ;;  %vm18509_vm4 = vcmask 261120   ;;  %18524 = vst [vmem:[#allocation92_spill] sm:$0xff] %v10789_v34 }
 0x294   :  { %vm10728_vm10 = vmand %vm18498_vm13, %vm18497_vm14  ;;  %v1754_v10 = vsel %vm18503_vm8, %v10686_v32, 0.0  ;;  %vm18504_vm13 = vcmp.ge.s32.totalorder %v9721_v53, 7  ;;  %18536 = vst [vmem:[#allocation93_spill] sm:$0xff] %v10821_v17 }
 0x295   :  { %vm10732_vm5 = vmor %vm705_vm6, %vm831_vm2  ;;  %7066 = vmatmul.msk.f32.gmra.mxu1 %vm18509_vm4, %v1754_v10  ;;  %v18518_v10 = vmov 0 }
 0x296   :  { %vm10747_vm3 = vmand %vm18504_vm13, %vm10570_vm7  ;;  %vm18512_vm13 = vcmp.eq.s32.totalorder %v2860_v14, 1  ;;  %vm18551_vm7 = vcmp.eq.s32.totalorder %v10372_v6, 13  ;;  %v18557_v14 = vmov 0 }
 0x297   :  { %vm10753_vm6 = vmor %vm10708_vm11, %vm917_vm0  ;;  %v2944_v45 = vsel %vm18512_vm13, %v10686_v32, 0.0  ;;  %vm18517_vm11 = vcmp.eq.s32.totalorder %v10133_v21, 41  ;;  %v2425_v49 = vsel %vm10747_vm3, 1, %v17671_v61 }
 0x298   :  { %vm18510_vm8 = vmmov %vm18509_vm4 }
 0x299   :  { %7109 = vmatmul.msk.f32.gmra.mxu2 %vm18510_vm8, %v1625_v30  ;;  %vm10768_vm0 = vmor %vm18514_vm1, %vm18513_vm9  ;;  %vm18520_vm8 = vcmp.eq.s32.totalorder %v10675_v25, 7  ;;  %vm18525_vm9 = vcmask 261120   ;;  %v18561_v30 = vmov 0 }
 0x29a   :  { %v18516_v29 = vsel %vm10768_vm0, 4294967295, %v18515_v29  ;;  %vm10776_vm4 = vmor %vm10717_vm15, %vm18517_vm11  ;;  %7153 = vmatmul.msk.f32.gmra.mxu3 %vm18525_vm9, %v2507_v36  ;;  %vm18527_vm15 = vnez %v18447_v31  ;;  %vm18528_vm11 = vnez %v18000_v7  ;;  %v10857_v36 = vpop.f32.mrf.mxu1  ;;  %v416_v7 = vadd.s32 200, %v8116_v9 }
 0x29b   :  { %v18519_v10 = vsel %vm10776_vm4, 4294967295, %v18518_v10  ;;  %vm10784_vm13 = vmor %vm18521_vm12, %vm18520_vm8  ;;  %v1542_v63 = vsel %vm18527_vm15, 1, %v17671_v61  ;;  %v2861_v22 = vsel %vm18528_vm11, 1, %v17671_v61  ;;  %vm18529_vm8 = vcmp.eq.s32.totalorder %v10260_v47, 27 }
 0x29c   :  { %vm18526_vm2 = vmmov %vm18525_vm9  ;;  %vm1167_vm9 = vcmp.eq.s32.totalorder %v10260_v47, 34  ;;  %vm18533_vm15 = vcmp.eq.s32.totalorder %v10550_v28, 28  ;;  %vm18537_vm11 = vmmov 1   ;;  %v10973_v33 = vshra.s32 %v416_v7, 3 }
 0x29d   :  { %7194 = vmatmul.msk.f32.gmra.mxu0 %vm18526_vm2, %v2944_v45  ;;  %vm10803_vm12 = vmor %vm10732_vm5, %vm18529_vm8  ;;  %vm18532_vm2 = vnez %v18454_v1  ;;  %v18539_v1 = vmov 0  ;;  %vm18545_vm8 = vnez %v18475_v60  ;;  %vm18560_vm5 = vcmp.ge.s32.totalorder %v9843_v43, 7 }
 0x29e   :  { %v2424_v45 = vsel %vm18532_vm2, 1, %v17671_v61  ;;  %vm10815_vm1 = vmor %vm10753_vm6, %vm18533_vm15  ;;  %vm18538_vm2 = vnez %v18465_v41  ;;  %vm18542_vm6 = vcmp.eq.s32.totalorder %v10675_v25, 14  ;;  %v18546_v41 = vmov 0  ;;  %18593 = vst [vmem:[#allocation96_spill] sm:$0xff] %v10973_v33 }
 0x29f   :  { %vm10829_vm14 = vmxor %vm18538_vm2, %vm18537_vm11  ;;  %vm18594_vm3 = vnez %v18516_v29  ;;  %v18627_v7 = vmov 0  ;;  %v7228_v29 = vld [vmem:[%s17061_s3 + $0x88] sm:$0xff] }
 0x2a0   :  { %v18540_v1 = vsel %vm10829_vm14, 4294967295, %v18539_v1  ;;  %vm10837_vm15 = vmor %vm10784_vm13, %vm18542_vm6  ;;  %vm18556_vm13 = vcmp.ge.s32.totalorder %v10133_v21, 7  ;;  %3438 = vmatpush.msrb.mxu1 %v7228_v29 }
 0x2a1   :  { %18541 = vst [vmem:[#allocation94_spill] sm:$0xff] %v18540_v1  ;;  %vm10845_vm0 = vmxor %vm18545_vm8, %vm18537_vm11  ;;  %vm18559_vm8 = vnez %v18489_v8  ;;  %v253_v8 = vadd.f32 %v10189_v35, %v8015_v38 }
 0x2a2   :  { %v18547_v41 = vsel %vm10845_vm0, 4294967295, %v18546_v41  ;;  %vm10851_vm2 = vmor %vm10803_vm12, %vm1167_vm9  ;;  %vm18552_vm0 = vcmp.eq.s32.totalorder %v10372_v6, 6  ;;  %vm18555_vm9 = vnez %v18485_v24  ;;  %vm18567_vm12 = vcmp.eq.s32.totalorder %v1542_v63, 1 }
 0x2a3   :  { %18548 = vst [vmem:[#allocation95_spill] sm:$0xff] %v18547_v41  ;;  %vm10865_vm14 = vmor %vm18552_vm0, %vm18551_vm7  ;;  %vm18563_vm7 = vcmp.eq.s32.totalorder %v10675_v25, 21  ;;  %v1626_v32 = vsel %vm18567_vm12, %v10821_v17, 0.0  ;;  %vm18576_vm12 = vcmp.eq.s32.totalorder %v10550_v28, 35  ;;  %v10975_v60 = vmax.f32 %v253_v8, 0.0  ;;  %v11006_v8 = vpop.f32.mrf.mxu1 }
 0x2a4   :  { %vm10874_vm6 = vmand %vm18556_vm13, %vm18555_vm9  ;;  %vm751_vm13 = vcmp.eq.s32.totalorder %v10789_v34, 14  ;;  %vm18572_vm9 = vcmask 261120  }
 0x2a5   :  { %v18558_v14 = vsel %vm10874_vm6, 4294967295, %v18557_v14  ;;  %vm10882_vm4 = vmand %vm18560_vm5, %vm18559_vm8  ;;  %vm18566_vm5 = vcmp.ge.s32.totalorder %v9721_v53, 7  ;;  %vm18568_vm8 = vcmp.eq.s32.totalorder %v10789_v34, 7  ;;  %vm18574_vm6 = vcmp.eq.s32.totalorder %v2424_v45, 1 }
 0x2a6   :  { %v18562_v30 = vsel %vm10882_vm4, 4294967295, %v18561_v30  ;;  %vm10890_vm0 = vmor %vm10837_vm15, %vm18563_vm7  ;;  %v1755_v12 = vsel %vm18566_vm5, %v10821_v17, 0.0  ;;  %vm18569_vm15 = vcmp.eq.s32.totalorder %v10789_v34, 0  ;;  %v2508_v38 = vsel %vm18574_vm6, %v10821_v17, 0.0 }
 0x2a7   :  { %vm10907_vm7 = vmor %vm18569_vm15, %vm18568_vm8  ;;  %7067 = vmatmul.msk.f32.gmra.mxu1 %vm18572_vm9, %v1755_v12  ;;  %vm18575_vm5 = vcmp.eq.s32.totalorder %v2861_v22, 1  ;;  %v18577_v53 = vmov 0  ;;  %vm18579_vm15 = vcmp.eq.s32.totalorder %v10260_v47, 41  ;;  %v18580_v12 = vmov 0 }
 0x2a8   :  { %vm18573_vm4 = vmmov %vm18572_vm9  ;;  %v2945_v63 = vsel %vm18575_vm5, %v10821_v17, 0.0  ;;  %vm18585_vm5 = vcmask 261120   ;;  %v1543_v22 = vsel %vm10728_vm10, 1, %v17671_v61 }
 0x2a9   :  { %7110 = vmatmul.msk.f32.gmra.mxu2 %vm18573_vm4, %v1626_v32  ;;  %vm10922_vm8 = vmor %vm10815_vm1, %vm18576_vm12  ;;  %vm18582_vm4 = vcmp.eq.s32.totalorder %v10372_v6, 20  ;;  %vm1000_vm1 = vcmp.eq.s32.totalorder %v10372_v6, 27  ;;  %7154 = vmatmul.msk.f32.gmra.mxu3 %vm18585_vm5, %v2508_v38  ;;  %v10977_v38 = vpop.f32.mrf.mxu2 }
 0x2aa   :  { %v18578_v53 = vsel %vm10922_vm8, 4294967295, %v18577_v53  ;;  %vm10930_vm9 = vmor %vm10851_vm2, %vm18579_vm15  ;;  %vm18587_vm2 = vnez %v18058_v0  ;;  %vm18588_vm15 = vcmp.eq.s32.totalorder %v10675_v25, 28  ;;  %vm18605_vm8 = vcmp.eq.s32.totalorder %v10789_v34, 21 }
 0x2ab   :  { %v18581_v12 = vsel %vm10930_vm9, 4294967295, %v18580_v12  ;;  %vm10938_vm6 = vmor %vm10865_vm14, %vm18582_vm4  ;;  %v2862_v45 = vsel %vm18587_vm2, 1, %v17671_v61  ;;  %vm1585_vm4 = vcmp.eq.s32.totalorder %v1543_v22, 1  ;;  %v11166_v29 = vpop.f32.mrf.mxu1 }
 0x2ac   :  { %vm18586_vm12 = vmmov %vm18585_vm5  ;;  %vm665_vm5 = vcmp.eq.s32.totalorder %v10550_v28, 13  ;;  %vm2904_vm2 = vcmp.eq.s32.totalorder %v2862_v45, 1  ;;  %v1627_v0 = vsel %vm1585_vm4, %v10975_v60, 0.0 }
 0x2ad   :  { %7195 = vmatmul.msk.f32.gmra.mxu0 %vm18586_vm12, %v2945_v63  ;;  %vm10955_vm14 = vmor %vm10890_vm0, %vm18588_vm15  ;;  %vm1168_vm12 = vcmp.eq.s32.totalorder %v10372_v6, 34  ;;  %v256_v63 = vadd.f32 %v10189_v35, %v8021_v40  ;;  %v2946_v17 = vsel %vm2904_vm2, %v10975_v60, 0.0 }
 0x2ae   :  { %vm10968_vm10 = vmor %vm10907_vm7, %vm751_vm13  ;;  %vm18598_vm13 = vnez %v18519_v10  ;;  %v417_v10 = vadd.s32 208, %v8116_v9 }
 0x2af   :  { %vm10983_vm15 = vmxor %vm18594_vm3, %vm18537_vm11  ;;  %vm18602_vm3 = vcmp.eq.s32.totalorder %v10550_v28, 6 }
 0x2b0   :  { %v18596_v3 = vsel %vm10983_vm15, 4294967295, %v18595_v3  ;;  %vm10990_vm7 = vmxor %vm18598_vm13, %vm18537_vm11  ;;  %vm18614_vm13 = vcmp.ge.s32.totalorder %v9843_v43, 7  ;;  %v18653_v43 = vmov 0 }
 0x2b1   :  { %18597 = vst [vmem:[#allocation97_spill] sm:$0xff] %v18596_v3  ;;  %v18600_v4 = vsel %vm10990_vm7, 4294967295, %v18599_v4  ;;  %vm1042_vm0 = vmor %vm10938_vm6, %vm1000_vm1  ;;  %v1756_v40 = vsel %vm18614_vm13, %v10975_v60, 0.0  ;;  %vm18622_vm13 = vcmask 261120  }
 0x2b2   :  { %18601 = vst [vmem:[#allocation98_spill] sm:$0xff] %v18600_v4  ;;  %vm11001_vm9 = vmor %vm18602_vm3, %vm665_vm5  ;;  %vm18608_vm5 = vnez %v18540_v1  ;;  %vm18609_vm3 = vcmp.ge.s32.totalorder %v10260_v47, 7  ;;  %7068 = vmatmul.msk.f32.gmra.mxu1 %vm18622_vm13, %v1756_v40  ;;  %v18637_v40 = vmov 0 }
 0x2b3   :  { %vm11013_vm6 = vmor %vm10968_vm10, %vm18605_vm8  ;;  %vm18619_vm10 = vcmp.eq.s32.totalorder %v10550_v28, 20  ;;  %vm18624_vm8 = vcmp.eq.s32.totalorder %v2425_v49, 1 }
 0x2b4   :  { %vm11025_vm15 = vmand %vm18609_vm3, %vm18608_vm5  ;;  %v2509_v22 = vsel %vm18624_vm8, %v10975_v60, 0.0  ;;  %vm18648_vm8 = vnez %v18578_v53  ;;  %v2683_v53 = vpop.f32.mrf.mxu3 }
 0x2b5   :  { %vm11029_vm7 = vmor %vm1042_vm0, %vm1168_vm12  ;;  %vm18615_vm0 = vnez %v18547_v41  ;;  %vm18616_vm12 = vcmp.ge.s32.totalorder %v9961_v5, 7  ;;  %v11128_v41 = vpop.f32.mrf.mxu2 }
 0x2b6   :  { %vm11047_vm3 = vmand %vm18616_vm12, %vm18615_vm0  ;;  %vm18625_vm12 = vnez %v18111_v16  ;;  %vm18626_vm0 = vcmp.eq.s32.totalorder %v10675_v25, 35 }
 0x2b7   :  { %vm11055_vm1 = vmor %vm11001_vm9, %vm18619_vm10  ;;  %v2863_v45 = vsel %vm18625_vm12, 1, %v17671_v61  ;;  %vm18629_vm10 = vcmp.eq.s32.totalorder %v10789_v34, 28  ;;  %v2427_v32 = vsel %vm11047_vm3, 1, %v17671_v61 }
 0x2b8   :  { %vm18623_vm2 = vmmov %vm18622_vm13 }
 0x2b9   :  { %7111 = vmatmul.msk.f32.gmra.mxu2 %vm18623_vm2, %v1627_v0  ;;  %vm11071_vm9 = vmor %vm10955_vm14, %vm18626_vm0  ;;  %vm18634_vm14 = vnez %v18558_v14  ;;  %vm18635_vm0 = vnez %v18562_v30  ;;  %v11113_v14 = vshra.s32 %v417_v10, 3  ;;  %v11115_v30 = vmax.f32 %v256_v63, 0.0 }
 0x2ba   :  { %v18628_v7 = vsel %vm11071_vm9, 4294967295, %v18627_v7  ;;  %vm11079_vm13 = vmor %vm11013_vm6, %vm18629_vm10  ;;  %v1544_v31 = vsel %vm18634_vm14, 1, %v17671_v61  ;;  %v2426_v49 = vsel %vm18635_vm0, 1, %v17671_v61  ;;  %vm18636_vm6 = vcmp.eq.s32.totalorder %v10372_v6, 41 }
 0x2bb   :  { %vm18632_vm4 = vmmov %vm18623_vm2  ;;  %18643 = vst [vmem:[#allocation99_spill] sm:$0xff] %v11113_v14  ;;  %v18649_v10 = vmov 0  ;;  %vm18668_vm0 = vcmp.ge.s32.totalorder %v10372_v6, 7  ;;  %vm18672_vm9 = vcmp.ge.s32.totalorder %v10133_v21, 7  ;;  %v1545_v0 = vsel %vm11025_vm15, 1, %v17671_v61 }
 0x2bc   :  { %7155 = vmatmul.msk.f32.gmra.mxu3 %vm18632_vm4, %v2509_v22  ;;  %vm18633_vm12 = vmmov %vm18623_vm2  ;;  %vm18639_vm4 = vcmp.eq.s32.totalorder %v10973_v33, 7  ;;  %18644 = vst [vmem:[#allocation100_spill] sm:$0xff] %v11115_v30  ;;  %v2200_v22 = vadd.f32 %v10823_v57, %v10857_v36 }
 0x2bd   :  { %7196 = vmatmul.msk.f32.gmra.mxu0 %vm18633_vm12, %v2946_v17  ;;  %vm11100_vm10 = vmor %vm11029_vm7, %vm18636_vm6  ;;  %vm18640_vm12 = vcmp.eq.s32.totalorder %v10973_v33, 0  ;;  %vm18645_vm7 = vcmp.eq.s32.totalorder %v10550_v28, 27  ;;  %v18840_v17 = vmov 0 }
 0x2be   :  { %v18638_v40 = vsel %vm11100_vm10, 4294967295, %v18637_v40  ;;  %vm11108_vm14 = vmor %vm18640_vm12, %vm18639_vm4  ;;  %vm18656_vm4 = vcmp.eq.s32.totalorder %v10675_v25, 13  ;;  %vm18657_vm12 = vcmp.eq.s32.totalorder %v10675_v25, 6  ;;  %vm18660_vm10 = vcmp.eq.s32.totalorder %v10973_v33, 14 }
 0x2bf   :  { %vm11121_vm6 = vmor %vm11055_vm1, %vm18645_vm7  ;;  %vm18652_vm1 = vnez %v18581_v12  ;;  %v418_v12 = vadd.s32 216, %v8116_v9  ;;  %v11164_v63 = vadd.f32 %v2683_v53, %v2200_v22  ;;  %vm18713_vm15 = vnez %v18638_v40 }
 0x2c0   :  { %vm11134_vm2 = vmxor %vm18648_vm8, %vm18537_vm11  ;;  %v2206_v40 = vadd.f32 %v11128_v41, %v11166_v29  ;;  %v18885_v29 = vmov 0 }
 0x2c1   :  { %v18650_v10 = vsel %vm11134_vm2, 4294967295, %v18649_v10  ;;  %vm11141_vm7 = vmxor %vm18652_vm1, %vm18537_vm11  ;;  %18663 = vst [vmem:[#allocation103_spill] sm:$0xff] %v11164_v63 }
 0x2c2   :  { %18651 = vst [vmem:[#allocation101_spill] sm:$0xff] %v18650_v10  ;;  %v18654_v43 = vsel %vm11141_vm7, 4294967295, %v18653_v43  ;;  %vm11149_vm5 = vmor %vm18657_vm12, %vm18656_vm4  ;;  %vm18664_vm12 = vcmp.eq.s32.totalorder %v10550_v28, 34  ;;  %vm18667_vm7 = vnez %v18596_v3  ;;  %vm18671_vm4 = vnez %v18600_v4 }
 0x2c3   :  { %18655 = vst [vmem:[#allocation102_spill] sm:$0xff] %v18654_v43  ;;  %vm11158_vm1 = vmor %vm11108_vm14, %vm18660_vm10  ;;  %vm18675_vm10 = vcmp.eq.s32.totalorder %v10675_v25, 20  ;;  %v259_v4 = vadd.f32 %v10189_v35, %v8027_v42  ;;  %vm18729_vm3 = vnez %v18654_v43  ;;  %v419_v43 = vadd.s32 224, %v8116_v9 }
 0x2c4   :  { %vm11173_vm2 = vmor %vm11121_vm6, %vm18664_vm12  ;;  %vm18680_vm12 = vcmp.eq.s32.totalorder %v10973_v33, 21 }
 0x2c5   :  { %vm11183_vm8 = vmand %vm18668_vm0, %vm18667_vm7  ;;  %vm18683_vm0 = vcmask 261120   ;;  %v11284_v53 = vmax.f32 %v259_v4, 0.0  ;;  %v18766_v4 = vmov 0 }
 0x2c6   :  { %vm11191_vm6 = vmand %vm18672_vm9, %vm18671_vm4  ;;  %vm18678_vm9 = vcmp.ge.s32.totalorder %v9961_v5, 7  ;;  %vm18679_vm4 = vcmp.eq.s32.totalorder %v1544_v31, 1  ;;  %v262_v5 = vadd.f32 %v10189_v35, %v8033_v44 }
 0x2c7   :  { %v18674_v62 = vsel %vm11191_vm6, 4294967295, %v18673_v62  ;;  %vm11200_vm14 = vmor %vm11149_vm5, %vm18675_vm10  ;;  %v1757_v63 = vsel %vm18678_vm9, %v11115_v30, 0.0  ;;  %v1628_v16 = vsel %vm18679_vm4, %v11115_v30, 0.0  ;;  %vm18685_vm6 = vcmp.eq.s32.totalorder %v2426_v49, 1 }
 0x2c8   :  { %vm11216_vm5 = vmor %vm11158_vm1, %vm18680_vm12  ;;  %7069 = vmatmul.msk.f32.gmra.mxu1 %vm18683_vm0, %v1757_v63  ;;  %v2510_v42 = vsel %vm18685_vm6, %v11115_v30, 0.0  ;;  %vm18686_vm9 = vcmp.eq.s32.totalorder %v2863_v45, 1  ;;  %vm18687_vm4 = vcmp.eq.s32.totalorder %v10789_v34, 35  ;;  %vm18690_vm12 = vcmp.eq.s32.totalorder %v11113_v14, 7 }
 0x2c9   :  { %vm18684_vm7 = vmmov %vm18683_vm0  ;;  %v2947_v31 = vsel %vm18686_vm9, %v11115_v30, 0.0  ;;  %vm18691_vm0 = vcmp.eq.s32.totalorder %v11113_v14, 0  ;;  %v11244_v45 = vshra.s32 %v418_v12, 3  ;;  %vm18695_vm6 = vcmask 261120  }
 0x2ca   :  { %7112 = vmatmul.msk.f32.gmra.mxu2 %vm18684_vm7, %v1628_v16  ;;  %vm11231_vm1 = vmor %vm11079_vm13, %vm18687_vm4  ;;  %vm753_vm7 = vcmp.eq.s32.totalorder %v11113_v14, 14  ;;  %7156 = vmatmul.msk.f32.gmra.mxu3 %vm18695_vm6, %v2510_v42  ;;  %vm18697_vm13 = vnez %v18163_v55  ;;  %vm18698_vm4 = vcmp.eq.s32.totalorder %v10550_v28, 41  ;;  %v18699_v63 = vmov 0  ;;  %v11326_v16 = vpop.f32.mrf.mxu1 }
 0x2cb   :  { %vm11239_vm10 = vmor %vm18691_vm0, %vm18690_vm12  ;;  %18694 = vst [vmem:[#allocation104_spill] sm:$0xff] %v11244_v45  ;;  %v2864_v49 = vsel %vm18697_vm13, 1, %v17671_v61  ;;  %vm18701_vm0 = vcmp.eq.s32.totalorder %v10675_v25, 27  ;;  %v2203_v42 = vadd.f32 %v10977_v38, %v11006_v8  ;;  %v2686_v38 = vpop.f32.mrf.mxu3  ;;  %v18714_v8 = vmov 0 }
 0x2cc   :  { %vm18696_vm9 = vmmov %vm18695_vm6  ;;  %vm18717_vm13 = vcmp.eq.s32.totalorder %v10675_v25, 34  ;;  %v18727_v12 = vmov 0  ;;  %v18832_v30 = vmov 0 }
 0x2cd   :  { %7197 = vmatmul.msk.f32.gmra.mxu0 %vm18696_vm9, %v2947_v31  ;;  %vm11258_vm12 = vmor %vm11173_vm2, %vm18698_vm4  ;;  %vm18704_vm9 = vcmp.eq.s32.totalorder %v10973_v33, 28  ;;  %v11288_v31 = vpop.f32.mrf.mxu2  ;;  %v11324_v57 = vadd.f32 %v2686_v38, %v2203_v42  ;;  %vm18721_vm4 = vcmp.eq.s32.totalorder %v10789_v34, 13  ;;  %v18731_v42 = vmov 0 }
 0x2ce   :  { %v18700_v63 = vsel %vm11258_vm12, 4294967295, %v18699_v63  ;;  %vm11266_vm6 = vmor %vm11200_vm14, %vm18701_vm0  ;;  %vm18707_vm0 = vnez %v18628_v7  ;;  %v11444_v7 = vmax.f32 %v262_v5, 0.0 }
 0x2cf   :  { %vm11278_vm2 = vmor %vm11216_vm5, %vm18704_vm9  ;;  %18720 = vst [vmem:[#allocation107_spill] sm:$0xff] %v11324_v57 }
 0x2d0   :  { %vm11294_vm5 = vmxor %vm18707_vm0, %vm18537_vm11 }
 0x2d1   :  { %v18709_v26 = vsel %vm11294_vm5, 4294967295, %v18708_v26  ;;  %vm11302_vm9 = vmor %vm11239_vm10, %vm753_vm7  ;;  %vm18726_vm7 = vcmp.ge.s32.totalorder %v10550_v28, 7 }
 0x2d2   :  { %18710 = vst [vmem:[#allocation105_spill] sm:$0xff] %v18709_v26  ;;  %vm11310_vm0 = vmxor %vm18713_vm15, %vm18537_vm11  ;;  %vm18730_vm15 = vcmp.ge.s32.totalorder %v10260_v47, 7 }
 0x2d3   :  { %v18715_v8 = vsel %vm11310_vm0, 4294967295, %v18714_v8  ;;  %vm11318_vm10 = vmor %vm11266_vm6, %vm18717_vm13  ;;  %vm18722_vm0 = vcmp.eq.s32.totalorder %v10789_v34, 6  ;;  %vm18725_vm6 = vnez %v18650_v10  ;;  %v2689_v41 = vpop.f32.mrf.mxu3 }
 0x2d4   :  { %18716 = vst [vmem:[#allocation106_spill] sm:$0xff] %v18715_v8  ;;  %vm11333_vm5 = vmor %vm18722_vm0, %vm18721_vm4  ;;  %vm18733_vm0 = vcmp.eq.s32.totalorder %v11113_v14, 21  ;;  %vm18737_vm4 = vcmp.eq.s32.totalorder %v1545_v0, 1  ;;  %v11483_v36 = vadd.f32 %v2689_v41, %v2206_v40  ;;  %v18785_v40 = vmov 0 }
 0x2d5   :  { %vm11342_vm14 = vmand %vm18726_vm7, %vm18725_vm6  ;;  %v1629_v55 = vsel %vm18737_vm4, %v11284_v53, 0.0  ;;  %vm18742_vm6 = vcmask 261120   ;;  %vm18746_vm4 = vnez %v18217_v51  ;;  %v11448_v38 = vpop.f32.mrf.mxu2 }
 0x2d6   :  { %v18728_v12 = vsel %vm11342_vm14, 4294967295, %v18727_v12  ;;  %vm11350_vm12 = vmand %vm18730_vm15, %vm18729_vm3  ;;  %vm18736_vm15 = vcmp.ge.s32.totalorder %v10133_v21, 7  ;;  %vm18738_vm3 = vcmp.eq.s32.totalorder %v11244_v45, 7  ;;  %vm18744_vm14 = vcmp.eq.s32.totalorder %v2427_v32, 1  ;;  %18779 = vst [vmem:[#allocation111_spill] sm:$0xff] %v11483_v36 }
 0x2d7   :  { %v18732_v42 = vsel %vm11350_vm12, 4294967295, %v18731_v42  ;;  %vm11359_vm13 = vmor %vm11302_vm9, %vm18733_vm0  ;;  %v1758_v57 = vsel %vm18736_vm15, %v11284_v53, 0.0  ;;  %vm18739_vm9 = vcmp.eq.s32.totalorder %v11244_v45, 0  ;;  %v2511_v44 = vsel %vm18744_vm14, %v11284_v53, 0.0 }
 0x2d8   :  { %vm11376_vm0 = vmor %vm18739_vm9, %vm18738_vm3  ;;  %7070 = vmatmul.msk.f32.gmra.mxu1 %vm18742_vm6, %v1758_v57  ;;  %vm18745_vm15 = vcmp.eq.s32.totalorder %v2864_v49, 1  ;;  %v2865_v21 = vsel %vm18746_vm4, 1, %v17671_v61  ;;  %vm18747_vm3 = vcmp.eq.s32.totalorder %v10973_v33, 35  ;;  %v1546_v49 = vsel %vm11183_vm8, 1, %v17671_v61 }
 0x2d9   :  { %vm18743_vm12 = vmmov %vm18742_vm6  ;;  %v2948_v0 = vsel %vm18745_vm15, %v11284_v53, 0.0  ;;  %vm1003_vm6 = vcmp.eq.s32.totalorder %v10789_v34, 27  ;;  %vm18753_vm15 = vcmask 261120   ;;  %vm18775_vm4 = vcmp.eq.s32.totalorder %v10973_v33, 13 }
 0x2da   :  { %7113 = vmatmul.msk.f32.gmra.mxu2 %vm18743_vm12, %v1629_v55  ;;  %vm11394_vm9 = vmor %vm11278_vm2, %vm18747_vm3  ;;  %vm18750_vm12 = vcmp.eq.s32.totalorder %v10789_v34, 20  ;;  %7157 = vmatmul.msk.f32.gmra.mxu3 %vm18753_vm15, %v2511_v44  ;;  %vm18755_vm2 = vnez %v18674_v62  ;;  %vm18756_vm3 = vcmp.eq.s32.totalorder %v10675_v25, 41  ;;  %v11442_v62 = vshra.s32 %v419_v43, 3  ;;  %v11485_v44 = vpop.f32.mrf.mxu1 }
 0x2db   :  { %vm11402_vm14 = vmor %vm11333_vm5, %vm18750_vm12  ;;  %v2428_v32 = vsel %vm18755_vm2, 1, %v17671_v61  ;;  %vm18759_vm12 = vcmp.eq.s32.totalorder %v11113_v14, 28  ;;  %vm18762_vm2 = vcmp.eq.s32.totalorder %v11244_v45, 14  ;;  %v18772_v43 = vmov 0 }
 0x2dc   :  { %vm18754_vm7 = vmmov %vm18753_vm15  ;;  %18765 = vst [vmem:[#allocation108_spill] sm:$0xff] %v11442_v62  ;;  %v265_v55 = vadd.f32 %v10189_v35, %v8039_v46  ;;  %v18878_v36 = vmov 0 }
 0x2dd   :  { %7198 = vmatmul.msk.f32.gmra.mxu0 %vm18754_vm7, %v2948_v0  ;;  %vm11419_vm5 = vmor %vm11318_vm10, %vm18756_vm3  ;;  %v420_v0 = vadd.s32 232, %v8116_v9  ;;  %vm18797_vm3 = vcmp.eq.s32.totalorder %v10973_v33, 20 }
 0x2de   :  { %vm11427_vm7 = vmor %vm11359_vm13, %vm18759_vm12  ;;  %v11604_v22 = vmax.f32 %v265_v55, 0.0 }
 0x2df   :  { %vm11437_vm10 = vmor %vm11376_vm0, %vm18762_vm2  ;;  %vm18784_vm2 = vcmp.ge.s32.totalorder %v10675_v25, 7 }
 0x2e0   :  { %vm11454_vm0 = vmxor %vm11231_vm1, %vm18537_vm11  ;;  %vm18771_vm1 = vnez %v18700_v63  ;;  %v18815_v63 = vmov 0  ;;  %18825 = vst [vmem:[#allocation113_spill] sm:$0xff] %v11604_v22 }
 0x2e1   :  { %v18767_v4 = vsel %vm11454_vm0, 4294967295, %v18766_v4  ;;  %vm11462_vm12 = vmor %vm11402_vm14, %vm1003_vm6  ;;  %vm18776_vm14 = vcmp.eq.s32.totalorder %v10973_v33, 6 }
 0x2e2   :  { %18768 = vst [vmem:[#allocation109_spill] sm:$0xff] %v18767_v4  ;;  %vm11470_vm15 = vmxor %vm18771_vm1, %vm18537_vm11  ;;  %vm18780_vm1 = vcmp.eq.s32.totalorder %v11244_v45, 21 }
 0x2e3   :  { %v18773_v43 = vsel %vm11470_vm15, 4294967295, %v18772_v43  ;;  %vm11478_vm6 = vmor %vm18776_vm14, %vm18775_vm4  ;;  %vm18783_vm14 = vnez %v18709_v26  ;;  %vm18802_vm4 = vcmp.eq.s32.totalorder %v2428_v32, 1 }
 0x2e4   :  { %18774 = vst [vmem:[#allocation110_spill] sm:$0xff] %v18773_v43  ;;  %vm11492_vm8 = vmor %vm11437_vm10, %vm18780_vm1  ;;  %vm18787_vm10 = vcmp.eq.s32.totalorder %v10789_v34, 34 }
 0x2e5   :  { %vm11504_vm13 = vmand %vm18784_vm2, %vm18783_vm14  ;;  %vm18790_vm2 = vcmp.ge.s32.totalorder %v10260_v47, 7  ;;  %vm18791_vm14 = vcmp.eq.s32.totalorder %v1546_v49, 1  ;;  %v18826_v47 = vmov 0 }
 0x2e6   :  { %v18786_v40 = vsel %vm11504_vm13, 4294967295, %v18785_v40  ;;  %vm11512_vm1 = vmor %vm11462_vm12, %vm18787_vm10  ;;  %v1759_v46 = vsel %vm18790_vm2, %v11444_v7, 0.0  ;;  %v1630_v41 = vsel %vm18791_vm14, %v11444_v7, 0.0  ;;  %vm18792_vm13 = vcmp.eq.s32.totalorder %v2865_v21, 1 }
 0x2e7   :  { %v2949_v5 = vsel %vm18792_vm13, %v11444_v7, 0.0  ;;  %vm18793_vm12 = vnez %v18715_v8  ;;  %vm18794_vm10 = vcmp.ge.s32.totalorder %v10372_v6, 7  ;;  %vm11538_vm15 = vmor %vm11478_vm6, %vm18797_vm3  ;;  %vm18800_vm2 = vcmask 261120   ;;  %v11645_v8 = vpop.f32.mrf.mxu1 }
 0x2e8   :  { %vm11530_vm0 = vmand %vm18794_vm10, %vm18793_vm12  ;;  %7071 = vmatmul.msk.f32.gmra.mxu1 %vm18800_vm2, %v1759_v46  ;;  %v2512_v21 = vsel %vm18802_vm4, %v11444_v7, 0.0  ;;  %vm18803_vm10 = vnez %v18272_v18  ;;  %vm18804_vm12 = vcmp.eq.s32.totalorder %v11113_v14, 35  ;;  %vm18807_vm6 = vcmp.eq.s32.totalorder %v11244_v45, 28 }
 0x2e9   :  { %vm18801_vm13 = vmmov %vm18800_vm2  ;;  %v2866_v49 = vsel %vm18803_vm10, 1, %v17671_v61  ;;  %vm18810_vm14 = vcmask 261120  }
 0x2ea   :  { %7114 = vmatmul.msk.f32.gmra.mxu2 %vm18801_vm13, %v1630_v41  ;;  %vm11554_vm3 = vmor %vm11427_vm7, %vm18804_vm12  ;;  %vm669_vm13 = vcmp.eq.s32.totalorder %v11113_v14, 13  ;;  %7158 = vmatmul.msk.f32.gmra.mxu3 %vm18810_vm14, %v2512_v21  ;;  %vm18812_vm7 = vnez %v18728_v12  ;;  %vm18813_vm12 = vnez %v18732_v42  ;;  %v11593_v12 = vshra.s32 %v420_v0, 3  ;;  %v11608_v21 = vpop.f32.mrf.mxu2 }
 0x2eb   :  { %vm11562_vm2 = vmor %vm11492_vm8, %vm18807_vm6  ;;  %v1547_v32 = vsel %vm18812_vm7, 1, %v17671_v61  ;;  %v2429_v57 = vsel %vm18813_vm12, 1, %v17671_v61  ;;  %vm18814_vm8 = vcmp.eq.s32.totalorder %v10789_v34, 41  ;;  %vm18822_vm12 = vcmp.eq.s32.totalorder %v10973_v33, 27 }
 0x2ec   :  { %vm18811_vm10 = vmmov %vm18810_vm14  ;;  %vm18817_vm14 = vcmp.eq.s32.totalorder %v11442_v62, 7  ;;  %18821 = vst [vmem:[#allocation112_spill] sm:$0xff] %v11593_v12  ;;  %v268_v41 = vadd.f32 %v10189_v35, %v8045_v48  ;;  %vm18842_vm7 = vnez %v18767_v4  ;;  %v18907_v0 = vmov 0 }
 0x2ed   :  { %7199 = vmatmul.msk.f32.gmra.mxu0 %vm18811_vm10, %v2949_v5  ;;  %vm11580_vm6 = vmor %vm11512_vm1, %vm18814_vm8  ;;  %vm18818_vm10 = vcmp.eq.s32.totalorder %v11442_v62, 0  ;;  %v2209_v5 = vadd.f32 %v11288_v31, %v11326_v16  ;;  %v2692_v31 = vpop.f32.mrf.mxu3  ;;  %vm18843_vm8 = vcmp.ge.s32.totalorder %v10789_v34, 7  ;;  %v18862_v16 = vmov 0 }
 0x2ee   :  { %v18816_v63 = vsel %vm11580_vm6, 4294967295, %v18815_v63  ;;  %vm11588_vm4 = vmor %vm18818_vm10, %vm18817_vm14 }
 0x2ef   :  { %vm11599_vm1 = vmor %vm11538_vm15, %vm18822_vm12  ;;  %vm18829_vm15 = vcmp.eq.s32.totalorder %v11113_v14, 6  ;;  %v11643_v55 = vadd.f32 %v2692_v31, %v2209_v5  ;;  %v18844_v5 = vmov 0  ;;  %v18938_v31 = vmov 0 }
 0x2f0   :  { %vm11614_vm10 = vmxor %vm11394_vm9, %vm18537_vm11 }
 0x2f1   :  { %v18827_v47 = vsel %vm11614_vm10, 4294967295, %v18826_v47  ;;  %vm11622_vm12 = vmor %vm18829_vm15, %vm669_vm13  ;;  %vm18835_vm10 = vcmp.eq.s32.totalorder %v11442_v62, 14  ;;  %vm923_vm15 = vcmp.eq.s32.totalorder %v11442_v62, 21  ;;  %18838 = vst [vmem:[#allocation116_spill] sm:$0xff] %v11643_v55 }
 0x2f2   :  { %18828 = vst [vmem:[#allocation114_spill] sm:$0xff] %v18827_v47  ;;  %vm11630_vm9 = vmxor %vm11419_vm5, %vm18537_vm11  ;;  %vm18839_vm5 = vcmp.eq.s32.totalorder %v10973_v33, 34  ;;  %v11755_v42 = vpop.f32.mrf.mxu2 }
 0x2f3   :  { %v18833_v30 = vsel %vm11630_vm9, 4294967295, %v18832_v30  ;;  %vm11638_vm13 = vmor %vm11588_vm4, %vm18835_vm10  ;;  %vm18849_vm10 = vcmp.ge.s32.totalorder %v10372_v6, 7  ;;  %v421_v6 = vadd.s32 240, %v8116_v9  ;;  %vm18859_vm4 = vcmp.eq.s32.totalorder %v2429_v57, 1  ;;  %v11809_v57 = vld [vmem:[%s17060_s2] ss:$0 sm:$0xff] }
 0x2f4   :  { %18834 = vst [vmem:[#allocation115_spill] sm:$0xff] %v18833_v30  ;;  %vm11652_vm14 = vmor %vm11599_vm1, %vm18839_vm5  ;;  %vm18846_vm1 = vcmp.eq.s32.totalorder %v11113_v14, 20  ;;  %v1760_v48 = vsel %vm18849_vm10, %v11604_v22, 0.0  ;;  %vm18857_vm10 = vcmask 261120   ;;  %v274_v30 = vadd.f32 %v11809_v57, %v8057_v52 }
 0x2f5   :  { %v18841_v17 = vsel %vm11652_vm14, 4294967295, %v18840_v17  ;;  %vm11664_vm6 = vmand %vm18843_vm8, %vm18842_vm7  ;;  %vm18850_vm14 = vcmp.eq.s32.totalorder %v1547_v32, 1  ;;  %vm18851_vm8 = vnez %v18773_v43  ;;  %vm18852_vm7 = vcmp.ge.s32.totalorder %v10550_v28, 7  ;;  %7072 = vmatmul.msk.f32.gmra.mxu1 %vm18857_vm10, %v1760_v48  ;;  %v11794_v48 = vpop.f32.mrf.mxu1 }
 0x2f6   :  { %v18845_v5 = vsel %vm11664_vm6, 4294967295, %v18844_v5  ;;  %vm11672_vm5 = vmor %vm11622_vm12, %vm18846_vm1  ;;  %v1631_v35 = vsel %vm18850_vm14, %v11604_v22, 0.0  ;;  %v2513_v32 = vsel %vm18859_vm4, %v11604_v22, 0.0  ;;  %vm756_vm4 = vcmp.eq.s32.totalorder %v11593_v12, 14 }
 0x2f7   :  { %vm11686_vm6 = vmand %vm18852_vm7, %vm18851_vm8  ;;  %vm18860_vm7 = vcmp.eq.s32.totalorder %v2866_v49, 1  ;;  %vm18861_vm8 = vcmp.eq.s32.totalorder %v11244_v45, 35 }
 0x2f8   :  { %vm11692_vm12 = vmor %vm11638_vm13, %vm923_vm15  ;;  %v2950_v43 = vsel %vm18860_vm7, %v11604_v22, 0.0  ;;  %vm18864_vm15 = vcmp.eq.s32.totalorder %v11593_v12, 7 }
 0x2f9   :  { %vm18858_vm14 = vmmov %vm18857_vm10  ;;  %vm18865_vm10 = vcmp.eq.s32.totalorder %v11593_v12, 0 }
 0x2fa   :  { %7115 = vmatmul.msk.f32.gmra.mxu2 %vm18858_vm14, %v1631_v35  ;;  %vm11708_vm13 = vmor %vm11562_vm2, %vm18861_vm8  ;;  %7159 = vmatmul.msk.f32.gmra.mxu3 %vm18858_vm14, %v2513_v32  ;;  %vm18869_vm2 = vnez %v18786_v40  ;;  %vm18870_vm8 = vnez %v18324_v11  ;;  %v11738_v35 = vmax.f32 %v268_v41, 0.0  ;;  %v2212_v41 = vadd.f32 %v11448_v38, %v11485_v44  ;;  %v2695_v44 = vpop.f32.mrf.mxu3 }
 0x2fb   :  { %v18863_v16 = vsel %vm11708_vm13, 4294967295, %v18862_v16  ;;  %vm11716_vm1 = vmor %vm18865_vm10, %vm18864_vm15  ;;  %v1548_v49 = vsel %vm18869_vm2, 1, %v17671_v61  ;;  %v2867_v46 = vsel %vm18870_vm8, 1, %v17671_v61  ;;  %vm18871_vm13 = vcmp.eq.s32.totalorder %v11113_v14, 27 }
 0x2fc   :  { %vm18868_vm7 = vmmov %vm18858_vm14  ;;  %18874 = vst [vmem:[#allocation117_spill] sm:$0xff] %v11738_v35  ;;  %vm18875_vm14 = vcmp.eq.s32.totalorder %v11442_v62, 28  ;;  %v11774_v38 = vshra.s32 %v421_v6, 3  ;;  %v11792_v6 = vadd.f32 %v2695_v44, %v2212_v41  ;;  %vm18892_vm2 = vcmp.eq.s32.totalorder %v11244_v45, 13  ;;  %v11813_v44 = vpop.f32.mrf.mxu0 }
 0x2fd   :  { %7200 = vmatmul.msk.f32.gmra.mxu0 %vm18868_vm7, %v2950_v43  ;;  %vm11733_vm15 = vmor %vm11672_vm5, %vm18871_vm13  ;;  %v2430_v43 = vsel %vm11530_vm0, 1, %v17671_v61  ;;  %v271_v41 = vadd.f32 %v11809_v57, %v8051_v50  ;;  %18896 = vst [vmem:[#allocation122_spill] sm:$0xff] %v11813_v44  ;;  %v422_v50 = vadd.s32 248, %v8116_v9  ;;  %v424_v40 = vadd.s32 264, %v8116_v9 }
 0x2fe   :  { %vm11747_vm7 = vmor %vm11692_vm12, %vm18875_vm14  ;;  %18883 = vst [vmem:[#allocation119_spill] sm:$0xff] %v11774_v38  ;;  %vm18893_vm14 = vcmp.eq.s32.totalorder %v11244_v45, 6 }
 0x2ff   :  { %vm11761_vm0 = vmxor %vm11554_vm3, %vm18537_vm11  ;;  %vm18884_vm3 = vnez %v18816_v63  ;;  %18891 = vst [vmem:[#allocation121_spill] sm:$0xff] %v11792_v6  ;;  %v18899_v6 = vmov 0  ;;  %v11918_v55 = vshra.s32 %v422_v50, 3  ;;  %v11920_v63 = vmax.f32 %v271_v41, 0.0 }
 0x300   :  { %v18879_v36 = vsel %vm11761_vm0, 4294967295, %v18878_v36  ;;  %vm11769_vm12 = vmor %vm11716_vm1, %vm756_vm4  ;;  %vm18888_vm1 = vcmp.eq.s32.totalorder %v11113_v14, 34 }
 0x301   :  { %18880 = vst [vmem:[#allocation118_spill] sm:$0xff] %v18879_v36  ;;  %vm11779_vm13 = vmxor %vm18884_vm3, %vm18537_vm11  ;;  %vm18898_vm3 = vcmp.ge.s32.totalorder %v10973_v33, 7 }
 0x302   :  { %v18886_v29 = vsel %vm11779_vm13, 4294967295, %v18885_v29  ;;  %vm11788_vm4 = vmor %vm11733_vm15, %vm18888_vm1  ;;  %vm18897_vm1 = vnez %v18827_v47  ;;  %vm18901_vm15 = vcmp.eq.s32.totalorder %v11593_v12, 21  ;;  %vm18913_vm13 = vcmask 261120   ;;  %18936 = vst [vmem:[#allocation123_spill] sm:$0xff] %v11918_v55 }
 0x303   :  { %18887 = vst [vmem:[#allocation120_spill] sm:$0xff] %v18886_v29  ;;  %vm11801_vm10 = vmor %vm18893_vm14, %vm18892_vm2  ;;  %vm18906_vm14 = vcmp.ge.s32.totalorder %v10675_v25, 7 }
 0x304   :  { %vm11819_vm2 = vmand %vm18898_vm3, %vm18897_vm1  ;;  %vm18904_vm3 = vcmp.ge.s32.totalorder %v10550_v28, 7  ;;  %vm18905_vm1 = vcmp.eq.s32.totalorder %v1548_v49, 1 }
 0x305   :  { %v18900_v6 = vsel %vm11819_vm2, 4294967295, %v18899_v6  ;;  %vm11828_vm5 = vmor %vm11769_vm12, %vm18901_vm15  ;;  %v1761_v11 = vsel %vm18904_vm3, %v11738_v35, 0.0  ;;  %v1632_v44 = vsel %vm18905_vm1, %v11738_v35, 0.0  ;;  %vm18909_vm12 = vcmp.eq.s32.totalorder %v10973_v33, 41 }
 0x306   :  { %vm11843_vm2 = vmand %vm18906_vm14, %vm11630_vm9  ;;  %vm18910_vm15 = vnez %v18841_v17  ;;  %vm589_vm1 = vcmp.eq.s32.totalorder %v11774_v38, 7  ;;  %7073 = vmatmul.msk.f32.gmra.mxu1 %vm18913_vm13, %v1761_v11  ;;  %vm18915_vm14 = vcmp.eq.s32.totalorder %v2430_v43, 1  ;;  %vm18916_vm9 = vcmp.eq.s32.totalorder %v2867_v46, 1  ;;  %v11961_v11 = vpop.f32.mrf.mxu1 }
 0x307   :  { %v18908_v0 = vsel %vm11843_vm2, 4294967295, %v18907_v0  ;;  %vm11851_vm8 = vmor %vm18910_vm15, %vm18909_vm12  ;;  %v2514_v49 = vsel %vm18915_vm14, %v11738_v35, 0.0  ;;  %v2951_v28 = vsel %vm18916_vm9, %v11738_v35, 0.0  ;;  %vm18917_vm2 = vcmp.eq.s32.totalorder %v11442_v62, 35 }
 0x308   :  { %vm18914_vm0 = vmmov %vm18913_vm13  ;;  %vm18920_vm15 = vcmp.eq.s32.totalorder %v11244_v45, 20  ;;  %vm18923_vm14 = vcmask 261120   ;;  %vm18927_vm3 = vcmp.eq.s32.totalorder %v11113_v14, 41  ;;  %v19112_v17 = vmov 0 }
 0x309   :  { %7116 = vmatmul.msk.f32.gmra.mxu2 %vm18914_vm0, %v1632_v44  ;;  %vm11867_vm12 = vmor %vm11747_vm7, %vm18917_vm2  ;;  %vm1006_vm0 = vcmp.eq.s32.totalorder %v11244_v45, 27  ;;  %7160 = vmatmul.msk.f32.gmra.mxu3 %vm18923_vm14, %v2514_v49  ;;  %vm18925_vm7 = vnez %v18845_v5  ;;  %vm18926_vm2 = vnez %v18376_v37  ;;  %v2431_v5 = vsel %vm11686_vm6, 1, %v17671_v61  ;;  %v11924_v49 = vpop.f32.mrf.mxu2 }
 0x30a   :  { %vm11875_vm13 = vmor %vm11801_vm10, %vm18920_vm15  ;;  %v1549_v46 = vsel %vm18925_vm7, 1, %v17671_v61  ;;  %v2868_v43 = vsel %vm18926_vm2, 1, %v17671_v61  ;;  %vm18930_vm15 = vcmp.eq.s32.totalorder %v11593_v12, 28  ;;  %vm671_vm7 = vcmp.eq.s32.totalorder %v11442_v62, 13 }
 0x30b   :  { %vm18924_vm9 = vmmov %vm18923_vm14  ;;  %v2215_v44 = vadd.f32 %v11608_v21, %v11645_v8  ;;  %v2698_v8 = vpop.f32.mrf.mxu3  ;;  %v18943_v21 = vmov 0  ;;  %vm18946_vm2 = vcmp.eq.s32.totalorder %v11442_v62, 6  ;;  %vm18955_vm6 = vcmp.ge.s32.totalorder %v11113_v14, 7 }
 0x30c   :  { %7201 = vmatmul.msk.f32.gmra.mxu0 %vm18924_vm9, %v2951_v28  ;;  %vm11892_vm10 = vmor %vm11788_vm4, %vm18927_vm3  ;;  %vm18933_vm4 = vcmp.eq.s32.totalorder %v11774_v38, 0  ;;  %vm18950_vm9 = vcmp.eq.s32.totalorder %v11774_v38, 14  ;;  %v2221_v41 = vadd.f32 %v11924_v49, %v11961_v11  ;;  %v19057_v11 = vmov 0 }
 0x30d   :  { %vm11900_vm14 = vmor %vm11828_vm5, %vm18930_vm15  ;;  %vm18937_vm15 = vnez %v18863_v16  ;;  %v11959_v50 = vadd.f32 %v2698_v8, %v2215_v44  ;;  %v11975_v44 = vpop.f32.mrf.mxu0  ;;  %v18956_v8 = vmov 0  ;;  %v283_v37 = vadd.f32 %v11809_v57, %v8075_v58 }
 0x30e   :  { %vm11913_vm3 = vmor %vm18933_vm4, %vm589_vm1  ;;  %18953 = vst [vmem:[#allocation127_spill] sm:$0xff] %v11975_v44 }
 0x30f   :  { %vm11930_vm1 = vmxor %vm18937_vm15, %vm18537_vm11  ;;  %18949 = vst [vmem:[#allocation126_spill] sm:$0xff] %v11959_v50 }
 0x310   :  { %v18939_v31 = vsel %vm11930_vm1, 4294967295, %v18938_v31  ;;  %vm11938_vm4 = vmor %vm11875_vm13, %vm1006_vm0  ;;  %vm18972_vm1 = vcmp.eq.s32.totalorder %v2431_v5, 1  ;;  %v18983_v5 = vmov 0 }
 0x311   :  { %18940 = vst [vmem:[#allocation124_spill] sm:$0xff] %v18939_v31  ;;  %vm11946_vm15 = vmxor %vm11851_vm8, %vm18537_vm11 }
 0x312   :  { %v18944_v21 = vsel %vm11946_vm15, 4294967295, %v18943_v21  ;;  %vm11954_vm13 = vmor %vm18946_vm2, %vm671_vm7  ;;  %vm18954_vm7 = vnez %v18879_v36  ;;  %vm18967_vm2 = vcmp.eq.s32.totalorder %v11442_v62, 20  ;;  %vm18970_vm15 = vcmask 261120  }
 0x313   :  { %18945 = vst [vmem:[#allocation125_spill] sm:$0xff] %v18944_v21  ;;  %vm11968_vm5 = vmor %vm11913_vm3, %vm18950_vm9  ;;  %vm18958_vm9 = vcmp.eq.s32.totalorder %v11244_v45, 34 }
 0x314   :  { %vm11981_vm8 = vmand %vm18955_vm6, %vm18954_vm7  ;;  %vm18961_vm6 = vcmp.ge.s32.totalorder %v10675_v25, 7  ;;  %vm18962_vm7 = vcmp.eq.s32.totalorder %v1549_v46, 1  ;;  %v2515_v46 = vsel %vm18972_vm1, %v11920_v63, 0.0  ;;  %vm18986_vm1 = vcmp.eq.s32.totalorder %v11918_v55, 0 }
 0x315   :  { %v18957_v8 = vsel %vm11981_vm8, 4294967295, %v18956_v8  ;;  %vm11989_vm3 = vmor %vm11938_vm4, %vm18958_vm9  ;;  %v1762_v52 = vsel %vm18961_vm6, %v11920_v63, 0.0  ;;  %v1633_v50 = vsel %vm18962_vm7, %v11920_v63, 0.0  ;;  %vm18963_vm8 = vnez %v18886_v29  ;;  %v12134_v18 = vpop.f32.mrf.mxu0 }
 0x316   :  { %vm18964_vm4 = vcmp.ge.s32.totalorder %v10789_v34, 7  ;;  %vm12013_vm0 = vmor %vm11954_vm13, %vm18967_vm2  ;;  %7074 = vmatmul.msk.f32.gmra.mxu1 %vm18970_vm15, %v1762_v52  ;;  %vm18977_vm2 = vcmp.eq.s32.totalorder %v11774_v38, 21  ;;  %19011 = vst [vmem:[#allocation132_spill] sm:$0xff] %v12134_v18  ;;  %v19106_v18 = vmov 0 }
 0x317   :  { %vm12005_vm9 = vmand %vm18964_vm4, %vm18963_vm8  ;;  %vm18973_vm4 = vcmp.eq.s32.totalorder %v2868_v43, 1  ;;  %vm18974_vm8 = vcmp.eq.s32.totalorder %v11593_v12, 35  ;;  %v423_v43 = vadd.s32 256, %v8116_v9 }
 0x318   :  { %vm18971_vm7 = vmmov %vm18970_vm15  ;;  %v2952_v25 = vsel %vm18973_vm4, %v11920_v63, 0.0 }
 0x319   :  { %7117 = vmatmul.msk.f32.gmra.mxu2 %vm18971_vm7, %v1633_v50  ;;  %vm12028_vm13 = vmor %vm11900_vm14, %vm18974_vm8  ;;  %7161 = vmatmul.msk.f32.gmra.mxu3 %vm18971_vm7, %v2515_v46  ;;  %vm18981_vm14 = vnez %v18900_v6  ;;  %vm18982_vm8 = vcmp.eq.s32.totalorder %v11244_v45, 41  ;;  %v12083_v46 = vpop.f32.mrf.mxu2  ;;  %v12119_v50 = vshra.s32 %v423_v43, 3  ;;  %v19014_v43 = vmov 0 }
 0x31a   :  { %vm12036_vm15 = vmor %vm11968_vm5, %vm18977_vm2  ;;  %v1550_v28 = vsel %vm18981_vm14, 1, %v17671_v61  ;;  %vm18985_vm2 = vcmp.eq.s32.totalorder %v11918_v55, 7  ;;  %vm18991_vm14 = vcmp.eq.s32.totalorder %v11442_v62, 27 }
 0x31b   :  { %vm18980_vm4 = vmmov %vm18971_vm7  ;;  %19006 = vst [vmem:[#allocation130_spill] sm:$0xff] %v12119_v50  ;;  %vm19008_vm7 = vcmp.eq.s32.totalorder %v11442_v62, 34 }
 0x31c   :  { %7202 = vmatmul.msk.f32.gmra.mxu0 %vm18980_vm4, %v2952_v25  ;;  %vm12051_vm5 = vmor %vm11989_vm3, %vm18982_vm8  ;;  %v12064_v25 = vmax.f32 %v274_v30, 0.0  ;;  %vm18989_vm4 = vnez %v18908_v0  ;;  %vm18990_vm3 = vnez %v18433_v2  ;;  %v2218_v30 = vadd.f32 %v11755_v42, %v11794_v48  ;;  %v2701_v42 = vpop.f32.mrf.mxu3  ;;  %v12123_v2 = vpop.f32.mrf.mxu1 }
 0x31d   :  { %v18984_v5 = vsel %vm12051_vm5, 4294967295, %v18983_v5  ;;  %vm12059_vm6 = vmor %vm18986_vm1, %vm18985_vm2  ;;  %v2432_v6 = vsel %vm18989_vm4, 1, %v17671_v61  ;;  %v2869_v32 = vsel %vm18990_vm3, 1, %v17671_v61  ;;  %v18994_v0 = vmov 0 }
 0x31e   :  { %vm12076_vm1 = vmor %vm12013_vm0, %vm18991_vm14  ;;  %vm18997_vm0 = vcmp.eq.s32.totalorder %v11774_v38, 28  ;;  %v19000_v48 = vmov 0  ;;  %vm19003_vm3 = vcmp.eq.s32.totalorder %v11918_v55, 14  ;;  %v12121_v29 = vadd.f32 %v2701_v42, %v2218_v30 }
 0x31f   :  { %vm12089_vm4 = vmxor %vm11867_vm12, %vm18537_vm11  ;;  %vm19016_vm2 = vcmp.eq.s32.totalorder %v11593_v12, 13  ;;  %v277_v30 = vadd.f32 %v11809_v57, %v8063_v54  ;;  %vm19022_vm8 = vnez %v18944_v21  ;;  %vm19031_vm5 = vcmp.eq.s32.totalorder %v2432_v6, 1 }
 0x320   :  { %v18995_v0 = vsel %vm12089_vm4, 4294967295, %v18994_v0  ;;  %vm12097_vm14 = vmor %vm12036_vm15, %vm18997_vm0  ;;  %19007 = vst [vmem:[#allocation131_spill] sm:$0xff] %v12121_v29  ;;  %vm19013_vm0 = vcmp.ge.s32.totalorder %v11244_v45, 7  ;;  %vm19029_vm4 = vcmask 261120   ;;  %v19050_v54 = vmov 0 }
 0x321   :  { %18996 = vst [vmem:[#allocation128_spill] sm:$0xff] %v18995_v0  ;;  %vm12106_vm12 = vmxor %vm11892_vm10, %vm18537_vm11  ;;  %vm19017_vm10 = vcmp.eq.s32.totalorder %v11593_v12, 6  ;;  %v12233_v52 = vmax.f32 %v277_v30, 0.0 }
 0x322   :  { %v19001_v48 = vsel %vm12106_vm12, 4294967295, %v19000_v48  ;;  %vm12114_vm15 = vmor %vm12059_vm6, %vm19003_vm3  ;;  %vm19012_vm3 = vnez %v18939_v31 }
 0x323   :  { %19002 = vst [vmem:[#allocation129_spill] sm:$0xff] %v19001_v48  ;;  %vm12130_vm6 = vmor %vm12076_vm1, %vm19008_vm7 }
 0x324   :  { %vm12140_vm12 = vmand %vm19013_vm0, %vm19012_vm3  ;;  %vm19020_vm0 = vcmp.ge.s32.totalorder %v10789_v34, 7  ;;  %vm19021_vm3 = vcmp.eq.s32.totalorder %v1550_v28, 1  ;;  %v2516_v28 = vsel %vm19031_vm5, %v12064_v25, 0.0  ;;  %vm19038_vm5 = vnez %v18957_v8  ;;  %19049 = vst [vmem:[#allocation133_spill] sm:$0xff] %v12233_v52  ;;  %v2704_v49 = vpop.f32.mrf.mxu3  ;;  %v12274_v21 = vpop.f32.mrf.mxu1 }
 0x325   :  { %v19015_v43 = vsel %vm12140_vm12, 4294967295, %v19014_v43  ;;  %vm12149_vm7 = vmor %vm19017_vm10, %vm19016_vm2  ;;  %v1763_v42 = vsel %vm19020_vm0, %v12064_v25, 0.0  ;;  %v1634_v29 = vsel %vm19021_vm3, %v12064_v25, 0.0  ;;  %vm19023_vm12 = vcmp.ge.s32.totalorder %v10973_v33, 7 }
 0x326   :  { %vm12165_vm2 = vmand %vm19023_vm12, %vm19022_vm8  ;;  %vm19026_vm10 = vcmp.eq.s32.totalorder %v11918_v55, 21  ;;  %7075 = vmatmul.msk.f32.gmra.mxu1 %vm19029_vm4, %v1763_v42  ;;  %vm19032_vm12 = vcmp.eq.s32.totalorder %v2869_v32, 1  ;;  %vm19033_vm8 = vcmp.eq.s32.totalorder %v11774_v38, 35  ;;  %v19041_v32 = vmov 0  ;;  %v12237_v42 = vpop.f32.mrf.mxu2 }
 0x327   :  { %vm12173_vm1 = vmor %vm12114_vm15, %vm19026_vm10  ;;  %v2953_v34 = vsel %vm19032_vm12, %v12064_v25, 0.0  ;;  %vm19039_vm12 = vnez %v18485_v24  ;;  %v2433_v8 = vsel %vm12005_vm9, 1, %v17671_v61  ;;  %vm19046_vm10 = vcmp.eq.s32.totalorder %v11918_v55, 28 }
 0x328   :  { %vm19030_vm3 = vmmov %vm19029_vm4  ;;  %vm591_vm4 = vcmp.eq.s32.totalorder %v12119_v50, 7  ;;  %v2870_v6 = vsel %vm19039_vm12, 1, %v17671_v61  ;;  %vm19060_vm12 = vcmp.eq.s32.totalorder %v11593_v12, 27  ;;  %vm19070_vm9 = vcmp.ge.s32.totalorder %v11442_v62, 7 }
 0x329   :  { %7118 = vmatmul.msk.f32.gmra.mxu2 %vm19030_vm3, %v1634_v29  ;;  %vm12188_vm15 = vmor %vm12097_vm14, %vm19033_vm8  ;;  %v1551_v29 = vsel %vm19038_vm5, 1, %v17671_v61  ;;  %vm19040_vm8 = vcmp.eq.s32.totalorder %v11442_v62, 41  ;;  %vm19056_vm5 = vnez %v18984_v5  ;;  %v2227_v30 = vadd.f32 %v12237_v42, %v12274_v21 }
 0x32a   :  { %vm19036_vm0 = vmmov %vm19030_vm3  ;;  %v19166_v42 = vmov 0 }
 0x32b   :  { %7162 = vmatmul.msk.f32.gmra.mxu3 %vm19036_vm0, %v2516_v28  ;;  %vm19037_vm3 = vmmov %vm19036_vm0  ;;  %vm19043_vm0 = vcmp.eq.s32.totalorder %v11593_v12, 20  ;;  %v12272_v28 = vadd.f32 %v2704_v49, %v2221_v41  ;;  %v12288_v41 = vpop.f32.mrf.mxu0  ;;  %v19071_v49 = vmov 0 }
 0x32c   :  { %7203 = vmatmul.msk.f32.gmra.mxu0 %vm19037_vm3, %v2953_v34  ;;  %vm12206_vm14 = vmor %vm12130_vm6, %vm19040_vm8  ;;  %vm19065_vm8 = vcmp.eq.s32.totalorder %v11774_v38, 6  ;;  %v280_v34 = vadd.f32 %v11809_v57, %v8069_v56  ;;  %19068 = vst [vmem:[#allocation137_spill] sm:$0xff] %v12288_v41  ;;  %v12307_v56 = vshra.s32 %v424_v40, 3 }
 0x32d   :  { %v19042_v32 = vsel %vm12206_vm14, 4294967295, %v19041_v32  ;;  %vm12214_vm3 = vmor %vm12149_vm7, %vm19043_vm0  ;;  %19063 = vst [vmem:[#allocation136_spill] sm:$0xff] %v12272_v28  ;;  %vm19064_vm7 = vcmp.eq.s32.totalorder %v11774_v38, 13  ;;  %vm19088_vm14 = vcmp.eq.s32.totalorder %v2433_v8, 1  ;;  %v2224_v28 = vadd.f32 %v12083_v46, %v12123_v2  ;;  %v2707_v46 = vpop.f32.mrf.mxu3 }
 0x32e   :  { %vm12226_vm6 = vmor %vm12173_vm1, %vm19046_vm10  ;;  %vm19053_vm10 = vcmp.eq.s32.totalorder %v12119_v50, 0  ;;  %19076 = vst [vmem:[#allocation138_spill] sm:$0xff] %v12307_v56  ;;  %v12371_v5 = vmax.f32 %v280_v34, 0.0  ;;  %v12388_v34 = vpop.f32.mrf.mxu2  ;;  %v425_v2 = vadd.s32 272, %v8116_v9 }
 0x32f   :  { %vm12243_vm1 = vmxor %vm12028_vm13, %vm18537_vm11 }
 0x330   :  { %v19051_v54 = vsel %vm12243_vm1, 4294967295, %v19050_v54  ;;  %vm12251_vm0 = vmor %vm19053_vm10, %vm591_vm4  ;;  %vm19077_vm10 = vcmp.ge.s32.totalorder %v10973_v33, 7  ;;  %19102 = vst [vmem:[#allocation139_spill] sm:$0xff] %v12371_v5 }
 0x331   :  { %19052 = vst [vmem:[#allocation134_spill] sm:$0xff] %v19051_v54  ;;  %vm12259_vm13 = vmxor %vm19056_vm5, %vm18537_vm11  ;;  %v1764_v24 = vsel %vm19077_vm10, %v12233_v52, 0.0  ;;  %vm19099_vm10 = vcmp.eq.s32.totalorder %v12119_v50, 21 }
 0x332   :  { %v19058_v11 = vsel %vm12259_vm13, 4294967295, %v19057_v11  ;;  %vm12267_vm4 = vmor %vm12214_vm3, %vm19060_vm12  ;;  %vm19069_vm3 = vnez %v18995_v0  ;;  %vm19086_vm12 = vcmask 261120  }
 0x333   :  { %19059 = vst [vmem:[#allocation135_spill] sm:$0xff] %v19058_v11  ;;  %vm12281_vm13 = vmor %vm19065_vm8, %vm19064_vm7  ;;  %vm19073_vm8 = vcmp.eq.s32.totalorder %v12119_v50, 14  ;;  %7076 = vmatmul.msk.f32.gmra.mxu1 %vm19086_vm12, %v1764_v24  ;;  %v12427_v24 = vpop.f32.mrf.mxu1 }
 0x334   :  { %vm12294_vm5 = vmand %vm19070_vm9, %vm19069_vm3  ;;  %vm19078_vm9 = vcmp.eq.s32.totalorder %v1551_v29, 1  ;;  %vm19079_vm3 = vnez %v19001_v48  ;;  %v2517_v29 = vsel %vm19088_vm14, %v12233_v52, 0.0  ;;  %vm1009_vm14 = vcmp.eq.s32.totalorder %v11774_v38, 27 }
 0x335   :  { %v19072_v49 = vsel %vm12294_vm5, 4294967295, %v19071_v49  ;;  %vm12302_vm7 = vmor %vm12251_vm0, %vm19073_vm8  ;;  %v1635_v41 = vsel %vm19078_vm9, %v12233_v52, 0.0  ;;  %vm19080_vm5 = vcmp.ge.s32.totalorder %v11113_v14, 7  ;;  %vm19083_vm0 = vcmp.eq.s32.totalorder %v11593_v12, 34  ;;  %v2710_v21 = vpop.f32.mrf.mxu3 }
 0x336   :  { %vm12318_vm1 = vmand %vm19080_vm5, %vm19079_vm3  ;;  %vm19089_vm5 = vcmp.eq.s32.totalorder %v2870_v6, 1  ;;  %vm19090_vm3 = vcmp.eq.s32.totalorder %v11918_v55, 35  ;;  %v12541_v40 = vpop.f32.mrf.mxu2 }
 0x337   :  { %vm12326_vm8 = vmor %vm12267_vm4, %vm19083_vm0  ;;  %v2954_v33 = vsel %vm19089_vm5, %v12233_v52, 0.0  ;;  %vm19093_vm0 = vcmp.eq.s32.totalorder %v11774_v38, 20 }
 0x338   :  { %vm19087_vm9 = vmmov %vm19086_vm12 }
 0x339   :  { %7119 = vmatmul.msk.f32.gmra.mxu2 %vm19087_vm9, %v1635_v41  ;;  %vm12341_vm4 = vmor %vm12226_vm6, %vm19090_vm3  ;;  %7163 = vmatmul.msk.f32.gmra.mxu3 %vm19087_vm9, %v2517_v29  ;;  %vm19097_vm6 = vnez %v19015_v43  ;;  %vm19098_vm3 = vnez %v18540_v1  ;;  %v12425_v29 = vadd.f32 %v2707_v46, %v2224_v28  ;;  %v12441_v28 = vpop.f32.mrf.mxu0  ;;  %v19125_v46 = vmov 0 }
 0x33a   :  { %vm12349_vm12 = vmor %vm12281_vm13, %vm19093_vm0  ;;  %v1552_v6 = vsel %vm19097_vm6, 1, %v17671_v61  ;;  %v2871_v8 = vsel %vm19098_vm3, 1, %v17671_v61  ;;  %vm1095_vm0 = vcmp.eq.s32.totalorder %v12119_v50, 28  ;;  %vm19119_vm3 = vcmp.eq.s32.totalorder %v12307_v56, 0  ;;  %19122 = vst [vmem:[#allocation143_spill] sm:$0xff] %v12441_v28 }
 0x33b   :  { %vm19096_vm5 = vmmov %vm19087_vm9  ;;  %vm19103_vm9 = vcmp.eq.s32.totalorder %v11593_v12, 41  ;;  %19117 = vst [vmem:[#allocation142_spill] sm:$0xff] %v12425_v29  ;;  %vm19131_vm6 = vcmp.eq.s32.totalorder %v1552_v6, 1  ;;  %v19134_v1 = vmov 0  ;;  %v12482_v6 = vshra.s32 %v425_v2, 3  ;;  %v12579_v41 = vpop.f32.mrf.mxu1  ;;  %v19175_v2 = vld [vmem:[#allocation2_spill] sm:$0xff] }
 0x33c   :  { %7204 = vmatmul.msk.f32.gmra.mxu0 %vm19096_vm5, %v2954_v33  ;;  %vm12366_vm13 = vmor %vm12302_vm7, %vm19099_vm10  ;;  %v2434_v33 = vsel %vm12165_vm2, 1, %v17671_v61  ;;  %v1636_v29 = vsel %vm19131_vm6, %v12371_v5, 0.0  ;;  %vm19141_vm6 = vcmask 261120   ;;  %v2233_v16 = vadd.f32 %v12541_v40, %v12579_v41 }
 0x33d   :  { %vm12380_vm5 = vmor %vm12326_vm8, %vm19103_vm9  ;;  %vm19118_vm9 = vcmp.eq.s32.totalorder %v12307_v56, 7  ;;  %19140 = vst [vmem:[#allocation144_spill] sm:$0xff] %v12482_v6 }
 0x33e   :  { %vm12394_vm2 = vmxor %vm12188_vm15, %vm18537_vm11  ;;  %vm19111_vm15 = vnez %v19042_v32 }
 0x33f   :  { %v19107_v18 = vsel %vm12394_vm2, 4294967295, %v19106_v18  ;;  %vm12402_vm8 = vmor %vm12349_vm12, %vm1009_vm14  ;;  %vm19130_vm14 = vcmp.ge.s32.totalorder %v11113_v14, 7 }
 0x340   :  { %19108 = vst [vmem:[#allocation140_spill] sm:$0xff] %v19107_v18  ;;  %vm12411_vm10 = vmxor %vm19111_vm15, %vm18537_vm11  ;;  %vm19124_vm15 = vcmp.ge.s32.totalorder %v11593_v12, 7  ;;  %v1765_v58 = vsel %vm19130_vm14, %v12371_v5, 0.0 }
 0x341   :  { %v19113_v17 = vsel %vm12411_vm10, 4294967295, %v19112_v17  ;;  %vm12419_vm12 = vmor %vm12366_vm13, %vm1095_vm0  ;;  %vm19123_vm0 = vnez %v19051_v54  ;;  %7077 = vmatmul.msk.f32.gmra.mxu1 %vm19141_vm6, %v1765_v58  ;;  %v12577_v58 = vadd.f32 %v2710_v21, %v2227_v30  ;;  %v12592_v44 = vpop.f32.mrf.mxu0  ;;  %v19179_v30 = vmov 0 }
 0x342   :  { %19114 = vst [vmem:[#allocation141_spill] sm:$0xff] %v19113_v17  ;;  %vm12434_vm10 = vmor %vm19119_vm3, %vm19118_vm9  ;;  %vm19127_vm3 = vcmp.eq.s32.totalorder %v11774_v38, 34 }
 0x343   :  { %vm12447_vm7 = vmand %vm19124_vm15, %vm19123_vm0  ;;  %vm19132_vm15 = vnez %v19058_v11  ;;  %vm19133_vm0 = vcmp.ge.s32.totalorder %v11244_v45, 7  ;;  %19171 = vst [vmem:[#allocation147_spill] sm:$0xff] %v12577_v58  ;;  %v12722_v32 = vpop.f32.mrf.mxu1 }
 0x344   :  { %v19126_v46 = vsel %vm12447_vm7, 4294967295, %v19125_v46  ;;  %vm12455_vm9 = vmor %vm12402_vm8, %vm19127_vm3  ;;  %vm19136_vm8 = vcmp.eq.s32.totalorder %v11918_v55, 13  ;;  %vm19137_vm3 = vcmp.eq.s32.totalorder %v11918_v55, 6  ;;  %19176 = vst [vmem:[#allocation2_spill] sm:$0xff] %v12592_v44 }
 0x345   :  { %vm12469_vm7 = vmand %vm19133_vm0, %vm19132_vm15  ;;  %vm19143_vm0 = vcmp.eq.s32.totalorder %v2434_v33, 1  ;;  %vm19144_vm15 = vcmp.eq.s32.totalorder %v2871_v8, 1 }
 0x346   :  { %v19135_v1 = vsel %vm12469_vm7, 4294967295, %v19134_v1  ;;  %vm12477_vm13 = vmor %vm19137_vm3, %vm19136_vm8  ;;  %v2518_v14 = vsel %vm19143_vm0, %v12371_v5, 0.0  ;;  %v2955_v11 = vsel %vm19144_vm15, %v12371_v5, 0.0  ;;  %vm19145_vm7 = vcmp.eq.s32.totalorder %v12119_v50, 35 }
 0x347   :  { %vm19142_vm2 = vmmov %vm19141_vm6  ;;  %vm19148_vm3 = vcmp.eq.s32.totalorder %v12307_v56, 14  ;;  %vm19151_vm0 = vcmask 261120  }
 0x348   :  { %7120 = vmatmul.msk.f32.gmra.mxu2 %vm19142_vm2, %v1636_v29  ;;  %vm12494_vm8 = vmor %vm12419_vm12, %vm19145_vm7  ;;  %vm928_vm2 = vcmp.eq.s32.totalorder %v12307_v56, 21  ;;  %7164 = vmatmul.msk.f32.gmra.mxu3 %vm19151_vm0, %v2518_v14  ;;  %vm19153_vm7 = vnez %v19072_v49  ;;  %vm19154_vm12 = vcmp.eq.s32.totalorder %v11774_v38, 41  ;;  %v2435_v14 = vsel %vm12318_vm1, 1, %v17671_v61 }
 0x349   :  { %vm12502_vm6 = vmor %vm12434_vm10, %vm19148_vm3  ;;  %v1553_v8 = vsel %vm19153_vm7, 1, %v17671_v61  ;;  %vm509_vm10 = vcmp.eq.s32.totalorder %v12482_v6, 0  ;;  %vm593_vm3 = vcmp.eq.s32.totalorder %v12482_v6, 7  ;;  %v12537_v49 = vmax.f32 %v283_v37, 0.0 }
 0x34a   :  { %vm19152_vm15 = vmmov %vm19151_vm0  ;;  %vm19157_vm0 = vnez %v18596_v3  ;;  %v19161_v29 = vmov 0  ;;  %v426_v37 = vadd.s32 280, %v8116_v9  ;;  %vm19172_vm7 = vcmp.eq.s32.totalorder %v11918_v55, 27 }
 0x34b   :  { %7205 = vmatmul.msk.f32.gmra.mxu0 %vm19152_vm15, %v2955_v11  ;;  %vm12516_vm14 = vmor %vm12455_vm9, %vm19154_vm12  ;;  %v2872_v11 = vsel %vm19157_vm0, 1, %v17671_v61  ;;  %vm19158_vm15 = vcmp.eq.s32.totalorder %v11918_v55, 20  ;;  %v286_v3 = vadd.f32 %v11809_v57, %v19175_v2  ;;  %vm19185_vm0 = vcmp.eq.s32.totalorder %v1553_v8, 1 }
 0x34c   :  { %vm12532_vm9 = vmor %vm12477_vm13, %vm19158_vm15  ;;  %v1637_v2 = vsel %vm19185_vm0, %v12537_v49, 0.0  ;;  %v12663_v43 = vshra.s32 %v426_v37, 3  ;;  %v12684_v37 = vpop.f32.mrf.mxu2 }
 0x34d   :  { %vm12547_vm12 = vmxor %vm12341_vm4, %vm18537_vm11  ;;  %v2236_v28 = vadd.f32 %v12684_v37, %v12722_v32  ;;  %v19315_v37 = vmov 0 }
 0x34e   :  { %v19162_v29 = vsel %vm12547_vm12, 4294967295, %v19161_v29  ;;  %vm12555_vm13 = vmor %vm12502_vm6, %vm928_vm2  ;;  %vm19184_vm6 = vcmp.ge.s32.totalorder %v11244_v45, 7  ;;  %19206 = vst [vmem:[#allocation148_spill] sm:$0xff] %v12663_v43 }
 0x34f   :  { %19163 = vst [vmem:[#allocation145_spill] sm:$0xff] %v19162_v29  ;;  %vm12563_vm1 = vmxor %vm12380_vm5, %vm18537_vm11  ;;  %vm19178_vm5 = vcmp.ge.s32.totalorder %v11774_v38, 7  ;;  %v1766_v21 = vsel %vm19184_vm6, %v12537_v49, 0.0 }
 0x350   :  { %v19167_v42 = vsel %vm12563_vm1, 4294967295, %v19166_v42  ;;  %vm12571_vm4 = vmor %vm509_vm10, %vm593_vm3  ;;  %vm19177_vm3 = vnez %v19107_v18  ;;  %vm19193_vm10 = vcmask 261120   ;;  %vm19195_vm1 = vcmp.eq.s32.totalorder %v2435_v14, 1 }
 0x351   :  { %19168 = vst [vmem:[#allocation146_spill] sm:$0xff] %v19167_v42  ;;  %vm12585_vm15 = vmor %vm12532_vm9, %vm19172_vm7  ;;  %vm19181_vm9 = vcmp.eq.s32.totalorder %v12307_v56, 28  ;;  %7078 = vmatmul.msk.f32.gmra.mxu1 %vm19193_vm10, %v1766_v21  ;;  %v2519_v8 = vsel %vm19195_vm1, %v12537_v49, 0.0  ;;  %vm19202_vm1 = vnez %v19126_v46  ;;  %v12665_v21 = vmax.f32 %v286_v3, 0.0 }
 0x352   :  { %vm12598_vm2 = vmand %vm19178_vm5, %vm19177_vm3  ;;  %vm19186_vm5 = vnez %v19113_v17  ;;  %vm19187_vm3 = vcmp.ge.s32.totalorder %v11442_v62, 7  ;;  %v1554_v14 = vsel %vm19202_vm1, 1, %v17671_v61  ;;  %v2230_v3 = vadd.f32 %v12388_v34, %v12427_v24  ;;  %v2713_v24 = vpop.f32.mrf.mxu3  ;;  %v12738_v17 = vpop.f32.mrf.mxu0 }
 0x353   :  { %v19180_v30 = vsel %vm12598_vm2, 4294967295, %v19179_v30  ;;  %vm12606_vm7 = vmor %vm12555_vm13, %vm19181_vm9  ;;  %vm19190_vm13 = vcmp.eq.s32.totalorder %v12482_v6, 14 }
 0x354   :  { %vm12620_vm2 = vmand %vm19187_vm3, %vm19186_vm5  ;;  %vm19196_vm3 = vcmp.eq.s32.totalorder %v2872_v11, 1  ;;  %vm19197_vm5 = vcmp.eq.s32.totalorder %v11918_v55, 34  ;;  %v12720_v33 = vadd.f32 %v2713_v24, %v2230_v3  ;;  %v19226_v3 = vld [vmem:[#allocation3_spill] sm:$0xff]  ;;  %v12836_v11 = vpop.f32.mrf.mxu2 }
 0x355   :  { %vm12628_vm9 = vmor %vm12571_vm4, %vm19190_vm13  ;;  %v2956_v45 = vsel %vm19196_vm3, %v12537_v49, 0.0  ;;  %vm1346_vm13 = vcmp.eq.s32.totalorder %v11918_v55, 41  ;;  %v289_v24 = vadd.f32 %v11809_v57, %v19226_v3  ;;  %19227 = vst [vmem:[#allocation3_spill] sm:$0xff] %v12738_v17  ;;  %v19261_v17 = vmov 0 }
 0x356   :  { %vm19194_vm0 = vmmov %vm19193_vm10  ;;  %19222 = vst [vmem:[#allocation150_spill] sm:$0xff] %v12720_v33  ;;  %v19229_v33 = vmov 0 }
 0x357   :  { %7121 = vmatmul.msk.f32.gmra.mxu2 %vm19194_vm0, %v1637_v2  ;;  %vm12643_vm4 = vmor %vm12585_vm15, %vm19197_vm5  ;;  %vm675_vm5 = vcmp.eq.s32.totalorder %v12119_v50, 13  ;;  %v19214_v2 = vmov 0  ;;  %v12832_v58 = vmax.f32 %v289_v24, 0.0  ;;  %v428_v24 = vadd.s32 296, %v8116_v9 }
 0x358   :  { %vm19200_vm6 = vmmov %vm19194_vm0 }
 0x359   :  { %7165 = vmatmul.msk.f32.gmra.mxu3 %vm19200_vm6, %v2519_v8  ;;  %vm19201_vm10 = vmmov %vm19194_vm0  ;;  %vm19203_vm0 = vcmp.eq.s32.totalorder %v12307_v56, 35  ;;  %vm19207_vm6 = vnez %v19135_v1  ;;  %v19212_v1 = vmov 0  ;;  %v7227_v8 = vld [vmem:[%s17061_s3 + $0x80] sm:$0xff]  ;;  %19260 = vst [vmem:[#allocation151_spill] sm:$0xff] %v12832_v58 }
 0x35a   :  { %7206 = vmatmul.msk.f32.gmra.mxu0 %vm19201_vm10, %v2956_v45  ;;  %vm12657_vm3 = vmor %vm12606_vm7, %vm19203_vm0  ;;  %v2436_v45 = vsel %vm19207_vm6, 1, %v17671_v61  ;;  %vm19208_vm10 = vnez %v18650_v10  ;;  %vm19209_vm7 = vcmp.eq.s32.totalorder %v12482_v6, 21  ;;  %vm594_vm6 = vcmp.eq.s32.totalorder %v12663_v43, 7  ;;  %3439 = vmatpush.msrb.mxu1 %v7227_v8  ;;  %v2716_v40 = vpop.f32.mrf.mxu3  ;;  %v12881_v44 = vpop.f32.mrf.mxu0 }
 0x35b   :  { %v2873_v46 = vsel %vm19208_vm10, 1, %v17671_v61  ;;  %vm12677_vm1 = vmor %vm12628_vm9, %vm19209_vm7  ;;  %vm19223_vm0 = vcmp.eq.s32.totalorder %v12482_v6, 28  ;;  %v19237_v8 = vmov 0  ;;  %v12866_v48 = vadd.f32 %v2716_v40, %v2233_v16 }
 0x35c   :  { %vm12690_vm15 = vmxor %vm12494_vm8, %vm18537_vm11  ;;  %vm510_vm8 = vcmp.eq.s32.totalorder %v12663_v43, 0 }
 0x35d   :  { %v19213_v1 = vsel %vm12690_vm15, 4294967295, %v19212_v1  ;;  %vm12697_vm9 = vmxor %vm12516_vm14, %vm18537_vm11  ;;  %vm19219_vm14 = vcmp.eq.s32.totalorder %v12119_v50, 6  ;;  %19269 = vst [vmem:[#allocation154_spill] sm:$0xff] %v12866_v48 }
 0x35e   :  { %v19215_v2 = vsel %vm12697_vm9, 4294967295, %v19214_v2  ;;  %vm12705_vm7 = vmor %vm12643_vm4, %vm1346_vm13  ;;  %vm19228_vm13 = vcmp.ge.s32.totalorder %v11918_v55, 7  ;;  %vm19235_vm9 = vnez %v19167_v42 }
 0x35f   :  { %19216 = vst [vmem:[#allocation149_spill] sm:$0xff] %v19215_v2  ;;  %vm12715_vm10 = vmor %vm19219_vm14, %vm675_vm5  ;;  %vm19233_vm14 = vcmp.ge.s32.totalorder %v11442_v62, 7 }
 0x360   :  { %vm12731_vm5 = vmor %vm12677_vm1, %vm19223_vm0  ;;  %v1767_v3 = vsel %vm19233_vm14, %v12665_v21, 0.0 }
 0x361   :  { %vm12744_vm4 = vmand %vm19228_vm13, %vm12547_vm12  ;;  %vm19234_vm13 = vcmp.eq.s32.totalorder %v1554_v14, 1  ;;  %vm19236_vm12 = vcmp.ge.s32.totalorder %v11593_v12, 7  ;;  %v427_v14 = vadd.s32 288, %v8116_v9 }
 0x362   :  { %v19230_v33 = vsel %vm12744_vm4, 4294967295, %v19229_v33  ;;  %vm12752_vm1 = vmor %vm510_vm8, %vm594_vm6  ;;  %v1638_v10 = vsel %vm19234_vm13, %v12665_v21, 0.0  ;;  %vm19239_vm6 = vcmp.eq.s32.totalorder %v12119_v50, 20  ;;  %vm19242_vm13 = vcmask 261120  }
 0x363   :  { %vm12766_vm4 = vmand %vm19236_vm12, %vm19235_vm9  ;;  %7079 = vmatmul.msk.f32.gmra.mxu1 %vm19242_vm13, %v1767_v3  ;;  %vm19244_vm12 = vcmp.eq.s32.totalorder %v2436_v45, 1  ;;  %vm19245_vm9 = vcmp.eq.s32.totalorder %v2873_v46, 1  ;;  %v12864_v34 = vshra.s32 %v427_v14, 3  ;;  %v12868_v3 = vpop.f32.mrf.mxu1  ;;  %v19280_v46 = vmov 0  ;;  %v19369_v45 = vld [vmem:[#allocation6_spill] sm:$0xff] }
 0x364   :  { %v19238_v8 = vsel %vm12766_vm4, 4294967295, %v19237_v8  ;;  %vm12774_vm8 = vmor %vm12715_vm10, %vm19239_vm6  ;;  %v2520_v62 = vsel %vm19244_vm12, %v12665_v21, 0.0  ;;  %v2957_v42 = vsel %vm19245_vm9, %v12665_v21, 0.0  ;;  %vm19246_vm4 = vcmp.eq.s32.totalorder %v12482_v6, 35 }
 0x365   :  { %vm19243_vm0 = vmmov %vm19242_vm13  ;;  %vm550_vm6 = vcmp.eq.s32.totalorder %v12307_v56, 6  ;;  %vm676_vm13 = vcmp.eq.s32.totalorder %v12307_v56, 13  ;;  %vm19250_vm12 = vnez %v19180_v30  ;;  %vm19251_vm9 = vcmp.eq.s32.totalorder %v12663_v43, 14  ;;  %19268 = vst [vmem:[#allocation153_spill] sm:$0xff] %v12864_v34 }
 0x366   :  { %7122 = vmatmul.msk.f32.gmra.mxu2 %vm19243_vm0, %v1638_v10  ;;  %vm12790_vm10 = vmor %vm12731_vm5, %vm19246_vm4  ;;  %7207 = vmatmul.msk.f32.gmra.mxu0 %vm19243_vm0, %v2957_v42  ;;  %v1555_v10 = vsel %vm19250_vm12, 1, %v17671_v61  ;;  %vm930_vm5 = vcmp.eq.s32.totalorder %v12663_v43, 21  ;;  %v19255_v30 = vmov 0 }
 0x367   :  { %vm19249_vm14 = vmmov %vm19243_vm0 }
 0x368   :  { %7166 = vmatmul.msk.f32.gmra.mxu3 %vm19249_vm14, %v2520_v62  ;;  %vm12805_vm4 = vmor %vm12752_vm1, %vm19251_vm9  ;;  %v2437_v62 = vsel %vm12620_vm2, 1, %v17671_v61  ;;  %vm19254_vm14 = vnez %v18709_v26  ;;  %vm19257_vm1 = vcmp.eq.s32.totalorder %v12119_v50, 27  ;;  %vm19270_vm2 = vcmp.eq.s32.totalorder %v12119_v50, 34  ;;  %v19273_v26 = vld [vmem:[#allocation4_spill] sm:$0xff] }
 0x369   :  { %v2874_v42 = vsel %vm19254_vm14, 1, %v17671_v61  ;;  %vm12819_vm0 = vmxor %vm12657_vm3, %vm18537_vm11  ;;  %v292_v14 = vadd.f32 %v11809_v57, %v19273_v26  ;;  %19274 = vst [vmem:[#allocation4_spill] sm:$0xff] %v12881_v44  ;;  %vm19285_vm14 = vcmp.ge.s32.totalorder %v11593_v12, 7  ;;  %v12981_v26 = vpop.f32.mrf.mxu2 }
 0x36a   :  { %v19256_v30 = vsel %vm12819_vm0, 4294967295, %v19255_v30  ;;  %vm12827_vm12 = vmor %vm12774_vm8, %vm19257_vm1  ;;  %v1768_v40 = vsel %vm19285_vm14, %v12832_v58, 0.0  ;;  %vm19292_vm14 = vcmp.eq.s32.totalorder %v2437_v62, 1 }
 0x36b   :  { %vm12842_vm9 = vmxor %vm12705_vm7, %vm18537_vm11 }
 0x36c   :  { %v19262_v17 = vsel %vm12842_vm9, 4294967295, %v19261_v17  ;;  %vm12850_vm8 = vmor %vm550_vm6, %vm676_vm13 }
 0x36d   :  { %19263 = vst [vmem:[#allocation152_spill] sm:$0xff] %v19262_v17  ;;  %vm12859_vm7 = vmor %vm12805_vm4, %vm930_vm5  ;;  %vm19275_vm5 = vcmp.ge.s32.totalorder %v12119_v50, 7  ;;  %vm19282_vm4 = vcmp.eq.s32.totalorder %v12307_v56, 20 }
 0x36e   :  { %vm12874_vm1 = vmor %vm12827_vm12, %vm19270_vm2  ;;  %vm19278_vm12 = vnez %v19215_v2  ;;  %vm19279_vm2 = vcmp.ge.s32.totalorder %v11774_v38, 7 }
 0x36f   :  { %vm12887_vm13 = vmand %vm19275_vm5, %vm12690_vm15  ;;  %vm19286_vm15 = vcmp.eq.s32.totalorder %v1555_v10, 1  ;;  %v2521_v10 = vsel %vm19292_vm14, %v12832_v58, 0.0  ;;  %vm19298_vm14 = vnez %v19230_v33  ;;  %v19304_v33 = vmov 0 }
 0x370   :  { %vm12895_vm6 = vmand %vm19279_vm2, %vm19278_vm12  ;;  %v1639_v2 = vsel %vm19286_vm15, %v12832_v58, 0.0  ;;  %vm19287_vm2 = vcmp.eq.s32.totalorder %v12663_v43, 28  ;;  %vm19293_vm15 = vcmp.eq.s32.totalorder %v2874_v42, 1 }
 0x371   :  { %v19281_v46 = vsel %vm12895_vm6, 4294967295, %v19280_v46  ;;  %vm12903_vm3 = vmor %vm12850_vm8, %vm19282_vm4  ;;  %vm19290_vm4 = vcmask 261120   ;;  %v2958_v12 = vsel %vm19293_vm15, %v12832_v58, 0.0  ;;  %vm19294_vm6 = vcmp.eq.s32.totalorder %v12119_v50, 41 }
 0x372   :  { %vm12917_vm12 = vmor %vm12859_vm7, %vm19287_vm2  ;;  %7080 = vmatmul.msk.f32.gmra.mxu1 %vm19290_vm4, %v1768_v40  ;;  %vm19299_vm15 = vnez %v18767_v4  ;;  %v12992_v40 = vshra.s32 %v428_v24, 3  ;;  %v2719_v4 = vpop.f32.mrf.mxu3  ;;  %v432_v58 = vadd.s32 328, %v8116_v9 }
 0x373   :  { %vm19291_vm5 = vmmov %vm19290_vm4  ;;  %vm595_vm4 = vcmp.eq.s32.totalorder %v12864_v34, 7  ;;  %v2875_v62 = vsel %vm19299_vm15, 1, %v17671_v61  ;;  %v13012_v24 = vadd.f32 %v2719_v4, %v2236_v28  ;;  %v13033_v4 = vpop.f32.mrf.mxu0  ;;  %v19331_v28 = vmov 0 }
 0x374   :  { %7123 = vmatmul.msk.f32.gmra.mxu2 %vm19291_vm5, %v1639_v2  ;;  %vm12933_vm7 = vmor %vm12874_vm1, %vm19294_vm6  ;;  %7208 = vmatmul.msk.f32.gmra.mxu0 %vm19291_vm5, %v2958_v12  ;;  %v1556_v2 = vsel %vm19298_vm14, 1, %v17671_v61  ;;  %vm19300_vm1 = vcmp.eq.s32.totalorder %v12307_v56, 27  ;;  %19313 = vst [vmem:[#allocation156_spill] sm:$0xff] %v12992_v40 }
 0x375   :  { %vm19297_vm8 = vmmov %vm19291_vm5  ;;  %vm19303_vm5 = vnez %v19238_v8  ;;  %v12977_v8 = vmax.f32 %v292_v14, 0.0  ;;  %19321 = vst [vmem:[#allocation157_spill] sm:$0xff] %v13012_v24  ;;  %v19359_v24 = vmov 0 }
 0x376   :  { %7167 = vmatmul.msk.f32.gmra.mxu3 %vm19297_vm8, %v2521_v10  ;;  %vm12951_vm6 = vmor %vm12903_vm3, %vm19300_vm1  ;;  %v2438_v12 = vsel %vm19303_vm5, 1, %v17671_v61  ;;  %vm19306_vm3 = vcmp.eq.s32.totalorder %v12663_v43, 35  ;;  %v19314_v10 = vld [vmem:[#allocation5_spill] sm:$0xff]  ;;  %19329 = vst [vmem:[#allocation158_spill] sm:$0xff] %v13033_v4  ;;  %vm19330_vm5 = vcmp.ge.s32.totalorder %v11918_v55, 7  ;;  %v429_v4 = vadd.s32 304, %v8116_v9 }
 0x377   :  { %vm12963_vm2 = vmxor %vm12790_vm10, %vm18537_vm11  ;;  %19309 = vst [vmem:[#allocation155_spill] sm:$0xff] %v12977_v8  ;;  %vm19310_vm10 = vcmp.eq.s32.totalorder %v12864_v34, 0  ;;  %v295_v14 = vadd.f32 %v11809_v57, %v19314_v10  ;;  %v13014_v10 = vpop.f32.mrf.mxu1 }
 0x378   :  { %v19305_v33 = vsel %vm12963_vm2, 4294967295, %v19304_v33  ;;  %vm12971_vm1 = vmor %vm12917_vm12, %vm19306_vm3  ;;  %vm19333_vm3 = vcmp.eq.s32.totalorder %v12864_v34, 14  ;;  %vm19336_vm12 = vcmp.ge.s32.totalorder %v11774_v38, 7  ;;  %v13115_v16 = vshra.s32 %v429_v4, 3 }
 0x379   :  { %vm12987_vm14 = vmor %vm19310_vm10, %vm595_vm4  ;;  %vm19318_vm4 = vcmp.eq.s32.totalorder %v12307_v56, 34  ;;  %v1769_v17 = vsel %vm19336_vm12, %v12977_v8, 0.0  ;;  %vm19343_vm12 = vcmp.eq.s32.totalorder %v2438_v12, 1  ;;  %v298_v4 = vadd.f32 %v11809_v57, %v19369_v45 }
 0x37a   :  { %vm12999_vm8 = vmxor %vm12933_vm7, %vm18537_vm11  ;;  %vm19322_vm7 = vcmp.ge.s32.totalorder %v12307_v56, 7  ;;  %19358 = vst [vmem:[#allocation160_spill] sm:$0xff] %v13115_v16  ;;  %v19373_v12 = vmov 0 }
 0x37b   :  { %v19316_v37 = vsel %vm12999_vm8, 4294967295, %v19315_v37  ;;  %vm13007_vm10 = vmor %vm12951_vm6, %vm19318_vm4  ;;  %vm19325_vm6 = vcmp.eq.s32.totalorder %v12482_v6, 13  ;;  %vm19326_vm4 = vcmp.eq.s32.totalorder %v12482_v6, 6 }
 0x37c   :  { %19317 = vst [vmem:[#allocation5_spill] sm:$0xff] %v19316_v37  ;;  %vm13020_vm15 = vmand %vm19322_vm7, %vm12819_vm0 }
 0x37d   :  { %vm13028_vm8 = vmor %vm19326_vm4, %vm19325_vm6  ;;  %vm19341_vm4 = vcmask 261120  }
 0x37e   :  { %vm13039_vm7 = vmand %vm19330_vm5, %vm12842_vm9  ;;  %vm19337_vm5 = vcmp.eq.s32.totalorder %v1556_v2, 1  ;;  %vm19338_vm9 = vcmp.eq.s32.totalorder %v12307_v56, 41  ;;  %7081 = vmatmul.msk.f32.gmra.mxu1 %vm19341_vm4, %v1769_v17  ;;  %v2522_v2 = vsel %vm19343_vm12, %v12977_v8, 0.0  ;;  %v1557_v17 = vsel %vm12887_vm13, 1, %v17671_v61 }
 0x37f   :  { %v19332_v28 = vsel %vm13039_vm7, 4294967295, %v19331_v28  ;;  %vm13047_vm6 = vmor %vm12987_vm14, %vm19333_vm3  ;;  %v1640_v44 = vsel %vm19337_vm5, %v12977_v8, 0.0  ;;  %vm596_vm3 = vcmp.eq.s32.totalorder %v12992_v40, 7  ;;  %vm19344_vm5 = vcmp.eq.s32.totalorder %v2875_v62, 1  ;;  %7168 = vmatmul.msk.f32.gmra.mxu3 %vm19341_vm4, %v2522_v2  ;;  %v13158_v2 = vpop.f32.mrf.mxu1 }
 0x380   :  { %vm13062_vm0 = vmor %vm13007_vm10, %vm19338_vm9  ;;  %v2959_v38 = vsel %vm19344_vm5, %v12977_v8, 0.0  ;;  %vm19345_vm9 = vnez %v18827_v47  ;;  %vm19346_vm10 = vcmp.eq.s32.totalorder %v12482_v6, 20  ;;  %vm19351_vm5 = vnez %v19281_v46 }
 0x381   :  { %vm19342_vm7 = vmmov %vm19341_vm4  ;;  %v2876_v32 = vsel %vm19345_vm9, 1, %v17671_v61  ;;  %v2439_v62 = vsel %vm19351_vm5, 1, %v17671_v61  ;;  %vm19355_vm13 = vcmp.eq.s32.totalorder %v12992_v40, 0  ;;  %v2239_v46 = vadd.f32 %v12836_v11, %v12868_v3  ;;  %v2722_v11 = vpop.f32.mrf.mxu3 }
 0x382   :  { %7124 = vmatmul.msk.f32.gmra.mxu2 %vm19342_vm7, %v1640_v44  ;;  %vm13081_vm14 = vmor %vm13028_vm8, %vm19346_vm10  ;;  %v13086_v44 = vmax.f32 %v295_v14, 0.0  ;;  %vm19352_vm8 = vcmp.eq.s32.totalorder %v12864_v34, 21  ;;  %v13119_v14 = vpop.f32.mrf.mxu2  ;;  %vm1181_vm5 = vcmp.eq.s32.totalorder %v12482_v6, 34  ;;  %v19364_v3 = vmov 0 }
 0x383   :  { %vm19350_vm12 = vmmov %vm19341_vm4  ;;  %vm1099_vm4 = vcmp.eq.s32.totalorder %v12864_v34, 28  ;;  %v13156_v48 = vadd.f32 %v2722_v11, %v2239_v46  ;;  %v13180_v11 = vpop.f32.mrf.mxu0  ;;  %v2245_v42 = vadd.f32 %v13119_v14, %v13158_v2 }
 0x384   :  { %19349 = vst [vmem:[#allocation159_spill] sm:$0xff] %v13086_v44  ;;  %7209 = vmatmul.msk.f32.gmra.mxu0 %vm19350_vm12, %v2959_v38  ;;  %vm13100_vm10 = vmor %vm13047_vm6, %vm19352_vm8  ;;  %vm19383_vm6 = vcmp.eq.s32.totalorder %v1557_v17, 1  ;;  %v19420_v38 = vld [vmem:[#allocation7_spill] sm:$0xff] }
 0x385   :  { %vm13110_vm7 = vmor %vm19355_vm13, %vm596_vm3  ;;  %vm19361_vm3 = vcmp.eq.s32.totalorder %v12482_v6, 27  ;;  %19370 = vst [vmem:[#allocation6_spill] sm:$0xff] %v13156_v48 }
 0x386   :  { %vm13124_vm8 = vmxor %vm12971_vm1, %vm18537_vm11  ;;  %19378 = vst [vmem:[#allocation162_spill] sm:$0xff] %v13180_v11 }
 0x387   :  { %v19360_v24 = vsel %vm13124_vm8, 4294967295, %v19359_v24  ;;  %vm13132_vm13 = vmor %vm13081_vm14, %vm19361_vm3  ;;  %vm19375_vm3 = vcmp.eq.s32.totalorder %v12992_v40, 14 }
 0x388   :  { %vm13140_vm1 = vmxor %vm13062_vm0, %vm18537_vm11  ;;  %vm19371_vm0 = vcmp.ge.s32.totalorder %v11918_v55, 7 }
 0x389   :  { %v19365_v3 = vsel %vm13140_vm1, 4294967295, %v19364_v3  ;;  %vm13148_vm14 = vmor %vm13100_vm10, %vm1099_vm4  ;;  %v1770_v47 = vsel %vm19371_vm0, %v13086_v44, 0.0  ;;  %vm19372_vm10 = vcmp.ge.s32.totalorder %v12482_v6, 7  ;;  %vm19379_vm0 = vcmp.eq.s32.totalorder %v2876_v32, 1 }
 0x38a   :  { %19366 = vst [vmem:[#allocation161_spill] sm:$0xff] %v19365_v3  ;;  %vm13167_vm4 = vmand %vm19372_vm10, %vm12963_vm2  ;;  %v2960_v45 = vsel %vm19379_vm0, %v13086_v44, 0.0  ;;  %vm19380_vm10 = vnez %v18879_v36  ;;  %v1641_v32 = vsel %vm19383_vm6, %v13086_v44, 0.0  ;;  %vm19384_vm0 = vcmp.eq.s32.totalorder %v2439_v62, 1 }
 0x38b   :  { %v19374_v12 = vsel %vm13167_vm4, 4294967295, %v19373_v12  ;;  %vm13175_vm12 = vmor %vm13110_vm7, %vm19375_vm3  ;;  %v2877_v55 = vsel %vm19380_vm10, 1, %v17671_v61  ;;  %v2523_v48 = vsel %vm19384_vm0, %v13086_v44, 0.0  ;;  %vm19385_vm10 = vnez %v19316_v37  ;;  %v13306_v44 = vpop.f32.mrf.mxu1  ;;  %v13317_v8 = vpop.f32.mrf.mxu0 }
 0x38c   :  { %vm13191_vm9 = vmor %vm13132_vm13, %vm1181_vm5  ;;  %vm19386_vm2 = vcmp.ge.s32.totalorder %v12119_v50, 7  ;;  %vm19389_vm13 = vcmp.eq.s32.totalorder %v12663_v43, 13  ;;  %vm19390_vm7 = vcmp.eq.s32.totalorder %v12663_v43, 6  ;;  %vm19393_vm0 = vcmask 261120   ;;  %19425 = vst [vmem:[#allocation164_spill] sm:$0xff] %v13317_v8 }
 0x38d   :  { %vm13205_vm11 = vmand %vm19386_vm2, %vm19385_vm10  ;;  %7082 = vmatmul.msk.f32.gmra.mxu1 %vm19393_vm0, %v1770_v47  ;;  %v1558_v62 = vsel %vm13020_vm15, 1, %v17671_v61  ;;  %vm19395_vm5 = vcmp.eq.s32.totalorder %v12992_v40, 21  ;;  %v430_v47 = vadd.s32 312, %v8116_v9  ;;  %7169 = vmatmul.msk.f32.gmra.mxu3 %vm19393_vm0, %v2523_v48  ;;  %vm19399_vm15 = vnez %v19332_v28  ;;  %v19476_v28 = vld [vmem:[#allocation8_spill] sm:$0xff] }
 0x38e   :  { %vm13214_vm3 = vmor %vm19390_vm7, %vm19389_vm13  ;;  %v2440_v41 = vsel %vm19399_vm15, 1, %v17671_v61  ;;  %vm19400_vm2 = vcmp.eq.s32.totalorder %v13115_v16, 7  ;;  %vm19401_vm6 = vcmp.eq.s32.totalorder %v13115_v16, 0  ;;  %vm553_vm13 = vcmp.eq.s32.totalorder %v12864_v34, 6 }
 0x38f   :  { %vm19394_vm4 = vmmov %vm19393_vm0  ;;  %vm19416_vm10 = vcmp.eq.s32.totalorder %v13115_v16, 14  ;;  %v13300_v37 = vshra.s32 %v430_v47, 3  ;;  %v301_v36 = vadd.f32 %v11809_v57, %v19420_v38  ;;  %v2441_v46 = vsel %vm13205_vm11, 1, %v17671_v61 }
 0x390   :  { %7125 = vmatmul.msk.f32.gmra.mxu2 %vm19394_vm4, %v1641_v32  ;;  %vm13229_vm7 = vmor %vm13175_vm12, %vm19395_vm5  ;;  %v13249_v32 = vmax.f32 %v298_v4, 0.0  ;;  %v2242_v4 = vadd.f32 %v12981_v26, %v13014_v10  ;;  %v2725_v26 = vpop.f32.mrf.mxu3  ;;  %vm19428_vm5 = vcmp.eq.s32.totalorder %v2877_v55, 1  ;;  %vm19468_vm11 = vmmov 1  }
 0x391   :  { %vm19398_vm4 = vmmov %vm19393_vm0  ;;  %vm679_vm0 = vcmp.eq.s32.totalorder %v12864_v34, 13  ;;  %19419 = vst [vmem:[#allocation163_spill] sm:$0xff] %v13300_v37  ;;  %v19479_v8 = vmov 0 }
 0x392   :  { %7210 = vmatmul.msk.f32.gmra.mxu0 %vm19398_vm4, %v2960_v45  ;;  %vm13244_vm12 = vmor %vm19401_vm6, %vm19400_vm2  ;;  %vm19404_vm4 = vcmp.eq.s32.totalorder %v12864_v34, 35  ;;  %vm19407_vm6 = vcmp.eq.s32.totalorder %v12663_v43, 20  ;;  %v13271_v45 = vpop.f32.mrf.mxu2  ;;  %v13304_v11 = vadd.f32 %v2725_v26, %v2242_v4  ;;  %v2961_v4 = vsel %vm19428_vm5, %v13249_v32, 0.0 }
 0x393   :  { %vm13256_vm15 = vmor %vm13148_vm14, %vm19404_vm4  ;;  %vm19410_vm14 = vcmp.eq.s32.totalorder %v12482_v6, 41  ;;  %vm19434_vm5 = vcmp.eq.s32.totalorder %v2440_v41, 1  ;;  %v431_v41 = vadd.s32 320, %v8116_v9  ;;  %v19458_v26 = vmov 0  ;;  %v13451_v3 = vpop.f32.mrf.mxu1 }
 0x394   :  { %vm13264_vm2 = vmor %vm13214_vm3, %vm19407_vm6  ;;  %vm19413_vm3 = vcmp.eq.s32.totalorder %v12992_v40, 28  ;;  %19421 = vst [vmem:[#allocation7_spill] sm:$0xff] %v13304_v11  ;;  %v2524_v55 = vsel %vm19434_vm5, %v13249_v32, 0.0  ;;  %vm19451_vm5 = vnez %v18939_v31 }
 0x395   :  { %vm13277_vm4 = vmor %vm13191_vm9, %vm19410_vm14  ;;  %vm19427_vm14 = vcmp.eq.s32.totalorder %v1558_v62, 1  ;;  %v19436_v62 = vmov 0  ;;  %v13438_v14 = vshra.s32 %v431_v41, 3  ;;  %v19469_v41 = vmov 0 }
 0x396   :  { %vm13285_vm6 = vmor %vm13229_vm7, %vm19413_vm3  ;;  %vm19422_vm7 = vcmp.eq.s32.totalorder %v12663_v43, 27  ;;  %v1642_v47 = vsel %vm19427_vm14, %v13249_v32, 0.0  ;;  %vm19441_vm14 = vcmask 261120  }
 0x397   :  { %vm13295_vm9 = vmor %vm13244_vm12, %vm19416_vm10  ;;  %vm19426_vm12 = vcmp.ge.s32.totalorder %v12119_v50, 7  ;;  %19463 = vst [vmem:[#allocation165_spill] sm:$0xff] %v13438_v14 }
 0x398   :  { %vm13312_vm3 = vmor %vm13264_vm2, %vm19422_vm7  ;;  %v1771_v57 = vsel %vm19426_vm12, %v13249_v32, 0.0  ;;  %vm19429_vm2 = vcmp.ge.s32.totalorder %v12663_v43, 7  ;;  %vm19435_vm12 = vcmp.ge.s32.totalorder %v12307_v56, 7  ;;  %v2728_v2 = vpop.f32.mrf.mxu3 }
 0x399   :  { %vm13330_vm7 = vmand %vm19429_vm2, %vm13124_vm8  ;;  %7083 = vmatmul.msk.f32.gmra.mxu1 %vm19441_vm14, %v1771_v57  ;;  %vm19444_vm8 = vcmp.eq.s32.totalorder %v12663_v43, 34  ;;  %v13380_v57 = vmax.f32 %v301_v36, 0.0  ;;  %v2878_v36 = vsel %vm19451_vm5, 1, %v17671_v61  ;;  %v13449_v10 = vadd.f32 %v2728_v2, %v2245_v42  ;;  %v13472_v42 = vld [vmem:[%s17060_s2] ss:$0 sm:$0xff] }
 0x39a   :  { %vm13338_vm10 = vmor %vm553_vm13, %vm679_vm0  ;;  %vm19438_vm13 = vcmp.eq.s32.totalorder %v13115_v16, 21  ;;  %v13419_v17 = vpop.f32.mrf.mxu2  ;;  %v304_v2 = vadd.f32 %v13472_v42, %v19476_v28  ;;  %v1560_v9 = vsel %vm13330_vm7, 1, %v17671_v61  ;;  %vm19501_vm7 = vnez %v18995_v0 }
 0x39b   :  { %vm13349_vm2 = vmand %vm19435_vm12, %vm13140_vm1  ;;  %vm19443_vm1 = vnez %v19374_v12  ;;  %19467 = vst [vmem:[#allocation166_spill] sm:$0xff] %v13449_v10  ;;  %v13476_v10 = vpop.f32.mrf.mxu0  ;;  %v19530_v0 = vmov 0 }
 0x39c   :  { %v19437_v62 = vsel %vm13349_vm2, 4294967295, %v19436_v62  ;;  %vm13358_vm0 = vmor %vm13295_vm9, %vm19438_vm13  ;;  %v1559_v50 = vsel %vm19443_vm1, 1, %v17671_v61  ;;  %vm1350_vm13 = vcmp.eq.s32.totalorder %v12663_v43, 41  ;;  %vm19448_vm1 = vcmp.eq.s32.totalorder %v12864_v34, 20 }
 0x39d   :  { %vm19442_vm12 = vmmov %vm19441_vm14  ;;  %vm598_vm14 = vcmp.eq.s32.totalorder %v13300_v37, 7 }
 0x39e   :  { %7126 = vmatmul.msk.f32.gmra.mxu2 %vm19442_vm12, %v1642_v47  ;;  %vm13373_vm9 = vmor %vm13312_vm3, %vm19444_vm8  ;;  %7170 = vmatmul.msk.f32.gmra.mxu3 %vm19442_vm12, %v2524_v55 }
 0x39f   :  { %vm19447_vm2 = vmmov %vm19442_vm12 }
 0x3a0   :  { %7211 = vmatmul.msk.f32.gmra.mxu0 %vm19447_vm2, %v2961_v4  ;;  %vm13388_vm8 = vmor %vm13338_vm10, %vm19448_vm1  ;;  %vm19452_vm2 = vcmp.eq.s32.totalorder %v12992_v40, 35  ;;  %vm19455_vm10 = vcmp.eq.s32.totalorder %v13115_v16, 28  ;;  %v19509_v4 = vmov 0 }
 0x3a1   :  { %vm13403_vm12 = vmor %vm13285_vm6, %vm19452_vm2  ;;  %vm19464_vm6 = vcmp.eq.s32.totalorder %v12864_v34, 27 }
 0x3a2   :  { %vm13411_vm1 = vmor %vm13358_vm0, %vm19455_vm10  ;;  %vm19460_vm0 = vcmp.eq.s32.totalorder %v13300_v37, 0  ;;  %v13571_v28 = vpop.f32.mrf.mxu2 }
 0x3a3   :  { %vm13425_vm2 = vmor %vm13373_vm9, %vm1350_vm13  ;;  %vm19482_vm13 = vcmp.eq.s32.totalorder %v13300_v37, 14 }
 0x3a4   :  { %v19459_v26 = vsel %vm13425_vm2, 4294967295, %v19458_v26  ;;  %vm13433_vm10 = vmor %vm19460_vm0, %vm598_vm14  ;;  %vm19490_vm14 = vcmp.eq.s32.totalorder %v2441_v46, 1  ;;  %v13544_v46 = vmax.f32 %v304_v2, 0.0  ;;  %v2248_v2 = vadd.f32 %v13271_v45, %v13306_v44  ;;  %v2731_v45 = vpop.f32.mrf.mxu3 }
 0x3a5   :  { %vm13444_vm9 = vmor %vm13388_vm8, %vm19464_vm6  ;;  %vm19472_vm8 = vcmp.eq.s32.totalorder %v12992_v40, 13  ;;  %vm19473_vm6 = vcmp.eq.s32.totalorder %v12992_v40, 6  ;;  %v2525_v55 = vsel %vm19490_vm14, %v13380_v57, 0.0  ;;  %vm19497_vm14 = vcmp.eq.s32.totalorder %v13300_v37, 21 }
 0x3a6   :  { %vm13456_vm3 = vmxor %vm13256_vm15, %vm19468_vm11  ;;  %vm19477_vm15 = vcmp.ge.s32.totalorder %v12307_v56, 7  ;;  %v13591_v44 = vshra.s32 %v432_v58, 3  ;;  %v13603_v56 = vpop.f32.mrf.mxu1  ;;  %v19518_v58 = vmov 0 }
 0x3a7   :  { %v19470_v41 = vsel %vm13456_vm3, 4294967295, %v19469_v41  ;;  %vm13464_vm5 = vmor %vm19473_vm6, %vm19472_vm8  ;;  %v1772_v11 = vsel %vm19477_vm15, %v13380_v57, 0.0  ;;  %vm19478_vm8 = vcmp.eq.s32.totalorder %v1559_v50, 1  ;;  %vm19491_vm15 = vcmp.eq.s32.totalorder %v2878_v36, 1 }
 0x3a8   :  { %19471 = vst [vmem:[#allocation167_spill] sm:$0xff] %v19470_v41  ;;  %v1643_v31 = vsel %vm19478_vm8, %v13380_v57, 0.0  ;;  %vm13486_vm6 = vmxor %vm13277_vm4, %vm19468_vm11  ;;  %vm19485_vm8 = vcmp.eq.s32.totalorder %v12864_v34, 34  ;;  %v2962_v38 = vsel %vm19491_vm15, %v13380_v57, 0.0  ;;  %vm19500_vm15 = vnez %v19437_v62 }
 0x3a9   :  { %v19480_v8 = vsel %vm13486_vm6, 4294967295, %v19479_v8  ;;  %vm13494_vm0 = vmor %vm13433_vm10, %vm19482_vm13  ;;  %vm19488_vm10 = vcmask 261120   ;;  %v2442_v48 = vsel %vm19500_vm15, 1, %v17671_v61  ;;  %v2879_v36 = vsel %vm19501_vm7, 1, %v17671_v61  ;;  %19513 = vst [vmem:[#allocation168_spill] sm:$0xff] %v13591_v44 }
 0x3aa   :  { %19481 = vst [vmem:[#allocation8_spill] sm:$0xff] %v19480_v8  ;;  %vm13504_vm4 = vmor %vm13444_vm9, %vm19485_vm8  ;;  %7084 = vmatmul.msk.f32.gmra.mxu1 %vm19488_vm10, %v1772_v11  ;;  %vm1351_vm9 = vcmp.eq.s32.totalorder %v12864_v34, 41  ;;  %vm19492_vm8 = vcmp.eq.s32.totalorder %v12992_v40, 20  ;;  %vm19514_vm15 = vcmp.eq.s32.totalorder %v13300_v37, 28  ;;  %vm19535_vm7 = vcmp.eq.s32.totalorder %v1560_v9, 1  ;;  %v13715_v50 = vpop.f32.mrf.mxu2 }
 0x3ab   :  { %vm19489_vm13 = vmmov %vm19488_vm10  ;;  %vm1016_vm10 = vcmp.eq.s32.totalorder %v12992_v40, 27  ;;  %v19550_v11 = vmov 0  ;;  %v19573_v62 = vmov 0 }
 0x3ac   :  { %7127 = vmatmul.msk.f32.gmra.mxu2 %vm19489_vm13, %v1643_v31  ;;  %vm13522_vm6 = vmor %vm13464_vm5, %vm19492_vm8  ;;  %v7276_v31 = vld [vmem:[%s17061_s3 + $0xb8] sm:$0xff]  ;;  %vm19502_vm8 = vcmp.eq.s32.totalorder %v13115_v16, 35 }
 0x3ad   :  { %vm19495_vm2 = vmmov %vm19489_vm13  ;;  %3878 = vmatpush.msrb.mxu2 %v7276_v31  ;;  %v7322_v31 = vld [vmem:[%s17061_s3 + $0xd8] sm:$0xff] }
 0x3ae   :  { %7171 = vmatmul.msk.f32.gmra.mxu3 %vm19495_vm2, %v2525_v55  ;;  %vm19496_vm13 = vmmov %vm19495_vm2 }
 0x3af   :  { %7212 = vmatmul.msk.f32.gmra.mxu0 %vm19496_vm13, %v2962_v38  ;;  %vm13539_vm5 = vmor %vm13494_vm0, %vm19497_vm14  ;;  %vm19505_vm13 = vcmp.eq.s32.totalorder %v13438_v14, 7  ;;  %vm19506_vm14 = vcmp.eq.s32.totalorder %v13438_v14, 0  ;;  %v13601_v38 = vadd.f32 %v2731_v45, %v2248_v2  ;;  %v19524_v2 = vld [vmem:[#allocation9_spill] sm:$0xff]  ;;  %v13626_v45 = vpop.f32.mrf.mxu0  ;;  %4404 = vmatpush.msrb.mxu3 %v7322_v31  ;;  %v19567_v31 = vld [vmem:[#allocation11_spill] sm:$0xff] }
 0x3b0   :  { %vm13556_vm0 = vmor %vm13411_vm1, %vm19502_vm8  ;;  %v307_v47 = vadd.f32 %v13472_v42, %v19524_v2  ;;  %v19533_v2 = vmov 0 }
 0x3b1   :  { %vm13564_vm2 = vmor %vm19506_vm14, %vm19505_vm13  ;;  %vm1184_vm14 = vcmp.eq.s32.totalorder %v12992_v40, 34  ;;  %19517 = vst [vmem:[#allocation169_spill] sm:$0xff] %v13601_v38 }
 0x3b2   :  { %vm13578_vm8 = vmor %vm13504_vm4, %vm1351_vm9  ;;  %vm19542_vm9 = vcmp.eq.s32.totalorder %v13438_v14, 21 }
 0x3b3   :  { %v19510_v4 = vsel %vm13578_vm8, 4294967295, %v19509_v4  ;;  %vm13586_vm13 = vmor %vm13522_vm6, %vm1016_vm10  ;;  %vm19526_vm6 = vcmp.ge.s32.totalorder %v12864_v34, 7  ;;  %vm1270_vm8 = vcmp.eq.s32.totalorder %v13300_v37, 35 }
 0x3b4   :  { %vm13597_vm4 = vmor %vm13539_vm5, %vm19514_vm15  ;;  %vm19521_vm5 = vcmp.eq.s32.totalorder %v13438_v14, 14 }
 0x3b5   :  { %vm13608_vm10 = vmxor %vm13403_vm12, %vm19468_vm11  ;;  %vm19525_vm12 = vcmp.ge.s32.totalorder %v12482_v6, 7 }
 0x3b6   :  { %v19519_v58 = vsel %vm13608_vm10, 4294967295, %v19518_v58  ;;  %vm13619_vm15 = vmor %vm13564_vm2, %vm19521_vm5  ;;  %v1773_v38 = vsel %vm19525_vm12, %v13544_v46, 0.0  ;;  %vm19529_vm2 = vnez %v19459_v26  ;;  %v1644_v26 = vsel %vm19535_vm7, %v13544_v46, 0.0 }
 0x3b7   :  { %19520 = vst [vmem:[#allocation170_spill] sm:$0xff] %v19519_v58  ;;  %vm13635_vm1 = vmand %vm19526_vm6, %vm13456_vm3  ;;  %vm19537_vm3 = vcmp.ge.s32.totalorder %v12482_v6, 7  ;;  %vm19540_vm6 = vcmp.eq.s32.totalorder %v2442_v48, 1  ;;  %vm19541_vm7 = vcmp.eq.s32.totalorder %v2879_v36, 1  ;;  %vm1103_vm10 = vcmp.eq.s32.totalorder %v13438_v14, 28  ;;  %v2734_v6 = vpop.f32.mrf.mxu3 }
 0x3b8   :  { %vm13642_vm5 = vmxor %vm19529_vm2, %vm19468_vm11  ;;  %vm19536_vm2 = vnez %v19480_v8  ;;  %v2526_v55 = vsel %vm19540_vm6, %v13544_v46, 0.0  ;;  %v2963_v9 = vsel %vm19541_vm7, %v13544_v46, 0.0  ;;  %v1561_v48 = vsel %vm13635_vm1, 1, %v17671_v61 }
 0x3b9   :  { %v19531_v0 = vsel %vm13642_vm5, 4294967295, %v19530_v0  ;;  %vm13650_vm12 = vmor %vm13586_vm13, %vm1184_vm14  ;;  %vm19538_vm14 = vcmask 261120   ;;  %vm19548_vm6 = vcmp.eq.s32.totalorder %v13115_v16, 6  ;;  %vm19552_vm1 = vcmp.eq.s32.totalorder %v13591_v44, 13 }
 0x3ba   :  { %19532 = vst [vmem:[#allocation9_spill] sm:$0xff] %v19531_v0  ;;  %v19534_v2 = vsel %vm13650_vm12, 4294967295, %v19533_v2  ;;  %vm2401_vm5 = vmand %vm19537_vm3, %vm19536_vm2  ;;  %7085 = vmatmul.msk.f32.gmra.mxu1 %vm19538_vm14, %v1773_v38 }
 0x3bb   :  { %vm19539_vm12 = vmmov %vm19538_vm14  ;;  %v2443_v36 = vsel %vm2401_vm5, 1, %v17671_v61 }
 0x3bc   :  { %7128 = vmatmul.msk.f32.gmra.mxu2 %vm19539_vm12, %v1644_v26  ;;  %vm13675_vm3 = vmor %vm13619_vm15, %vm19542_vm9  ;;  %vm849_vm9 = vcmp.eq.s32.totalorder %v13115_v16, 20  ;;  %vm19549_vm15 = vnez %v19051_v54  ;;  %v13711_v26 = vmax.f32 %v307_v47, 0.0  ;;  %v19618_v47 = vld [vmem:[#allocation15_spill] sm:$0xff] }
 0x3bd   :  { %vm19545_vm13 = vmmov %vm19539_vm12  ;;  %v2880_v38 = vsel %vm19549_vm15, 1, %v17671_v61 }
 0x3be   :  { %7172 = vmatmul.msk.f32.gmra.mxu3 %vm19545_vm13, %v2526_v55  ;;  %vm19546_vm14 = vmmov %vm19539_vm12  ;;  %vm19547_vm12 = vcmp.eq.s32.totalorder %v13115_v16, 13  ;;  %v2251_v55 = vadd.f32 %v13419_v17, %v13451_v3  ;;  %v13732_v3 = vpop.f32.mrf.mxu1  ;;  %v19561_v17 = vmov 0 }
 0x3bf   :  { %7213 = vmatmul.msk.f32.gmra.mxu0 %vm19546_vm14, %v2963_v9  ;;  %vm723_vm7 = vmor %vm19548_vm6, %vm19547_vm12  ;;  %vm19553_vm14 = vcmp.eq.s32.totalorder %v13591_v44, 6  ;;  %vm1603_vm6 = vcmp.eq.s32.totalorder %v1561_v48, 1  ;;  %v310_v48 = vadd.f32 %v13472_v42, %v19567_v31  ;;  %v13835_v9 = vpop.f32.mrf.mxu2 }
 0x3c0   :  { %vm13698_vm13 = vmor %vm13597_vm4, %vm1270_vm8  ;;  %v13730_v8 = vadd.f32 %v2734_v6, %v2251_v55  ;;  %v13752_v55 = vpop.f32.mrf.mxu0 }
 0x3c1   :  { %v19551_v11 = vsel %vm13698_vm13, 4294967295, %v19550_v11  ;;  %vm13706_vm12 = vmor %vm19553_vm14, %vm19552_vm1  ;;  %vm19576_vm14 = vcmp.ge.s32.totalorder %v12663_v43, 7  ;;  %v13831_v12 = vmax.f32 %v310_v48, 0.0  ;;  %v19604_v43 = vmov 0 }
 0x3c2   :  { %vm13722_vm4 = vmor %vm13675_vm3, %vm1103_vm10  ;;  %19560 = vst [vmem:[#allocation171_spill] sm:$0xff] %v13730_v8  ;;  %vm19564_vm3 = vcmp.eq.s32.totalorder %v13591_v44, 20  ;;  %vm19572_vm10 = vnez %v19510_v4  ;;  %v1774_v31 = vsel %vm19576_vm14, %v13711_v26, 0.0  ;;  %v1645_v8 = vsel %vm1603_vm6, %v13711_v26, 0.0 }
 0x3c3   :  { %vm13726_vm1 = vmor %vm723_vm7, %vm849_vm9  ;;  %vm19569_vm9 = vcmp.ge.s32.totalorder %v12992_v40, 7  ;;  %vm19583_vm6 = vcmp.eq.s32.totalorder %v13115_v16, 27  ;;  %19597 = vst [vmem:[#allocation173_spill] sm:$0xff] %v13831_v12 }
 0x3c4   :  { %vm13737_vm5 = vmxor %vm13556_vm0, %vm19468_vm11  ;;  %vm19568_vm0 = vnez %v19519_v58 }
 0x3c5   :  { %v19562_v17 = vsel %vm13737_vm5, 4294967295, %v19561_v17  ;;  %vm13746_vm7 = vmor %vm13706_vm12, %vm19564_vm3  ;;  %vm19579_vm5 = vcmask 261120   ;;  %vm19581_vm3 = vcmp.eq.s32.totalorder %v2443_v36, 1  ;;  %v19624_v36 = vmov 0 }
 0x3c6   :  { %19563 = vst [vmem:[#allocation172_spill] sm:$0xff] %v19562_v17  ;;  %vm13758_vm8 = vmand %vm19569_vm9, %vm19568_vm0  ;;  %vm19577_vm9 = vnez %v19531_v0  ;;  %vm1271_vm0 = vcmp.eq.s32.totalorder %v13438_v14, 35  ;;  %7086 = vmatmul.msk.f32.gmra.mxu1 %vm19579_vm5, %v1774_v31  ;;  %v2527_v4 = vsel %vm19581_vm3, %v13711_v26, 0.0  ;;  %vm19588_vm3 = vnez %v19534_v2  ;;  %v13856_v48 = vpop.f32.mrf.mxu1 }
 0x3c7   :  { %vm13765_vm12 = vmxor %vm19572_vm10, %vm19468_vm11  ;;  %v19592_v2 = vmov 0  ;;  %v2254_v31 = vadd.f32 %v13571_v28, %v13603_v56  ;;  %v313_v0 = vadd.f32 %v13472_v42, %v19618_v47  ;;  %v19641_v28 = vmov 0 }
 0x3c8   :  { %v19574_v62 = vsel %vm13765_vm12, 4294967295, %v19573_v62  ;;  %vm19578_vm2 = vmmov %vm19576_vm14  ;;  %vm19582_vm14 = vcmp.eq.s32.totalorder %v2880_v38, 1 }
 0x3c9   :  { %19575 = vst [vmem:[#allocation11_spill] sm:$0xff] %v19574_v62  ;;  %vm2402_vm15 = vmand %vm19578_vm2, %vm19577_vm9  ;;  %v2964_v54 = vsel %vm19582_vm14, %v13711_v26, 0.0  ;;  %vm1185_vm2 = vcmp.eq.s32.totalorder %v13115_v16, 34 }
 0x3ca   :  { %vm19580_vm12 = vmmov %vm19579_vm5  ;;  %7214 = vmatmul.msk.f32.gmra.mxu0 %vm19579_vm5, %v2964_v54  ;;  %v2444_v38 = vsel %vm2402_vm15, 1, %v17671_v61  ;;  %vm19603_vm15 = vnez %v19551_v11  ;;  %v2257_v11 = vadd.f32 %v13715_v50, %v13732_v3  ;;  %v19646_v3 = vmov 0 }
 0x3cb   :  { %7129 = vmatmul.msk.f32.gmra.mxu2 %vm19580_vm12, %v1645_v8  ;;  %vm13790_vm13 = vmor %vm13726_vm1, %vm19583_vm6  ;;  %v1562_v8 = vsel %vm13758_vm8, 1, %v17671_v61  ;;  %vm19587_vm12 = vcmp.eq.s32.totalorder %v12992_v40, 41  ;;  %vm516_vm1 = vcmp.eq.s32.totalorder %v13591_v44, 0  ;;  %vm600_vm6 = vcmp.eq.s32.totalorder %v13591_v44, 7 }
 0x3cc   :  { %vm19586_vm10 = vmmov %vm19579_vm5  ;;  %vm19594_vm5 = vcmp.eq.s32.totalorder %v13591_v44, 27 }
 0x3cd   :  { %7173 = vmatmul.msk.f32.gmra.mxu3 %vm19586_vm10, %v2527_v4  ;;  %vm13804_vm14 = vmor %vm19588_vm3, %vm19587_vm12  ;;  %vm19591_vm10 = vnez %v19107_v18  ;;  %v2737_v4 = vpop.f32.mrf.mxu3  ;;  %vm19621_vm3 = vnez %v19574_v62 }
 0x3ce   :  { %v2881_v54 = vsel %vm19591_vm10, 1, %v17671_v61  ;;  %vm13818_vm8 = vmor %vm13722_vm4, %vm1271_vm0  ;;  %v13854_v56 = vadd.f32 %v2737_v4, %v2254_v31  ;;  %v13874_v4 = vpop.f32.mrf.mxu0  ;;  %vm19623_vm10 = vcmp.eq.s32.totalorder %v13115_v16, 41  ;;  %v13961_v50 = vpop.f32.mrf.mxu1  ;;  %v19674_v31 = vmov 0 }
 0x3cf   :  { %v19593_v2 = vsel %vm13818_vm8, 4294967295, %v19592_v2  ;;  %vm13826_vm12 = vmor %vm13746_vm7, %vm19594_vm5  ;;  %19610 = vst [vmem:[#allocation176_spill] sm:$0xff] %v13874_v4 }
 0x3d0   :  { %vm13842_vm0 = vmor %vm13790_vm13, %vm1185_vm2  ;;  %19602 = vst [vmem:[#allocation174_spill] sm:$0xff] %v13854_v56  ;;  %vm19611_vm2 = vnez %v19562_v17  ;;  %vm19612_vm13 = vcmp.ge.s32.totalorder %v13115_v16, 7  ;;  %v19615_v56 = vmov 0 }
 0x3d1   :  { %vm13849_vm5 = vmor %vm516_vm1, %vm600_vm6  ;;  %vm19607_vm6 = vcmp.eq.s32.totalorder %v13591_v44, 34 }
 0x3d2   :  { %vm13861_vm7 = vmxor %vm19603_vm15, %vm19468_vm11 }
 0x3d3   :  { %v19605_v43 = vsel %vm13861_vm7, 4294967295, %v19604_v43  ;;  %vm13870_vm4 = vmor %vm13826_vm12, %vm19607_vm6  ;;  %vm19619_vm6 = vcmp.ge.s32.totalorder %v12864_v34, 7  ;;  %vm19629_vm7 = vcmp.eq.s32.totalorder %v2881_v54, 1  ;;  %v7275_v34 = vld [vmem:[%s17061_s3 + $0xb0] sm:$0xff] }
 0x3d4   :  { %19606 = vst [vmem:[#allocation175_spill] sm:$0xff] %v19605_v43  ;;  %vm13880_vm15 = vmand %vm19612_vm13, %vm19611_vm2  ;;  %v1775_v18 = vsel %vm19619_vm6, %v13831_v12, 0.0  ;;  %vm19620_vm13 = vcmp.eq.s32.totalorder %v1562_v8, 1  ;;  %vm768_vm2 = vcmp.eq.s32.totalorder %v13591_v44, 14  ;;  %v2965_v47 = vsel %vm19629_vm7, %v13831_v12, 0.0  ;;  %3879 = vmatpush.msrb.mxu2 %v7275_v34 }
 0x3d5   :  { %vm13887_vm1 = vmxor %vm13804_vm14, %vm19468_vm11  ;;  %v1646_v4 = vsel %vm19620_vm13, %v13831_v12, 0.0  ;;  %vm19628_vm13 = vcmp.eq.s32.totalorder %v2444_v38, 1 }
 0x3d6   :  { %v19616_v56 = vsel %vm13887_vm1, 4294967295, %v19615_v56  ;;  %vm19622_vm9 = vmmov %vm19619_vm6  ;;  %vm19626_vm1 = vcmask 261120   ;;  %v2528_v8 = vsel %vm19628_vm13, %v13831_v12, 0.0  ;;  %vm19645_vm13 = vnez %v19593_v2 }
 0x3d7   :  { %19617 = vst [vmem:[#allocation177_spill] sm:$0xff] %v19616_v56  ;;  %vm2403_vm14 = vmand %vm19622_vm9, %vm19621_vm3  ;;  %7087 = vmatmul.msk.f32.gmra.mxu1 %vm19626_vm1, %v1775_v18  ;;  %vm19630_vm9 = vcmp.eq.s32.totalorder %v13300_v37, 13  ;;  %vm19631_vm3 = vcmp.eq.s32.totalorder %v13300_v37, 6  ;;  %v1563_v18 = vsel %vm13880_vm15, 1, %v17671_v61 }
 0x3d8   :  { %vm13907_vm12 = vmor %vm13842_vm0, %vm19623_vm10  ;;  %vm850_vm0 = vcmp.eq.s32.totalorder %v13300_v37, 20  ;;  %v2445_v38 = vsel %vm2403_vm14, 1, %v17671_v61  ;;  %vm1605_vm15 = vcmp.eq.s32.totalorder %v1563_v18, 1 }
 0x3d9   :  { %v19625_v36 = vsel %vm13907_vm12, 4294967295, %v19624_v36  ;;  %vm19627_vm6 = vmmov %vm19626_vm1 }
 0x3da   :  { %7130 = vmatmul.msk.f32.gmra.mxu2 %vm19627_vm6, %v1646_v4  ;;  %vm724_vm10 = vmor %vm19631_vm3, %vm19630_vm9  ;;  %vm19635_vm3 = vnez %v19162_v29  ;;  %v13942_v4 = vmax.f32 %v313_v0, 0.0 }
 0x3db   :  { %vm19632_vm12 = vmmov %vm19626_vm1  ;;  %v2882_v54 = vsel %vm19635_vm3, 1, %v17671_v61 }
 0x3dc   :  { %7174 = vmatmul.msk.f32.gmra.mxu3 %vm19632_vm12, %v2528_v8  ;;  %vm19633_vm8 = vmmov %vm19626_vm1  ;;  %vm19634_vm1 = vcmp.eq.s32.totalorder %v13591_v44, 41  ;;  %19638 = vst [vmem:[#allocation15_spill] sm:$0xff] %v13942_v4  ;;  %v13946_v8 = vpop.f32.mrf.mxu2  ;;  %v1647_v29 = vsel %vm1605_vm15, %v13942_v4, 0.0  ;;  %vm19664_vm15 = vcmp.eq.s32.totalorder %v13591_v44, 21 }
 0x3dd   :  { %7215 = vmatmul.msk.f32.gmra.mxu0 %vm19633_vm8, %v2965_v47  ;;  %vm1398_vm7 = vmor %vm13870_vm4, %vm19634_vm1  ;;  %vm17386_vm8 = vcmp.ge.s32.totalorder %v13300_v37, 7  ;;  %v2740_v47 = vpop.f32.mrf.mxu3  ;;  %vm19653_vm1 = vnez %v19605_v43 }
 0x3de   :  { %vm13938_vm12 = vmor %vm13849_vm5, %vm768_vm2  ;;  %vm17383_vm2 = vcmp.lt.s32.totalorder %v13591_v44, 35  ;;  %v13959_v0 = vadd.f32 %v2740_v47, %v2257_v11  ;;  %v19649_v11 = vmov 0  ;;  %v13982_v47 = vpop.f32.mrf.mxu0 }
 0x3df   :  { %vm13949_vm4 = vmor %vm724_vm10, %vm850_vm0  ;;  %19652 = vst [vmem:[#allocation182_spill] sm:$0xff] %v13982_v47  ;;  %vm19658_vm10 = vnez %v19616_v56  ;;  %v7274_v47 = vld [vmem:[%s17061_s3 + $0xa8] sm:$0xff] }
 0x3e0   :  { %vm13954_vm5 = vmxor %vm1398_vm7, %vm19468_vm11  ;;  %19644 = vst [vmem:[#allocation179_spill] sm:$0xff] %v13959_v0  ;;  %v19656_v0 = vld [vmem:[#allocation17_spill] sm:$0xff]  ;;  %3880 = vmatpush.msrb.mxu2 %v7274_v47 }
 0x3e1   :  { %v19642_v28 = vsel %vm13954_vm5, 4294967295, %v19641_v28  ;;  %vm13966_vm9 = vmxor %vm19645_vm13, %vm19468_vm11  ;;  %v316_v62 = vadd.f32 %v13472_v42, %v19656_v0  ;;  %vm19660_vm13 = vcmask 261120   ;;  %v19701_v0 = vmov 0 }
 0x3e2   :  { %19643 = vst [vmem:[#allocation178_spill] sm:$0xff] %v19642_v28  ;;  %v19647_v3 = vsel %vm13966_vm9, 4294967295, %v19646_v3  ;;  %vm13978_vm0 = vmand %vm17383_vm2, %vm13954_vm5  ;;  %vm19657_vm2 = vcmp.ge.s32.totalorder %v12992_v40, 7  ;;  %vm851_vm5 = vcmp.eq.s32.totalorder %v13438_v14, 20  ;;  %v2263_v40 = vadd.f32 %v13946_v8, %v13961_v50 }
 0x3e3   :  { %19648 = vst [vmem:[#allocation180_spill] sm:$0xff] %v19647_v3  ;;  %v19650_v11 = vsel %vm13978_vm0, 4294967295, %v19649_v11  ;;  %vm13988_vm7 = vmand %vm17386_vm8, %vm19653_vm1  ;;  %vm19662_vm0 = vcmp.eq.s32.totalorder %v2445_v38, 1  ;;  %v14052_v2 = vmax.f32 %v316_v62, 0.0  ;;  %v19685_v38 = vld [vmem:[#allocation19_spill] sm:$0xff] }
 0x3e4   :  { %19651 = vst [vmem:[#allocation181_spill] sm:$0xff] %v19650_v11  ;;  %v1776_v11 = vsel %vm19657_vm2, %v13942_v4, 0.0  ;;  %vm19659_vm8 = vmmov %vm19657_vm2  ;;  %v2529_v34 = vsel %vm19662_vm0, %v13942_v4, 0.0  ;;  %vm19663_vm2 = vcmp.eq.s32.totalorder %v2882_v54, 1  ;;  %v7273_v54 = vld [vmem:[%s17061_s3 + $0xa0] sm:$0xff] }
 0x3e5   :  { %vm2404_vm6 = vmand %vm19659_vm8, %vm19658_vm10  ;;  %7088 = vmatmul.msk.f32.gmra.mxu1 %vm19660_vm13, %v1776_v11  ;;  %v2966_v18 = vsel %vm19663_vm2, %v13942_v4, 0.0  ;;  %vm1104_vm8 = vcmp.eq.s32.totalorder %v13591_v44, 28  ;;  %v2743_v47 = vpop.f32.mrf.mxu3  ;;  %3881 = vmatpush.msrb.mxu2 %v7273_v54  ;;  %v319_v54 = vadd.f32 %v13472_v42, %v19685_v38 }
 0x3e6   :  { %vm19661_vm14 = vmmov %vm19660_vm13  ;;  %v2446_v6 = vsel %vm2404_vm6, 1, %v17671_v61 }
 0x3e7   :  { %7131 = vmatmul.msk.f32.gmra.mxu2 %vm19661_vm14, %v1647_v29  ;;  %vm14017_vm3 = vmor %vm13938_vm12, %vm19664_vm15  ;;  %v1564_v29 = vsel %vm13988_vm7, 1, %v17671_v61  ;;  %vm19669_vm14 = vcmp.eq.s32.totalorder %v13300_v37, 27  ;;  %vm1186_vm12 = vcmp.eq.s32.totalorder %v13300_v37, 34  ;;  %vm19673_vm7 = vnez %v19625_v36  ;;  %v7414_v36 = vld [vmem:[%s17061_s3 + $0x118] sm:$0xff] }
 0x3e8   :  { %vm19667_vm10 = vmmov %vm19660_vm13  ;;  %vm683_vm15 = vcmp.eq.s32.totalorder %v13438_v14, 13  ;;  %vm2488_vm6 = vcmp.eq.s32.totalorder %v2446_v6, 1  ;;  %5330 = vmatpush.msra.mxu1 %v7414_v36  ;;  %v14146_v62 = vmax.f32 %v319_v54, 0.0  ;;  %v19704_v54 = vmov 0  ;;  %v7320_v36 = vld [vmem:[%s17061_s3 + $0xc8] sm:$0xff] }
 0x3e9   :  { %7175 = vmatmul.msk.f32.gmra.mxu3 %vm19667_vm10, %v2529_v34  ;;  %vm19668_vm13 = vmmov %vm19667_vm10  ;;  %vm19672_vm10 = vnez %v19213_v1  ;;  %v2260_v34 = vadd.f32 %v13835_v9, %v13856_v48  ;;  %v14077_v48 = vpop.f32.mrf.mxu1 }
 0x3ea   :  { %7216 = vmatmul.msk.f32.gmra.mxu0 %vm19668_vm13, %v2966_v18  ;;  %vm14031_vm0 = vmor %vm13949_vm4, %vm19669_vm14  ;;  %v2883_v11 = vsel %vm19672_vm10, 1, %v17671_v61  ;;  %vm557_vm4 = vcmp.eq.s32.totalorder %v13438_v14, 6  ;;  %v14056_v18 = vpop.f32.mrf.mxu2  ;;  %vm1606_vm14 = vcmp.eq.s32.totalorder %v1564_v29, 1  ;;  %v14088_v29 = vpop.f32.mrf.mxu0 }
 0x3eb   :  { %vm14046_vm2 = vmxor %vm19673_vm7, %vm19468_vm11  ;;  %v14075_v9 = vadd.f32 %v2743_v47, %v2260_v34  ;;  %v7368_v34 = vld [vmem:[%s17061_s3 + $0xf8] sm:$0xff]  ;;  %v2530_v47 = vsel %vm2488_vm6, %v14052_v2, 0.0 }
 0x3ec   :  { %v19675_v31 = vsel %vm14046_vm2, 4294967295, %v19674_v31  ;;  %vm14063_vm13 = vmor %vm14017_vm3, %vm1104_vm8  ;;  %vm2925_vm3 = vcmp.eq.s32.totalorder %v2883_v11, 1  ;;  %vm19686_vm8 = vcmp.ge.s32.totalorder %v13115_v16, 7  ;;  %v1648_v11 = vsel %vm1606_vm14, %v14052_v2, 0.0  ;;  %4846 = vmatpush.msra.mxu0 %v7368_v34  ;;  %v7321_v34 = vld [vmem:[%s17061_s3 + $0xd0] sm:$0xff] }
 0x3ed   :  { %19676 = vst [vmem:[#allocation17_spill] sm:$0xff] %v19675_v31  ;;  %vm14071_vm7 = vmor %vm14031_vm0, %vm1186_vm12  ;;  %vm19684_vm0 = vcmp.ge.s32.totalorder %v13438_v14, 7  ;;  %v1777_v6 = vsel %vm19686_vm8, %v14052_v2, 0.0  ;;  %v2967_v38 = vsel %vm2925_vm3, %v14052_v2, 0.0  ;;  %vm19690_vm14 = vcmp.eq.s32.totalorder %v13591_v44, 35  ;;  %v2746_v56 = vpop.f32.mrf.mxu3  ;;  %4405 = vmatpush.msrb.mxu3 %v7321_v34  ;;  %v7319_v34 = vld [vmem:[%s17061_s3 + $0xc0] sm:$0xff] }
 0x3ee   :  { %19681 = vst [vmem:[#allocation183_spill] sm:$0xff] %v14075_v9  ;;  %vm14084_vm10 = vmor %vm557_vm4, %vm683_vm15  ;;  %vm17399_vm3 = vcmp.ge.s32.totalorder %v13591_v44, 7  ;;  %v14165_v8 = vadd.f32 %v2746_v56, %v2263_v40  ;;  %v19710_v40 = vld [vmem:[#allocation22_spill] sm:$0xff] }
 0x3ef   :  { %vm1523_vm12 = vmand %vm19684_vm0, %vm13966_vm9  ;;  %vm19688_vm0 = vcmask 261120   ;;  %4406 = vmatpush.msrb.mxu3 %v7320_v36  ;;  %v19720_v36 = vmov 0 }
 0x3f0   :  { %vm19687_vm4 = vmmov %vm19686_vm8  ;;  %7089 = vmatmul.msk.f32.gmra.mxu1 %vm19688_vm0, %v1777_v6  ;;  %v1565_v6 = vsel %vm1523_vm12, 1, %v17671_v61  ;;  %19707 = vst [vmem:[#allocation185_spill] sm:$0xff] %v14165_v8 }
 0x3f1   :  { %vm2405_vm15 = vmand %vm19687_vm4, %vm14046_vm2  ;;  %v1999_v50 = vpop.f32.mrf.mxu1  ;;  %4407 = vmatpush.msrb.mxu3 %v7319_v34  ;;  %v19729_v34 = vld [vmem:[#allocation27_spill] sm:$0xff] }
 0x3f2   :  { %vm19689_vm1 = vmmov %vm19688_vm0  ;;  %v2447_v16 = vsel %vm2405_vm15, 1, %v17671_v61  ;;  %v2268_v31 = vpop.f32.mrf.mxu2 }
 0x3f3   :  { %7132 = vmatmul.msk.f32.gmra.mxu2 %vm19689_vm1, %v1648_v11  ;;  %vm14117_vm8 = vmor %vm14063_vm13, %vm19690_vm14  ;;  %vm19695_vm1 = vcmp.eq.s32.totalorder %v13300_v37, 41  ;;  %vm19698_vm13 = vnez %v19256_v30  ;;  %vm2489_vm15 = vcmp.eq.s32.totalorder %v2447_v16, 1  ;;  %v322_v16 = vadd.f32 %v13472_v42, %v19710_v40 }
 0x3f4   :  { %vm19693_vm4 = vmmov %vm19688_vm0  ;;  %v2531_v42 = vsel %vm2489_vm15, %v14146_v62, 0.0 }
 0x3f5   :  { %7176 = vmatmul.msk.f32.gmra.mxu3 %vm19693_vm4, %v2530_v47  ;;  %vm19694_vm2 = vmmov %vm19688_vm0  ;;  %v2884_v47 = vsel %vm19698_vm13, 1, %v17671_v61  ;;  %v14215_v9 = vmax.f32 %v322_v16, 0.0 }
 0x3f6   :  { %7217 = vmatmul.msk.f32.gmra.mxu0 %vm19694_vm2, %v2967_v38  ;;  %vm14128_vm6 = vmor %vm14071_vm7, %vm19695_vm1  ;;  %vm1019_vm7 = vcmp.eq.s32.totalorder %v13438_v14, 27  ;;  %vm2926_vm0 = vcmp.eq.s32.totalorder %v2884_v47, 1  ;;  %vm19711_vm1 = vcmp.ge.s32.totalorder %v13300_v37, 7 }
 0x3f7   :  { %vm14141_vm2 = vmor %vm14084_vm10, %vm851_vm5  ;;  %vm1607_vm5 = vcmp.eq.s32.totalorder %v1565_v6, 1  ;;  %v14179_v6 = vpop.f32.mrf.mxu0  ;;  %v1778_v56 = vsel %vm19711_vm1, %v14146_v62, 0.0  ;;  %v2968_v47 = vsel %vm2926_vm0, %v14146_v62, 0.0 }
 0x3f8   :  { %vm14154_vm12 = vmxor %vm14117_vm8, %vm19468_vm11  ;;  %vm1187_vm8 = vcmp.eq.s32.totalorder %v13438_v14, 34  ;;  %v1649_v11 = vsel %vm1607_vm5, %v14146_v62, 0.0 }
 0x3f9   :  { %v19702_v0 = vsel %vm14154_vm12, 4294967295, %v19701_v0  ;;  %vm14161_vm10 = vmxor %vm14128_vm6, %vm19468_vm11  ;;  %v2002_v37 = vpop.f32.mrf.mxu1 }
 0x3fa   :  { %19703 = vst [vmem:[#allocation19_spill] sm:$0xff] %v19702_v0  ;;  %v19705_v54 = vsel %vm14161_vm10, 4294967295, %v19704_v54  ;;  %vm14171_vm14 = vmor %vm14141_vm2, %vm1019_vm7  ;;  %vm19713_vm7 = vcmask 261120  }
 0x3fb   :  { %19706 = vst [vmem:[#allocation184_spill] sm:$0xff] %v19705_v54  ;;  %vm1524_vm4 = vmand %vm17399_vm3, %vm14154_vm12  ;;  %7090 = vmatmul.msk.f32.gmra.mxu1 %vm19713_vm7, %v1778_v56 }
 0x3fc   :  { %vm19712_vm6 = vmmov %vm19711_vm1  ;;  %vm1355_vm1 = vcmp.eq.s32.totalorder %v13438_v14, 41  ;;  %v1566_v38 = vsel %vm1524_vm4, 1, %v17671_v61  ;;  %vm19723_vm4 = vcmp.ge.s32.totalorder %v13438_v14, 7 }
 0x3fd   :  { %vm2406_vm2 = vmand %vm19712_vm6, %vm14161_vm10  ;;  %vm1608_vm15 = vcmp.eq.s32.totalorder %v1566_v38, 1 }
 0x3fe   :  { %vm19714_vm3 = vmmov %vm19713_vm7  ;;  %v2448_v40 = vsel %vm2406_vm2, 1, %v17671_v61 }
 0x3ff   :  { %7133 = vmatmul.msk.f32.gmra.mxu2 %vm19714_vm3, %v1649_v11  ;;  %vm1229_vm5 = vmor %vm14171_vm14, %vm1187_vm8  ;;  %v2266_v11 = vadd.f32 %v14056_v18, %v14077_v48  ;;  %vm2490_vm0 = vcmp.eq.s32.totalorder %v2448_v40, 1  ;;  %v14221_v54 = vpop.f32.mrf.mxu0  ;;  %v1779_v18 = vsel %vm19723_vm4, %v14215_v9, 0.0  ;;  %v1650_v48 = vsel %vm1608_vm15, %v14215_v9, 0.0 }
 0x400   :  { %vm19715_vm13 = vmmov %vm19714_vm3  ;;  %19719 = vst [vmem:[#allocation186_spill] sm:$0xff] %v14221_v54  ;;  %v2532_v16 = vsel %vm2490_vm0, %v14215_v9, 0.0  ;;  %vm19731_vm15 = vnez %v19360_v24  ;;  %v20173_v24 = vld [vmem:[#allocation177_spill] sm:$0xff] }
 0x401   :  { %7177 = vmatmul.msk.f32.gmra.mxu3 %vm19715_vm13, %v2531_v42  ;;  %vm19716_vm6 = vmmov %vm19714_vm3  ;;  %vm19717_vm3 = vnez %v19305_v33  ;;  %v2271_v42 = vpop.f32.mrf.mxu2  ;;  %v2005_v54 = vpop.f32.mrf.mxu1  ;;  %v20163_v33 = vld [vmem:[#allocation11_spill] sm:$0xff] }
 0x402   :  { %7218 = vmatmul.msk.f32.gmra.mxu0 %vm19716_vm6, %v2968_v47  ;;  %v2885_v56 = vsel %vm19717_vm3, 1, %v17671_v61  ;;  %vm1397_vm13 = vmor %vm1229_vm5, %vm1355_vm1  ;;  %v2749_v47 = vpop.f32.mrf.mxu3 }
 0x403   :  { %v14219_v8 = vadd.f32 %v2749_v47, %v2266_v11  ;;  %vm2927_vm14 = vcmp.eq.s32.totalorder %v2885_v56, 1  ;;  %vm14224_vm8 = vmxor %vm1397_vm13, %vm19468_vm11  ;;  %vm19730_vm13 = vnez %v19729_v34  ;;  %v2886_v11 = vsel %vm19731_vm15, 1, %v17671_v61 }
 0x404   :  { %v19721_v36 = vsel %vm14224_vm8, 4294967295, %v19720_v36  ;;  %vm19724_vm2 = vmmov %vm19723_vm4  ;;  %v2969_v38 = vsel %vm2927_vm14, %v14215_v9, 0.0  ;;  %v3609_v40 = vsel %vm19730_vm13, 1, %v17671_v61  ;;  %v2269_v47 = vadd.f32 %v2268_v31, %v1999_v50 }
 0x405   :  { %19718 = vst [vmem:[#allocation22_spill] sm:$0xff] %v14219_v8  ;;  %vm2407_vm7 = vmand %vm19724_vm2, %vm14224_vm8  ;;  %vm3651_vm0 = vcmp.eq.s32.totalorder %v3609_v40, 1  ;;  %vm2928_vm4 = vcmp.eq.s32.totalorder %v2886_v11, 1  ;;  %vm19735_vm2 = vcmp.ge.s32.totalorder %v13591_v44, 7  ;;  %v19741_v40 = vld [vmem:[#allocation31_spill] sm:$0xff] }
 0x406   :  { %19722 = vst [vmem:[#allocation187_spill] sm:$0xff] %v19721_v36  ;;  %vm19725_vm5 = vmmov %vm19716_vm6  ;;  %v2449_v56 = vsel %vm2407_vm7, 1, %v17671_v61  ;;  %v3693_v14 = vsel %vm3651_vm0, %v9723_v39, 0.0  ;;  %vm19736_vm7 = vnez %v19642_v28  ;;  %vm19742_vm0 = vnez %v19741_v40  ;;  %v19747_v44 = vld [vmem:[#allocation23_spill] sm:$0xff] }
 0x407   :  { %7091 = vmatmul.msk.f32.gmra.mxu1 %vm19725_vm5, %v1779_v18  ;;  %vm19726_vm1 = vmmov %vm19725_vm5  ;;  %vm2491_vm14 = vcmp.eq.s32.totalorder %v2449_v56, 1  ;;  %v3610_v56 = vsel %vm19742_vm0, 1, %v17671_v61 }
 0x408   :  { %7134 = vmatmul.msk.f32.gmra.mxu2 %vm19726_vm1, %v1650_v48  ;;  %vm19727_vm11 = vmmov %vm19726_vm1 }
 0x409   :  { %7178 = vmatmul.msk.f32.gmra.mxu3 %vm19727_vm11, %v2532_v16  ;;  %vm19728_vm6 = vmmov %vm19726_vm1  ;;  %v2274_v18 = vpop.f32.mrf.mxu2  ;;  %v14251_v16 = vpop.f32.mrf.mxu0 }
 0x40a   :  { %7219 = vmatmul.msk.f32.gmra.mxu0 %vm19728_vm6, %v2969_v38  ;;  %v2752_v48 = vpop.f32.mrf.mxu3  ;;  %19733 = vst [vmem:[#allocation189_spill] sm:$0xff] %v14251_v16  ;;  %v19734_v38 = vld [vmem:[#allocation26_spill] sm:$0xff]  ;;  %vm19737_vm5 = vmmov %vm19735_vm2 }
 0x40b   :  { %v14249_v8 = vadd.f32 %v2752_v48, %v2269_v47  ;;  %v1780_v34 = vsel %vm19735_vm2, %v19734_v38, 0.0  ;;  %vm2408_vm1 = vmand %vm19737_vm5, %vm19736_vm7  ;;  %v2533_v31 = vsel %vm2491_vm14, %v19734_v38, 0.0  ;;  %v2970_v50 = vsel %vm2928_vm4, %v19734_v38, 0.0 }
 0x40c   :  { %vm19738_vm11 = vmmov %vm19728_vm6  ;;  %v2450_v11 = vsel %vm2408_vm1, 1, %v17671_v61  ;;  %vm19743_vm2 = vnez %v19470_v41  ;;  %v2272_v47 = vadd.f32 %v2271_v42, %v2002_v37  ;;  %vm3652_vm4 = vcmp.eq.s32.totalorder %v3610_v56, 1  ;;  %v19749_v37 = vld [vmem:[#allocation30_spill] sm:$0xff]  ;;  %v19809_v41 = vld [vmem:[#allocation36_spill] sm:$0xff] }
 0x40d   :  { %19732 = vst [vmem:[#allocation188_spill] sm:$0xff] %v14249_v8  ;;  %vm19739_vm13 = vmmov %vm19728_vm6  ;;  %v19744_v8 = vld [vmem:[#allocation13_spill] sm:$0xff]  ;;  %v3694_v40 = vsel %vm3652_vm4, %v9857_v20, 0.0  ;;  %vm19748_vm5 = vnez %v19747_v44 }
 0x40e   :  { %vm19740_vm8 = vmmov %vm19728_vm6  ;;  %vm17411_vm14 = vcmp.lt.s32.totalorder %v19744_v8, 35 }
 0x40f   :  { %7092 = vmatmul.msk.f32.gmra.mxu1 %vm19738_vm11, %v1780_v34  ;;  %v2887_v34 = vsel %vm19743_vm2, 1, %v17671_v61  ;;  %vm4093_vm1 = vmand %vm17411_vm14, %vm19748_vm5  ;;  %vm19755_vm5 = vnez %v19519_v58  ;;  %v19783_v58 = vld [vmem:[#allocation29_spill] sm:$0xff] }
 0x410   :  { %7277 = vmatmul.msk.f32.vlgmr.msrb.gmra.mxu2 %vm19728_vm6, %v3693_v14  ;;  %vm19750_vm11 = vmmov %vm19728_vm6  ;;  %v2888_v56 = vsel %vm19755_vm5, 1, %v17671_v61 }
 0x411   :  { %7179 = vmatmul.msk.f32.gmra.mxu3 %vm19739_vm13, %v2533_v31  ;;  %v2277_v48 = vpop.f32.mrf.mxu2  ;;  %v2008_v31 = vpop.f32.mrf.mxu1  ;;  %vm2929_vm13 = vcmp.eq.s32.totalorder %v2887_v34, 1  ;;  %vm19751_vm0 = vmmov %vm19728_vm6  ;;  %v2275_v34 = vadd.f32 %v2274_v18, %v2005_v54  ;;  %v19760_v54 = vld [vmem:[#allocation34_spill] sm:$0xff] }
 0x412   :  { %7220 = vmatmul.msk.f32.gmra.mxu0 %vm19740_vm8, %v2970_v50  ;;  %v2755_v16 = vpop.f32.mrf.mxu3  ;;  %vm2492_vm8 = vcmp.eq.s32.totalorder %v2450_v11, 1  ;;  %v14277_v50 = vpop.f32.mrf.mxu0  ;;  %v2971_v28 = vsel %vm2929_vm13, %v19749_v37, 0.0  ;;  %vm19752_vm7 = vmmov %vm19751_vm0  ;;  %v4135_v11 = vsel %vm4093_vm1, 1, %v17671_v61 }
 0x413   :  { %v14275_v14 = vadd.f32 %v2755_v16, %v2272_v47  ;;  %19746 = vst [vmem:[#allocation13_spill] sm:$0xff] %v14277_v50  ;;  %v2534_v42 = vsel %vm2492_vm8, %v19749_v37, 0.0  ;;  %v19753_v16 = vld [vmem:[#allocation35_spill] sm:$0xff]  ;;  %v19756_v50 = vld [vmem:[#allocation10_spill] sm:$0xff]  ;;  %vm19761_vm14 = vmmov %vm19728_vm6 }
 0x414   :  { %vm19754_vm4 = vnez %v19753_v16  ;;  %vm17418_vm13 = vcmp.lt.s32.totalorder %v19756_v50, 35 }
 0x415   :  { %19745 = vst [vmem:[#allocation26_spill] sm:$0xff] %v14275_v14  ;;  %v3611_v44 = vsel %vm19754_vm4, 1, %v17671_v61  ;;  %vm19762_vm4 = vmmov %vm19728_vm6 }
 0x416   :  { %vm3653_vm8 = vcmp.eq.s32.totalorder %v3611_v44, 1  ;;  %vm19763_vm10 = vmmov %vm19762_vm4  ;;  %v19764_v44 = vld [vmem:[#allocation39_spill] sm:$0xff] }
 0x417   :  { %7231 = vmatmul.msk.f32.vlgmr.msrb.gmra.mxu1 %vm19750_vm11, %v9583_v23  ;;  %v3695_v16 = vsel %vm3653_vm8, %v9997_v15, 0.0  ;;  %vm19759_vm11 = vnez %v17601_v13  ;;  %vm19765_vm8 = vnez %v19764_v44  ;;  %v19782_v23 = vld [vmem:[#allocation77_spill] sm:$0xff] }
 0x418   :  { %7278 = vmatmul.msk.f32.gmra.mxu2 %vm19728_vm6, %v3694_v40  ;;  %vm4094_vm1 = vmand %vm17418_vm13, %vm19759_vm11  ;;  %v3612_v13 = vsel %vm19765_vm8, 1, %v17671_v61  ;;  %vm19766_vm11 = vnez %v19562_v17 }
 0x419   :  { %7180 = vmatmul.msk.f32.gmra.mxu3 %vm19751_vm0, %v2534_v42  ;;  %v2280_v47 = vpop.f32.mrf.mxu2  ;;  %v2011_v42 = vpop.f32.mrf.mxu1  ;;  %vm4177_vm0 = vcmp.eq.s32.totalorder %v4135_v11, 1  ;;  %v4136_v11 = vsel %vm4094_vm1, 1, %v17671_v61  ;;  %vm19773_vm13 = vmmov %vm19728_vm6 }
 0x41a   :  { %7221 = vmatmul.msk.f32.gmra.mxu0 %vm19752_vm7, %v2971_v28  ;;  %v2758_v14 = vpop.f32.mrf.mxu3  ;;  %vm2930_vm7 = vcmp.eq.s32.totalorder %v2888_v56, 1  ;;  %v14301_v28 = vpop.f32.mrf.mxu0  ;;  %v2889_v56 = vsel %vm19766_vm11, 1, %v17671_v61  ;;  %vm19774_vm8 = vmmov %vm19728_vm6 }
 0x41b   :  { %v14299_v40 = vadd.f32 %v2758_v14, %v2275_v34  ;;  %19758 = vst [vmem:[#allocation30_spill] sm:$0xff] %v14301_v28  ;;  %v2972_v18 = vsel %vm2930_vm7, %v19760_v54, 0.0  ;;  %v4219_v14 = vsel %vm4177_vm0, %v10408_v59, 0.0  ;;  %v2278_v34 = vadd.f32 %v2277_v48, %v2008_v31  ;;  %v19770_v48 = vld [vmem:[#allocation25_spill] sm:$0xff]  ;;  %v7366_v31 = vld [vmem:[%s17061_s3 + $0xe8] sm:$0xff] }
 0x41c   :  { %vm19771_vm0 = vnez %v19770_v48 }
 0x41d   :  { %19757 = vst [vmem:[#allocation23_spill] sm:$0xff] %v14299_v40 }
 0x41f   :  { %7232 = vmatmul.msk.f32.gmra.mxu1 %vm19728_vm6, %v9723_v39 }
 0x420   :  { %7279 = vmatmul.msk.f32.gmra.mxu2 %vm19761_vm14, %v3695_v16  ;;  %vm3654_vm14 = vcmp.eq.s32.totalorder %v3612_v13, 1  ;;  %v19767_v16 = vld [vmem:[#allocation12_spill] sm:$0xff] }
 0x421   :  { %7323 = vmatmul.msk.f32.vlgmr.msrb.gmra.mxu3 %vm19763_vm10, %v4219_v14  ;;  %v2283_v40 = vpop.f32.mrf.mxu2  ;;  %vm17426_vm7 = vcmp.lt.s32.totalorder %v19767_v16, 35  ;;  %vm2931_vm10 = vcmp.eq.s32.totalorder %v2889_v56, 1  ;;  %v7367_v14 = vld [vmem:[%s17061_s3 + $0xf0] sm:$0xff]  ;;  %v3696_v39 = vsel %vm3654_vm14, %v10135_v27, 0.0  ;;  %vm19775_vm14 = vmmov %vm19728_vm6 }
 0x422   :  { %7222 = vmatmul.msk.f32.gmra.mxu0 %vm19762_vm4, %v2972_v18  ;;  %v2761_v28 = vpop.f32.mrf.mxu3  ;;  %v2014_v18 = vpop.f32.mrf.mxu1  ;;  %vm4178_vm4 = vcmp.eq.s32.totalorder %v4136_v11, 1  ;;  %vm4095_vm1 = vmand %vm17426_vm7, %vm19771_vm0  ;;  %v19776_v11 = vld [vmem:[#allocation42_spill] sm:$0xff]  ;;  %vm19786_vm7 = vcmask 261120  }
 0x423   :  { %v14323_v36 = vadd.f32 %v2761_v28, %v2278_v34  ;;  %v14328_v44 = vpop.f32.mrf.mxu0  ;;  %4847 = vmatpush.msra.mxu0 %v7367_v14  ;;  %v19772_v28 = vld [vmem:[#allocation38_spill] sm:$0xff]  ;;  %v4220_v56 = vsel %vm4178_vm4, %v10552_v19, 0.0  ;;  %vm19777_vm0 = vnez %v19776_v11 }
 0x424   :  { %19769 = vst [vmem:[#allocation190_spill] sm:$0xff] %v14328_v44  ;;  %v2973_v13 = vsel %vm2931_vm10, %v19772_v28, 0.0  ;;  %v3613_v34 = vsel %vm19777_vm0, 1, %v17671_v61  ;;  %v7365_v14 = vld [vmem:[%s17061_s3 + $0xe0] sm:$0xff]  ;;  %vm19778_vm10 = vnez %v19605_v43  ;;  %vm19787_vm0 = vmmov %vm19786_vm7 }
 0x425   :  { %19768 = vst [vmem:[#allocation34_spill] sm:$0xff] %v14323_v36  ;;  %v2890_v48 = vsel %vm19778_vm10, 1, %v17671_v61  ;;  %4848 = vmatpush.msra.mxu0 %v7366_v31  ;;  %v2281_v36 = vadd.f32 %v2280_v47, %v2011_v42  ;;  %v19785_v47 = vld [vmem:[#allocation41_spill] sm:$0xff]  ;;  %vm19789_vm10 = vmmov %vm19787_vm0 }
 0x426   :  { %vm2932_vm4 = vcmp.eq.s32.totalorder %v2890_v48, 1  ;;  %vm19790_vm11 = vmmov %vm19787_vm0 }
 0x427   :  { %7233 = vmatmul.msk.f32.gmra.mxu1 %vm19728_vm6, %v9857_v20  ;;  %4849 = vmatpush.msra.mxu0 %v7365_v14  ;;  %v2974_v42 = vsel %vm2932_vm4, %v19785_v47, 0.0  ;;  %v2891_v14 = vsel %vm13966_vm9, 1, %v17671_v61 }
 0x428   :  { %7280 = vmatmul.msk.f32.gmra.mxu2 %vm19773_vm13, %v3696_v39  ;;  %v4137_v39 = vsel %vm4095_vm1, 1, %v17671_v61  ;;  %vm3655_vm13 = vcmp.eq.s32.totalorder %v3613_v34, 1  ;;  %v19791_v34 = vld [vmem:[#allocation48_spill] sm:$0xff] }
 0x429   :  { %7324 = vmatmul.msk.f32.gmra.mxu3 %vm19775_vm14, %v4220_v56  ;;  %v2286_v44 = vpop.f32.mrf.mxu2  ;;  %v19779_v56 = vld [vmem:[#allocation14_spill] sm:$0xff]  ;;  %vm4179_vm6 = vcmp.eq.s32.totalorder %v4137_v39, 1  ;;  %v3697_v43 = vsel %vm3655_vm13, %v19782_v23, 0.0  ;;  %vm19784_vm14 = vnez %v19783_v58  ;;  %vm19792_vm13 = vnez %v19791_v34 }
 0x42a   :  { %7223 = vmatmul.msk.f32.gmra.mxu0 %vm19774_vm8, %v2973_v13  ;;  %v2764_v13 = vpop.f32.mrf.mxu3  ;;  %vm17429_vm8 = vcmp.lt.s32.totalorder %v19779_v56, 35  ;;  %v2017_v20 = vpop.f32.mrf.mxu1  ;;  %v3614_v58 = vsel %vm19792_vm13, 1, %v17671_v61  ;;  %v2284_v39 = vadd.f32 %v2283_v40, %v2014_v18  ;;  %v19798_v40 = vld [vmem:[#allocation47_spill] sm:$0xff] }
 0x42b   :  { %v14356_v11 = vadd.f32 %v2764_v13, %v2281_v36  ;;  %v14358_v17 = vpop.f32.mrf.mxu0  ;;  %vm4096_vm1 = vmand %vm17429_vm8, %vm19784_vm14  ;;  %v19788_v36 = vld [vmem:[#allocation89_spill] sm:$0xff]  ;;  %vm19799_vm14 = vcmask 261120  }
 0x42c   :  { %19781 = vst [vmem:[#allocation191_spill] sm:$0xff] %v14358_v17  ;;  %v4221_v31 = vsel %vm4179_vm6, %v19788_v36, 0.0  ;;  %v4138_v48 = vsel %vm4096_vm1, 1, %v17671_v61  ;;  %vm19800_vm1 = vmmov %vm19799_vm14 }
 0x42d   :  { %19780 = vst [vmem:[#allocation25_spill] sm:$0xff] %v14356_v11  ;;  %vm19802_vm8 = vmmov %vm19800_vm1 }
 0x42e   :  { %vm19803_vm13 = vmmov %vm19800_vm1 }
 0x42f   :  { %7234 = vmatmul.msk.f32.gmra.mxu1 %vm19786_vm7, %v9997_v15  ;;  %vm3656_vm7 = vcmp.eq.s32.totalorder %v3614_v58, 1  ;;  %v19796_v15 = vld [vmem:[#allocation32_spill] sm:$0xff] }
 0x430   :  { %7281 = vmatmul.msk.f32.gmra.mxu2 %vm19787_vm0, %v3697_v43  ;;  %v19793_v43 = vld [vmem:[#allocation16_spill] sm:$0xff]  ;;  %v3698_v34 = vsel %vm3656_vm7, %v10408_v59, 0.0  ;;  %vm19797_vm4 = vnez %v19796_v15 }
 0x431   :  { %7325 = vmatmul.msk.f32.gmra.mxu3 %vm19790_vm11, %v4221_v31  ;;  %v2289_v13 = vpop.f32.mrf.mxu2  ;;  %vm17434_vm0 = vcmp.lt.s32.totalorder %v19793_v43, 35  ;;  %vm2933_vm11 = vcmp.eq.s32.totalorder %v2891_v14, 1  ;;  %v19804_v14 = vld [vmem:[#allocation46_spill] sm:$0xff] }
 0x432   :  { %7224 = vmatmul.msk.f32.gmra.mxu0 %vm19789_vm10, %v2974_v42  ;;  %v2767_v11 = vpop.f32.mrf.mxu3  ;;  %v2020_v42 = vpop.f32.mrf.mxu1  ;;  %vm4180_vm10 = vcmp.eq.s32.totalorder %v4138_v48, 1  ;;  %vm4097_vm6 = vmand %vm17434_vm0, %vm19797_vm4  ;;  %v2975_v18 = vsel %vm2933_vm11, %v19798_v40, 0.0  ;;  %vm19805_vm7 = vnez %v19804_v14  ;;  %v2892_v48 = vsel %vm14154_vm12, 1, %v17671_v61 }
 0x433   :  { %v14380_v17 = vadd.f32 %v2767_v11, %v2284_v39  ;;  %v14382_v31 = vpop.f32.mrf.mxu0  ;;  %v19801_v11 = vld [vmem:[#allocation93_spill] sm:$0xff]  ;;  %v3615_v15 = vsel %vm19805_vm7, 1, %v17671_v61  ;;  %v4139_v39 = vsel %vm4097_vm6, 1, %v17671_v61  ;;  %vm19810_vm4 = vnez %v19809_v41  ;;  %vm19813_vm0 = vmmov %vm19800_vm1 }
 0x434   :  { %19795 = vst [vmem:[#allocation89_spill] sm:$0xff] %v14382_v31  ;;  %v4222_v58 = vsel %vm4180_vm10, %v19801_v11, 0.0  ;;  %vm3657_vm11 = vcmp.eq.s32.totalorder %v3615_v15, 1  ;;  %vm19814_vm7 = vmmov %vm19813_vm0 }
 0x435   :  { %19794 = vst [vmem:[#allocation29_spill] sm:$0xff] %v14380_v17  ;;  %v2287_v17 = vadd.f32 %v2286_v44, %v2017_v20  ;;  %v3699_v14 = vsel %vm3657_vm11, %v10552_v19, 0.0  ;;  %v19811_v20 = vld [vmem:[#allocation52_spill] sm:$0xff] }
 0x437   :  { %7235 = vmatmul.msk.f32.gmra.mxu1 %vm19799_vm14, %v10135_v27  ;;  %vm19812_vm14 = vmmov %vm19800_vm1 }
 0x438   :  { %7282 = vmatmul.msk.f32.gmra.mxu2 %vm19800_vm1, %v3698_v34  ;;  %v19806_v34 = vld [vmem:[#allocation18_spill] sm:$0xff] }
 0x439   :  { %7326 = vmatmul.msk.f32.gmra.mxu3 %vm19803_vm13, %v4222_v58  ;;  %v2292_v31 = vpop.f32.mrf.mxu2  ;;  %vm17437_vm10 = vcmp.lt.s32.totalorder %v19806_v34, 35  ;;  %vm4181_vm13 = vcmp.eq.s32.totalorder %v4139_v39, 1 }
 0x43a   :  { %7225 = vmatmul.msk.f32.gmra.mxu0 %vm19802_vm8, %v2975_v18  ;;  %v2770_v27 = vpop.f32.mrf.mxu3  ;;  %v2023_v18 = vpop.f32.mrf.mxu1  ;;  %vm2934_vm8 = vcmp.eq.s32.totalorder %v2892_v48, 1  ;;  %vm4098_vm6 = vmand %vm17437_vm10, %vm19810_vm4  ;;  %v2290_v48 = vadd.f32 %v2289_v13, %v2020_v42  ;;  %v19824_v13 = vld [vmem:[#allocation100_spill] sm:$0xff] }
 0x43b   :  { %v14404_v3 = vadd.f32 %v2770_v27, %v2287_v17  ;;  %v14406_v58 = vpop.f32.mrf.mxu0  ;;  %v2976_v44 = vsel %vm2934_vm8, %v19811_v20, 0.0  ;;  %v4223_v27 = vsel %vm4181_vm13, %v10975_v60, 0.0  ;;  %v19815_v17 = vld [vmem:[#allocation51_spill] sm:$0xff]  ;;  %v4140_v15 = vsel %vm4098_vm6, 1, %v17671_v61  ;;  %vm19822_vm6 = vmmov %vm19800_vm1 }
 0x43c   :  { %19808 = vst [vmem:[#allocation93_spill] sm:$0xff] %v14406_v58  ;;  %vm19816_vm11 = vnez %v19815_v17  ;;  %v19817_v58 = vld [vmem:[#allocation21_spill] sm:$0xff]  ;;  %vm4182_vm13 = vcmp.eq.s32.totalorder %v4140_v15, 1  ;;  %vm19826_vm10 = vmmov %vm19822_vm6 }
 0x43d   :  { %19807 = vst [vmem:[#allocation32_spill] sm:$0xff] %v14404_v3  ;;  %v3616_v41 = vsel %vm19816_vm11, 1, %v17671_v61  ;;  %vm17440_vm4 = vcmp.lt.s32.totalorder %v19817_v58, 35  ;;  %v4224_v42 = vsel %vm4182_vm13, %v19824_v13, 0.0  ;;  %vm19827_vm11 = vmmov %vm19822_vm6 }
 0x43e   :  { %vm3658_vm8 = vcmp.eq.s32.totalorder %v3616_v41, 1  ;;  %v19828_v41 = vld [vmem:[#allocation55_spill] sm:$0xff] }
 0x43f   :  { %7236 = vmatmul.msk.f32.gmra.mxu1 %vm19812_vm14, %v19782_v23  ;;  %vm19823_vm14 = vmmov %vm19800_vm1 }
 0x440   :  { %7283 = vmatmul.msk.f32.gmra.mxu2 %vm19800_vm1, %v3699_v14  ;;  %vm19825_vm1 = vcmp.lt.s32.totalorder %v19744_v8, 35 }
 0x441   :  { %7327 = vmatmul.msk.f32.gmra.mxu3 %vm19814_vm7, %v4223_v27  ;;  %v2295_v39 = vpop.f32.mrf.mxu2  ;;  %v19820_v27 = vld [vmem:[#allocation40_spill] sm:$0xff] }
 0x442   :  { %7226 = vmatmul.msk.f32.gmra.mxu0 %vm19813_vm0, %v2976_v44  ;;  %v2773_v3 = vpop.f32.mrf.mxu3  ;;  %v2026_v14 = vpop.f32.mrf.mxu1  ;;  %v3700_v44 = vsel %vm3658_vm8, %v19788_v36, 0.0  ;;  %vm19821_vm0 = vnez %v19820_v27  ;;  %vm19829_vm8 = vnez %v19828_v41  ;;  %v2293_v27 = vadd.f32 %v2292_v31, %v2023_v18  ;;  %v19832_v41 = vld [vmem:[#allocation45_spill] sm:$0xff] }
 0x443   :  { %v14425_v23 = vadd.f32 %v2773_v3, %v2290_v48  ;;  %v14427_v0 = vpop.f32.mrf.mxu0  ;;  %vm4099_vm7 = vmand %vm17440_vm4, %vm19821_vm0  ;;  %v4661_v3 = vsel %vm19825_vm1, %v10552_v19, 0.0  ;;  %v3617_v15 = vsel %vm19829_vm8, 1, %v17671_v61  ;;  %vm19836_vm1 = vcmp.lt.s32.totalorder %v19756_v50, 35 }
 0x444   :  { %19819 = vst [vmem:[#allocation192_spill] sm:$0xff] %v14427_v0  ;;  %v4141_v48 = vsel %vm4099_vm7, 1, %v17671_v61  ;;  %vm3659_vm0 = vcmp.eq.s32.totalorder %v3617_v15, 1  ;;  %vm19834_vm7 = vmmov %vm19823_vm14  ;;  %v4662_v31 = vsel %vm19836_vm1, %v19788_v36, 0.0 }
 0x445   :  { %19818 = vst [vmem:[#allocation36_spill] sm:$0xff] %v14425_v23  ;;  %vm19838_vm4 = vmmov %vm19834_vm7 }
 0x447   :  { %7237 = vmatmul.msk.f32.gmra.mxu1 %vm19822_vm6, %v10408_v59  ;;  %vm4183_vm6 = vcmp.eq.s32.totalorder %v4141_v48, 1 }
 0x448   :  { %7284 = vmatmul.msk.f32.gmra.mxu2 %vm19823_vm14, %v3700_v44  ;;  %v19830_v44 = vld [vmem:[#allocation24_spill] sm:$0xff]  ;;  %vm19835_vm14 = vmmov %vm19834_vm7 }
 0x449   :  { %7328 = vmatmul.msk.f32.gmra.mxu3 %vm19826_vm10, %v4224_v42  ;;  %v2298_v23 = vpop.f32.mrf.mxu2  ;;  %vm17443_vm13 = vcmp.lt.s32.totalorder %v19830_v44, 35  ;;  %v7413_v42 = vld [vmem:[%s17061_s3 + $0x110] sm:$0xff]  ;;  %vm19833_vm10 = vnez %v19832_v41 }
 0x44a   :  { %7369 = vmatmul.msk.f32.vlgmr.msra.gmra.mxu0 %vm19827_vm11, %v4661_v3  ;;  %v2776_v0 = vpop.f32.mrf.mxu3  ;;  %v2029_v59 = vpop.f32.mrf.mxu1  ;;  %5331 = vmatpush.msra.mxu1 %v7413_v42  ;;  %v3701_v3 = vsel %vm3659_vm0, %v19801_v11, 0.0  ;;  %vm4100_vm11 = vmand %vm17443_vm13, %vm19833_vm10  ;;  %v19840_v41 = vld [vmem:[#allocation60_spill] sm:$0xff]  ;;  %vm19847_vm13 = vcmp.lt.s32.totalorder %v19767_v16, 35 }
 0x44b   :  { %v14448_v17 = vadd.f32 %v2776_v0, %v2293_v27  ;;  %v4225_v0 = vsel %vm4183_vm6, %v11284_v53, 0.0  ;;  %v14465_v18 = vpop.f32.mrf.mxu0  ;;  %vm19839_vm0 = vmmov %vm19838_vm4  ;;  %vm19841_vm10 = vnez %v19840_v41  ;;  %v4142_v48 = vsel %vm4100_vm11, 1, %v17671_v61 }
 0x44c   :  { %19837 = vst [vmem:[#allocation100_spill] sm:$0xff] %v14465_v18  ;;  %v3618_v15 = vsel %vm19841_vm10, 1, %v17671_v61  ;;  %v2296_v27 = vadd.f32 %v2295_v39, %v2026_v14  ;;  %v19844_v18 = vld [vmem:[#allocation44_spill] sm:$0xff]  ;;  %vm19846_vm11 = vmmov %vm19839_vm0  ;;  %v4663_v14 = vsel %vm19847_vm13, %v19801_v11, 0.0 }
 0x44d   :  { %19831 = vst [vmem:[#allocation40_spill] sm:$0xff] %v14448_v17  ;;  %vm3660_vm6 = vcmp.eq.s32.totalorder %v3618_v15, 1  ;;  %v19842_v17 = vld [vmem:[#allocation20_spill] sm:$0xff]  ;;  %vm19848_vm10 = vmmov %vm19839_vm0 }
 0x44e   :  { %vm19849_vm8 = vmmov %vm19839_vm0 }
 0x44f   :  { %7238 = vmatmul.msk.f32.gmra.mxu1 %vm19834_vm7, %v10552_v19  ;;  %vm17445_vm7 = vcmp.lt.s32.totalorder %v19842_v17, 35 }
 0x450   :  { %7285 = vmatmul.msk.f32.gmra.mxu2 %vm19835_vm14, %v3701_v3  ;;  %vm4184_vm14 = vcmp.eq.s32.totalorder %v4142_v48, 1  ;;  %v2299_v48 = vadd.f32 %v2298_v23, %v2029_v59 }
 0x451   :  { %7329 = vmatmul.msk.f32.gmra.mxu3 %vm19838_vm4, %v4225_v0  ;;  %v2301_v42 = vpop.f32.mrf.mxu2  ;;  %v3702_v0 = vsel %vm3660_vm6, %v10975_v60, 0.0  ;;  %vm19845_vm4 = vnez %v19844_v18  ;;  %v4226_v39 = vsel %vm4184_vm14, %v11444_v7, 0.0 }
 0x452   :  { %7370 = vmatmul.msk.f32.gmra.mxu0 %vm19839_vm0, %v4662_v31  ;;  %v2779_v3 = vpop.f32.mrf.mxu3  ;;  %v2032_v50 = vpop.f32.mrf.mxu1  ;;  %vm4101_vm1 = vmand %vm17445_vm7, %vm19845_vm4  ;;  %v19850_v31 = vld [vmem:[#allocation64_spill] sm:$0xff] }
 0x453   :  { %v14474_v19 = vadd.f32 %v2779_v3, %v2296_v27  ;;  %vm19851_vm6 = vnez %v19850_v31  ;;  %v4143_v15 = vsel %vm4101_vm1, 1, %v17671_v61  ;;  %v14494_v27 = vpop.f32.mrf.mxu0  ;;  %vm19857_vm1 = vmmov %vm19839_vm0 }
 0x454   :  { %v3619_v18 = vsel %vm19851_vm6, 1, %v17671_v61  ;;  %19852 = vst [vmem:[#allocation44_spill] sm:$0xff] %v14494_v27  ;;  %vm4185_vm13 = vcmp.eq.s32.totalorder %v4143_v15, 1  ;;  %vm19859_vm7 = vmmov %vm19839_vm0 }
 0x455   :  { %19843 = vst [vmem:[#allocation45_spill] sm:$0xff] %v14474_v19  ;;  %vm3661_vm14 = vcmp.eq.s32.totalorder %v3619_v18, 1  ;;  %v19853_v19 = vld [vmem:[#allocation28_spill] sm:$0xff]  ;;  %v4227_v23 = vsel %vm4185_vm13, %v11604_v22, 0.0  ;;  %vm19860_vm6 = vmmov %vm19839_vm0 }
 0x456   :  { %vm17447_vm4 = vcmp.lt.s32.totalorder %v19853_v19, 35  ;;  %v19861_v18 = vld [vmem:[#allocation68_spill] sm:$0xff] }
 0x457   :  { %7239 = vmatmul.msk.f32.gmra.mxu1 %vm19839_vm0, %v19788_v36 }
 0x458   :  { %7286 = vmatmul.msk.f32.gmra.mxu2 %vm19846_vm11, %v3702_v0  ;;  %vm19858_vm11 = vcmp.lt.s32.totalorder %v19779_v56, 35 }
 0x459   :  { %7330 = vmatmul.msk.f32.gmra.mxu3 %vm19848_vm10, %v4226_v39  ;;  %v2304_v3 = vpop.f32.mrf.mxu2  ;;  %v3703_v39 = vsel %vm3661_vm14, %v19824_v13, 0.0  ;;  %v4664_v59 = vsel %vm19858_vm11, %v10975_v60, 0.0  ;;  %vm19862_vm14 = vnez %v19861_v18  ;;  %vm19869_vm11 = vcmp.lt.s32.totalorder %v19793_v43, 35 }
 0x45a   :  { %7371 = vmatmul.msk.f32.gmra.mxu0 %vm19849_vm8, %v4663_v14  ;;  %v2782_v0 = vpop.f32.mrf.mxu3  ;;  %v2035_v16 = vpop.f32.mrf.mxu1  ;;  %v19855_v14 = vld [vmem:[#allocation50_spill] sm:$0xff]  ;;  %v3620_v15 = vsel %vm19862_vm14, 1, %v17671_v61  ;;  %vm19871_vm14 = vmmov %vm19839_vm0 }
 0x45b   :  { %v14497_v41 = vadd.f32 %v2782_v0, %v2299_v48  ;;  %vm19856_vm8 = vnez %v19855_v14  ;;  %v2302_v0 = vadd.f32 %v2301_v42, %v2032_v50  ;;  %v14518_v27 = vpop.f32.mrf.mxu0  ;;  %v19872_v42 = vld [vmem:[#allocation71_spill] sm:$0xff] }
 0x45c   :  { %vm4102_vm10 = vmand %vm17447_vm4, %vm19856_vm8  ;;  %vm3662_vm8 = vcmp.eq.s32.totalorder %v3620_v15, 1  ;;  %19864 = vst [vmem:[#allocation50_spill] sm:$0xff] %v14518_v27 }
 0x45d   :  { %19854 = vst [vmem:[#allocation193_spill] sm:$0xff] %v14497_v41  ;;  %v4144_v48 = vsel %vm4102_vm10, 1, %v17671_v61  ;;  %vm19868_vm10 = vmmov %vm19839_vm0 }
 0x45e   :  { %vm19870_vm4 = vmmov %vm19839_vm0 }
 0x45f   :  { %7240 = vmatmul.msk.f32.gmra.mxu1 %vm19857_vm1, %v19801_v11 }
 0x460   :  { %7287 = vmatmul.msk.f32.gmra.mxu2 %vm19839_vm0, %v3703_v39  ;;  %v19863_v39 = vld [vmem:[#allocation33_spill] sm:$0xff] }
 0x461   :  { %7331 = vmatmul.msk.f32.gmra.mxu3 %vm19859_vm7, %v4227_v23  ;;  %v2307_v14 = vpop.f32.mrf.mxu2  ;;  %vm17449_vm13 = vcmp.lt.s32.totalorder %v19863_v39, 35  ;;  %vm4186_vm7 = vcmp.eq.s32.totalorder %v4144_v48, 1  ;;  %v3704_v23 = vsel %vm3662_vm8, %v11284_v53, 0.0  ;;  %vm19873_vm8 = vnez %v19872_v42 }
 0x462   :  { %7372 = vmatmul.msk.f32.gmra.mxu0 %vm19860_vm6, %v4664_v59  ;;  %v2785_v41 = vpop.f32.mrf.mxu3  ;;  %v2038_v56 = vpop.f32.mrf.mxu1  ;;  %v19866_v59 = vld [vmem:[#allocation54_spill] sm:$0xff]  ;;  %v4228_v50 = vsel %vm4186_vm7, %v11738_v35, 0.0  ;;  %v3621_v15 = vsel %vm19873_vm8, 1, %v17671_v61  ;;  %vm19882_vm8 = vmmov %vm19839_vm0 }
 0x463   :  { %v14520_v31 = vadd.f32 %v2785_v41, %v2302_v0  ;;  %vm19867_vm6 = vnez %v19866_v59  ;;  %v4665_v41 = vsel %vm19869_vm11, %v19824_v13, 0.0  ;;  %v2305_v0 = vadd.f32 %v2304_v3, %v2035_v16  ;;  %v14543_v43 = vpop.f32.mrf.mxu0  ;;  %v19883_v3 = vld [vmem:[#allocation75_spill] sm:$0xff] }
 0x464   :  { %vm4103_vm1 = vmand %vm17449_vm13, %vm19867_vm6  ;;  %vm3663_vm6 = vcmp.eq.s32.totalorder %v3621_v15, 1  ;;  %vm19880_vm11 = vcmp.lt.s32.totalorder %v19806_v34, 35  ;;  %v19887_v34 = vld [vmem:[#allocation63_spill] sm:$0xff] }
 0x465   :  { %19865 = vst [vmem:[#allocation33_spill] sm:$0xff] %v14520_v31  ;;  %v4145_v48 = vsel %vm4103_vm1, 1, %v17671_v61  ;;  %vm19879_vm1 = vmmov %vm19839_vm0 }
 0x466   :  { %vm19881_vm13 = vmmov %vm19839_vm0 }
 0x467   :  { %7241 = vmatmul.msk.f32.gmra.mxu1 %vm19868_vm10, %v10975_v60  ;;  %vm4187_vm10 = vcmp.eq.s32.totalorder %v4145_v48, 1 }
 0x468   :  { %7288 = vmatmul.msk.f32.gmra.mxu2 %vm19839_vm0, %v3704_v23  ;;  %v19874_v23 = vld [vmem:[#allocation37_spill] sm:$0xff]  ;;  %v4229_v16 = vsel %vm4187_vm10, %v11920_v63, 0.0 }
 0x469   :  { %7332 = vmatmul.msk.f32.gmra.mxu3 %vm19870_vm4, %v4228_v50  ;;  %v2310_v59 = vpop.f32.mrf.mxu2  ;;  %vm17451_vm7 = vcmp.lt.s32.totalorder %v19874_v23, 35  ;;  %19876 = vst [vmem:[#allocation37_spill] sm:$0xff] %v14543_v43  ;;  %v3705_v50 = vsel %vm3663_vm6, %v11444_v7, 0.0  ;;  %vm19884_vm6 = vnez %v19883_v3 }
 0x46a   :  { %7373 = vmatmul.msk.f32.gmra.mxu0 %vm19871_vm14, %v4665_v41  ;;  %v2788_v31 = vpop.f32.mrf.mxu3  ;;  %v2041_v18 = vpop.f32.mrf.mxu1  ;;  %v19877_v41 = vld [vmem:[#allocation59_spill] sm:$0xff]  ;;  %v3622_v15 = vsel %vm19884_vm6, 1, %v17671_v61 }
 0x46b   :  { %v14541_v27 = vadd.f32 %v2788_v31, %v2305_v0  ;;  %vm19878_vm4 = vnez %v19877_v41  ;;  %v4666_v31 = vsel %vm19880_vm11, %v11284_v53, 0.0  ;;  %v2308_v0 = vadd.f32 %v2307_v14, %v2038_v56  ;;  %v14578_v14 = vpop.f32.mrf.mxu0 }
 0x46c   :  { %vm4104_vm14 = vmand %vm17451_vm7, %vm19878_vm4  ;;  %vm3664_vm4 = vcmp.eq.s32.totalorder %v3622_v15, 1  ;;  %vm19890_vm11 = vcmp.lt.s32.totalorder %v19817_v58, 35  ;;  %19891 = vst [vmem:[#allocation63_spill] sm:$0xff] %v14578_v14  ;;  %v19898_v14 = vld [vmem:[#allocation67_spill] sm:$0xff] }
 0x46d   :  { %19875 = vst [vmem:[#allocation54_spill] sm:$0xff] %v14541_v27  ;;  %v4146_v48 = vsel %vm4104_vm14, 1, %v17671_v61  ;;  %vm19889_vm14 = vmmov %vm19839_vm0 }
 0x46e   :  { %vm19892_vm7 = vmmov %vm19839_vm0 }
 0x46f   :  { %7242 = vmatmul.msk.f32.gmra.mxu1 %vm19879_vm1, %v19824_v13  ;;  %vm4188_vm1 = vcmp.eq.s32.totalorder %v4146_v48, 1  ;;  %v2311_v48 = vadd.f32 %v2310_v59, %v2041_v18 }
 0x470   :  { %7289 = vmatmul.msk.f32.gmra.mxu2 %vm19839_vm0, %v3705_v50  ;;  %v19885_v50 = vld [vmem:[#allocation43_spill] sm:$0xff]  ;;  %v4230_v56 = vsel %vm4188_vm1, %v12064_v25, 0.0 }
 0x471   :  { %7333 = vmatmul.msk.f32.gmra.mxu3 %vm19881_vm13, %v4229_v16  ;;  %v2313_v41 = vpop.f32.mrf.mxu2  ;;  %vm17453_vm10 = vcmp.lt.s32.totalorder %v19885_v50, 35  ;;  %v3706_v16 = vsel %vm3664_vm4, %v11604_v22, 0.0  ;;  %vm19888_vm13 = vnez %v19887_v34  ;;  %vm19893_vm4 = vmmov %vm19839_vm0  ;;  %v19894_v34 = vld [vmem:[#allocation79_spill] sm:$0xff] }
 0x472   :  { %7374 = vmatmul.msk.f32.gmra.mxu0 %vm19882_vm8, %v4666_v31  ;;  %v2791_v27 = vpop.f32.mrf.mxu3  ;;  %v2044_v42 = vpop.f32.mrf.mxu1  ;;  %vm4105_vm8 = vmand %vm17453_vm10, %vm19888_vm13  ;;  %vm19895_vm13 = vnez %v19894_v34  ;;  %vm19901_vm10 = vcmp.lt.s32.totalorder %v19830_v44, 35 }
 0x473   :  { %v14564_v43 = vadd.f32 %v2791_v27, %v2308_v0  ;;  %v4667_v27 = vsel %vm19890_vm11, %v11444_v7, 0.0  ;;  %v3623_v31 = vsel %vm19895_vm13, 1, %v17671_v61  ;;  %v4147_v15 = vsel %vm4105_vm8, 1, %v17671_v61  ;;  %vm19900_vm8 = vmmov %vm19893_vm4 }
 0x474   :  { %vm3665_vm1 = vcmp.eq.s32.totalorder %v3623_v31, 1  ;;  %v4668_v59 = vsel %vm19901_vm10, %v11604_v22, 0.0  ;;  %vm19902_vm13 = vmmov %vm19893_vm4 }
 0x475   :  { %19886 = vst [vmem:[#allocation59_spill] sm:$0xff] %v14564_v43  ;;  %v19896_v43 = vld [vmem:[#allocation49_spill] sm:$0xff]  ;;  %vm19903_vm6 = vmmov %vm19893_vm4 }
 0x477   :  { %7243 = vmatmul.msk.f32.gmra.mxu1 %vm19839_vm0, %v11284_v53  ;;  %vm17455_vm0 = vcmp.lt.s32.totalorder %v19896_v43, 35 }
 0x478   :  { %7290 = vmatmul.msk.f32.gmra.mxu2 %vm19889_vm14, %v3706_v16  ;;  %vm4189_vm14 = vcmp.eq.s32.totalorder %v4147_v15, 1  ;;  %v2314_v15 = vadd.f32 %v2313_v41, %v2044_v42 }
 0x479   :  { %7334 = vmatmul.msk.f32.gmra.mxu3 %vm19892_vm7, %v4230_v56  ;;  %v2316_v0 = vpop.f32.mrf.mxu2  ;;  %v3707_v56 = vsel %vm3665_vm1, %v11738_v35, 0.0  ;;  %vm19899_vm7 = vnez %v19898_v14  ;;  %v4231_v18 = vsel %vm4189_vm14, %v12233_v52, 0.0 }
 0x47a   :  { %7375 = vmatmul.msk.f32.gmra.mxu0 %vm19893_vm4, %v4667_v27  ;;  %v2794_v16 = vpop.f32.mrf.mxu3  ;;  %v2047_v58 = vpop.f32.mrf.mxu1  ;;  %vm4106_vm11 = vmand %vm17455_vm0, %vm19899_vm7  ;;  %v19904_v27 = vld [vmem:[#allocation83_spill] sm:$0xff] }
 0x47b   :  { %v14587_v3 = vadd.f32 %v2794_v16, %v2311_v48  ;;  %vm19905_vm1 = vnez %v19904_v27  ;;  %v4148_v31 = vsel %vm4106_vm11, 1, %v17671_v61  ;;  %v14607_v48 = vpop.f32.mrf.mxu0  ;;  %vm19910_vm11 = vmmov %vm19893_vm4 }
 0x47c   :  { %v3624_v14 = vsel %vm19905_vm1, 1, %v17671_v61  ;;  %19906 = vst [vmem:[#allocation67_spill] sm:$0xff] %v14607_v48  ;;  %vm4190_vm10 = vcmp.eq.s32.totalorder %v4148_v31, 1  ;;  %vm19912_vm0 = vmmov %vm19893_vm4  ;;  %v2317_v31 = vadd.f32 %v2316_v0, %v2047_v58 }
 0x47d   :  { %19897 = vst [vmem:[#allocation194_spill] sm:$0xff] %v14587_v3  ;;  %vm3666_vm14 = vcmp.eq.s32.totalorder %v3624_v14, 1  ;;  %v19907_v3 = vld [vmem:[#allocation53_spill] sm:$0xff]  ;;  %v4232_v42 = vsel %vm4190_vm10, %v12371_v5, 0.0  ;;  %vm19913_vm1 = vmmov %vm19912_vm0 }
 0x47e   :  { %vm17456_vm7 = vcmp.lt.s32.totalorder %v19907_v3, 35 }
 0x47f   :  { %7244 = vmatmul.msk.f32.gmra.mxu1 %vm19893_vm4, %v11444_v7 }
 0x480   :  { %7291 = vmatmul.msk.f32.gmra.mxu2 %vm19900_vm8, %v3707_v56  ;;  %vm19911_vm8 = vcmp.lt.s32.totalorder %v19842_v17, 35 }
 0x481   :  { %7335 = vmatmul.msk.f32.gmra.mxu3 %vm19902_vm13, %v4231_v18  ;;  %v3708_v18 = vsel %vm3666_vm14, %v11920_v63, 0.0  ;;  %v4669_v41 = vsel %vm19911_vm8, %v11738_v35, 0.0  ;;  %vm19922_vm8 = vcmp.lt.s32.totalorder %v19853_v19, 35 }
 0x482   :  { %7376 = vmatmul.msk.f32.gmra.mxu0 %vm19903_vm6, %v4668_v59  ;;  %v2319_v16 = vpop.f32.mrf.mxu2  ;;  %vm19909_vm6 = vnez %v18217_v51  ;;  %v19914_v51 = vld [vmem:[#allocation87_spill] sm:$0xff]  ;;  %v4670_v0 = vsel %vm19922_vm8, %v11920_v63, 0.0  ;;  %vm19935_vm8 = vcmp.lt.s32.totalorder %v19863_v39, 35 }
 0x483   :  { %vm4107_vm13 = vmand %vm17456_vm7, %vm19909_vm6  ;;  %vm19915_vm14 = vnez %v19914_v51 }
 0x484   :  { %v2797_v56 = vpop.f32.mrf.mxu3  ;;  %v2050_v44 = vpop.f32.mrf.mxu1  ;;  %v3625_v59 = vsel %vm19915_vm14, 1, %v17671_v61  ;;  %v4149_v14 = vsel %vm4107_vm13, 1, %v17671_v61  ;;  %vm19921_vm13 = vmmov %vm19893_vm4 }
 0x485   :  { %v14610_v34 = vadd.f32 %v2797_v56, %v2314_v15  ;;  %vm3667_vm6 = vcmp.eq.s32.totalorder %v3625_v59, 1  ;;  %vm19923_vm7 = vmmov %vm19893_vm4  ;;  %v19925_v59 = vld [vmem:[#allocation91_spill] sm:$0xff] }
 0x486   :  { %vm19924_vm14 = vmmov %vm19893_vm4 }
 0x487   :  { %19908 = vst [vmem:[#allocation195_spill] sm:$0xff] %v14610_v34  ;;  %7245 = vmatmul.msk.f32.gmra.mxu1 %vm19910_vm11, %v11604_v22  ;;  %v14631_v34 = vpop.f32.mrf.mxu0  ;;  %v19932_v22 = vld [vmem:[#allocation78_spill] sm:$0xff] }
 0x488   :  { %7292 = vmatmul.msk.f32.gmra.mxu2 %vm19893_vm4, %v3708_v18  ;;  %v19916_v18 = vld [vmem:[#allocation57_spill] sm:$0xff]  ;;  %19917 = vst [vmem:[#allocation196_spill] sm:$0xff] %v14631_v34 }
 0x489   :  { %7336 = vmatmul.msk.f32.gmra.mxu3 %vm19912_vm0, %v4232_v42  ;;  %vm17461_vm10 = vcmp.lt.s32.totalorder %v19916_v18, 35  ;;  %vm4191_vm0 = vcmp.eq.s32.totalorder %v4149_v14, 1  ;;  %v3709_v42 = vsel %vm3667_vm6, %v12064_v25, 0.0  ;;  %vm19926_vm6 = vnez %v19925_v59 }
 0x48a   :  { %7377 = vmatmul.msk.f32.gmra.mxu0 %vm19913_vm1, %v4669_v41  ;;  %v19919_v41 = vld [vmem:[#allocation74_spill] sm:$0xff]  ;;  %v4233_v58 = vsel %vm4191_vm0, %v12537_v49, 0.0  ;;  %v3626_v14 = vsel %vm19926_vm6, 1, %v17671_v61 }
 0x48b   :  { %v2322_v15 = vpop.f32.mrf.mxu2  ;;  %vm19920_vm1 = vnez %v19919_v41  ;;  %vm3668_vm0 = vcmp.eq.s32.totalorder %v3626_v14, 1 }
 0x48c   :  { %v2800_v56 = vpop.f32.mrf.mxu3  ;;  %v2053_v27 = vpop.f32.mrf.mxu1  ;;  %vm4108_vm11 = vmand %vm17461_vm10, %vm19920_vm1  ;;  %v3710_v59 = vsel %vm3668_vm0, %v12233_v52, 0.0 }
 0x48d   :  { %v14633_v48 = vadd.f32 %v2800_v56, %v2317_v31  ;;  %v4150_v31 = vsel %vm4108_vm11, 1, %v17671_v61  ;;  %v2320_v56 = vadd.f32 %v2319_v16, %v2050_v44  ;;  %vm19936_vm10 = vmmov %vm19893_vm4  ;;  %v2323_v14 = vadd.f32 %v2322_v15, %v2053_v27  ;;  %v19948_v27 = vld [vmem:[#allocation151_spill] sm:$0xff] }
 0x48e   :  { %vm19937_vm0 = vmmov %vm19893_vm4 }
 0x48f   :  { %19918 = vst [vmem:[#allocation197_spill] sm:$0xff] %v14633_v48  ;;  %7246 = vmatmul.msk.f32.gmra.mxu1 %vm19921_vm13, %v11738_v35  ;;  %v19927_v48 = vld [vmem:[#allocation103_spill] sm:$0xff]  ;;  %v19929_v35 = vld [vmem:[#allocation61_spill] sm:$0xff]  ;;  %v14658_v17 = vpop.f32.mrf.mxu0  ;;  %vm19934_vm13 = vmmov %vm19893_vm4 }
 0x490   :  { %7293 = vmatmul.msk.f32.gmra.mxu2 %vm19893_vm4, %v3709_v42  ;;  %v19928_v42 = vld [vmem:[#allocation122_spill] sm:$0xff]  ;;  %vm17462_vm1 = vcmp.lt.s32.totalorder %v19929_v35, 35  ;;  %19931 = vst [vmem:[#allocation103_spill] sm:$0xff] %v14658_v17 }
 0x491   :  { %7337 = vmatmul.msk.f32.gmra.mxu3 %vm19923_vm7, %v4233_v58  ;;  %v3251_v34 = vadd.f32 %v19928_v42, %v19927_v48  ;;  %vm4192_vm7 = vcmp.eq.s32.totalorder %v4150_v31, 1  ;;  %v19944_v17 = vld [vmem:[#allocation82_spill] sm:$0xff] }
 0x492   :  { %7378 = vmatmul.msk.f32.gmra.mxu0 %vm19924_vm14, %v4670_v0  ;;  %vm19933_vm14 = vnez %v19932_v22  ;;  %v4234_v44 = vsel %vm4192_vm7, %v12665_v21, 0.0  ;;  %v19938_v22 = vld [vmem:[#allocation95_spill] sm:$0xff] }
 0x493   :  { %v3883_v41 = vpop.f32.mrf.mxu2  ;;  %vm4109_vm11 = vmand %vm17462_vm1, %vm19933_vm14  ;;  %vm19939_vm6 = vnez %v19938_v22  ;;  %v19959_v22 = vld [vmem:[#allocation86_spill] sm:$0xff] }
 0x494   :  { %v2803_v51 = vpop.f32.mrf.mxu3  ;;  %v3441_v58 = vpop.f32.mrf.mxu1  ;;  %v3627_v16 = vsel %vm19939_vm6, 1, %v17671_v61 }
 0x495   :  { %v14656_v19 = vadd.f32 %v2803_v51, %v2320_v56  ;;  %v3567_v0 = vadd.f32 %v3441_v58, %v3251_v34  ;;  %v4671_v34 = vsel %vm19935_vm8, %v12064_v25, 0.0  ;;  %v4151_v51 = vsel %vm4109_vm11, 1, %v17671_v61  ;;  %v19941_v56 = vld [vmem:[#allocation127_spill] sm:$0xff]  ;;  %vm19947_vm8 = vmmov %vm19937_vm0 }
 0x496   :  { %vm3669_vm7 = vcmp.eq.s32.totalorder %v3627_v16, 1 }
 0x497   :  { %19930 = vst [vmem:[#allocation74_spill] sm:$0xff] %v14656_v19  ;;  %7247 = vmatmul.msk.f32.gmra.mxu1 %vm19934_vm13, %v11920_v63  ;;  %v4009_v48 = vadd.f32 %v3883_v41, %v3567_v0  ;;  %v19942_v19 = vld [vmem:[#allocation65_spill] sm:$0xff]  ;;  %vm19945_vm13 = vnez %v19944_v17  ;;  %v19953_v17 = vld [vmem:[#allocation98_spill] sm:$0xff] }
 0x498   :  { %7294 = vmatmul.msk.f32.gmra.mxu2 %vm19893_vm4, %v3710_v59  ;;  %v19940_v59 = vld [vmem:[#allocation107_spill] sm:$0xff]  ;;  %vm17463_vm14 = vcmp.lt.s32.totalorder %v19942_v19, 35  ;;  %vm19946_vm4 = vmmov %vm19937_vm0 }
 0x499   :  { %7338 = vmatmul.msk.f32.gmra.mxu3 %vm19936_vm10, %v4234_v44  ;;  %v3252_v42 = vadd.f32 %v19941_v56, %v19940_v59  ;;  %vm4193_vm10 = vcmp.eq.s32.totalorder %v4151_v51, 1  ;;  %vm4110_vm11 = vmand %vm17463_vm14, %vm19945_vm13  ;;  %vm19954_vm13 = vnez %v19953_v17  ;;  %v7412_v56 = vld [vmem:[%s17061_s3 + $0x108] sm:$0xff]  ;;  %vm19964_vm14 = vcmp.lt.s32.totalorder %v19885_v50, 35  ;;  %v19972_v50 = vld [vmem:[#allocation72_spill] sm:$0xff] }
 0x49a   :  { %7379 = vmatmul.msk.f32.gmra.mxu0 %vm19937_vm0, %v4671_v34  ;;  %v3711_v34 = vsel %vm3669_vm7, %v12371_v5, 0.0  ;;  %v4235_v15 = vsel %vm4193_vm10, %v19948_v27, 0.0  ;;  %vm19949_vm0 = vcmp.lt.s32.totalorder %v19874_v23, 35  ;;  %vm19951_vm7 = vmmov %vm19946_vm4  ;;  %v3628_v59 = vsel %vm19954_vm13, 1, %v17671_v61  ;;  %5332 = vmatpush.msra.mxu1 %v7412_v56 }
 0x49b   :  { %v3886_v31 = vpop.f32.mrf.mxu2  ;;  %v4672_v16 = vsel %vm19949_vm0, %v12233_v52, 0.0  ;;  %vm19952_vm1 = vmmov %vm19946_vm4  ;;  %vm3670_vm10 = vcmp.eq.s32.totalorder %v3628_v59, 1  ;;  %v19963_v59 = vld [vmem:[#allocation155_spill] sm:$0xff] }
 0x49c   :  { %v2806_v58 = vpop.f32.mrf.mxu3  ;;  %v3444_v0 = vpop.f32.mrf.mxu1  ;;  %v3712_v17 = vsel %vm3670_vm10, %v12537_v49, 0.0  ;;  %vm19961_vm0 = vmmov %vm19951_vm7 }
 0x49d   :  { %v14681_v41 = vadd.f32 %v2806_v58, %v2323_v14  ;;  %v3568_v44 = vadd.f32 %v3444_v0, %v3252_v42  ;;  %v14695_v14 = vpop.f32.mrf.mxu0  ;;  %v4152_v42 = vsel %vm4110_vm11, 1, %v17671_v61  ;;  %v19955_v0 = vld [vmem:[#allocation111_spill] sm:$0xff]  ;;  %vm19965_vm13 = vmmov %vm19961_vm0 }
 0x49e   :  { %19950 = vst [vmem:[#allocation78_spill] sm:$0xff] %v14695_v14  ;;  %vm19966_vm10 = vmmov %vm19961_vm0 }
 0x49f   :  { %19943 = vst [vmem:[#allocation122_spill] sm:$0xff] %v14681_v41  ;;  %7248 = vmatmul.msk.f32.gmra.mxu1 %vm19946_vm4, %v12064_v25  ;;  %v4010_v51 = vadd.f32 %v3886_v31, %v3568_v44  ;;  %v19956_v31 = vld [vmem:[#allocation132_spill] sm:$0xff] }
 0x4a0   :  { %7295 = vmatmul.msk.f32.gmra.mxu2 %vm19947_vm8, %v3711_v34  ;;  %v3253_v44 = vadd.f32 %v19956_v31, %v19955_v0  ;;  %vm19960_vm8 = vnez %v19959_v22  ;;  %v19967_v22 = vld [vmem:[#allocation102_spill] sm:$0xff] }
 0x4a1   :  { %7339 = vmatmul.msk.f32.gmra.mxu3 %vm19951_vm7, %v4235_v15  ;;  %v19957_v15 = vld [vmem:[#allocation69_spill] sm:$0xff]  ;;  %vm19962_vm7 = vmmov %vm19961_vm0  ;;  %vm19968_vm6 = vnez %v19967_v22  ;;  %v19974_v22 = vld [vmem:[#allocation90_spill] sm:$0xff] }
 0x4a2   :  { %7380 = vmatmul.msk.f32.gmra.mxu0 %vm19952_vm1, %v4672_v16  ;;  %vm17466_vm4 = vcmp.lt.s32.totalorder %v19957_v15, 35  ;;  %vm4194_vm1 = vcmp.eq.s32.totalorder %v4152_v42, 1 }
 0x4a3   :  { %v3889_v58 = vpop.f32.mrf.mxu2  ;;  %vm4111_vm11 = vmand %vm17466_vm4, %vm19960_vm8  ;;  %v4236_v56 = vsel %vm4194_vm1, %v19963_v59, 0.0  ;;  %vm19975_vm8 = vnez %v19974_v22 }
 0x4a4   :  { %v4409_v34 = vpop.f32.mrf.mxu3  ;;  %v3447_v41 = vpop.f32.mrf.mxu1  ;;  %v4153_v0 = vsel %vm4111_vm11, 1, %v17671_v61  ;;  %vm19979_vm4 = vmmov %vm19961_vm0 }
 0x4a5   :  { %v14709_v16 = vadd.f32 %v4409_v34, %v4009_v48  ;;  %v3569_v14 = vadd.f32 %v3447_v41, %v3253_v44  ;;  %v4673_v48 = vsel %vm19964_vm14, %v12371_v5, 0.0  ;;  %v3629_v41 = vsel %vm19968_vm6, 1, %v17671_v61  ;;  %v14729_v31 = vpop.f32.mrf.mxu0  ;;  %v19970_v44 = vld [vmem:[#allocation116_spill] sm:$0xff]  ;;  %v19971_v34 = vld [vmem:[#allocation137_spill] sm:$0xff] }
 0x4a6   :  { %19969 = vst [vmem:[#allocation127_spill] sm:$0xff] %v14729_v31  ;;  %vm3671_vm1 = vcmp.eq.s32.totalorder %v3629_v41, 1  ;;  %vm17469_vm14 = vcmp.lt.s32.totalorder %v19972_v50, 35  ;;  %v19977_v41 = vld [vmem:[#allocation159_spill] sm:$0xff] }
 0x4a7   :  { %19958 = vst [vmem:[#allocation107_spill] sm:$0xff] %v14709_v16  ;;  %7249 = vmatmul.msk.f32.gmra.mxu1 %vm19961_vm0, %v12233_v52  ;;  %v4011_v42 = vadd.f32 %v3889_v58, %v3569_v14  ;;  %v3254_v16 = vadd.f32 %v19971_v34, %v19970_v44  ;;  %vm4112_vm11 = vmand %vm17469_vm14, %vm19975_vm8 }
 0x4a8   :  { %7296 = vmatmul.msk.f32.gmra.mxu2 %vm19962_vm7, %v3712_v17  ;;  %vm19976_vm7 = vmmov %vm19961_vm0 }
 0x4a9   :  { %7340 = vmatmul.msk.f32.gmra.mxu3 %vm19965_vm13, %v4236_v56  ;;  %vm4195_vm13 = vcmp.eq.s32.totalorder %v4153_v0, 1  ;;  %v4154_v0 = vsel %vm4112_vm11, 1, %v17671_v61 }
 0x4aa   :  { %7381 = vmatmul.msk.f32.gmra.mxu0 %vm19966_vm10, %v4673_v48  ;;  %v3713_v48 = vsel %vm3671_vm1, %v12665_v21, 0.0  ;;  %v4237_v44 = vsel %vm4195_vm13, %v19977_v41, 0.0  ;;  %vm19978_vm10 = vcmp.lt.s32.totalorder %v19896_v43, 35  ;;  %vm19980_vm1 = vmmov %vm19961_vm0 }
 0x4ab   :  { %v3892_v17 = vpop.f32.mrf.mxu2 }
 0x4ac   :  { %v4412_v52 = vpop.f32.mrf.mxu3  ;;  %v3450_v58 = vpop.f32.mrf.mxu1 }
 0x4ad   :  { %v14734_v14 = vadd.f32 %v4412_v52, %v4010_v51  ;;  %v3570_v56 = vadd.f32 %v3450_v58, %v3254_v16  ;;  %v4674_v52 = vsel %vm19978_vm10, %v12537_v49, 0.0  ;;  %v19981_v16 = vld [vmem:[#allocation106_spill] sm:$0xff]  ;;  %v19983_v58 = vld [vmem:[#allocation121_spill] sm:$0xff]  ;;  %v14757_v43 = vpop.f32.mrf.mxu0  ;;  %vm19991_vm10 = vmmov %vm19980_vm1 }
 0x4ae   :  { %vm19982_vm6 = vnez %v19981_v16  ;;  %19986 = vst [vmem:[#allocation151_spill] sm:$0xff] %v14757_v43  ;;  %v19988_v16 = vld [vmem:[#allocation94_spill] sm:$0xff] }
 0x4af   :  { %19973 = vst [vmem:[#allocation82_spill] sm:$0xff] %v14734_v14  ;;  %7250 = vmatmul.msk.f32.gmra.mxu1 %vm19961_vm0, %v12371_v5  ;;  %v4012_v51 = vadd.f32 %v3892_v17, %v3570_v56  ;;  %v3630_v22 = vsel %vm19982_vm6, 1, %v17671_v61  ;;  %v19985_v5 = vld [vmem:[#allocation76_spill] sm:$0xff]  ;;  %vm19989_vm0 = vnez %v19988_v16 }
 0x4b0   :  { %7297 = vmatmul.msk.f32.gmra.mxu2 %vm19976_vm7, %v3713_v48  ;;  %v19984_v48 = vld [vmem:[#allocation143_spill] sm:$0xff]  ;;  %vm3672_vm13 = vcmp.eq.s32.totalorder %v3630_v22, 1  ;;  %vm17471_vm8 = vcmp.lt.s32.totalorder %v19985_v5, 35  ;;  %vm19990_vm7 = vmmov %vm19980_vm1 }
 0x4b1   :  { %7341 = vmatmul.msk.f32.gmra.mxu3 %vm19979_vm4, %v4237_v44  ;;  %v3255_v31 = vadd.f32 %v19984_v48, %v19983_v58  ;;  %vm4196_vm4 = vcmp.eq.s32.totalorder %v4154_v0, 1  ;;  %vm4113_vm11 = vmand %vm17471_vm8, %vm19989_vm0  ;;  %v19997_v48 = vld [vmem:[#allocation126_spill] sm:$0xff] }
 0x4b2   :  { %7382 = vmatmul.msk.f32.gmra.mxu0 %vm19980_vm1, %v4674_v52  ;;  %v3714_v52 = vsel %vm3672_vm13, %v19948_v27, 0.0  ;;  %v4238_v22 = vsel %vm4196_vm4, %v13249_v32, 0.0  ;;  %vm19992_vm1 = vcmp.lt.s32.totalorder %v19907_v3, 35  ;;  %vm19993_vm14 = vmmov %vm19990_vm7  ;;  %v4155_v0 = vsel %vm4113_vm11, 1, %v17671_v61 }
 0x4b3   :  { %v3895_v34 = vpop.f32.mrf.mxu2  ;;  %vm19994_vm13 = vmmov %vm19990_vm7 }
 0x4b4   :  { %v4415_v14 = vpop.f32.mrf.mxu3  ;;  %v3453_v56 = vpop.f32.mrf.mxu1 }
 0x4b5   :  { %v14759_v17 = vadd.f32 %v4415_v14, %v4011_v42  ;;  %v3571_v44 = vadd.f32 %v3453_v56, %v3255_v31  ;;  %v4675_v42 = vsel %vm19992_vm1, %v12665_v21, 0.0  ;;  %v19995_v31 = vld [vmem:[#allocation110_spill] sm:$0xff]  ;;  %vm20004_vm1 = vmmov %vm19991_vm10 }
 0x4b6   :  { %vm19996_vm6 = vnez %v19995_v31  ;;  %v19998_v56 = vld [vmem:[#allocation2_spill] sm:$0xff]  ;;  %v20002_v31 = vld [vmem:[#allocation97_spill] sm:$0xff]  ;;  %vm20006_vm8 = vmmov %vm20004_vm1 }
 0x4b7   :  { %19987 = vst [vmem:[#allocation111_spill] sm:$0xff] %v14759_v17  ;;  %7251 = vmatmul.msk.f32.gmra.mxu1 %vm19990_vm7, %v12537_v49  ;;  %v4013_v14 = vadd.f32 %v3895_v34, %v3571_v44  ;;  %v3631_v16 = vsel %vm19996_vm6, 1, %v17671_v61  ;;  %v19999_v17 = vld [vmem:[#allocation80_spill] sm:$0xff]  ;;  %vm20003_vm7 = vnez %v20002_v31  ;;  %v20008_v31 = vld [vmem:[#allocation115_spill] sm:$0xff] }
 0x4b8   :  { %7298 = vmatmul.msk.f32.gmra.mxu2 %vm19991_vm10, %v3714_v52  ;;  %v3256_v52 = vadd.f32 %v19998_v56, %v19997_v48  ;;  %vm3673_vm4 = vcmp.eq.s32.totalorder %v3631_v16, 1  ;;  %vm17473_vm0 = vcmp.lt.s32.totalorder %v19999_v17, 35  ;;  %vm20009_vm6 = vnez %v20008_v31 }
 0x4b9   :  { %7342 = vmatmul.msk.f32.gmra.mxu3 %vm19993_vm14, %v4238_v22  ;;  %vm4197_vm14 = vcmp.eq.s32.totalorder %v4155_v0, 1  ;;  %v14784_v22 = vpop.f32.mrf.mxu0  ;;  %vm4114_vm11 = vmand %vm17473_vm0, %vm20003_vm7  ;;  %v3632_v0 = vsel %vm20009_vm6, 1, %v17671_v61 }
 0x4ba   :  { %7383 = vmatmul.msk.f32.gmra.mxu0 %vm19994_vm13, %v4675_v42  ;;  %20001 = vst [vmem:[#allocation86_spill] sm:$0xff] %v14784_v22  ;;  %v3715_v42 = vsel %vm3673_vm4, %v19963_v59, 0.0  ;;  %vm20005_vm13 = vcmp.lt.s32.totalorder %v19916_v18, 35  ;;  %vm20007_vm4 = vmmov %vm20004_vm1  ;;  %v4156_v48 = vsel %vm4114_vm11, 1, %v17671_v61 }
 0x4bb   :  { %v3898_v58 = vpop.f32.mrf.mxu2  ;;  %vm20020_vm0 = vmmov %vm20004_vm1 }
 0x4bc   :  { %v4418_v43 = vpop.f32.mrf.mxu3  ;;  %v3456_v34 = vpop.f32.mrf.mxu1 }
 0x4bd   :  { %v14782_v3 = vadd.f32 %v4418_v43, %v4012_v51  ;;  %v3572_v44 = vadd.f32 %v3456_v34, %v3256_v52  ;;  %v4239_v43 = vsel %vm4197_vm14, %v13380_v57, 0.0  ;;  %v4676_v51 = vsel %vm20005_vm13, %v19948_v27, 0.0  ;;  %v20010_v52 = vld [vmem:[#allocation131_spill] sm:$0xff]  ;;  %vm20016_vm13 = vmmov %vm20004_vm1 }
 0x4be   :  { %v20011_v34 = vld [vmem:[#allocation3_spill] sm:$0xff]  ;;  %vm3674_vm14 = vcmp.eq.s32.totalorder %v3632_v0, 1 }
 0x4bf   :  { %20000 = vst [vmem:[#allocation132_spill] sm:$0xff] %v14782_v3  ;;  %7252 = vmatmul.msk.f32.gmra.mxu1 %vm19991_vm10, %v12665_v21  ;;  %v4014_v16 = vadd.f32 %v3898_v58, %v3572_v44  ;;  %v20012_v3 = vld [vmem:[#allocation84_spill] sm:$0xff] }
 0x4c0   :  { %7299 = vmatmul.msk.f32.gmra.mxu2 %vm20004_vm1, %v3715_v42  ;;  %v3257_v42 = vadd.f32 %v20011_v34, %v20010_v52  ;;  %vm17475_vm7 = vcmp.lt.s32.totalorder %v20012_v3, 35  ;;  %v20021_v52 = vld [vmem:[#allocation120_spill] sm:$0xff] }
 0x4c1   :  { %7343 = vmatmul.msk.f32.gmra.mxu3 %vm20006_vm8, %v4239_v43  ;;  %vm4198_vm8 = vcmp.eq.s32.totalorder %v4156_v48, 1  ;;  %v3716_v43 = vsel %vm3674_vm14, %v19977_v41, 0.0  ;;  %v14821_v48 = vpop.f32.mrf.mxu0  ;;  %vm20019_vm14 = vmmov %vm20004_vm1 }
 0x4c2   :  { %7384 = vmatmul.msk.f32.gmra.mxu0 %vm20007_vm4, %v4676_v51  ;;  %v20014_v51 = vld [vmem:[#allocation101_spill] sm:$0xff]  ;;  %v4240_v0 = vsel %vm4198_vm8, %v13544_v46, 0.0  ;;  %vm20017_vm4 = vcmp.lt.s32.totalorder %v19929_v35, 35  ;;  %20018 = vst [vmem:[#allocation116_spill] sm:$0xff] %v14821_v48  ;;  %v20025_v35 = vld [vmem:[#allocation88_spill] sm:$0xff] }
 0x4c3   :  { %v3901_v56 = vpop.f32.mrf.mxu2  ;;  %vm20015_vm10 = vnez %v20014_v51  ;;  %v20024_v51 = vld [vmem:[#allocation4_spill] sm:$0xff]  ;;  %v20027_v48 = vld [vmem:[#allocation105_spill] sm:$0xff] }
 0x4c4   :  { %v4421_v22 = vpop.f32.mrf.mxu3  ;;  %v3459_v58 = vpop.f32.mrf.mxu1  ;;  %vm4115_vm11 = vmand %vm17475_vm7, %vm20015_vm10  ;;  %vm20022_vm10 = vnez %v20021_v52  ;;  %vm20031_vm7 = vcmp.lt.s32.totalorder %v19942_v19, 35  ;;  %v20039_v19 = vld [vmem:[#allocation92_spill] sm:$0xff] }
 0x4c5   :  { %v14807_v18 = vadd.f32 %v4421_v22, %v4013_v14  ;;  %v3573_v44 = vadd.f32 %v3459_v58, %v3257_v42  ;;  %v4677_v14 = vsel %vm20017_vm4, %v19963_v59, 0.0  ;;  %v3633_v34 = vsel %vm20022_vm10, 1, %v17671_v61  ;;  %vm20029_vm4 = vmmov %vm20019_vm14 }
 0x4c6   :  { %v4157_v42 = vsel %vm4115_vm11, 1, %v17671_v61  ;;  %vm3675_vm8 = vcmp.eq.s32.totalorder %v3633_v34, 1  ;;  %vm20032_vm10 = vmmov %vm20029_vm4 }
 0x4c7   :  { %20013 = vst [vmem:[#allocation155_spill] sm:$0xff] %v14807_v18  ;;  %7253 = vmatmul.msk.f32.gmra.mxu1 %vm20004_vm1, %v19948_v27  ;;  %v4015_v22 = vadd.f32 %v3901_v56, %v3573_v44  ;;  %vm17477_vm1 = vcmp.lt.s32.totalorder %v20025_v35, 35 }
 0x4c8   :  { %7300 = vmatmul.msk.f32.gmra.mxu2 %vm20016_vm13, %v3716_v43  ;;  %v20023_v43 = vld [vmem:[#allocation136_spill] sm:$0xff]  ;;  %vm4199_vm13 = vcmp.eq.s32.totalorder %v4157_v42, 1 }
 0x4c9   :  { %7344 = vmatmul.msk.f32.gmra.mxu3 %vm20019_vm14, %v4240_v0  ;;  %v3258_v31 = vadd.f32 %v20024_v51, %v20023_v43  ;;  %vm20030_vm14 = vmmov %vm20029_vm4  ;;  %v4241_v34 = vsel %vm4199_vm13, %v13711_v26, 0.0  ;;  %v14852_v43 = vpop.f32.mrf.mxu0 }
 0x4ca   :  { %7385 = vmatmul.msk.f32.gmra.mxu0 %vm20020_vm0, %v4677_v14  ;;  %v3717_v14 = vsel %vm3675_vm8, %v13249_v32, 0.0  ;;  %vm20028_vm0 = vnez %v20027_v48  ;;  %vm20033_vm8 = vmmov %vm20029_vm4  ;;  %20036 = vst [vmem:[#allocation90_spill] sm:$0xff] %v14852_v43 }
 0x4cb   :  { %v3904_v58 = vpop.f32.mrf.mxu2  ;;  %vm4116_vm11 = vmand %vm17477_vm1, %vm20028_vm0 }
 0x4cc   :  { %v4424_v18 = vpop.f32.mrf.mxu3  ;;  %v3462_v44 = vpop.f32.mrf.mxu1  ;;  %v4158_v42 = vsel %vm4116_vm11, 1, %v17671_v61  ;;  %vm20045_vm1 = vmmov %vm20029_vm4 }
 0x4cd   :  { %v14832_v56 = vadd.f32 %v4424_v18, %v4014_v16  ;;  %v3574_v0 = vadd.f32 %v3462_v44, %v3258_v31  ;;  %v4678_v18 = vsel %vm20031_vm7, %v19977_v41, 0.0  ;;  %v20034_v31 = vld [vmem:[#allocation125_spill] sm:$0xff]  ;;  %v20037_v44 = vld [vmem:[#allocation142_spill] sm:$0xff]  ;;  %vm17479_vm7 = vcmp.lt.s32.totalorder %v20039_v19, 35 }
 0x4ce   :  { %vm20035_vm6 = vnez %v20034_v31  ;;  %v20041_v31 = vld [vmem:[#allocation109_spill] sm:$0xff] }
 0x4cf   :  { %20026 = vst [vmem:[#allocation137_spill] sm:$0xff] %v14832_v56  ;;  %7254 = vmatmul.msk.f32.gmra.mxu1 %vm20029_vm4, %v19963_v59  ;;  %v4016_v16 = vadd.f32 %v3904_v58, %v3574_v0  ;;  %v3634_v48 = vsel %vm20035_vm6, 1, %v17671_v61  ;;  %vm20042_vm0 = vnez %v20041_v31 }
 0x4d0   :  { %7301 = vmatmul.msk.f32.gmra.mxu2 %vm20030_vm14, %v3717_v14  ;;  %v20038_v14 = vld [vmem:[#allocation158_spill] sm:$0xff]  ;;  %vm3676_vm13 = vcmp.eq.s32.totalorder %v3634_v48, 1  ;;  %vm4117_vm11 = vmand %vm17479_vm7, %vm20042_vm0 }
 0x4d1   :  { %7345 = vmatmul.msk.f32.gmra.mxu3 %vm20032_vm10, %v4241_v34  ;;  %v3259_v52 = vadd.f32 %v20038_v14, %v20037_v44  ;;  %vm4200_vm10 = vcmp.eq.s32.totalorder %v4158_v42, 1  ;;  %vm20043_vm14 = vmmov %vm20029_vm4  ;;  %v4159_v42 = vsel %vm4117_vm11, 1, %v17671_v61  ;;  %v20049_v14 = vld [vmem:[#allocation147_spill] sm:$0xff] }
 0x4d2   :  { %7386 = vmatmul.msk.f32.gmra.mxu0 %vm20033_vm8, %v4678_v18  ;;  %v3718_v18 = vsel %vm3676_vm13, %v13380_v57, 0.0  ;;  %v4242_v48 = vsel %vm4200_vm10, %v13831_v12, 0.0  ;;  %vm20044_vm8 = vcmp.lt.s32.totalorder %v19957_v15, 35  ;;  %vm20046_vm13 = vmmov %vm20045_vm1  ;;  %v14880_v15 = vpop.f32.mrf.mxu0 }
 0x4d3   :  { %v3907_v51 = vpop.f32.mrf.mxu2  ;;  %20052 = vst [vmem:[#allocation121_spill] sm:$0xff] %v14880_v15 }
 0x4d4   :  { %v4427_v56 = vpop.f32.mrf.mxu3  ;;  %v3465_v0 = vpop.f32.mrf.mxu1 }
 0x4d5   :  { %v14857_v58 = vadd.f32 %v4427_v56, %v4015_v22  ;;  %v3575_v34 = vadd.f32 %v3465_v0, %v3259_v52  ;;  %v4679_v22 = vsel %vm20044_vm8, %v13249_v32, 0.0  ;;  %v20047_v52 = vld [vmem:[#allocation129_spill] sm:$0xff]  ;;  %v20050_v0 = vld [vmem:[#allocation162_spill] sm:$0xff]  ;;  %vm20057_vm8 = vmmov %vm20046_vm13 }
 0x4d6   :  { %vm20048_vm6 = vnez %v20047_v52  ;;  %v20054_v52 = vld [vmem:[#allocation114_spill] sm:$0xff]  ;;  %vm20059_vm7 = vmmov %vm20057_vm8 }
 0x4d7   :  { %20040 = vst [vmem:[#allocation159_spill] sm:$0xff] %v14857_v58  ;;  %7255 = vmatmul.msk.f32.gmra.mxu1 %vm20029_vm4, %v19977_v41  ;;  %v4017_v56 = vadd.f32 %v3907_v51, %v3575_v34  ;;  %v3635_v31 = vsel %vm20048_vm6, 1, %v17671_v61  ;;  %v20051_v58 = vld [vmem:[#allocation96_spill] sm:$0xff]  ;;  %vm20055_vm4 = vnez %v20054_v52  ;;  %v20061_v52 = vld [vmem:[#allocation135_spill] sm:$0xff] }
 0x4d8   :  { %7302 = vmatmul.msk.f32.gmra.mxu2 %vm20043_vm14, %v3718_v18  ;;  %v3260_v18 = vadd.f32 %v20050_v0, %v20049_v14  ;;  %vm3677_vm10 = vcmp.eq.s32.totalorder %v3635_v31, 1  ;;  %vm17481_vm0 = vcmp.lt.s32.totalorder %v20051_v58, 35  ;;  %vm20056_vm14 = vmmov %vm20046_vm13  ;;  %vm20062_vm6 = vnez %v20061_v52  ;;  %v20067_v52 = vld [vmem:[#allocation118_spill] sm:$0xff] }
 0x4d9   :  { %7346 = vmatmul.msk.f32.gmra.mxu3 %vm20045_vm1, %v4242_v48  ;;  %vm4201_vm1 = vcmp.eq.s32.totalorder %v4159_v42, 1  ;;  %vm4118_vm11 = vmand %vm17481_vm0, %vm20055_vm4  ;;  %v3636_v42 = vsel %vm20062_vm6, 1, %v17671_v61 }
 0x4da   :  { %7387 = vmatmul.msk.f32.gmra.mxu0 %vm20046_vm13, %v4679_v22  ;;  %v3719_v22 = vsel %vm3677_vm10, %v13544_v46, 0.0  ;;  %v4243_v31 = vsel %vm4201_vm1, %v13942_v4, 0.0  ;;  %vm20058_vm13 = vcmp.lt.s32.totalorder %v19972_v50, 35  ;;  %vm20060_vm10 = vmmov %vm20059_vm7  ;;  %v4160_v14 = vsel %vm4118_vm11, 1, %v17671_v61 }
 0x4db   :  { %v3910_v44 = vpop.f32.mrf.mxu2  ;;  %vm3678_vm1 = vcmp.eq.s32.totalorder %v3636_v42, 1  ;;  %vm20071_vm0 = vmmov %vm20057_vm8 }
 0x4dc   :  { %v4430_v43 = vpop.f32.mrf.mxu3  ;;  %v3468_v34 = vpop.f32.mrf.mxu1 }
 0x4dd   :  { %v14882_v51 = vadd.f32 %v4430_v43, %v4016_v16  ;;  %v3576_v48 = vadd.f32 %v3468_v34, %v3260_v18  ;;  %v4680_v16 = vsel %vm20058_vm13, %v13380_v57, 0.0  ;;  %v20063_v18 = vld [vmem:[#allocation150_spill] sm:$0xff]  ;;  %v20064_v34 = vld [vmem:[#allocation164_spill] sm:$0xff]  ;;  %vm20069_vm13 = vmmov %vm20057_vm8 }
 0x4df   :  { %20053 = vst [vmem:[#allocation143_spill] sm:$0xff] %v14882_v51  ;;  %7256 = vmatmul.msk.f32.gmra.mxu1 %vm20056_vm14, %v13249_v32  ;;  %v4018_v43 = vadd.f32 %v3910_v44, %v3576_v48  ;;  %v20065_v51 = vld [vmem:[#allocation99_spill] sm:$0xff]  ;;  %vm20068_vm14 = vnez %v20067_v52  ;;  %v20073_v52 = vld [vmem:[#allocation141_spill] sm:$0xff] }
 0x4e0   :  { %7303 = vmatmul.msk.f32.gmra.mxu2 %vm20057_vm8, %v3719_v22  ;;  %v3261_v22 = vadd.f32 %v20064_v34, %v20063_v18  ;;  %vm17483_vm4 = vcmp.lt.s32.totalorder %v20065_v51, 35  ;;  %vm20074_vm6 = vnez %v20073_v52 }
 0x4e1   :  { %7347 = vmatmul.msk.f32.gmra.mxu3 %vm20059_vm7, %v4243_v31  ;;  %vm4202_vm7 = vcmp.eq.s32.totalorder %v4160_v14, 1  ;;  %v14907_v31 = vpop.f32.mrf.mxu0  ;;  %vm4119_vm11 = vmand %vm17483_vm4, %vm20068_vm14  ;;  %v3637_v14 = vsel %vm20074_vm6, 1, %v17671_v61 }
 0x4e2   :  { %7388 = vmatmul.msk.f32.gmra.mxu0 %vm20060_vm10, %v4680_v16  ;;  %v3720_v16 = vsel %vm3678_vm1, %v13711_v26, 0.0  ;;  %vm20070_vm10 = vcmp.lt.s32.totalorder %v19985_v5, 35  ;;  %vm20072_vm1 = vmmov %vm20071_vm0  ;;  %v4161_v18 = vsel %vm4119_vm11, 1, %v17671_v61 }
 0x4e3   :  { %v3913_v0 = vpop.f32.mrf.mxu2 }
 0x4e4   :  { %v4433_v15 = vpop.f32.mrf.mxu3  ;;  %v3471_v44 = vpop.f32.mrf.mxu1 }
 0x4e5   :  { %v14905_v50 = vadd.f32 %v4433_v15, %v4017_v56  ;;  %v3577_v48 = vadd.f32 %v3471_v44, %v3261_v22  ;;  %v4244_v15 = vsel %vm4202_vm7, %v14052_v2, 0.0  ;;  %v4681_v56 = vsel %vm20070_vm10, %v13544_v46, 0.0  ;;  %v20075_v22 = vld [vmem:[#allocation154_spill] sm:$0xff]  ;;  %vm20081_vm10 = vmmov %vm20072_vm1 }
 0x4e6   :  { %v3262_v44 = vadd.f32 %v13476_v10, %v20075_v22  ;;  %vm3679_vm7 = vcmp.eq.s32.totalorder %v3637_v14, 1  ;;  %v20085_v22 = vld [vmem:[#allocation146_spill] sm:$0xff] }
 0x4e7   :  { %20066 = vst [vmem:[#allocation94_spill] sm:$0xff] %v14905_v50  ;;  %7257 = vmatmul.msk.f32.gmra.mxu1 %vm20057_vm8, %v13380_v57  ;;  %v4019_v42 = vadd.f32 %v3913_v0, %v3577_v48  ;;  %v20076_v50 = vld [vmem:[#allocation104_spill] sm:$0xff] }
 0x4e8   :  { %7304 = vmatmul.msk.f32.gmra.mxu2 %vm20069_vm13, %v3720_v16  ;;  %vm17485_vm14 = vcmp.lt.s32.totalorder %v20076_v50, 35  ;;  %vm20080_vm13 = vmmov %vm20072_vm1 }
 0x4e9   :  { %7348 = vmatmul.msk.f32.gmra.mxu3 %vm20071_vm0, %v4244_v15  ;;  %vm4203_vm0 = vcmp.eq.s32.totalorder %v4161_v18, 1  ;;  %v3721_v15 = vsel %vm3679_vm7, %v13831_v12, 0.0  ;;  %v14944_v18 = vpop.f32.mrf.mxu0  ;;  %vm20083_vm7 = vmmov %vm20081_vm10 }
 0x4ea   :  { %7389 = vmatmul.msk.f32.gmra.mxu0 %vm20072_vm1, %v4681_v56  ;;  %v20078_v56 = vld [vmem:[#allocation124_spill] sm:$0xff]  ;;  %v4245_v10 = vsel %vm4203_vm0, %v14146_v62, 0.0  ;;  %vm20082_vm1 = vcmp.lt.s32.totalorder %v19999_v17, 35  ;;  %vm20084_vm4 = vmmov %vm20083_vm7 }
 0x4eb   :  { %v3916_v34 = vpop.f32.mrf.mxu2  ;;  %vm20079_vm8 = vnez %v20078_v56  ;;  %v20090_v17 = vld [vmem:[#allocation128_spill] sm:$0xff] }
 0x4ec   :  { %v4436_v16 = vpop.f32.mrf.mxu3  ;;  %v3474_v0 = vpop.f32.mrf.mxu1  ;;  %vm4120_vm11 = vmand %vm17485_vm14, %vm20079_vm8  ;;  %vm20086_vm8 = vnez %v20085_v22  ;;  %vm20094_vm14 = vcmp.lt.s32.totalorder %v20012_v3, 35 }
 0x4ed   :  { %v14930_v5 = vadd.f32 %v4436_v16, %v4018_v43  ;;  %v3578_v48 = vadd.f32 %v3474_v0, %v3262_v44  ;;  %v4682_v43 = vsel %vm20082_vm1, %v13711_v26, 0.0  ;;  %v3638_v44 = vsel %vm20086_vm8, 1, %v17671_v61  ;;  %vm20092_vm1 = vmmov %vm20083_vm7 }
 0x4ee   :  { %v4162_v16 = vsel %vm4120_vm11, 1, %v17671_v61  ;;  %vm3680_vm0 = vcmp.eq.s32.totalorder %v3638_v44, 1  ;;  %vm20095_vm8 = vmmov %vm20092_vm1 }
 0x4ef   :  { %20077 = vst [vmem:[#allocation126_spill] sm:$0xff] %v14930_v5  ;;  %7258 = vmatmul.msk.f32.gmra.mxu1 %vm20080_vm13, %v13544_v46  ;;  %v4020_v14 = vadd.f32 %v3916_v34, %v3578_v48  ;;  %v20088_v5 = vld [vmem:[#allocation108_spill] sm:$0xff]  ;;  %v3722_v22 = vsel %vm3680_vm0, %v13942_v4, 0.0  ;;  %vm20096_vm0 = vmmov %vm20092_vm1 }
 0x4f0   :  { %7305 = vmatmul.msk.f32.gmra.mxu2 %vm20081_vm10, %v3721_v15  ;;  %v20087_v15 = vld [vmem:[#allocation157_spill] sm:$0xff]  ;;  %vm17486_vm13 = vcmp.lt.s32.totalorder %v20088_v5, 35  ;;  %vm4204_vm10 = vcmp.eq.s32.totalorder %v4162_v16, 1 }
 0x4f1   :  { %7349 = vmatmul.msk.f32.gmra.mxu3 %vm20083_vm7, %v4245_v10  ;;  %v3263_v56 = vadd.f32 %v13626_v45, %v20087_v15  ;;  %v7411_v10 = vld [vmem:[%s17061_s3 + $0x100] sm:$0xff]  ;;  %vm20093_vm7 = vmmov %vm20092_vm1  ;;  %v4246_v45 = vsel %vm4204_vm10, %v14215_v9, 0.0  ;;  %v14978_v15 = vpop.f32.mrf.mxu0 }
 0x4f2   :  { %7390 = vmatmul.msk.f32.gmra.mxu0 %vm20084_vm4, %v4682_v43  ;;  %5333 = vmatpush.msra.mxu1 %v7411_v10  ;;  %vm20091_vm4 = vnez %v20090_v17  ;;  %v20097_v17 = vld [vmem:[#allocation149_spill] sm:$0xff] }
 0x4f3   :  { %v3919_v0 = vpop.f32.mrf.mxu2  ;;  %vm4121_vm11 = vmand %vm17486_vm13, %vm20091_vm4  ;;  %vm20098_vm6 = vnez %v20097_v17  ;;  %v20102_v17 = vld [vmem:[#allocation134_spill] sm:$0xff] }
 0x4f4   :  { %v4439_v52 = vpop.f32.mrf.mxu3  ;;  %v3477_v48 = vpop.f32.mrf.mxu1  ;;  %v3639_v44 = vsel %vm20098_vm6, 1, %v17671_v61  ;;  %v4163_v16 = vsel %vm4121_vm11, 1, %v17671_v61  ;;  %vm20103_vm4 = vnez %v20102_v17  ;;  %v20109_v17 = vld [vmem:[#allocation152_spill] sm:$0xff] }
 0x4f5   :  { %v14955_v34 = vadd.f32 %v4439_v52, %v4019_v42  ;;  %v3579_v43 = vadd.f32 %v3477_v48, %v3263_v56  ;;  %v4683_v42 = vsel %vm20094_vm14, %v13831_v12, 0.0  ;;  %v20099_v56 = vld [vmem:[#allocation6_spill] sm:$0xff]  ;;  %vm3681_vm10 = vcmp.eq.s32.totalorder %v3639_v44, 1 }
 0x4f6   :  { %v3264_v48 = vadd.f32 %v13752_v55, %v20099_v56  ;;  %vm20110_vm6 = vnez %v20109_v17  ;;  %v20115_v17 = vld [vmem:[#allocation140_spill] sm:$0xff] }
 0x4f7   :  { %20089 = vst [vmem:[#allocation2_spill] sm:$0xff] %v14955_v34  ;;  %7259 = vmatmul.msk.f32.gmra.mxu1 %vm20092_vm1, %v13711_v26  ;;  %v4021_v52 = vadd.f32 %v3919_v0, %v3579_v43  ;;  %v20100_v34 = vld [vmem:[#allocation112_spill] sm:$0xff]  ;;  %vm20104_vm1 = vmmov %vm20096_vm0 }
 0x4f8   :  { %7306 = vmatmul.msk.f32.gmra.mxu2 %vm20093_vm7, %v3722_v22  ;;  %vm17489_vm14 = vcmp.lt.s32.totalorder %v20100_v34, 35  ;;  %vm20105_vm7 = vmmov %vm20096_vm0 }
 0x4f9   :  { %7350 = vmatmul.msk.f32.gmra.mxu3 %vm20095_vm8, %v4246_v45  ;;  %vm4205_vm8 = vcmp.eq.s32.totalorder %v4163_v16, 1  ;;  %vm4122_vm11 = vmand %vm17489_vm14, %vm20103_vm4  ;;  %v3640_v16 = vsel %vm20110_vm6, 1, %v17671_v61 }
 0x4fa   :  { %7391 = vmatmul.msk.f32.gmra.mxu0 %vm20096_vm0, %v4683_v42  ;;  %v3723_v42 = vsel %vm3681_vm10, %v14052_v2, 0.0  ;;  %v4247_v55 = vsel %vm4205_vm8, %v19734_v38, 0.0  ;;  %vm20106_vm0 = vcmp.lt.s32.totalorder %v20025_v35, 35  ;;  %vm20107_vm13 = vmmov %vm20104_vm1  ;;  %v4164_v56 = vsel %vm4122_vm11, 1, %v17671_v61  ;;  %v15006_v35 = vpop.f32.mrf.mxu0 }
 0x4fb   :  { %v3922_v22 = vpop.f32.mrf.mxu2  ;;  %vm20108_vm10 = vmmov %vm20104_vm1  ;;  %vm3682_vm8 = vcmp.eq.s32.totalorder %v3640_v16, 1 }
 0x4fc   :  { %v4442_v10 = vpop.f32.mrf.mxu3  ;;  %v3480_v43 = vpop.f32.mrf.mxu1 }
 0x4fd   :  { %v14983_v0 = vadd.f32 %v4442_v10, %v4020_v14  ;;  %v3580_v45 = vadd.f32 %v3480_v43, %v3264_v48  ;;  %v4684_v14 = vsel %vm20106_vm0, %v13942_v4, 0.0  ;;  %v20111_v10 = vld [vmem:[#allocation7_spill] sm:$0xff]  ;;  %v20112_v43 = vld [vmem:[#allocation176_spill] sm:$0xff]  ;;  %vm20117_vm0 = vmmov %vm20105_vm7 }
 0x4fe   :  { %vm20119_vm14 = vmmov %vm20117_vm0 }
 0x4ff   :  { %20101 = vst [vmem:[#allocation97_spill] sm:$0xff] %v14983_v0  ;;  %7260 = vmatmul.msk.f32.gmra.mxu1 %vm20104_vm1, %v13831_v12  ;;  %v4022_v44 = vadd.f32 %v3922_v22, %v3580_v45  ;;  %v20113_v12 = vld [vmem:[#allocation119_spill] sm:$0xff]  ;;  %vm20116_vm1 = vnez %v20115_v17  ;;  %v20121_v17 = vld [vmem:[#allocation5_spill] sm:$0xff] }
 0x500   :  { %7307 = vmatmul.msk.f32.gmra.mxu2 %vm20105_vm7, %v3723_v42  ;;  %v3265_v42 = vadd.f32 %v20112_v43, %v20111_v10  ;;  %vm17492_vm4 = vcmp.lt.s32.totalorder %v20113_v12, 35  ;;  %vm20122_vm6 = vnez %v20121_v17  ;;  %v20127_v17 = vld [vmem:[#allocation145_spill] sm:$0xff] }
 0x501   :  { %7351 = vmatmul.msk.f32.gmra.mxu3 %vm20107_vm13, %v4247_v55  ;;  %vm4206_vm13 = vcmp.eq.s32.totalorder %v4164_v56, 1  ;;  %vm4123_vm11 = vmand %vm17492_vm4, %vm20116_vm1  ;;  %v3641_v56 = vsel %vm20122_vm6, 1, %v17671_v61 }
 0x502   :  { %7392 = vmatmul.msk.f32.gmra.mxu0 %vm20108_vm10, %v4684_v14  ;;  %v3724_v14 = vsel %vm3682_vm8, %v14146_v62, 0.0  ;;  %v4248_v16 = vsel %vm4206_vm13, %v19749_v37, 0.0  ;;  %vm20118_vm10 = vcmp.lt.s32.totalorder %v20039_v19, 35  ;;  %vm20120_vm8 = vmmov %vm20117_vm0  ;;  %v4165_v10 = vsel %vm4123_vm11, 1, %v17671_v61 }
 0x503   :  { %v3925_v48 = vpop.f32.mrf.mxu2  ;;  %vm3683_vm13 = vcmp.eq.s32.totalorder %v3641_v56, 1  ;;  %vm20131_vm4 = vmmov %vm20117_vm0 }
 0x504   :  { %v4445_v0 = vpop.f32.mrf.mxu3  ;;  %v3483_v45 = vpop.f32.mrf.mxu1 }
 0x505   :  { %v15008_v22 = vadd.f32 %v4445_v0, %v4021_v52  ;;  %v3581_v55 = vadd.f32 %v3483_v45, %v3265_v42  ;;  %v4685_v52 = vsel %vm20118_vm10, %v14052_v2, 0.0  ;;  %v20123_v42 = vld [vmem:[#allocation166_spill] sm:$0xff]  ;;  %vm20129_vm10 = vmmov %vm20117_vm0 }
 0x506   :  { %v20124_v45 = vld [vmem:[#allocation182_spill] sm:$0xff] }
 0x507   :  { %20114 = vst [vmem:[#allocation131_spill] sm:$0xff] %v15008_v22  ;;  %7261 = vmatmul.msk.f32.gmra.mxu1 %vm20105_vm7, %v13942_v4  ;;  %v4023_v0 = vadd.f32 %v3925_v48, %v3581_v55  ;;  %v20125_v4 = vld [vmem:[#allocation123_spill] sm:$0xff]  ;;  %vm20128_vm7 = vnez %v20127_v17  ;;  %v20133_v17 = vld [vmem:[#allocation161_spill] sm:$0xff] }
 0x508   :  { %7308 = vmatmul.msk.f32.gmra.mxu2 %vm20117_vm0, %v3724_v14  ;;  %v3266_v14 = vadd.f32 %v20124_v45, %v20123_v42  ;;  %vm17494_vm1 = vcmp.lt.s32.totalorder %v20125_v4, 35  ;;  %vm20134_vm6 = vnez %v20133_v17  ;;  %v20135_v45 = vld [vmem:[#allocation169_spill] sm:$0xff] }
 0x509   :  { %7352 = vmatmul.msk.f32.gmra.mxu3 %vm20119_vm14, %v4248_v16  ;;  %vm4207_vm14 = vcmp.eq.s32.totalorder %v4165_v10, 1  ;;  %v15033_v16 = vpop.f32.mrf.mxu0  ;;  %vm4124_vm11 = vmand %vm17494_vm1, %vm20128_vm7  ;;  %v3642_v10 = vsel %vm20134_vm6, 1, %v17671_v61 }
 0x50a   :  { %7393 = vmatmul.msk.f32.gmra.mxu0 %vm20120_vm8, %v4685_v52  ;;  %v3725_v52 = vsel %vm3683_vm13, %v14215_v9, 0.0  ;;  %vm20130_vm8 = vcmp.lt.s32.totalorder %v20051_v58, 35  ;;  %vm20132_vm13 = vmmov %vm20117_vm0  ;;  %v4166_v42 = vsel %vm4124_vm11, 1, %v17671_v61 }
 0x50b   :  { %v3928_v43 = vpop.f32.mrf.mxu2 }
 0x50c   :  { %v4448_v22 = vpop.f32.mrf.mxu3  ;;  %v3486_v48 = vpop.f32.mrf.mxu1 }
 0x50d   :  { %v15031_v19 = vadd.f32 %v4448_v22, %v4022_v44  ;;  %v3582_v55 = vadd.f32 %v3486_v48, %v3266_v14  ;;  %v4249_v44 = vsel %vm4207_vm14, %v19760_v54, 0.0  ;;  %v4686_v22 = vsel %vm20130_vm8, %v14146_v62, 0.0  ;;  %vm20139_vm8 = vmmov %vm20129_vm10 }
 0x50e   :  { %v3267_v14 = vadd.f32 %v14088_v29, %v20135_v45  ;;  %vm3684_vm14 = vcmp.eq.s32.totalorder %v3642_v10, 1  ;;  %vm20142_vm1 = vmmov %vm20139_vm8 }
 0x50f   :  { %20126 = vst [vmem:[#allocation3_spill] sm:$0xff] %v15031_v19  ;;  %7262 = vmatmul.msk.f32.gmra.mxu1 %vm20117_vm0, %v14052_v2  ;;  %v4024_v56 = vadd.f32 %v3928_v43, %v3582_v55  ;;  %vm20138_vm0 = vnez %v19213_v1  ;;  %v20143_v1 = vld [vmem:[#allocation8_spill] sm:$0xff] }
 0x510   :  { %7309 = vmatmul.msk.f32.gmra.mxu2 %vm20129_vm10, %v3725_v52  ;;  %v20136_v52 = vld [vmem:[#allocation130_spill] sm:$0xff] }
 0x511   :  { %7353 = vmatmul.msk.f32.gmra.mxu3 %vm20131_vm4, %v4249_v44  ;;  %vm17495_vm7 = vcmp.lt.s32.totalorder %v20136_v52, 35  ;;  %vm4208_vm4 = vcmp.eq.s32.totalorder %v4166_v42, 1  ;;  %v3726_v44 = vsel %vm3684_vm14, %v19734_v38, 0.0  ;;  %v15070_v10 = vpop.f32.mrf.mxu0  ;;  %vm20141_vm14 = vmmov %vm20139_vm8 }
 0x512   :  { %7394 = vmatmul.msk.f32.gmra.mxu0 %vm20132_vm13, %v4686_v22  ;;  %vm4125_vm11 = vmand %vm17495_vm7, %vm20138_vm0  ;;  %v4250_v29 = vsel %vm4208_vm4, %v19772_v28, 0.0  ;;  %vm20140_vm13 = vcmp.lt.s32.totalorder %v20065_v51, 35  ;;  %vm20144_vm0 = vnez %v20143_v1  ;;  %vm20151_vm7 = vcmp.lt.s32.totalorder %v20076_v50, 35  ;;  %v20167_v1 = vld [vmem:[#allocation148_spill] sm:$0xff] }
 0x513   :  { %v3931_v19 = vpop.f32.mrf.mxu2  ;;  %v3643_v42 = vsel %vm20144_vm0, 1, %v17671_v61  ;;  %v4167_v45 = vsel %vm4125_vm11, 1, %v17671_v61 }
 0x514   :  { %v4451_v48 = vpop.f32.mrf.mxu3  ;;  %v3489_v43 = vpop.f32.mrf.mxu1  ;;  %vm3685_vm4 = vcmp.eq.s32.totalorder %v3643_v42, 1 }
 0x515   :  { %v15056_v58 = vadd.f32 %v4451_v48, %v4023_v0  ;;  %v3583_v55 = vadd.f32 %v3489_v43, %v3267_v14  ;;  %v4687_v0 = vsel %vm20140_vm13, %v14215_v9, 0.0  ;;  %v20145_v14 = vld [vmem:[#allocation171_spill] sm:$0xff]  ;;  %vm20149_vm13 = vmmov %vm20141_vm14 }
 0x516   :  { %v3268_v48 = vadd.f32 %v14179_v6, %v20145_v14  ;;  %vm20152_vm0 = vmmov %vm20149_vm13  ;;  %v7464_v14 = vld [vmem:[%s17062_s5 + $0x78] sm:$0xff] }
 0x517   :  { %20137 = vst [vmem:[#allocation84_spill] sm:$0xff] %v15056_v58  ;;  %7263 = vmatmul.msk.f32.gmra.mxu1 %vm20129_vm10, %v14146_v62  ;;  %v4025_v22 = vadd.f32 %v3931_v19, %v3583_v55  ;;  %5620 = vmatpush.msra.mxu2 %v7464_v14  ;;  %v20197_v58 = vld [vmem:[#allocation172_spill] sm:$0xff] }
 0x518   :  { %7310 = vmatmul.msk.f32.gmra.mxu2 %vm20139_vm8, %v3726_v44  ;;  %v20146_v44 = vld [vmem:[#allocation138_spill] sm:$0xff]  ;;  %vm4209_vm8 = vcmp.eq.s32.totalorder %v4167_v45, 1 }
 0x519   :  { %7354 = vmatmul.msk.f32.gmra.mxu3 %vm20141_vm14, %v4250_v29  ;;  %vm17496_vm10 = vcmp.lt.s32.totalorder %v20146_v44, 35  ;;  %vm20150_vm14 = vmmov %vm20149_vm13  ;;  %v4251_v6 = vsel %vm4209_vm8, %v19785_v47, 0.0 }
 0x51a   :  { %7395 = vmatmul.msk.f32.gmra.mxu0 %vm20142_vm1, %v4687_v0  ;;  %v3727_v0 = vsel %vm3685_vm4, %v19749_v37, 0.0  ;;  %vm20148_vm1 = vnez %v19256_v30  ;;  %vm20153_vm4 = vmmov %vm20152_vm0  ;;  %v20154_v30 = vld [vmem:[#allocation9_spill] sm:$0xff] }
 0x51b   :  { %v3934_v17 = vpop.f32.mrf.mxu2  ;;  %vm4126_vm11 = vmand %vm17496_vm10, %vm20148_vm1  ;;  %vm20155_vm6 = vnez %v20154_v30 }
 0x51c   :  { %v4454_v43 = vpop.f32.mrf.mxu3  ;;  %v3492_v55 = vpop.f32.mrf.mxu1  ;;  %v3644_v45 = vsel %vm20155_vm6, 1, %v17671_v61  ;;  %vm20162_vm10 = vmmov %vm20153_vm4 }
 0x51d   :  { %v15081_v19 = vadd.f32 %v4454_v43, %v4024_v56  ;;  %v3584_v29 = vadd.f32 %v3492_v55, %v3268_v48  ;;  %v4688_v56 = vsel %vm20151_vm7, %v19734_v38, 0.0  ;;  %v4168_v48 = vsel %vm4126_vm11, 1, %v17671_v61  ;;  %v15104_v43 = vpop.f32.mrf.mxu0  ;;  %vm20159_vm11 = vmmov %vm20153_vm4 }
 0x51e   :  { %vm3686_vm7 = vcmp.eq.s32.totalorder %v3644_v45, 1 }
 0x51f   :  { %20147 = vst [vmem:[#allocation101_spill] sm:$0xff] %v15081_v19  ;;  %7264 = vmatmul.msk.f32.gmra.mxu1 %vm20149_vm13, %v14215_v9  ;;  %v4026_v42 = vadd.f32 %v3934_v17, %v3584_v29  ;;  %vm20160_vm13 = vmmov %vm20153_vm4 }
 0x520   :  { %7311 = vmatmul.msk.f32.gmra.mxu2 %vm20150_vm14, %v3727_v0  ;;  %v5598_v0 = vld [vmem:[%s17062_s5 + $0x38] sm:$0xff]  ;;  %vm20161_vm14 = vcmp.lt.s32.totalorder %v20088_v5, 35 }
 0x521   :  { %7355 = vmatmul.msk.f32.gmra.mxu3 %vm20152_vm0, %v4251_v6  ;;  %vm4210_vm0 = vcmp.eq.s32.totalorder %v4168_v48, 1  ;;  %v20158_v6 = vld [vmem:[#allocation144_spill] sm:$0xff]  ;;  %v4689_v45 = vsel %vm20161_vm14, %v19749_v37, 0.0  ;;  %vm20170_vm14 = vcmp.lt.s32.totalorder %v20100_v34, 35 }
 0x522   :  { %7396 = vmatmul.msk.f32.gmra.mxu0 %vm20153_vm4, %v4688_v56  ;;  %vm17497_vm8 = vcmp.lt.s32.totalorder %v20158_v6, 35  ;;  %5643 = vmatpush.msra.mxu3 %v5598_v0  ;;  %v3728_v56 = vsel %vm3686_vm7, %v19760_v54, 0.0  ;;  %vm20164_vm7 = vnez %v20163_v33 }
 0x523   :  { %vm4127_vm1 = vmand %vm17497_vm8, %vm19717_vm3  ;;  %v3645_v14 = vsel %vm20164_vm7, 1, %v17671_v61 }
 0x524   :  { %v4457_v55 = vpop.f32.mrf.mxu3  ;;  %v15108_v29 = vpop.f32.mrf.mxu1  ;;  %v4169_v48 = vsel %vm4127_vm1, 1, %v17671_v61  ;;  %vm3687_vm3 = vcmp.eq.s32.totalorder %v3645_v14, 1  ;;  %vm20168_vm1 = vmmov %vm20153_vm4 }
 0x525   :  { %v15106_v17 = vadd.f32 %v4457_v55, %v4025_v22  ;;  %20157 = vst [vmem:[#allocation4_spill] sm:$0xff] %v15108_v29  ;;  %v4252_v22 = vsel %vm4210_vm0, %v19798_v40, 0.0  ;;  %v15132_v0 = vpop.f32.mrf.mxu0  ;;  %vm4211_vm0 = vcmp.eq.s32.totalorder %v4169_v48, 1  ;;  %vm20172_vm8 = vmmov %vm20168_vm1 }
 0x527   :  { %20156 = vst [vmem:[#allocation136_spill] sm:$0xff] %v15106_v17  ;;  %7265 = vmatmul.msk.f32.gmra.mxu1 %vm20159_vm11, %v19734_v38  ;;  %vm17498_vm11 = vcmp.lt.s32.totalorder %v20167_v1, 35  ;;  %v20193_v17 = vld [vmem:[#allocation184_spill] sm:$0xff] }
 0x528   :  { %7312 = vmatmul.msk.f32.gmra.mxu2 %vm20160_vm13, %v3728_v56  ;;  %vm20169_vm13 = vmmov %vm20168_vm1 }
 0x529   :  { %7356 = vmatmul.msk.f32.gmra.mxu3 %vm20153_vm4, %v4252_v22  ;;  %v3729_v22 = vsel %vm3687_vm3, %v19772_v28, 0.0  ;;  %vm20171_vm4 = vmmov %vm20168_vm1  ;;  %vm20174_vm3 = vnez %v20173_v24 }
 0x52a   :  { %7397 = vmatmul.msk.f32.gmra.mxu0 %vm20162_vm10, %v4689_v45  ;;  %vm4128_vm10 = vmand %vm17498_vm11, %vm19731_vm15  ;;  %v4690_v45 = vsel %vm20170_vm14, %v19760_v54, 0.0  ;;  %v3646_v14 = vsel %vm20174_vm3, 1, %v17671_v61 }
 0x52b   :  { %v4170_v48 = vsel %vm4128_vm10, 1, %v17671_v61  ;;  %vm3688_vm15 = vcmp.eq.s32.totalorder %v3646_v14, 1  ;;  %vm20179_vm14 = vmmov %vm20171_vm4  ;;  %vm20181_vm10 = vcmp.lt.s32.totalorder %v20113_v12, 35 }
 0x52c   :  { %v4460_v55 = vpop.f32.mrf.mxu3  ;;  %v15136_v30 = vpop.f32.mrf.mxu1  ;;  %v4691_v14 = vsel %vm20181_vm10, %v19772_v28, 0.0  ;;  %vm20182_vm11 = vmmov %vm20171_vm4 }
 0x52d   :  { %v15134_v56 = vadd.f32 %v4460_v55, %v4026_v42  ;;  %20166 = vst [vmem:[#allocation142_spill] sm:$0xff] %v15136_v30  ;;  %v4253_v42 = vsel %vm4211_vm0, %v19811_v20, 0.0  ;;  %v20175_v55 = vld [vmem:[#allocation153_spill] sm:$0xff]  ;;  %vm4212_vm0 = vcmp.eq.s32.totalorder %v4170_v48, 1  ;;  %v15160_v33 = vpop.f32.mrf.mxu0  ;;  %v3730_v30 = vsel %vm3688_vm15, %v19785_v47, 0.0  ;;  %vm20189_vm10 = vmmov %vm20171_vm4 }
 0x52f   :  { %20165 = vst [vmem:[#allocation105_spill] sm:$0xff] %v15134_v56  ;;  %7266 = vmatmul.msk.f32.gmra.mxu1 %vm20168_vm1, %v19749_v37  ;;  %vm17501_vm1 = vcmp.lt.s32.totalorder %v20175_v55, 35  ;;  %v20183_v56 = vld [vmem:[#allocation17_spill] sm:$0xff] }
 0x530   :  { %7313 = vmatmul.msk.f32.gmra.mxu2 %vm20169_vm13, %v3729_v22  ;;  %vm20178_vm13 = vmmov %vm20171_vm4  ;;  %vm20184_vm15 = vnez %v20183_v56 }
 0x531   :  { %7357 = vmatmul.msk.f32.gmra.mxu3 %vm20171_vm4, %v4253_v42  ;;  %v20180_v42 = vld [vmem:[#allocation56_spill] sm:$0xff]  ;;  %v3647_v48 = vsel %vm20184_vm15, 1, %v17671_v61 }
 0x532   :  { %7398 = vmatmul.msk.f32.gmra.mxu0 %vm20172_vm8, %v4690_v45  ;;  %vm4129_vm8 = vmand %vm17501_vm1, %vm19743_vm2  ;;  %v4254_v45 = vsel %vm4212_vm0, %v20180_v42, 0.0  ;;  %vm3689_vm2 = vcmp.eq.s32.totalorder %v3647_v48, 1 }
 0x533   :  { %v4171_v24 = vsel %vm4129_vm8, 1, %v17671_v61  ;;  %v3731_v29 = vsel %vm3689_vm2, %v19798_v40, 0.0  ;;  %vm20191_vm8 = vcmp.lt.s32.totalorder %v20125_v4, 35  ;;  %vm20192_vm2 = vmmov %vm20171_vm4 }
 0x534   :  { %v15158_v22 = vpop.f32.mrf.mxu1  ;;  %vm4213_vm0 = vcmp.eq.s32.totalorder %v4171_v24, 1  ;;  %v4692_v48 = vsel %vm20191_vm8, %v19785_v47, 0.0  ;;  %vm20198_vm8 = vnez %v20197_v58  ;;  %vm20202_vm1 = vmmov %vm20192_vm2  ;;  %v20204_v58 = vld [vmem:[#allocation187_spill] sm:$0xff] }
 0x535   :  { %20176 = vst [vmem:[#allocation158_spill] sm:$0xff] %v15158_v22  ;;  %v20185_v22 = vld [vmem:[#allocation156_spill] sm:$0xff]  ;;  %v15195_v56 = vpop.f32.mrf.mxu0 }
 0x537   :  { %7267 = vmatmul.msk.f32.gmra.mxu1 %vm20178_vm13, %v19760_v54  ;;  %vm17500_vm13 = vcmp.lt.s32.totalorder %v20185_v22, 35 }
 0x538   :  { %7314 = vmatmul.msk.f32.gmra.mxu2 %vm20179_vm14, %v3730_v30  ;;  %vm4130_vm14 = vmand %vm17500_vm13, %vm19755_vm5  ;;  %vm20194_vm5 = vnez %v20193_v17 }
 0x539   :  { %7358 = vmatmul.msk.f32.gmra.mxu3 %vm20171_vm4, %v4254_v45  ;;  %v20190_v45 = vld [vmem:[#allocation58_spill] sm:$0xff]  ;;  %v3648_v24 = vsel %vm20194_vm5, 1, %v17671_v61  ;;  %vm20199_vm13 = vmmov %vm20192_vm2 }
 0x53a   :  { %7399 = vmatmul.msk.f32.gmra.mxu0 %vm20182_vm11, %v4691_v14  ;;  %vm20188_vm11 = vmmov %vm20171_vm4  ;;  %v4255_v14 = vsel %vm4213_vm0, %v20190_v45, 0.0 }
 0x53b   :  { %vm20203_vm5 = vmmov %vm20202_vm1 }
 0x53c   :  { %v15181_v30 = vpop.f32.mrf.mxu1 }
 0x53d   :  { %20186 = vst [vmem:[#allocation109_spill] sm:$0xff] %v15181_v30  ;;  %v4172_v30 = vsel %vm4130_vm14, 1, %v17671_v61  ;;  %vm20201_vm14 = vcmp.lt.s32.totalorder %v20136_v52, 35  ;;  %v20208_v52 = vld [vmem:[#allocation175_spill] sm:$0xff] }
 0x53e   :  { %vm4214_vm0 = vcmp.eq.s32.totalorder %v4172_v30, 1 }
 0x53f   :  { %7268 = vmatmul.msk.f32.gmra.mxu1 %vm20188_vm11, %v19772_v28  ;;  %vm3690_vm11 = vcmp.eq.s32.totalorder %v3648_v24, 1  ;;  %v4693_v24 = vsel %vm20201_vm14, %v19798_v40, 0.0  ;;  %vm20212_vm14 = vcmp.lt.s32.totalorder %v20146_v44, 35 }
 0x540   :  { %7315 = vmatmul.msk.f32.gmra.mxu2 %vm20189_vm10, %v3731_v29  ;;  %v20195_v29 = vld [vmem:[#allocation160_spill] sm:$0xff]  ;;  %v3732_v4 = vsel %vm3690_vm11, %v19811_v20, 0.0  ;;  %vm20205_vm11 = vnez %v20204_v58 }
 0x541   :  { %7359 = vmatmul.msk.f32.gmra.mxu3 %vm20171_vm4, %v4255_v14  ;;  %vm17504_vm10 = vcmp.lt.s32.totalorder %v20195_v29, 35  ;;  %v20200_v14 = vld [vmem:[#allocation62_spill] sm:$0xff]  ;;  %v3649_v30 = vsel %vm20205_vm11, 1, %v17671_v61 }
 0x542   :  { %7400 = vmatmul.msk.f32.gmra.mxu0 %vm20192_vm2, %v4692_v48  ;;  %vm4131_vm4 = vmand %vm17504_vm10, %vm20198_vm8  ;;  %v4256_v48 = vsel %vm4214_vm0, %v20200_v14, 0.0  ;;  %vm3691_vm8 = vcmp.eq.s32.totalorder %v3649_v30, 1  ;;  %v5597_v30 = vld [vmem:[%s17062_s5 + $0x30] sm:$0xff] }
 0x543   :  { %v4173_v17 = vsel %vm4131_vm4, 1, %v17671_v61  ;;  %vm20210_vm4 = vmmov %vm20192_vm2  ;;  %5644 = vmatpush.msra.mxu3 %v5597_v30 }
 0x544   :  { %v15204_v19 = vpop.f32.mrf.mxu1  ;;  %vm4215_vm0 = vcmp.eq.s32.totalorder %v4173_v17, 1  ;;  %v20211_v17 = vld [vmem:[#allocation66_spill] sm:$0xff]  ;;  %vm20214_vm10 = vmmov %vm20192_vm2 }
 0x545   :  { %20196 = vst [vmem:[#allocation147_spill] sm:$0xff] %v15204_v19  ;;  %v15224_v19 = vpop.f32.mrf.mxu0  ;;  %v4257_v58 = vsel %vm4215_vm0, %v20211_v17, 0.0 }
 0x547   :  { %7269 = vmatmul.msk.f32.gmra.mxu1 %vm20192_vm2, %v19785_v47 }
 0x548   :  { %7316 = vmatmul.msk.f32.gmra.mxu2 %vm20199_vm13, %v3732_v4  ;;  %v20206_v4 = vld [vmem:[#allocation163_spill] sm:$0xff] }
 0x549   :  { %7360 = vmatmul.msk.f32.gmra.mxu3 %vm20202_vm1, %v4256_v48  ;;  %vm17509_vm13 = vcmp.lt.s32.totalorder %v20206_v4, 35  ;;  %v7463_v48 = vld [vmem:[%s17062_s5 + $0x70] sm:$0xff]  ;;  %vm20209_vm1 = vnez %v20208_v52  ;;  %v20215_v52 = vld [vmem:[#allocation178_spill] sm:$0xff] }
 0x54a   :  { %7401 = vmatmul.msk.f32.gmra.mxu0 %vm20203_vm5, %v4693_v24  ;;  %5621 = vmatpush.msra.mxu2 %v7463_v48  ;;  %v3733_v24 = vsel %vm3691_vm8, %v20180_v42, 0.0  ;;  %vm4132_vm5 = vmand %vm17509_vm13, %vm20209_vm1  ;;  %v4694_v48 = vsel %vm20212_vm14, %v19811_v20, 0.0  ;;  %vm20216_vm1 = vnez %v20215_v52 }
 0x54b   :  { %vm20213_vm8 = vmmov %vm20192_vm2  ;;  %v4174_v28 = vsel %vm4132_vm5, 1, %v17671_v61 }
 0x54c   :  { %v15227_v47 = vpop.f32.mrf.mxu1  ;;  %vm4216_vm0 = vcmp.eq.s32.totalorder %v4174_v28, 1  ;;  %vm20220_vm14 = vmmov %vm20213_vm8 }
 0x54d   :  { %20207 = vst [vmem:[#allocation162_spill] sm:$0xff] %v15227_v47  ;;  %v3650_v47 = vsel %vm20216_vm1, 1, %v17671_v61  ;;  %vm20221_vm5 = vmmov %vm20213_vm8 }
 0x54e   :  { %vm20224_vm1 = vmmov %vm20221_vm5 }
 0x54f   :  { %7270 = vmatmul.msk.f32.gmra.mxu1 %vm20210_vm4, %v19798_v40  ;;  %vm3692_vm4 = vcmp.eq.s32.totalorder %v3650_v47, 1  ;;  %v20217_v40 = vld [vmem:[#allocation165_spill] sm:$0xff]  ;;  %v20222_v47 = vld [vmem:[#allocation70_spill] sm:$0xff]  ;;  %vm20225_vm13 = vmmov %vm20224_vm1 }
 0x550   :  { %7317 = vmatmul.msk.f32.gmra.mxu2 %vm20192_vm2, %v3733_v24  ;;  %vm4091_vm2 = vcmp.lt.s32.totalorder %v20217_v40, 35  ;;  %v15254_v24 = vpop.f32.mrf.mxu0  ;;  %v3734_v44 = vsel %vm3692_vm4, %v20190_v45, 0.0  ;;  %v4258_v30 = vsel %vm4216_vm0, %v20222_v47, 0.0 }
 0x551   :  { %7361 = vmatmul.msk.f32.gmra.mxu3 %vm20213_vm8, %v4257_v58  ;;  %vm20223_vm8 = vcmp.lt.s32.totalorder %v20158_v6, 35  ;;  %v20227_v58 = vld [vmem:[#allocation27_spill] sm:$0xff]  ;;  %v20231_v6 = vld [vmem:[#allocation168_spill] sm:$0xff] }
 0x552   :  { %7402 = vmatmul.msk.f32.gmra.mxu0 %vm20214_vm10, %v4694_v48  ;;  %vm4133_vm10 = vmand %vm4091_vm2, %vm13966_vm9  ;;  %v4695_v48 = vsel %vm20223_vm8, %v20180_v42, 0.0  ;;  %vm20228_vm4 = vnez %v20227_v58  ;;  %vm20232_vm0 = vcmp.lt.s32.totalorder %v20231_v6, 35 }
 0x553   :  { %v4175_v28 = vsel %vm4133_vm10, 1, %v17671_v61  ;;  %vm4134_vm8 = vmand %vm20232_vm0, %vm14154_vm12 }
 0x554   :  { %v15256_v12 = vpop.f32.mrf.mxu1  ;;  %vm4217_vm9 = vcmp.eq.s32.totalorder %v4175_v28, 1  ;;  %vm20235_vm10 = vmmov %vm20224_vm1 }
 0x555   :  { %20218 = vst [vmem:[#allocation114_spill] sm:$0xff] %v15256_v12  ;;  %v4176_v12 = vsel %vm4134_vm8, 1, %v17671_v61 }
 0x556   :  { %vm4218_vm12 = vcmp.eq.s32.totalorder %v4176_v12, 1 }
 0x557   :  { %7271 = vmatmul.msk.f32.gmra.mxu1 %vm20220_vm14, %v19811_v20  ;;  %vm20229_vm14 = vcmp.lt.s32.totalorder %v19744_v8, 35 }
 0x558   :  { %7318 = vmatmul.msk.f32.gmra.mxu2 %vm20221_vm5, %v3734_v44  ;;  %vm5019_vm5 = vmand %vm20229_vm14, %vm20228_vm4  ;;  %v15279_v44 = vpop.f32.mrf.mxu0 }
 0x559   :  { %7362 = vmatmul.msk.f32.gmra.mxu3 %vm20224_vm1, %v4258_v30  ;;  %v20233_v30 = vld [vmem:[#allocation73_spill] sm:$0xff]  ;;  %v5061_v58 = vsel %vm5019_vm5, 1, %v17671_v61  ;;  %vm20236_vm4 = vmmov %vm20224_vm1  ;;  %vm20243_vm5 = vcmp.lt.s32.totalorder %v20175_v55, 35 }
 0x55a   :  { %7403 = vmatmul.msk.f32.gmra.mxu0 %vm20225_vm13, %v4695_v48  ;;  %v4259_v48 = vsel %vm4217_vm9, %v20233_v30, 0.0  ;;  %vm20234_vm13 = vcmp.lt.s32.totalorder %v20167_v1, 35  ;;  %vm5103_vm14 = vcmp.eq.s32.totalorder %v5061_v58, 1  ;;  %vm20245_vm8 = vmmov %vm20236_vm4  ;;  %v20250_v58 = vld [vmem:[#allocation12_spill] sm:$0xff] }
 0x55b   :  { %v4696_v28 = vsel %vm20234_vm13, %v20190_v45, 0.0  ;;  %v5145_v1 = vsel %vm5103_vm14, %v19788_v36, 0.0  ;;  %v20242_v45 = vld [vmem:[#allocation77_spill] sm:$0xff]  ;;  %vm20244_vm13 = vmmov %vm20236_vm4  ;;  %v20248_v36 = vld [vmem:[#allocation35_spill] sm:$0xff] }
 0x55c   :  { %v15273_v52 = vpop.f32.mrf.mxu1  ;;  %v4260_v20 = vsel %vm4218_vm12, %v20242_v45, 0.0  ;;  %vm20249_vm14 = vnez %v20248_v36  ;;  %vm20251_vm12 = vcmp.lt.s32.totalorder %v20250_v58, 35  ;;  %v20256_v36 = vld [vmem:[#allocation39_spill] sm:$0xff]  ;;  %v20258_v58 = vld [vmem:[#allocation14_spill] sm:$0xff] }
 0x55d   :  { %20226 = vst [vmem:[#allocation150_spill] sm:$0xff] %v15273_v52  ;;  %v20238_v52 = vld [vmem:[#allocation31_spill] sm:$0xff] }
 0x55e   :  { %vm20239_vm0 = vnez %v20238_v52 }
 0x55f   :  { %7272 = vmatmul.msk.f32.gmra.mxu1 %vm20224_vm1, %v20180_v42  ;;  %v20240_v42 = vld [vmem:[#allocation10_spill] sm:$0xff] }
 0x560   :  { %vm20241_vm9 = vcmp.lt.s32.totalorder %v20240_v42, 35 }
 0x561   :  { %7363 = vmatmul.msk.f32.gmra.mxu3 %vm20235_vm10, %v4259_v48  ;;  %vm5020_vm1 = vmand %vm20241_vm9, %vm20239_vm0  ;;  %v4697_v48 = vsel %vm20243_vm5, %v20200_v14, 0.0  ;;  %vm20252_vm9 = vcmp.lt.s32.totalorder %v20185_v22, 35 }
 0x562   :  { %7404 = vmatmul.msk.f32.gmra.mxu0 %vm20236_vm4, %v4696_v28  ;;  %v15307_v28 = vpop.f32.mrf.mxu0  ;;  %vm20246_vm10 = vmmov %vm20236_vm4  ;;  %v5062_v52 = vsel %vm5020_vm1, 1, %v17671_v61 }
 0x563   :  { %vm5104_vm4 = vcmp.eq.s32.totalorder %v5062_v52, 1  ;;  %vm5021_vm0 = vmand %vm20251_vm12, %vm20249_vm14  ;;  %vm20260_vm14 = vcmp.lt.s32.totalorder %v20195_v29, 35 }
 0x564   :  { %v15295_v8 = vpop.f32.mrf.mxu1  ;;  %v5146_v12 = vsel %vm5104_vm4, %v19801_v11, 0.0  ;;  %vm20253_vm5 = vmmov %vm20245_vm8 }
 0x565   :  { %20237 = vst [vmem:[#allocation164_spill] sm:$0xff] %v15295_v8  ;;  %vm20261_vm12 = vmmov %vm20253_vm5  ;;  %v20283_v8 = vld [vmem:[#allocation81_spill] sm:$0xff] }
 0x567   :  { %7415 = vmatmul.msk.f32.vlgmr.msra.gmra.mxu1 %vm20244_vm13, %v5145_v1  ;;  %v4698_v1 = vsel %vm20252_vm9, %v20211_v17, 0.0  ;;  %vm20254_vm13 = vmmov %vm20253_vm5 }
 0x569   :  { %7364 = vmatmul.msk.f32.gmra.mxu3 %vm20245_vm8, %v4260_v20  ;;  %v5063_v20 = vsel %vm5021_vm0, 1, %v17671_v61  ;;  %vm20257_vm8 = vnez %v20256_v36  ;;  %vm20262_vm0 = vmmov %vm20253_vm5 }
 0x56a   :  { %7405 = vmatmul.msk.f32.gmra.mxu0 %vm20246_vm10, %v4697_v48  ;;  %v15325_v48 = vpop.f32.mrf.mxu0  ;;  %vm5105_vm1 = vcmp.eq.s32.totalorder %v5063_v20, 1  ;;  %vm20259_vm10 = vcmp.lt.s32.totalorder %v20258_v58, 35  ;;  %v5596_v20 = vld [vmem:[%s17062_s5 + $0x28] sm:$0xff] }
 0x56b   :  { %vm5022_vm4 = vmand %vm20259_vm10, %vm20257_vm8  ;;  %v5147_v11 = vsel %vm5105_vm1, %v10975_v60, 0.0  ;;  %5645 = vmatpush.msra.mxu3 %v5596_v20  ;;  %vm20268_vm8 = vcmp.lt.s32.totalorder %v20206_v4, 35 }
 0x56c   :  { %v15312_v42 = vpop.f32.mrf.mxu1  ;;  %v5064_v36 = vsel %vm5022_vm4, 1, %v17671_v61  ;;  %vm20269_vm10 = vmmov %vm20262_vm0 }
 0x56d   :  { %20247 = vst [vmem:[#allocation99_spill] sm:$0xff] %v15312_v42  ;;  %vm5106_vm9 = vcmp.eq.s32.totalorder %v5064_v36, 1  ;;  %v20266_v42 = vld [vmem:[#allocation16_spill] sm:$0xff]  ;;  %vm20270_vm4 = vmmov %vm20262_vm0 }
 0x56e   :  { %v20272_v36 = vld [vmem:[#allocation48_spill] sm:$0xff] }
 0x56f   :  { %7416 = vmatmul.msk.f32.gmra.mxu1 %vm20253_vm5, %v5146_v12  ;;  %v7462_v12 = vld [vmem:[%s17062_s5 + $0x68] sm:$0xff] }
 0x570   :  { %5622 = vmatpush.msra.mxu2 %v7462_v12  ;;  %v4700_v12 = vsel %vm20268_vm8, %v20233_v30, 0.0 }
 0x572   :  { %7406 = vmatmul.msk.f32.gmra.mxu0 %vm20254_vm13, %v4698_v1  ;;  %v4699_v1 = vsel %vm20260_vm14, %v20222_v47, 0.0  ;;  %v15346_v60 = vpop.f32.mrf.mxu0  ;;  %vm20267_vm13 = vcmp.lt.s32.totalorder %v20266_v42, 35 }
 0x574   :  { %v15327_v52 = vpop.f32.mrf.mxu1 }
 0x575   :  { %20255 = vst [vmem:[#allocation118_spill] sm:$0xff] %v15327_v52  ;;  %v20264_v52 = vld [vmem:[#allocation42_spill] sm:$0xff] }
 0x576   :  { %vm20265_vm5 = vnez %v20264_v52  ;;  %v20274_v52 = vld [vmem:[#allocation18_spill] sm:$0xff] }
 0x577   :  { %7417 = vmatmul.msk.f32.gmra.mxu1 %vm20261_vm12, %v5147_v11  ;;  %vm5023_vm1 = vmand %vm20267_vm13, %vm20265_vm5  ;;  %v5148_v11 = vsel %vm5106_vm9, %v19824_v13, 0.0  ;;  %vm20273_vm12 = vnez %v20272_v36 }
 0x578   :  { %vm20276_vm9 = vmmov %vm20270_vm4 }
 0x579   :  { %vm20277_vm13 = vmmov %vm20270_vm4 }
 0x57a   :  { %7407 = vmatmul.msk.f32.gmra.mxu0 %vm20262_vm0, %v4699_v1  ;;  %v5065_v1 = vsel %vm5023_vm1, 1, %v17671_v61  ;;  %vm20275_vm0 = vcmp.lt.s32.totalorder %v20274_v52, 35  ;;  %v15367_v42 = vpop.f32.mrf.mxu0  ;;  %v20279_v52 = vld [vmem:[#allocation46_spill] sm:$0xff] }
 0x57b   :  { %vm5107_vm14 = vcmp.eq.s32.totalorder %v5065_v1, 1  ;;  %vm5024_vm5 = vmand %vm20275_vm0, %vm20273_vm12  ;;  %vm20280_vm8 = vnez %v20279_v52 }
 0x57c   :  { %v15348_v58 = vpop.f32.mrf.mxu1  ;;  %v5149_v13 = vsel %vm5107_vm14, %v11284_v53, 0.0  ;;  %v5066_v1 = vsel %vm5024_vm5, 1, %v17671_v61  ;;  %v20281_v53 = vld [vmem:[#allocation21_spill] sm:$0xff]  ;;  %vm20284_vm14 = vcmp.lt.s32.totalorder %v20231_v6, 35  ;;  %vm20285_vm12 = vmmov %vm20276_vm9 }
 0x57d   :  { %20263 = vst [vmem:[#allocation154_spill] sm:$0xff] %v15348_v58  ;;  %v15370_v58 = vpop.f32.mrf.mxu2  ;;  %vm5108_vm1 = vcmp.eq.s32.totalorder %v5066_v1, 1  ;;  %vm20286_vm0 = vmmov %vm20276_vm9  ;;  %v20292_v6 = vld [vmem:[#allocation113_spill] sm:$0xff] }
 0x57f   :  { %7418 = vmatmul.msk.f32.gmra.mxu1 %vm20269_vm10, %v5148_v11  ;;  %v4701_v11 = vsel %vm4091_vm2, %v20242_v45, 0.0  ;;  %vm20282_vm10 = vcmp.lt.s32.totalorder %v20281_v53, 35 }
 0x582   :  { %7408 = vmatmul.msk.f32.gmra.mxu0 %vm20270_vm4, %v4700_v12  ;;  %v15376_v12 = vpop.f32.mrf.mxu3  ;;  %vm5025_vm4 = vmand %vm20282_vm10, %vm20280_vm8  ;;  %v15391_v45 = vpop.f32.mrf.mxu0 }
 0x583   :  { %vm20293_vm8 = vmmov %vm20286_vm0 }
 0x584   :  { %v15361_v20 = vpop.f32.mrf.mxu1 }
 0x585   :  { %20271 = vst [vmem:[#allocation104_spill] sm:$0xff] %v15361_v20  ;;  %v5150_v20 = vsel %vm5108_vm1, %v11444_v7, 0.0  ;;  %v15395_v1 = vpop.f32.mrf.mxu2  ;;  %v20288_v7 = vld [vmem:[#allocation51_spill] sm:$0xff] }
 0x587   :  { %7419 = vmatmul.msk.f32.gmra.mxu1 %vm20276_vm9, %v5149_v13  ;;  %v4702_v13 = vsel %vm20284_vm14, %v20283_v8, 0.0  ;;  %vm20289_vm9 = vnez %v20288_v7 }
 0x58a   :  { %7409 = vmatmul.msk.f32.gmra.mxu0 %vm20277_vm13, %v4701_v11  ;;  %v5067_v11 = vsel %vm5025_vm4, 1, %v17671_v61  ;;  %v15397_v52 = vpop.f32.mrf.mxu3 }
 0x58b   :  { %vm5109_vm5 = vcmp.eq.s32.totalorder %v5067_v11, 1  ;;  %v20295_v11 = vld [vmem:[#allocation55_spill] sm:$0xff] }
 0x58c   :  { %v15380_v36 = vpop.f32.mrf.mxu1  ;;  %vm20296_vm4 = vnez %v20295_v11 }
 0x58d   :  { %20278 = vst [vmem:[#allocation124_spill] sm:$0xff] %v15380_v36  ;;  %v20290_v36 = vld [vmem:[#allocation24_spill] sm:$0xff]  ;;  %v15408_v8 = vpop.f32.mrf.mxu2 }
 0x58e   :  { %vm20291_vm13 = vcmp.lt.s32.totalorder %v20290_v36, 35  ;;  %v20299_v36 = vld [vmem:[#allocation117_spill] sm:$0xff] }
 0x58f   :  { %7420 = vmatmul.msk.f32.gmra.mxu1 %vm20285_vm12, %v5150_v20  ;;  %vm5026_vm1 = vmand %vm20291_vm13, %vm20289_vm9  ;;  %v5151_v20 = vsel %vm5109_vm5, %v20292_v6, 0.0  ;;  %v7461_v6 = vld [vmem:[%s17062_s5 + $0x60] sm:$0xff] }
 0x590   :  { %5623 = vmatpush.msra.mxu2 %v7461_v6 }
 0x592   :  { %7410 = vmatmul.msk.f32.gmra.mxu0 %vm20286_vm0, %v4702_v13  ;;  %v5068_v13 = vsel %vm5026_vm1, 1, %v17671_v61  ;;  %v15410_v40 = vpop.f32.mrf.mxu3 }
 0x593   :  { %vm5110_vm10 = vcmp.eq.s32.totalorder %v5068_v13, 1 }
 0x594   :  { %v15399_v53 = vpop.f32.mrf.mxu1  ;;  %v5152_v7 = vsel %vm5110_vm10, %v20299_v36, 0.0  ;;  %v20301_v36 = vld [vmem:[#allocation60_spill] sm:$0xff] }
 0x595   :  { %20287 = vst [vmem:[#allocation157_spill] sm:$0xff] %v15399_v53  ;;  %v20297_v53 = vld [vmem:[#allocation20_spill] sm:$0xff]  ;;  %vm20302_vm9 = vnez %v20301_v36 }
 0x596   :  { %vm20298_vm14 = vcmp.lt.s32.totalorder %v20297_v53, 35  ;;  %v15429_v53 = vpop.f32.mrf.mxu2 }
 0x597   :  { %7421 = vmatmul.msk.f32.gmra.mxu1 %vm20293_vm8, %v5151_v20  ;;  %vm5027_vm12 = vmand %vm20298_vm14, %vm20296_vm4  ;;  %v5595_v20 = vld [vmem:[%s17062_s5 + $0x20] sm:$0xff]  ;;  %vm20309_vm14 = vcmp.lt.s32.totalorder %v19863_v39, 35  ;;  %v20314_v39 = vld [vmem:[#allocation133_spill] sm:$0xff] }
 0x598   :  { %v5069_v13 = vsel %vm5027_vm12, 1, %v17671_v61  ;;  %5646 = vmatpush.msra.mxu3 %v5595_v20  ;;  %vm20305_vm8 = vmmov %vm20286_vm0  ;;  %v20307_v20 = vld [vmem:[#allocation64_spill] sm:$0xff] }
 0x599   :  { %vm5111_vm5 = vcmp.eq.s32.totalorder %v5069_v13, 1  ;;  %vm20308_vm4 = vnez %v20307_v20 }
 0x59a   :  { %v5153_v4 = vsel %vm5111_vm5, %v11920_v63, 0.0  ;;  %vm5029_vm12 = vmand %vm20309_vm14, %vm20308_vm4 }
 0x59b   :  { %v5071_v63 = vsel %vm5029_vm12, 1, %v17671_v61 }
 0x59c   :  { %v15412_v30 = vpop.f32.mrf.mxu1  ;;  %vm5113_vm5 = vcmp.eq.s32.totalorder %v5071_v63, 1  ;;  %v20319_v63 = vld [vmem:[#allocation71_spill] sm:$0xff] }
 0x59d   :  { %20294 = vst [vmem:[#allocation108_spill] sm:$0xff] %v15412_v30  ;;  %v15435_v30 = vpop.f32.mrf.mxu3  ;;  %v5155_v20 = vsel %vm5113_vm5, %v20314_v39, 0.0  ;;  %vm20320_vm4 = vnez %v20319_v63 }
 0x59e   :  { %v15447_v36 = vpop.f32.mrf.mxu2 }
 0x59f   :  { %7422 = vmatmul.msk.f32.gmra.mxu1 %vm20286_vm0, %v5152_v7  ;;  %v20303_v7 = vld [vmem:[#allocation28_spill] sm:$0xff] }
 0x5a0   :  { %vm20304_vm13 = vcmp.lt.s32.totalorder %v20303_v7, 35 }
 0x5a1   :  { %vm5028_vm1 = vmand %vm20304_vm13, %vm20302_vm9  ;;  %vm20313_vm13 = vcmp.lt.s32.totalorder %v19874_v23, 35  ;;  %v20323_v23 = vld [vmem:[#allocation139_spill] sm:$0xff] }
 0x5a2   :  { %v5070_v47 = vsel %vm5028_vm1, 1, %v17671_v61 }
 0x5a3   :  { %vm5112_vm10 = vcmp.eq.s32.totalorder %v5070_v47, 1  ;;  %v20311_v47 = vld [vmem:[#allocation68_spill] sm:$0xff] }
 0x5a4   :  { %v15427_v11 = vpop.f32.mrf.mxu1  ;;  %v5154_v13 = vsel %vm5112_vm10, %v12064_v25, 0.0  ;;  %vm20312_vm9 = vnez %v20311_v47 }
 0x5a5   :  { %20300 = vst [vmem:[#allocation128_spill] sm:$0xff] %v15427_v11  ;;  %v15450_v7 = vpop.f32.mrf.mxu3  ;;  %vm5030_vm1 = vmand %vm20313_vm13, %vm20312_vm9 }
 0x5a6   :  { %v5072_v25 = vsel %vm5030_vm1, 1, %v17671_v61 }
 0x5a7   :  { %7423 = vmatmul.msk.f32.gmra.mxu1 %vm20305_vm8, %v5153_v4  ;;  %vm20315_vm8 = vmmov %vm20286_vm0  ;;  %vm5114_vm10 = vcmp.eq.s32.totalorder %v5072_v25, 1  ;;  %v20327_v25 = vld [vmem:[#allocation75_spill] sm:$0xff] }
 0x5a8   :  { %v5156_v47 = vsel %vm5114_vm10, %v20323_v23, 0.0  ;;  %vm20328_vm9 = vnez %v20327_v25  ;;  %v5594_v23 = vld [vmem:[%s17062_s5 + $0x18] sm:$0xff]  ;;  %v7458_v25 = vld [vmem:[%s17062_s5 + $0x48] sm:$0xff] }
 0x5a9   :  { %5647 = vmatpush.msra.mxu3 %v5594_v23  ;;  %v20333_v23 = vld [vmem:[#allocation79_spill] sm:$0xff] }
 0x5ac   :  { %v15440_v6 = vpop.f32.mrf.mxu1 }
 0x5ad   :  { %20306 = vst [vmem:[#allocation6_spill] sm:$0xff] %v15440_v6  ;;  %v15462_v6 = vpop.f32.mrf.mxu2 }
 0x5ae   :  { %20316 = vst [vmem:[#allocation134_spill] sm:$0xff] %v15462_v6 }
 0x5af   :  { %7424 = vmatmul.msk.f32.gmra.mxu1 %vm20286_vm0, %v5154_v13  ;;  %v15464_v13 = vpop.f32.mrf.mxu3 }
 0x5b0   :  { %20317 = vst [vmem:[#allocation7_spill] sm:$0xff] %v15464_v13 }
 0x5b4   :  { %v15453_v4 = vpop.f32.mrf.mxu1 }
 0x5b5   :  { %20310 = vst [vmem:[#allocation112_spill] sm:$0xff] %v15453_v4  ;;  %v20321_v4 = vld [vmem:[#allocation43_spill] sm:$0xff] }
 0x5b6   :  { %vm20322_vm14 = vcmp.lt.s32.totalorder %v20321_v4, 35 }
 0x5b7   :  { %7425 = vmatmul.msk.f32.gmra.mxu1 %vm20315_vm8, %v5155_v20  ;;  %vm5031_vm12 = vmand %vm20322_vm14, %vm20320_vm4  ;;  %v15475_v20 = vpop.f32.mrf.mxu2  ;;  %v15477_v6 = vpop.f32.mrf.mxu3  ;;  %vm20334_vm4 = vnez %v20333_v23  ;;  %v7474_v23 = vld [vmem:[%s17062_s5 + $0xb8] sm:$0xff] }
 0x5b8   :  { %v5073_v39 = vsel %vm5031_vm12, 1, %v17671_v61  ;;  %20324 = vst [vmem:[#allocation140_spill] sm:$0xff] %v15475_v20  ;;  %vm20331_vm8 = vmmov %vm20286_vm0 }
 0x5b9   :  { %vm5115_vm5 = vcmp.eq.s32.totalorder %v5073_v39, 1  ;;  %20325 = vst [vmem:[#allocation166_spill] sm:$0xff] %v15477_v6  ;;  %v5593_v39 = vld [vmem:[%s17062_s5 + $0x10] sm:$0xff]  ;;  %v7457_v6 = vld [vmem:[%s17062_s5 + $0x40] sm:$0xff] }
 0x5ba   :  { %v5157_v4 = vsel %vm5115_vm5, %v12537_v49, 0.0  ;;  %v7459_v49 = vld [vmem:[%s17062_s5 + $0x50] sm:$0xff]  ;;  %5648 = vmatpush.msra.mxu3 %v5593_v39 }
 0x5bc   :  { %v15466_v11 = vpop.f32.mrf.mxu1 }
 0x5bd   :  { %20318 = vst [vmem:[#allocation176_spill] sm:$0xff] %v15466_v11  ;;  %v20329_v11 = vld [vmem:[#allocation49_spill] sm:$0xff] }
 0x5be   :  { %vm20330_vm13 = vcmp.lt.s32.totalorder %v20329_v11, 35  ;;  %v5592_v11 = vld [vmem:[%s17062_s5 + $0x8] sm:$0xff] }
 0x5bf   :  { %7426 = vmatmul.msk.f32.gmra.mxu1 %vm20286_vm0, %v5156_v47  ;;  %vm5032_vm1 = vmand %vm20330_vm13, %vm20328_vm9  ;;  %v7460_v47 = vld [vmem:[%s17062_s5 + $0x58] sm:$0xff]  ;;  %v15520_v20 = vpop.f32.mrf.mxu3  ;;  %5649 = vmatpush.msra.mxu3 %v5592_v11 }
 0x5c0   :  { %v5074_v63 = vsel %vm5032_vm1, 1, %v17671_v61  ;;  %5624 = vmatpush.msra.mxu2 %v7460_v47  ;;  %v20335_v47 = vld [vmem:[#allocation53_spill] sm:$0xff] }
 0x5c1   :  { %vm5116_vm10 = vcmp.eq.s32.totalorder %v5074_v63, 1  ;;  %vm20336_vm14 = vcmp.lt.s32.totalorder %v20335_v47, 35  ;;  %v5591_v63 = vld [vmem:[%s17062_s5] sm:$0xff]  ;;  %v7473_v47 = vld [vmem:[%s17062_s5 + $0xb0] sm:$0xff] }
 0x5c2   :  { %5625 = vmatpush.msra.mxu2 %v7459_v49  ;;  %vm5033_vm12 = vmand %vm20336_vm14, %vm20334_vm4  ;;  %v5158_v39 = vsel %vm5116_vm10, %v12665_v21, 0.0  ;;  %5650 = vmatpush.msra.mxu3 %v5591_v63  ;;  %v7472_v21 = vld [vmem:[%s17062_s5 + $0xa8] sm:$0xff]  ;;  %v7471_v63 = vld [vmem:[%s17062_s5 + $0xa0] sm:$0xff] }
 0x5c3   :  { %v5075_v49 = vsel %vm5033_vm12, 1, %v17671_v61 }
 0x5c4   :  { %v15479_v13 = vpop.f32.mrf.mxu1  ;;  %5626 = vmatpush.msra.mxu2 %v7458_v25  ;;  %vm5117_vm5 = vcmp.eq.s32.totalorder %v5075_v49, 1  ;;  %v20338_v25 = vld [vmem:[#allocation83_spill] sm:$0xff] }
 0x5c5   :  { %20326 = vst [vmem:[#allocation182_spill] sm:$0xff] %v15479_v13  ;;  %v15508_v13 = vpop.f32.mrf.mxu2  ;;  %vm20339_vm9 = vnez %v20338_v25  ;;  %v7470_v25 = vld [vmem:[%s17062_s5 + $0x98] sm:$0xff] }
 0x5c6   :  { %5627 = vmatpush.msra.mxu2 %v7457_v6  ;;  %v20340_v6 = vld [vmem:[#allocation57_spill] sm:$0xff] }
 0x5c7   :  { %7427 = vmatmul.msk.f32.gmra.mxu1 %vm20331_vm8, %v5157_v4  ;;  %vm20341_vm13 = vcmp.lt.s32.totalorder %v20340_v6, 35  ;;  %vm20342_vm8 = vmmov %vm20286_vm0  ;;  %v7483_v6 = vld [vmem:[%s17062_s5 + $0xf8] sm:$0xff] }
 0x5c8   :  { %5675 = vmatpush.msrb.mxu2 %v7474_v23  ;;  %vm5034_vm1 = vmand %vm20341_vm13, %vm20339_vm9  ;;  %v15547_v23 = vpop.f32.mrf.mxu3  ;;  %5708 = vmatpush.msrb.mxu3 %v7483_v6  ;;  %v7480_v6 = vld [vmem:[%s17062_s5 + $0xe0] sm:$0xff] }
 0x5c9   :  { %20343 = vst [vmem:[#allocation171_spill] sm:$0xff] %v15547_v23 }
 0x5ca   :  { %5676 = vmatpush.msrb.mxu2 %v7473_v47  ;;  %v5076_v47 = vsel %vm5034_vm1, 1, %v17671_v61 }
 0x5cb   :  { %vm5118_vm10 = vcmp.eq.s32.totalorder %v5076_v47, 1  ;;  %v7467_v47 = vld [vmem:[%s17062_s5 + $0x80] sm:$0xff] }
 0x5cc   :  { %v15506_v4 = vpop.f32.mrf.mxu1  ;;  %5677 = vmatpush.msrb.mxu2 %v7472_v21  ;;  %v7482_v21 = vld [vmem:[%s17062_s5 + $0xf0] sm:$0xff]  ;;  %v5160_v23 = vsel %vm5118_vm10, %v19963_v59, 0.0  ;;  %v20351_v59 = vld [vmem:[#allocation107_spill] sm:$0xff]  ;;  %vm5608_vm10 = vcmask 523264  }
 0x5cd   :  { %20332 = vst [vmem:[#allocation145_spill] sm:$0xff] %v15506_v4  ;;  %v15544_v49 = vpop.f32.mrf.mxu2  ;;  %5709 = vmatpush.msrb.mxu3 %v7482_v21  ;;  %v20345_v4 = vld [vmem:[#allocation87_spill] sm:$0xff]  ;;  %v7479_v21 = vld [vmem:[%s17062_s5 + $0xd8] sm:$0xff] }
 0x5ce   :  { %5678 = vmatpush.msrb.mxu2 %v7471_v63  ;;  %v7468_v63 = vld [vmem:[%s17062_s5 + $0x88] sm:$0xff]  ;;  %vm20346_vm4 = vnez %v20345_v4 }
 0x5cf   :  { %7428 = vmatmul.msk.f32.gmra.mxu1 %vm20286_vm0, %v5158_v39  ;;  %v5159_v39 = vsel %vm5117_vm5, %v19948_v27, 0.0  ;;  %v7469_v27 = vld [vmem:[%s17062_s5 + $0x90] sm:$0xff] }
 0x5d0   :  { %5679 = vmatpush.msrb.mxu2 %v7470_v25  ;;  %v20347_v25 = vld [vmem:[#allocation61_spill] sm:$0xff] }
 0x5d1   :  { %vm20348_vm14 = vcmp.lt.s32.totalorder %v20347_v25, 35  ;;  %v7478_v25 = vld [vmem:[%s17062_s5 + $0xd0] sm:$0xff] }
 0x5d2   :  { %5680 = vmatpush.msrb.mxu2 %v7469_v27  ;;  %vm5035_vm12 = vmand %vm20348_vm14, %vm20346_vm4 }
 0x5d3   :  { %v5077_v27 = vsel %vm5035_vm12, 1, %v17671_v61 }
 0x5d4   :  { %v15534_v11 = vpop.f32.mrf.mxu1  ;;  %5681 = vmatpush.msrb.mxu2 %v7468_v63  ;;  %v15598_v63 = vld [vmem:[%s17063_s4] ss:$0 sm:$0xff]  ;;  %vm5119_vm5 = vcmp.eq.s32.totalorder %v5077_v27, 1 }
 0x5d5   :  { %20337 = vst [vmem:[#allocation169_spill] sm:$0xff] %v15534_v11  ;;  %v15583_v4 = vpop.f32.mrf.mxu2 }
 0x5d6   :  { %5682 = vmatpush.msrb.mxu2 %v7467_v47  ;;  %20349 = vst [vmem:[#allocation167_spill] sm:$0xff] %v15583_v4  ;;  %v20352_v4 = vld [vmem:[#allocation91_spill] sm:$0xff] }
 0x5d7   :  { %7429 = vmatmul.msk.f32.gmra.mxu1 %vm20342_vm8, %v5159_v39  ;;  %v7481_v39 = vld [vmem:[%s17062_s5 + $0xe8] sm:$0xff]  ;;  %vm20353_vm9 = vnez %v20352_v4  ;;  %vm20356_vm8 = vmmov %vm20286_vm0  ;;  %v20357_v4 = vld [vmem:[#allocation82_spill] sm:$0xff] }
 0x5d8   :  { %5710 = vmatpush.msrb.mxu3 %v7481_v39  ;;  %v7477_v39 = vld [vmem:[%s17062_s5 + $0xc8] sm:$0xff] }
 0x5da   :  { %5711 = vmatpush.msrb.mxu3 %v7480_v6 }
 0x5dc   :  { %v15568_v11 = vpop.f32.mrf.mxu1  ;;  %5712 = vmatpush.msrb.mxu3 %v7479_v21  ;;  %v5161_v21 = vsel %vm5119_vm5, %v19977_v41, 0.0  ;;  %v7500_v41 = vld [vmem:[%s17062_s5 + $0x170] sm:$0xff]  ;;  %vm20362_vm5 = vmmov %vm20356_vm8 }
 0x5dd   :  { %20344 = vst [vmem:[#allocation153_spill] sm:$0xff] %v15568_v11  ;;  %v15591_v11 = vpop.f32.mrf.mxu3 }
 0x5de   :  { %20350 = vst [vmem:[#allocation156_spill] sm:$0xff] %v15591_v11  ;;  %5713 = vmatpush.msrb.mxu3 %v7478_v25  ;;  %v20354_v11 = vld [vmem:[#allocation65_spill] sm:$0xff] }
 0x5df   :  { %7430 = vmatmul.msk.f32.gmra.mxu1 %vm20286_vm0, %v5160_v23  ;;  %v4977_v23 = vadd.f32 %v14907_v31, %v20351_v59  ;;  %vm20355_vm13 = vcmp.lt.s32.totalorder %v20354_v11, 35  ;;  %v7476_v31 = vld [vmem:[%s17062_s5 + $0xc0] sm:$0xff]  ;;  %v7501_v11 = vld [vmem:[%s17062_s5 + $0x178] sm:$0xff] }
 0x5e0   :  { %vm5036_vm1 = vmand %vm20355_vm13, %vm20353_vm9  ;;  %5714 = vmatpush.msrb.mxu3 %v7477_v39 }
 0x5e1   :  { %v5078_v25 = vsel %vm5036_vm1, 1, %v17671_v61 }
 0x5e2   :  { %5715 = vmatpush.msrb.mxu3 %v7476_v31  ;;  %vm5120_vm4 = vcmp.eq.s32.totalorder %v5078_v25, 1 }
 0x5e3   :  { %v5162_v25 = vsel %vm5120_vm4, %v13249_v32, 0.0  ;;  %v7497_v32 = vld [vmem:[%s17062_s5 + $0x158] sm:$0xff]  ;;  %vm20368_vm4 = vmmov %vm20362_vm5 }
 0x5e4   :  { %v5335_v47 = vpop.f32.mrf.mxu1 }
 0x5e5   :  { %v5461_v6 = vadd.f32 %v5335_v47, %v4977_v23  ;;  %v4978_v23 = vadd.f32 %v14944_v18, %v20357_v4  ;;  %v15619_v47 = vpop.f32.mrf.mxu2  ;;  %v15625_v39 = vpop.f32.mrf.mxu3  ;;  %v7499_v18 = vld [vmem:[%s17062_s5 + $0x168] sm:$0xff] }
 0x5e7   :  { %v5507_v27 = vadd.f32 %v15598_v63, %v5461_v6  ;;  %7431 = vmatmul.msk.f32.gmra.mxu1 %vm20356_vm8, %v5161_v21  ;;  %v20358_v21 = vld [vmem:[#allocation95_spill] sm:$0xff] }
 0x5e8   :  { %vm20359_vm14 = vnez %v20358_v21  ;;  %v7491_v21 = vld [vmem:[%s17062_s5 + $0x130] sm:$0xff] }
 0x5e9   :  { %v5549_v59 = vmax.f32 %v5507_v27, 0.0  ;;  %v20360_v27 = vld [vmem:[#allocation69_spill] sm:$0xff] }
 0x5ea   :  { %vm20361_vm12 = vcmp.lt.s32.totalorder %v20360_v27, 35  ;;  %v7496_v27 = vld [vmem:[%s17062_s5 + $0x150] sm:$0xff] }
 0x5eb   :  { %7466 = vmatmul.msk.f32.vlgmr.msra.gmra.mxu3 %vm5608_vm10, %v5549_v59  ;;  %vm5037_vm0 = vmand %vm20361_vm12, %vm20359_vm14 }
 0x5ec   :  { %v5338_v6 = vpop.f32.mrf.mxu1  ;;  %5774 = vmatpush.msra.mxu3 %v7501_v11  ;;  %v7498_v11 = vld [vmem:[%s17062_s5 + $0x160] sm:$0xff]  ;;  %v5079_v4 = vsel %vm5037_vm0, 1, %v17671_v61 }
 0x5ed   :  { %v5462_v31 = vadd.f32 %v5338_v6, %v4978_v23  ;;  %v7492_v6 = vld [vmem:[%s17062_s5 + $0x138] sm:$0xff]  ;;  %vm5121_vm9 = vcmp.eq.s32.totalorder %v5079_v4, 1  ;;  %v7490_v4 = vld [vmem:[%s17062_s5 + $0x128] sm:$0xff] }
 0x5ee   :  { %5775 = vmatpush.msra.mxu3 %v7500_v41  ;;  %v20363_v41 = vld [vmem:[#allocation111_spill] sm:$0xff] }
 0x5ef   :  { %v5508_v59 = vadd.f32 %v15598_v63, %v5462_v31  ;;  %7432 = vmatmul.msk.f32.gmra.mxu1 %vm20362_vm5, %v5162_v25  ;;  %v4979_v31 = vadd.f32 %v14978_v15, %v20363_v41  ;;  %v15656_v25 = vpop.f32.mrf.mxu2  ;;  %v20366_v15 = vld [vmem:[#allocation72_spill] sm:$0xff]  ;;  %v15668_v41 = vpop.f32.mrf.mxu3 }
 0x5f0   :  { %5776 = vmatpush.msra.mxu3 %v7499_v18  ;;  %vm20367_vm1 = vcmp.lt.s32.totalorder %v20366_v15, 35 }
 0x5f1   :  { %v5550_v23 = vmax.f32 %v5508_v59, 0.0 }
 0x5f2   :  { %5777 = vmatpush.msra.mxu3 %v7498_v11  ;;  %v20364_v11 = vld [vmem:[#allocation98_spill] sm:$0xff] }
 0x5f3   :  { %7465 = vmatmul.msk.f32.vlgmr.msra.gmra.mxu2 %vm5608_vm10, %v5550_v23  ;;  %vm20365_vm13 = vnez %v20364_v11  ;;  %v7495_v23 = vld [vmem:[%s17062_s5 + $0x148] sm:$0xff] }
 0x5f4   :  { %v5341_v18 = vpop.f32.mrf.mxu1  ;;  %5741 = vmatpush.msra.mxu2 %v7492_v6  ;;  %5778 = vmatpush.msra.mxu3 %v7497_v32  ;;  %vm5038_vm8 = vmand %vm20367_vm1, %vm20365_vm13  ;;  %v5163_v6 = vsel %vm5121_vm9, %v13380_v57, 0.0  ;;  %v7488_v57 = vld [vmem:[%s17062_s5 + $0x118] sm:$0xff] }
 0x5f5   :  { %v5463_v59 = vadd.f32 %v5341_v18, %v4979_v31  ;;  %v7489_v31 = vld [vmem:[%s17062_s5 + $0x120] sm:$0xff]  ;;  %v5080_v11 = vsel %vm5038_vm8, 1, %v17671_v61  ;;  %vm20374_vm9 = vmmov %vm20368_vm4 }
 0x5f6   :  { %5742 = vmatpush.msra.mxu2 %v7491_v21  ;;  %5779 = vmatpush.msra.mxu3 %v7496_v27  ;;  %v7494_v18 = vld [vmem:[%s17062_s5 + $0x140] sm:$0xff]  ;;  %v20369_v21 = vld [vmem:[#allocation132_spill] sm:$0xff]  ;;  %vm5122_vm14 = vcmp.eq.s32.totalorder %v5080_v11, 1 }
 0x5f7   :  { %v5509_v32 = vadd.f32 %v15598_v63, %v5463_v59  ;;  %7433 = vmatmul.msk.f32.gmra.mxu1 %vm20368_vm4, %v5163_v6  ;;  %v4980_v27 = vadd.f32 %v15006_v35, %v20369_v21  ;;  %v7487_v59 = vld [vmem:[%s17062_s5 + $0x110] sm:$0xff]  ;;  %v5164_v35 = vsel %vm5122_vm14, %v13544_v46, 0.0  ;;  %v7510_v46 = vld [vmem:[%s17062_s5 + $0x1b8] sm:$0xff]  ;;  %vm20381_vm14 = vmmov %vm20374_vm9 }
 0x5f8   :  { %5743 = vmatpush.msra.mxu2 %v7490_v4  ;;  %5780 = vmatpush.msra.mxu3 %v7495_v23  ;;  %v20370_v23 = vld [vmem:[#allocation102_spill] sm:$0xff] }
 0x5f9   :  { %v5551_v15 = vmax.f32 %v5509_v32, 0.0  ;;  %vm20371_vm12 = vnez %v20370_v23  ;;  %v20372_v32 = vld [vmem:[#allocation76_spill] sm:$0xff] }
 0x5fa   :  { %5744 = vmatpush.msra.mxu2 %v7489_v31  ;;  %5781 = vmatpush.msra.mxu3 %v7494_v18  ;;  %vm20373_vm0 = vcmp.lt.s32.totalorder %v20372_v32, 35  ;;  %v7486_v31 = vld [vmem:[%s17062_s5 + $0x108] sm:$0xff]  ;;  %v15697_v18 = vpop.f32.mrf.mxu2  ;;  %v7518_v32 = vld [vmem:[%s17062_s5 + $0x1f0] sm:$0xff] }
 0x5fb   :  { %7475 = vmatmul.msk.f32.vlgmr.msrb.gmra.mxu2 %vm5608_vm10, %v5551_v15  ;;  %vm5039_vm5 = vmand %vm20373_vm0, %vm20371_vm12  ;;  %v7485_v15 = vld [vmem:[%s17062_s5 + $0x100] sm:$0xff] }
 0x5fc   :  { %v5344_v6 = vpop.f32.mrf.mxu1  ;;  %5745 = vmatpush.msra.mxu2 %v7488_v57  ;;  %v15704_v57 = vpop.f32.mrf.mxu3  ;;  %v5081_v21 = vsel %vm5039_vm5, 1, %v17671_v61  ;;  %vm20385_vm5 = vcmp.lt.s32.totalorder %v20012_v3, 35  ;;  %v7503_v3 = vld [vmem:[%s17062_s5 + $0x180] sm:$0xff] }
 0x5fd   :  { %v5464_v4 = vadd.f32 %v5344_v6, %v4980_v27  ;;  %20375 = vst [vmem:[#allocation170_spill] sm:$0xff] %v15704_v57  ;;  %v7509_v6 = vld [vmem:[%s17062_s5 + $0x1b0] sm:$0xff]  ;;  %vm5123_vm13 = vcmp.eq.s32.totalorder %v5081_v21, 1 }
 0x5fe   :  { %5746 = vmatpush.msra.mxu2 %v7487_v59  ;;  %v7519_v59 = vld [vmem:[%s17062_s5 + $0x1f8] sm:$0xff]  ;;  %v20379_v57 = vld [vmem:[#allocation80_spill] sm:$0xff]  ;;  %v5165_v21 = vsel %vm5123_vm13, %v13711_v26, 0.0  ;;  %vm20387_vm13 = vmmov %vm20381_vm14 }
 0x5ff   :  { %v5510_v11 = vadd.f32 %v15598_v63, %v5464_v4  ;;  %7434 = vmatmul.msk.f32.gmra.mxu1 %vm20374_vm9, %v5164_v35  ;;  %v20376_v4 = vld [vmem:[#allocation155_spill] sm:$0xff]  ;;  %vm20380_vm8 = vcmp.lt.s32.totalorder %v20379_v57, 35  ;;  %v7516_v57 = vld [vmem:[%s17062_s5 + $0x1e0] sm:$0xff] }
 0x600   :  { %5747 = vmatpush.msra.mxu2 %v7486_v31  ;;  %v4981_v23 = vadd.f32 %v15033_v16, %v20376_v4  ;;  %v7508_v35 = vld [vmem:[%s17062_s5 + $0x1a8] sm:$0xff]  ;;  %v7506_v4 = vld [vmem:[%s17062_s5 + $0x198] sm:$0xff] }
 0x601   :  { %v5552_v27 = vmax.f32 %v5510_v11, 0.0  ;;  %v7517_v16 = vld [vmem:[%s17062_s5 + $0x1e8] sm:$0xff] }
 0x602   :  { %5748 = vmatpush.msra.mxu2 %v7485_v15  ;;  %v20377_v15 = vld [vmem:[#allocation106_spill] sm:$0xff] }
 0x603   :  { %7484 = vmatmul.msk.f32.vlgmr.msrb.gmra.mxu3 %vm5608_vm10, %v5552_v27  ;;  %vm20378_vm1 = vnez %v20377_v15  ;;  %v7514_v15 = vld [vmem:[%s17062_s5 + $0x1d0] sm:$0xff] }
 0x604   :  { %5807 = vmatpush.msrb.mxu2 %v7510_v46  ;;  %v5347_v31 = vpop.f32.mrf.mxu1  ;;  %5840 = vmatpush.msrb.mxu3 %v7519_v59  ;;  %vm5040_vm4 = vmand %vm20380_vm8, %vm20378_vm1  ;;  %v7507_v46 = vld [vmem:[%s17062_s5 + $0x1a0] sm:$0xff] }
 0x605   :  { %v5465_v11 = vadd.f32 %v5347_v31, %v4981_v23  ;;  %v5082_v59 = vsel %vm5040_vm4, 1, %v17671_v61  ;;  %v7515_v23 = vld [vmem:[%s17062_s5 + $0x1d8] sm:$0xff] }
 0x606   :  { %5808 = vmatpush.msrb.mxu2 %v7509_v6  ;;  %5841 = vmatpush.msrb.mxu3 %v7518_v32  ;;  %v15742_v6 = vpop.f32.mrf.mxu2  ;;  %v15750_v32 = vpop.f32.mrf.mxu3  ;;  %v20382_v31 = vld [vmem:[#allocation137_spill] sm:$0xff]  ;;  %vm5124_vm12 = vcmp.eq.s32.totalorder %v5082_v59, 1 }
 0x607   :  { %v5511_v27 = vadd.f32 %v15598_v63, %v5465_v11  ;;  %7435 = vmatmul.msk.f32.gmra.mxu1 %vm20381_vm14, %v5165_v21  ;;  %v7505_v11 = vld [vmem:[%s17062_s5 + $0x190] sm:$0xff] }
 0x608   :  { %5809 = vmatpush.msrb.mxu2 %v7508_v35  ;;  %5842 = vmatpush.msrb.mxu3 %v7517_v16  ;;  %v4982_v35 = vadd.f32 %v15070_v10, %v20382_v31  ;;  %v7504_v10 = vld [vmem:[%s17062_s5 + $0x188] sm:$0xff]  ;;  %v7528_v31 = vld [vmem:[%s17062_s5 + $0x238] sm:$0xff] }
 0x609   :  { %v5553_v26 = vmax.f32 %v5511_v27, 0.0  ;;  %v7513_v27 = vld [vmem:[%s17062_s5 + $0x1c8] sm:$0xff] }
 0x60a   :  { %5810 = vmatpush.msrb.mxu2 %v7507_v46  ;;  %5843 = vmatpush.msrb.mxu3 %v7516_v57  ;;  %v20383_v46 = vld [vmem:[#allocation110_spill] sm:$0xff]  ;;  %v20386_v57 = vld [vmem:[#allocation173_spill] sm:$0xff] }
 0x60b   :  { %7493 = vmatmul.msk.f32.vlgmr.msra.gmra.mxu2 %vm5608_vm10, %v5553_v26  ;;  %vm20384_vm0 = vnez %v20383_v46  ;;  %v5166_v59 = vsel %vm5124_vm12, %v20386_v57, 0.0  ;;  %vm20394_vm12 = vmmov %vm20387_vm13 }
 0x60c   :  { %v5350_v16 = vpop.f32.mrf.mxu1  ;;  %5811 = vmatpush.msrb.mxu2 %v7506_v4  ;;  %5844 = vmatpush.msrb.mxu3 %v7515_v23  ;;  %vm5041_vm9 = vmand %vm20385_vm5, %vm20384_vm0  ;;  %v7512_v4 = vld [vmem:[%s17062_s5 + $0x1c0] sm:$0xff] }
 0x60d   :  { %v5466_v21 = vadd.f32 %v5350_v16, %v4982_v35  ;;  %v5083_v23 = vsel %vm5041_vm9, 1, %v17671_v61  ;;  %v20388_v16 = vld [vmem:[#allocation159_spill] sm:$0xff] }
 0x60e   :  { %5812 = vmatpush.msrb.mxu2 %v7505_v11  ;;  %5845 = vmatpush.msrb.mxu3 %v7514_v15  ;;  %v7537_v11 = vld [vmem:[%s17062_s5 + $0x278] sm:$0xff]  ;;  %v7527_v15 = vld [vmem:[%s17062_s5 + $0x230] sm:$0xff]  ;;  %v15792_v46 = vpop.f32.mrf.mxu2  ;;  %vm5125_vm1 = vcmp.eq.s32.totalorder %v5083_v23, 1  ;;  %v20393_v23 = vld [vmem:[#allocation15_spill] sm:$0xff] }
 0x60f   :  { %v5512_v26 = vadd.f32 %v15598_v63, %v5466_v21  ;;  %7436 = vmatmul.msk.f32.gmra.mxu1 %vm20387_vm13, %v5166_v59  ;;  %v4983_v21 = vadd.f32 %v15104_v43, %v20388_v16  ;;  %v7526_v59 = vld [vmem:[%s17062_s5 + $0x228] sm:$0xff] }
 0x610   :  { %5813 = vmatpush.msrb.mxu2 %v7504_v10  ;;  %5846 = vmatpush.msrb.mxu3 %v7513_v27  ;;  %v7536_v10 = vld [vmem:[%s17062_s5 + $0x270] sm:$0xff]  ;;  %v15798_v27 = vpop.f32.mrf.mxu3  ;;  %v20389_v43 = vld [vmem:[#allocation115_spill] sm:$0xff] }
 0x611   :  { %v5554_v35 = vmax.f32 %v5512_v26, 0.0  ;;  %vm20390_vm8 = vnez %v20389_v43  ;;  %v7523_v43 = vld [vmem:[%s17062_s5 + $0x210] sm:$0xff] }
 0x612   :  { %5814 = vmatpush.msrb.mxu2 %v7503_v3  ;;  %5847 = vmatpush.msrb.mxu3 %v7512_v4  ;;  %v20391_v3 = vld [vmem:[#allocation88_spill] sm:$0xff]  ;;  %v7535_v4 = vld [vmem:[%s17062_s5 + $0x268] sm:$0xff] }
 0x613   :  { %7502 = vmatmul.msk.f32.vlgmr.msra.gmra.mxu3 %vm5608_vm10, %v5554_v35  ;;  %vm20392_vm4 = vcmp.lt.s32.totalorder %v20391_v3, 35  ;;  %v7525_v35 = vld [vmem:[%s17062_s5 + $0x220] sm:$0xff]  ;;  %v7532_v3 = vld [vmem:[%s17062_s5 + $0x250] sm:$0xff] }
 0x614   :  { %5873 = vmatpush.msra.mxu2 %v7528_v31  ;;  %v5353_v57 = vpop.f32.mrf.mxu1  ;;  %5906 = vmatpush.msra.mxu3 %v7537_v11  ;;  %vm5042_vm14 = vmand %vm20392_vm4, %vm20390_vm8  ;;  %v5167_v31 = vsel %vm5125_vm1, %v20393_v23, 0.0 }
 0x615   :  { %v5467_v26 = vadd.f32 %v5353_v57, %v4983_v21  ;;  %v5084_v16 = vsel %vm5042_vm14, 1, %v17671_v61  ;;  %v7524_v57 = vld [vmem:[%s17062_s5 + $0x218] sm:$0xff]  ;;  %vm20400_vm1 = vmmov %vm20394_vm12 }
 0x616   :  { %5874 = vmatpush.msra.mxu2 %v7527_v15  ;;  %5907 = vmatpush.msra.mxu3 %v7536_v10  ;;  %v7534_v15 = vld [vmem:[%s17062_s5 + $0x260] sm:$0xff]  ;;  %v7533_v10 = vld [vmem:[%s17062_s5 + $0x258] sm:$0xff]  ;;  %vm5126_vm0 = vcmp.eq.s32.totalorder %v5084_v16, 1  ;;  %v15835_v23 = vpop.f32.mrf.mxu2 }
 0x617   :  { %v5513_v11 = vadd.f32 %v15598_v63, %v5467_v26  ;;  %7437 = vmatmul.msk.f32.gmra.mxu1 %vm20394_vm12, %v5167_v31  ;;  %v20395_v26 = vld [vmem:[#allocation143_spill] sm:$0xff] }
 0x618   :  { %5875 = vmatpush.msra.mxu2 %v7526_v59  ;;  %5908 = vmatpush.msra.mxu3 %v7535_v4  ;;  %v4984_v59 = vadd.f32 %v15132_v0, %v20395_v26  ;;  %v20398_v0 = vld [vmem:[#allocation92_spill] sm:$0xff]  ;;  %v15847_v16 = vpop.f32.mrf.mxu3  ;;  %v7530_v26 = vld [vmem:[%s17062_s5 + $0x240] sm:$0xff] }
 0x619   :  { %v5555_v21 = vmax.f32 %v5513_v11, 0.0  ;;  %vm20399_vm9 = vcmp.lt.s32.totalorder %v20398_v0, 35  ;;  %v7522_v11 = vld [vmem:[%s17062_s5 + $0x208] sm:$0xff]  ;;  %v7554_v0 = vld [vmem:[%s17062_s5 + $0x2f0] sm:$0xff] }
 0x61a   :  { %5876 = vmatpush.msra.mxu2 %v7525_v35  ;;  %5909 = vmatpush.msra.mxu3 %v7534_v15  ;;  %v20396_v35 = vld [vmem:[#allocation120_spill] sm:$0xff]  ;;  %v7531_v15 = vld [vmem:[%s17062_s5 + $0x248] sm:$0xff] }
 0x61b   :  { %7511 = vmatmul.msk.f32.vlgmr.msrb.gmra.mxu2 %vm5608_vm10, %v5555_v21  ;;  %vm20397_vm5 = vnez %v20396_v35  ;;  %v5168_v21 = vsel %vm5126_vm0, %v14052_v2, 0.0  ;;  %v7546_v2 = vld [vmem:[%s17062_s5 + $0x2b8] sm:$0xff]  ;;  %vm20406_vm0 = vmmov %vm20400_vm1 }
 0x61c   :  { %v5356_v4 = vpop.f32.mrf.mxu1  ;;  %5877 = vmatpush.msra.mxu2 %v7524_v57  ;;  %5910 = vmatpush.msra.mxu3 %v7533_v10  ;;  %vm5043_vm13 = vmand %vm20399_vm9, %vm20397_vm5  ;;  %v7521_v10 = vld [vmem:[%s17062_s5 + $0x200] sm:$0xff] }
 0x61d   :  { %v5468_v31 = vadd.f32 %v5356_v4, %v4984_v59  ;;  %v5085_v59 = vsel %vm5043_vm13, 1, %v17671_v61  ;;  %v7545_v4 = vld [vmem:[%s17062_s5 + $0x2b0] sm:$0xff]  ;;  %vm20410_vm13 = vcmp.lt.s32.totalorder %v20065_v51, 35  ;;  %v7539_v51 = vld [vmem:[%s17062_s5 + $0x280] sm:$0xff] }
 0x61e   :  { %5878 = vmatpush.msra.mxu2 %v7523_v43  ;;  %5911 = vmatpush.msra.mxu3 %v7532_v3  ;;  %v7555_v3 = vld [vmem:[%s17062_s5 + $0x2f8] sm:$0xff]  ;;  %vm5127_vm8 = vcmp.eq.s32.totalorder %v5085_v59, 1  ;;  %v7543_v59 = vld [vmem:[%s17062_s5 + $0x2a0] sm:$0xff] }
 0x61f   :  { %v5514_v57 = vadd.f32 %v15598_v63, %v5468_v31  ;;  %7438 = vmatmul.msk.f32.gmra.mxu1 %vm20400_vm1, %v5168_v21  ;;  %v20401_v31 = vld [vmem:[#allocation94_spill] sm:$0xff] }
 0x620   :  { %5879 = vmatpush.msra.mxu2 %v7522_v11  ;;  %5912 = vmatpush.msra.mxu3 %v7531_v15  ;;  %v4985_v35 = vadd.f32 %v15160_v33, %v20401_v31  ;;  %v7544_v15 = vld [vmem:[%s17062_s5 + $0x2a8] sm:$0xff] }
 0x621   :  { %v5556_v43 = vmax.f32 %v5514_v57, 0.0  ;;  %v20402_v57 = vld [vmem:[#allocation125_spill] sm:$0xff]  ;;  %v7553_v33 = vld [vmem:[%s17062_s5 + $0x2e8] sm:$0xff] }
 0x622   :  { %5880 = vmatpush.msra.mxu2 %v7521_v10  ;;  %5913 = vmatpush.msra.mxu3 %v7530_v26  ;;  %vm20403_vm4 = vnez %v20402_v57  ;;  %v20404_v10 = vld [vmem:[#allocation96_spill] sm:$0xff]  ;;  %v5169_v26 = vsel %vm5127_vm8, %v14146_v62, 0.0  ;;  %vm20411_vm8 = vmmov %vm20406_vm0 }
 0x623   :  { %7520 = vmatmul.msk.f32.vlgmr.msrb.gmra.mxu3 %vm5608_vm10, %v5556_v43  ;;  %vm20405_vm14 = vcmp.lt.s32.totalorder %v20404_v10, 35  ;;  %v7550_v57 = vld [vmem:[%s17062_s5 + $0x2d0] sm:$0xff] }
 0x624   :  { %5939 = vmatpush.msrb.mxu2 %v7546_v2  ;;  %v5359_v11 = vpop.f32.mrf.mxu1  ;;  %5972 = vmatpush.msrb.mxu3 %v7555_v3  ;;  %vm5044_vm12 = vmand %vm20405_vm14, %vm20403_vm4  ;;  %v15888_v2 = vpop.f32.mrf.mxu2  ;;  %v7552_v3 = vld [vmem:[%s17062_s5 + $0x2e0] sm:$0xff] }
 0x625   :  { %v5469_v21 = vadd.f32 %v5359_v11, %v4985_v35  ;;  %v5086_v62 = vsel %vm5044_vm12, 1, %v17671_v61  ;;  %v7542_v35 = vld [vmem:[%s17062_s5 + $0x298] sm:$0xff]  ;;  %v20407_v11 = vld [vmem:[#allocation126_spill] sm:$0xff]  ;;  %vm20415_vm12 = vcmp.lt.s32.totalorder %v20076_v50, 35 }
 0x626   :  { %5940 = vmatpush.msrb.mxu2 %v7545_v4  ;;  %5973 = vmatpush.msrb.mxu3 %v7554_v0  ;;  %v15895_v4 = vpop.f32.mrf.mxu3  ;;  %v7551_v0 = vld [vmem:[%s17062_s5 + $0x2d8] sm:$0xff]  ;;  %vm5128_vm5 = vcmp.eq.s32.totalorder %v5086_v62, 1  ;;  %v7548_v62 = vld [vmem:[%s17062_s5 + $0x2c0] sm:$0xff] }
 0x627   :  { %v5515_v43 = vadd.f32 %v15598_v63, %v5469_v21  ;;  %7439 = vmatmul.msk.f32.gmra.mxu1 %vm20406_vm0, %v5169_v26  ;;  %v7541_v21 = vld [vmem:[%s17062_s5 + $0x290] sm:$0xff]  ;;  %v20408_v26 = vld [vmem:[#allocation129_spill] sm:$0xff]  ;;  %v7570_v50 = vld [vmem:[%s17062_s5 + $0x360] sm:$0xff] }
 0x628   :  { %5941 = vmatpush.msrb.mxu2 %v7544_v15  ;;  %5974 = vmatpush.msrb.mxu3 %v7553_v33  ;;  %v4986_v15 = vadd.f32 %v15195_v56, %v20407_v11  ;;  %vm20409_vm9 = vnez %v20408_v26  ;;  %v7540_v56 = vld [vmem:[%s17062_s5 + $0x288] sm:$0xff]  ;;  %v7573_v11 = vld [vmem:[%s17062_s5 + $0x378] sm:$0xff] }
 0x629   :  { %v5557_v31 = vmax.f32 %v5515_v43, 0.0  ;;  %vm5045_vm1 = vmand %vm20410_vm13, %vm20409_vm9  ;;  %v5170_v43 = vsel %vm5128_vm5, %v14215_v9, 0.0  ;;  %v7564_v9 = vld [vmem:[%s17062_s5 + $0x338] sm:$0xff] }
 0x62a   :  { %5942 = vmatpush.msrb.mxu2 %v7543_v59  ;;  %5975 = vmatpush.msrb.mxu3 %v7552_v3  ;;  %v7549_v59 = vld [vmem:[%s17062_s5 + $0x2c8] sm:$0xff]  ;;  %vm20416_vm5 = vmmov %vm20411_vm8 }
 0x62b   :  { %7529 = vmatmul.msk.f32.vlgmr.msra.gmra.mxu2 %vm5608_vm10, %v5557_v31  ;;  %v5087_v31 = vsel %vm5045_vm1, 1, %v17671_v61  ;;  %vm20420_vm1 = vcmp.lt.s32.totalorder %v20088_v5, 35  ;;  %v7557_v5 = vld [vmem:[%s17062_s5 + $0x300] sm:$0xff] }
 0x62c   :  { %v5362_v10 = vpop.f32.mrf.mxu1  ;;  %5943 = vmatpush.msrb.mxu2 %v7542_v35  ;;  %5976 = vmatpush.msrb.mxu3 %v7551_v0  ;;  %v15936_v35 = vpop.f32.mrf.mxu2  ;;  %vm5129_vm4 = vcmp.eq.s32.totalorder %v5087_v31, 1 }
 0x62d   :  { %v5470_v33 = vadd.f32 %v5362_v10, %v4986_v15 }
 0x62e   :  { %5944 = vmatpush.msrb.mxu2 %v7541_v21  ;;  %5977 = vmatpush.msrb.mxu3 %v7550_v57  ;;  %v15941_v15 = vpop.f32.mrf.mxu3  ;;  %v7563_v21 = vld [vmem:[%s17062_s5 + $0x330] sm:$0xff]  ;;  %v20412_v57 = vld [vmem:[#allocation2_spill] sm:$0xff] }
 0x62f   :  { %v5516_v3 = vadd.f32 %v15598_v63, %v5470_v33  ;;  %7440 = vmatmul.msk.f32.gmra.mxu1 %vm20411_vm8, %v5170_v43  ;;  %v4987_v10 = vadd.f32 %v15224_v19, %v20412_v57  ;;  %v7572_v33 = vld [vmem:[%s17062_s5 + $0x370] sm:$0xff]  ;;  %v20413_v43 = vld [vmem:[#allocation135_spill] sm:$0xff] }
 0x630   :  { %5945 = vmatpush.msrb.mxu2 %v7540_v56  ;;  %5978 = vmatpush.msrb.mxu3 %v7549_v59  ;;  %v7562_v56 = vld [vmem:[%s17062_s5 + $0x328] sm:$0xff]  ;;  %vm20414_vm14 = vnez %v20413_v43 }
 0x631   :  { %v5558_v0 = vmax.f32 %v5516_v3, 0.0  ;;  %vm5046_vm0 = vmand %vm20415_vm12, %vm20414_vm14  ;;  %v7571_v19 = vld [vmem:[%s17062_s5 + $0x368] sm:$0xff]  ;;  %v5171_v3 = vsel %vm5129_vm4, %v19734_v38, 0.0  ;;  %v7560_v38 = vld [vmem:[%s17062_s5 + $0x318] sm:$0xff] }
 0x632   :  { %5946 = vmatpush.msrb.mxu2 %v7539_v51  ;;  %5979 = vmatpush.msrb.mxu3 %v7548_v62  ;;  %v7561_v51 = vld [vmem:[%s17062_s5 + $0x320] sm:$0xff]  ;;  %v5088_v31 = vsel %vm5046_vm0, 1, %v17671_v61  ;;  %v7558_v43 = vld [vmem:[%s17062_s5 + $0x308] sm:$0xff]  ;;  %vm20421_vm4 = vmmov %vm20416_vm5  ;;  %vm20425_vm0 = vcmp.lt.s32.totalorder %v20100_v34, 35 }
 0x633   :  { %7538 = vmatmul.msk.f32.vlgmr.msra.gmra.mxu3 %vm5608_vm10, %v5558_v0  ;;  %v7569_v0 = vld [vmem:[%s17062_s5 + $0x358] sm:$0xff]  ;;  %vm5130_vm9 = vcmp.eq.s32.totalorder %v5088_v31, 1  ;;  %v7588_v34 = vld [vmem:[%s17062_s5 + $0x3e0] sm:$0xff] }
 0x634   :  { %6005 = vmatpush.msra.mxu2 %v7564_v9  ;;  %v5365_v26 = vpop.f32.mrf.mxu1  ;;  %6038 = vmatpush.msra.mxu3 %v7573_v11  ;;  %v20417_v11 = vld [vmem:[#allocation97_spill] sm:$0xff]  ;;  %v15980_v57 = vpop.f32.mrf.mxu2 }
 0x635   :  { %v5471_v59 = vadd.f32 %v5365_v26, %v4987_v10  ;;  %v7559_v10 = vld [vmem:[%s17062_s5 + $0x310] sm:$0xff] }
 0x636   :  { %6006 = vmatpush.msra.mxu2 %v7563_v21  ;;  %6039 = vmatpush.msra.mxu3 %v7572_v33  ;;  %v4988_v21 = vadd.f32 %v15254_v24, %v20417_v11  ;;  %v7568_v33 = vld [vmem:[%s17062_s5 + $0x350] sm:$0xff]  ;;  %v15989_v26 = vpop.f32.mrf.mxu3  ;;  %v20418_v24 = vld [vmem:[#allocation141_spill] sm:$0xff]  ;;  %v20422_v11 = vld [vmem:[#allocation131_spill] sm:$0xff] }
 0x637   :  { %v5517_v62 = vadd.f32 %v15598_v63, %v5471_v59  ;;  %7441 = vmatmul.msk.f32.gmra.mxu1 %vm20416_vm5, %v5171_v3  ;;  %vm20419_vm13 = vnez %v20418_v24  ;;  %v5172_v3 = vsel %vm5130_vm9, %v19749_v37, 0.0  ;;  %v7582_v37 = vld [vmem:[%s17062_s5 + $0x3b8] sm:$0xff]  ;;  %vm20426_vm9 = vmmov %vm20421_vm4 }
 0x638   :  { %6007 = vmatpush.msra.mxu2 %v7562_v56  ;;  %6040 = vmatpush.msra.mxu3 %v7571_v19  ;;  %vm5047_vm8 = vmand %vm20420_vm1, %vm20419_vm13  ;;  %v7567_v19 = vld [vmem:[%s17062_s5 + $0x348] sm:$0xff] }
 0x639   :  { %v5559_v9 = vmax.f32 %v5517_v62, 0.0  ;;  %v7566_v62 = vld [vmem:[%s17062_s5 + $0x340] sm:$0xff] }
 0x63a   :  { %6008 = vmatpush.msra.mxu2 %v7561_v51  ;;  %6041 = vmatpush.msra.mxu3 %v7570_v50  ;;  %v5089_v50 = vsel %vm5047_vm8, 1, %v17671_v61 }
 0x63b   :  { %7547 = vmatmul.msk.f32.vlgmr.msrb.gmra.mxu2 %vm5608_vm10, %v5559_v9  ;;  %v7591_v9 = vld [vmem:[%s17062_s5 + $0x3f8] sm:$0xff]  ;;  %vm5131_vm14 = vcmp.eq.s32.totalorder %v5089_v50, 1 }
 0x63c   :  { %v5368_v56 = vpop.f32.mrf.mxu1  ;;  %6009 = vmatpush.msra.mxu2 %v7560_v38  ;;  %6042 = vmatpush.msra.mxu3 %v7569_v0  ;;  %v16017_v38 = vpop.f32.mrf.mxu0  ;;  %v7581_v0 = vld [vmem:[%s17062_s5 + $0x3b0] sm:$0xff] }
 0x63d   :  { %v5472_v59 = vadd.f32 %v5368_v56, %v4988_v21  ;;  %v4989_v21 = vadd.f32 %v15279_v44, %v20422_v11  ;;  %v7580_v56 = vld [vmem:[%s17062_s5 + $0x3a8] sm:$0xff]  ;;  %v7586_v11 = vld [vmem:[%s17062_s5 + $0x3d0] sm:$0xff] }
 0x63e   :  { %6010 = vmatpush.msra.mxu2 %v7559_v10  ;;  %6043 = vmatpush.msra.mxu3 %v7568_v33  ;;  %v7590_v10 = vld [vmem:[%s17062_s5 + $0x3f0] sm:$0xff]  ;;  %v7589_v44 = vld [vmem:[%s17062_s5 + $0x3e8] sm:$0xff] }
 0x63f   :  { %v5518_v51 = vadd.f32 %v15598_v63, %v5472_v59  ;;  %7442 = vmatmul.msk.f32.gmra.mxu1 %vm20421_vm4, %v5172_v3  ;;  %v16031_v59 = vpop.f32.mrf.mxu2  ;;  %v5173_v3 = vsel %vm5131_vm14, %v19760_v54, 0.0  ;;  %v7578_v54 = vld [vmem:[%s17062_s5 + $0x398] sm:$0xff]  ;;  %vm20433_vm14 = vmmov %vm20426_vm9 }
 0x640   :  { %6011 = vmatpush.msra.mxu2 %v7558_v43  ;;  %6044 = vmatpush.msra.mxu3 %v7567_v19  ;;  %v20423_v43 = vld [vmem:[#allocation146_spill] sm:$0xff]  ;;  %v16040_v19 = vpop.f32.mrf.mxu3 }
 0x641   :  { %v5560_v31 = vmax.f32 %v5518_v51, 0.0  ;;  %vm20424_vm12 = vnez %v20423_v43  ;;  %v7579_v51 = vld [vmem:[%s17062_s5 + $0x3a0] sm:$0xff]  ;;  %v7585_v43 = vld [vmem:[%s17062_s5 + $0x3c8] sm:$0xff] }
 0x642   :  { %6012 = vmatpush.msra.mxu2 %v7557_v5  ;;  %6045 = vmatpush.msra.mxu3 %v7566_v62  ;;  %vm5048_vm5 = vmand %vm20425_vm0, %vm20424_vm12 }
 0x643   :  { %7556 = vmatmul.msk.f32.vlgmr.msrb.gmra.mxu3 %vm5608_vm10, %v5560_v31  ;;  %v5090_v62 = vsel %vm5048_vm5, 1, %v17671_v61  ;;  %v20427_v31 = vld [vmem:[#allocation3_spill] sm:$0xff] }
 0x644   :  { %6071 = vmatpush.msrb.mxu2 %v7582_v37  ;;  %v5371_v33 = vpop.f32.mrf.mxu1  ;;  %6104 = vmatpush.msrb.mxu3 %v7591_v9  ;;  %v7587_v37 = vld [vmem:[%s17062_s5 + $0x3d8] sm:$0xff]  ;;  %v4990_v9 = vadd.f32 %v15307_v28, %v20427_v31  ;;  %vm5132_vm13 = vcmp.eq.s32.totalorder %v5090_v62, 1  ;;  %v20430_v28 = vld [vmem:[#allocation119_spill] sm:$0xff]  ;;  %v7584_v62 = vld [vmem:[%s17062_s5 + $0x3c0] sm:$0xff] }
 0x645   :  { %v5473_v24 = vadd.f32 %v5371_v33, %v4989_v21  ;;  %v16067_v21 = vpop.f32.mrf.mxu0  ;;  %vm20431_vm8 = vcmp.lt.s32.totalorder %v20430_v28, 35  ;;  %v7598_v28 = vld [vmem:[%s17062_s5 + $0x428] sm:$0xff] }
 0x646   :  { %6072 = vmatpush.msrb.mxu2 %v7581_v0  ;;  %6105 = vmatpush.msrb.mxu3 %v7590_v10  ;;  %v7577_v0 = vld [vmem:[%s17062_s5 + $0x390] sm:$0xff] }
 0x647   :  { %v5519_v5 = vadd.f32 %v15598_v63, %v5473_v24  ;;  %7443 = vmatmul.msk.f32.gmra.mxu1 %vm20426_vm9, %v5173_v3  ;;  %v7576_v24 = vld [vmem:[%s17062_s5 + $0x388] sm:$0xff] }
 0x648   :  { %6073 = vmatpush.msrb.mxu2 %v7580_v56  ;;  %6106 = vmatpush.msrb.mxu3 %v7589_v44  ;;  %v20428_v56 = vld [vmem:[#allocation149_spill] sm:$0xff]  ;;  %v20432_v44 = vld [vmem:[#allocation38_spill] sm:$0xff] }
 0x649   :  { %v5561_v50 = vmax.f32 %v5519_v5, 0.0  ;;  %vm20429_vm1 = vnez %v20428_v56  ;;  %v5174_v3 = vsel %vm5132_vm13, %v20432_v44, 0.0  ;;  %v20437_v44 = vld [vmem:[#allocation123_spill] sm:$0xff]  ;;  %vm20440_vm13 = vmmov %vm20433_vm14 }
 0x64a   :  { %6074 = vmatpush.msrb.mxu2 %v7579_v51  ;;  %6107 = vmatpush.msrb.mxu3 %v7588_v34  ;;  %vm5049_vm4 = vmand %vm20431_vm8, %vm20429_vm1  ;;  %v16080_v51 = vpop.f32.mrf.mxu2  ;;  %v7575_v34 = vld [vmem:[%s17062_s5 + $0x380] sm:$0xff]  ;;  %vm20438_vm5 = vcmp.lt.s32.totalorder %v20437_v44, 35 }
 0x64b   :  { %7565 = vmatmul.msk.f32.vlgmr.msra.gmra.mxu2 %vm5608_vm10, %v5561_v50  ;;  %v16090_v50 = vpop.f32.mrf.mxu3 }
 0x64c   :  { %v5374_v10 = vpop.f32.mrf.mxu1  ;;  %6075 = vmatpush.msrb.mxu2 %v7578_v54  ;;  %6108 = vmatpush.msrb.mxu3 %v7587_v37  ;;  %v5091_v54 = vsel %vm5049_vm4, 1, %v17671_v61  ;;  %v7600_v37 = vld [vmem:[%s17062_s5 + $0x438] sm:$0xff] }
 0x64d   :  { %v5474_v33 = vadd.f32 %v5374_v10, %v4990_v9  ;;  %v7609_v9 = vld [vmem:[%s17062_s5 + $0x478] sm:$0xff]  ;;  %vm5133_vm12 = vcmp.eq.s32.totalorder %v5091_v54, 1 }
 0x64e   :  { %6076 = vmatpush.msrb.mxu2 %v7577_v0  ;;  %6109 = vmatpush.msrb.mxu3 %v7586_v11  ;;  %v7599_v0 = vld [vmem:[%s17062_s5 + $0x430] sm:$0xff] }
 0x64f   :  { %v5520_v5 = vadd.f32 %v15598_v63, %v5474_v33  ;;  %7444 = vmatmul.msk.f32.gmra.mxu1 %vm20433_vm14, %v5174_v3  ;;  %v20434_v11 = vld [vmem:[#allocation84_spill] sm:$0xff]  ;;  %v16118_v3 = vpop.f32.mrf.mxu0 }
 0x650   :  { %6077 = vmatpush.msrb.mxu2 %v7576_v24  ;;  %6110 = vmatpush.msrb.mxu3 %v7585_v43  ;;  %v4991_v10 = vadd.f32 %v15325_v48, %v20434_v11  ;;  %v7608_v33 = vld [vmem:[%s17062_s5 + $0x470] sm:$0xff]  ;;  %v7607_v48 = vld [vmem:[%s17062_s5 + $0x468] sm:$0xff]  ;;  %v7596_v11 = vld [vmem:[%s17062_s5 + $0x418] sm:$0xff] }
 0x651   :  { %v5562_v31 = vmax.f32 %v5520_v5, 0.0  ;;  %v20435_v43 = vld [vmem:[#allocation152_spill] sm:$0xff]  ;;  %v20439_v5 = vld [vmem:[#allocation41_spill] sm:$0xff] }
 0x652   :  { %6078 = vmatpush.msrb.mxu2 %v7575_v34  ;;  %6111 = vmatpush.msrb.mxu3 %v7584_v62  ;;  %vm20436_vm0 = vnez %v20435_v43  ;;  %v5175_v34 = vsel %vm5133_vm12, %v20439_v5, 0.0  ;;  %v7597_v62 = vld [vmem:[%s17062_s5 + $0x420] sm:$0xff]  ;;  %v7604_v43 = vld [vmem:[%s17062_s5 + $0x450] sm:$0xff]  ;;  %v20442_v5 = vld [vmem:[#allocation5_spill] sm:$0xff] }
 0x653   :  { %7574 = vmatmul.msk.f32.vlgmr.msra.gmra.mxu3 %vm5608_vm10, %v5562_v31  ;;  %vm5050_vm9 = vmand %vm20438_vm5, %vm20436_vm0  ;;  %vm20443_vm8 = vnez %v20442_v5 }
 0x654   :  { %6137 = vmatpush.msra.mxu2 %v7600_v37  ;;  %v5377_v56 = vpop.f32.mrf.mxu1  ;;  %6170 = vmatpush.msra.mxu3 %v7609_v9  ;;  %v7606_v37 = vld [vmem:[%s17062_s5 + $0x460] sm:$0xff]  ;;  %v5092_v31 = vsel %vm5050_vm9, 1, %v17671_v61  ;;  %v16130_v9 = vpop.f32.mrf.mxu2  ;;  %vm20447_vm12 = vmmov %vm20440_vm13 }
 0x655   :  { %v5475_v24 = vadd.f32 %v5377_v56, %v4991_v10  ;;  %v7605_v10 = vld [vmem:[%s17062_s5 + $0x458] sm:$0xff]  ;;  %vm5134_vm1 = vcmp.eq.s32.totalorder %v5092_v31, 1 }
 0x656   :  { %6138 = vmatpush.msra.mxu2 %v7599_v0  ;;  %6171 = vmatpush.msra.mxu3 %v7608_v33  ;;  %v16138_v33 = vpop.f32.mrf.mxu3  ;;  %v20441_v56 = vld [vmem:[#allocation101_spill] sm:$0xff] }
 0x657   :  { %v5521_v54 = vadd.f32 %v15598_v63, %v5475_v24  ;;  %7445 = vmatmul.msk.f32.gmra.mxu1 %vm20440_vm13, %v5175_v34  ;;  %v7595_v24 = vld [vmem:[%s17062_s5 + $0x410] sm:$0xff]  ;;  %v20444_v34 = vld [vmem:[#allocation130_spill] sm:$0xff] }
 0x658   :  { %6139 = vmatpush.msra.mxu2 %v7598_v28  ;;  %6172 = vmatpush.msra.mxu3 %v7607_v48  ;;  %v4992_v28 = vadd.f32 %v15346_v60, %v20441_v56  ;;  %vm20445_vm4 = vcmp.lt.s32.totalorder %v20444_v34, 35  ;;  %v7594_v60 = vld [vmem:[%s17062_s5 + $0x408] sm:$0xff] }
 0x659   :  { %v5563_v0 = vmax.f32 %v5521_v54, 0.0  ;;  %vm5051_vm14 = vmand %vm20445_vm4, %vm20443_vm8  ;;  %v20446_v54 = vld [vmem:[#allocation47_spill] sm:$0xff] }
 0x65a   :  { %6140 = vmatpush.msra.mxu2 %v7597_v62  ;;  %6173 = vmatpush.msra.mxu3 %v7606_v37  ;;  %v7603_v62 = vld [vmem:[%s17062_s5 + $0x448] sm:$0xff]  ;;  %v5176_v37 = vsel %vm5134_vm1, %v20446_v54, 0.0  ;;  %v5093_v56 = vsel %vm5051_vm14, 1, %v17671_v61  ;;  %vm20455_vm1 = vmmov %vm20447_vm12 }
 0x65b   :  { %7583 = vmatmul.msk.f32.vlgmr.msrb.gmra.mxu2 %vm5608_vm10, %v5563_v0  ;;  %v7593_v0 = vld [vmem:[%s17062_s5 + $0x400] sm:$0xff]  ;;  %vm5135_vm0 = vcmp.eq.s32.totalorder %v5093_v56, 1  ;;  %v20454_v56 = vld [vmem:[#allocation52_spill] sm:$0xff] }
 0x65c   :  { %v5380_v44 = vpop.f32.mrf.mxu1  ;;  %6141 = vmatpush.msra.mxu2 %v7596_v11  ;;  %6174 = vmatpush.msra.mxu3 %v7605_v10  ;;  %v7602_v11 = vld [vmem:[%s17062_s5 + $0x440] sm:$0xff]  ;;  %v16168_v10 = vpop.f32.mrf.mxu0 }
 0x65d   :  { %v5476_v48 = vadd.f32 %v5380_v44, %v4992_v28  ;;  %v7618_v28 = vld [vmem:[%s17062_s5 + $0x4b8] sm:$0xff]  ;;  %v7617_v44 = vld [vmem:[%s17062_s5 + $0x4b0] sm:$0xff]  ;;  %v16182_v34 = vpop.f32.mrf.mxu2 }
 0x65e   :  { %6142 = vmatpush.msra.mxu2 %v7595_v24  ;;  %6175 = vmatpush.msra.mxu3 %v7604_v43  ;;  %v7627_v43 = vld [vmem:[%s17062_s5 + $0x4f8] sm:$0xff] }
 0x65f   :  { %v5522_v31 = vadd.f32 %v15598_v63, %v5476_v48  ;;  %7446 = vmatmul.msk.f32.gmra.mxu1 %vm20447_vm12, %v5176_v37  ;;  %v20448_v48 = vld [vmem:[#allocation136_spill] sm:$0xff]  ;;  %v7616_v37 = vld [vmem:[%s17062_s5 + $0x4a8] sm:$0xff] }
 0x660   :  { %6143 = vmatpush.msra.mxu2 %v7594_v60  ;;  %6176 = vmatpush.msra.mxu3 %v7603_v62  ;;  %v4993_v5 = vadd.f32 %v15367_v42, %v20448_v48  ;;  %v7626_v60 = vld [vmem:[%s17062_s5 + $0x4f0] sm:$0xff]  ;;  %v16188_v62 = vpop.f32.mrf.mxu3  ;;  %v20450_v42 = vld [vmem:[#allocation161_spill] sm:$0xff] }
 0x661   :  { %v5564_v24 = vmax.f32 %v5522_v31, 0.0  ;;  %20449 = vst [vmem:[#allocation160_spill] sm:$0xff] %v16188_v62  ;;  %vm20451_vm5 = vnez %v20450_v42  ;;  %v20459_v62 = vld [vmem:[#allocation105_spill] sm:$0xff] }
 0x662   :  { %6144 = vmatpush.msra.mxu2 %v7593_v0  ;;  %6177 = vmatpush.msra.mxu3 %v7602_v11  ;;  %v20452_v0 = vld [vmem:[#allocation138_spill] sm:$0xff]  ;;  %v7625_v11 = vld [vmem:[%s17062_s5 + $0x4e8] sm:$0xff] }
 0x663   :  { %7592 = vmatmul.msk.f32.vlgmr.msrb.gmra.mxu3 %vm5608_vm10, %v5564_v24  ;;  %vm20453_vm9 = vcmp.lt.s32.totalorder %v20452_v0, 35  ;;  %v7615_v24 = vld [vmem:[%s17062_s5 + $0x4a0] sm:$0xff] }
 0x664   :  { %6203 = vmatpush.msrb.mxu2 %v7618_v28  ;;  %v5383_v54 = vpop.f32.mrf.mxu1  ;;  %6236 = vmatpush.msrb.mxu3 %v7627_v43  ;;  %vm5052_vm13 = vmand %vm20453_vm9, %vm20451_vm5  ;;  %v5177_v28 = vsel %vm5135_vm0, %v20454_v56, 0.0  ;;  %v20458_v56 = vld [vmem:[#allocation4_spill] sm:$0xff] }
 0x665   :  { %v5477_v31 = vadd.f32 %v5383_v54, %v4993_v5  ;;  %v5094_v48 = vsel %vm5052_vm13, 1, %v17671_v61  ;;  %v20456_v5 = vld [vmem:[#allocation174_spill] sm:$0xff]  ;;  %vm20466_vm0 = vmmov %vm20455_vm1 }
 0x666   :  { %6204 = vmatpush.msrb.mxu2 %v7617_v44  ;;  %6237 = vmatpush.msrb.mxu3 %v7626_v60  ;;  %v7624_v44 = vld [vmem:[%s17062_s5 + $0x4e0] sm:$0xff]  ;;  %v7614_v60 = vld [vmem:[%s17062_s5 + $0x498] sm:$0xff]  ;;  %vm5136_vm8 = vcmp.eq.s32.totalorder %v5094_v48, 1  ;;  %v16240_v48 = vpop.f32.mrf.mxu2 }
 0x667   :  { %v5523_v43 = vadd.f32 %v15598_v63, %v5477_v31  ;;  %7447 = vmatmul.msk.f32.gmra.mxu1 %vm20455_vm1, %v5177_v28  ;;  %v20457_v54 = vld [vmem:[#allocation186_spill] sm:$0xff]  ;;  %v16218_v31 = vpop.f32.mrf.mxu0 }
 0x668   :  { %6205 = vmatpush.msrb.mxu2 %v7616_v37  ;;  %6238 = vmatpush.msrb.mxu3 %v7625_v11  ;;  %v3269_v42 = vadd.f32 %v20457_v54, %v20456_v5  ;;  %v7623_v37 = vld [vmem:[%s17062_s5 + $0x4d8] sm:$0xff]  ;;  %v4994_v11 = vadd.f32 %v15391_v45, %v20459_v62  ;;  %v20460_v54 = vld [vmem:[#allocation8_spill] sm:$0xff]  ;;  %v7612_v45 = vld [vmem:[%s17062_s5 + $0x488] sm:$0xff] }
 0x669   :  { %v5565_v0 = vmax.f32 %v5523_v43, 0.0  ;;  %v7622_v43 = vld [vmem:[%s17062_s5 + $0x4d0] sm:$0xff]  ;;  %vm20461_vm4 = vnez %v20460_v54  ;;  %v7621_v62 = vld [vmem:[%s17062_s5 + $0x4c8] sm:$0xff]  ;;  %v7620_v54 = vld [vmem:[%s17062_s5 + $0x4c0] sm:$0xff] }
 0x66a   :  { %6206 = vmatpush.msrb.mxu2 %v7615_v24  ;;  %6239 = vmatpush.msrb.mxu3 %v7624_v44  ;;  %v3585_v28 = vadd.f32 %v20458_v56, %v3269_v42  ;;  %v7613_v24 = vld [vmem:[%s17062_s5 + $0x490] sm:$0xff] }
 0x66b   :  { %7601 = vmatmul.msk.f32.vlgmr.msra.gmra.mxu2 %vm5608_vm10, %v5565_v0  ;;  %v20462_v42 = vld [vmem:[#allocation144_spill] sm:$0xff]  ;;  %v16242_v0 = vpop.f32.mrf.mxu3 }
 0x66c   :  { %v5386_v5 = vpop.f32.mrf.mxu1  ;;  %6207 = vmatpush.msrb.mxu2 %v7614_v60  ;;  %6240 = vmatpush.msrb.mxu3 %v7623_v37  ;;  %vm20463_vm14 = vcmp.lt.s32.totalorder %v20462_v42, 35  ;;  %20464 = vst [vmem:[#allocation172_spill] sm:$0xff] %v16242_v0  ;;  %v20465_v60 = vld [vmem:[#allocation56_spill] sm:$0xff]  ;;  %v4027_v56 = vadd.f32 %v15370_v58, %v3585_v28  ;;  %v20467_v58 = vld [vmem:[#allocation179_spill] sm:$0xff] }
 0x66d   :  { %v5478_v44 = vadd.f32 %v5386_v5, %v4994_v11  ;;  %vm5053_vm12 = vmand %vm20463_vm14, %vm20461_vm4  ;;  %v5178_v37 = vsel %vm5136_vm8, %v20465_v60, 0.0  ;;  %v7611_v5 = vld [vmem:[%s17062_s5 + $0x480] sm:$0xff]  ;;  %v7645_v60 = vld [vmem:[%s17062_s5 + $0x578] sm:$0xff]  ;;  %vm20479_vm8 = vcmp.lt.s32.totalorder %v20175_v55, 35 }
 0x66e   :  { %6208 = vmatpush.msrb.mxu2 %v7613_v24  ;;  %6241 = vmatpush.msrb.mxu3 %v7622_v43  ;;  %v5095_v42 = vsel %vm5053_vm12, 1, %v17671_v61  ;;  %v7636_v24 = vld [vmem:[%s17062_s5 + $0x538] sm:$0xff]  ;;  %v4553_v43 = vadd.f32 %v15376_v12, %v4027_v56  ;;  %v7644_v12 = vld [vmem:[%s17062_s5 + $0x570] sm:$0xff]  ;;  %vm5055_vm4 = vmand %vm20479_vm8, %vm20164_vm7  ;;  %vm20485_vm12 = vcmp.lt.s32.totalorder %v20185_v22, 35 }
 0x66f   :  { %v5524_v11 = vadd.f32 %v15598_v63, %v5478_v44  ;;  %7448 = vmatmul.msk.f32.gmra.mxu1 %vm20466_vm0, %v5178_v37  ;;  %v20468_v63 = vld [vmem:[#allocation189_spill] sm:$0xff]  ;;  %v20469_v37 = vld [vmem:[#allocation142_spill] sm:$0xff]  ;;  %vm5137_vm5 = vcmp.eq.s32.totalorder %v5095_v42, 1  ;;  %v16273_v56 = vpop.f32.mrf.mxu0  ;;  %v7643_v42 = vld [vmem:[%s17062_s5 + $0x568] sm:$0xff] }
 0x670   :  { %6209 = vmatpush.msrb.mxu2 %v7612_v45  ;;  %6242 = vmatpush.msrb.mxu3 %v7621_v62  ;;  %v3270_v28 = vadd.f32 %v20468_v63, %v20467_v58  ;;  %v7635_v45 = vld [vmem:[%s17062_s5 + $0x530] sm:$0xff]  ;;  %v4995_v62 = vadd.f32 %v16017_v38, %v4553_v43  ;;  %vm20480_vm7 = vmmov %vm20466_vm0  ;;  %v7660_v22 = vld [vmem:[%s17062_s5 + $0x5e0] sm:$0xff] }
 0x671   :  { %v5566_v44 = vmax.f32 %v5524_v11, 0.0  ;;  %v20471_v38 = vld [vmem:[#allocation148_spill] sm:$0xff] }
 0x672   :  { %6210 = vmatpush.msrb.mxu2 %v7611_v5  ;;  %6243 = vmatpush.msrb.mxu3 %v7620_v54  ;;  %v3586_v0 = vadd.f32 %v20469_v37, %v3270_v28  ;;  %v7634_v5 = vld [vmem:[%s17062_s5 + $0x528] sm:$0xff]  ;;  %vm20472_vm9 = vcmp.lt.s32.totalorder %v20471_v38, 35  ;;  %v20473_v28 = vld [vmem:[#allocation58_spill] sm:$0xff] }
 0x673   :  { %7610 = vmatmul.msk.f32.vlgmr.msra.gmra.mxu3 %vm5608_vm10, %v5566_v44  ;;  %vm5054_vm13 = vmand %vm20472_vm9, %vm20155_vm6  ;;  %v5179_v43 = vsel %vm5137_vm5, %v20473_v28, 0.0  ;;  %v7633_v44 = vld [vmem:[%s17062_s5 + $0x520] sm:$0xff]  ;;  %vm20491_vm9 = vcmp.lt.s32.totalorder %v20195_v29, 35 }
 0x674   :  { %6269 = vmatpush.msra.mxu2 %v7636_v24  ;;  %v5389_v11 = vpop.f32.mrf.mxu1  ;;  %6302 = vmatpush.msra.mxu3 %v7645_v60  ;;  %v5652_v24 = vpop.f32.mrf.mxu3  ;;  %v4028_v60 = vadd.f32 %v15395_v1, %v3586_v0  ;;  %vm20474_vm6 = vmmov %vm20466_vm0  ;;  %v5096_v58 = vsel %vm5054_vm13, 1, %v17671_v61  ;;  %v20476_v1 = vld [vmem:[#allocation13_spill] sm:$0xff]  ;;  %v7647_v29 = vld [vmem:[%s17062_s5 + $0x580] sm:$0xff] }
 0x675   :  { %v5479_v54 = vadd.f32 %v5389_v11, %v4995_v62  ;;  %v7642_v11 = vld [vmem:[%s17062_s5 + $0x560] sm:$0xff]  ;;  %vm5138_vm1 = vcmp.eq.s32.totalorder %v5096_v58, 1  ;;  %vm5056_vm0 = vmand %vm20485_vm12, %vm20174_vm3 }
 0x676   :  { %6270 = vmatpush.msra.mxu2 %v7635_v45  ;;  %v5629_v63 = vpop.f32.mrf.mxu2  ;;  %6303 = vmatpush.msra.mxu3 %v7644_v12  ;;  %v16293_v45 = vld [vmem:[%s17063_s4] ss:$0 sm:$0xff]  ;;  %v20475_v12 = vld [vmem:[#allocation183_spill] sm:$0xff]  ;;  %v4554_v38 = vadd.f32 %v15397_v52, %v4028_v60  ;;  %v7631_v52 = vld [vmem:[%s17062_s5 + $0x510] sm:$0xff] }
 0x677   :  { %v5525_v37 = vadd.f32 %v16293_v45, %v5479_v54  ;;  %v5653_v62 = vadd.f32 %v5652_v24, %v5629_v63  ;;  %7449 = vmatmul.msk.f32.gmra.mxu1 %vm20474_vm6, %v5179_v43  ;;  %v3271_v0 = vadd.f32 %v20476_v1, %v20475_v12  ;;  %v7632_v54 = vld [vmem:[%s17062_s5 + $0x518] sm:$0xff]  ;;  %v20477_v24 = vld [vmem:[#allocation158_spill] sm:$0xff]  ;;  %v7640_v43 = vld [vmem:[%s17062_s5 + $0x550] sm:$0xff]  ;;  %v16329_v58 = vpop.f32.mrf.mxu0  ;;  %v5180_v1 = vsel %vm5138_vm1, %v20200_v14, 0.0 }
 0x678   :  { %6271 = vmatpush.msra.mxu2 %v7634_v5  ;;  %6304 = vmatpush.msra.mxu3 %v7643_v42  ;;  %v7641_v5 = vld [vmem:[%s17062_s5 + $0x558] sm:$0xff]  ;;  %v4996_v42 = vadd.f32 %v16067_v21, %v4554_v38  ;;  %v7630_v21 = vld [vmem:[%s17062_s5 + $0x508] sm:$0xff]  ;;  %vm20486_vm5 = vmmov %vm20474_vm6 }
 0x679   :  { %v5567_v28 = vmax.f32 %v5525_v37, 0.0  ;;  %v3587_v63 = vadd.f32 %v20477_v24, %v3271_v0  ;;  %v7654_v14 = vld [vmem:[%s17062_s5 + $0x5b8] sm:$0xff]  ;;  %vm5057_vm13 = vmand %vm20491_vm9, %vm20184_vm15 }
 0x67a   :  { %6272 = vmatpush.msra.mxu2 %v7633_v44  ;;  %6305 = vmatpush.msra.mxu3 %v7642_v11  ;;  %v7639_v11 = vld [vmem:[%s17062_s5 + $0x548] sm:$0xff]  ;;  %vm20493_vm6 = vmmov %vm20486_vm5 }
 0x67b   :  { %7619 = vmatmul.msk.f32.vlgmr.msrb.gmra.mxu2 %vm5608_vm10, %v5567_v28  ;;  %v4029_v0 = vadd.f32 %v15408_v8, %v3587_v63  ;;  %v7629_v28 = vld [vmem:[%s17062_s5 + $0x500] sm:$0xff]  ;;  %v20481_v8 = vld [vmem:[#allocation185_spill] sm:$0xff]  ;;  %vm5059_vm12 = vmand %vm4091_vm2, %vm20205_vm11 }
 0x67c   :  { %v5392_v44 = vpop.f32.mrf.mxu1  ;;  %6273 = vmatpush.msra.mxu2 %v7632_v54  ;;  %6306 = vmatpush.msra.mxu3 %v7641_v5  ;;  %v7638_v54 = vld [vmem:[%s17062_s5 + $0x540] sm:$0xff]  ;;  %v5097_v5 = vsel %vm5055_vm4, 1, %v17671_v61 }
 0x67d   :  { %v5480_v60 = vadd.f32 %v5392_v44, %v4996_v42  ;;  %v4555_v63 = vadd.f32 %v15410_v40, %v4029_v0  ;;  %v20483_v44 = vld [vmem:[#allocation109_spill] sm:$0xff]  ;;  %vm5139_vm14 = vcmp.eq.s32.totalorder %v5097_v5, 1  ;;  %v7662_v40 = vld [vmem:[%s17062_s5 + $0x5f0] sm:$0xff] }
 0x67e   :  { %v5684_v12 = vpop.f32.mrf.mxu2  ;;  %6274 = vmatpush.msra.mxu2 %v7631_v52  ;;  %6307 = vmatpush.msra.mxu3 %v7640_v43  ;;  %v7663_v52 = vld [vmem:[%s17062_s5 + $0x5f8] sm:$0xff]  ;;  %v7653_v43 = vld [vmem:[%s17062_s5 + $0x5b0] sm:$0xff] }
 0x67f   :  { %v5526_v55 = vadd.f32 %v16293_v45, %v5480_v60  ;;  %v5687_v38 = vadd.f32 %v5684_v12, %v5653_v62  ;;  %7450 = vmatmul.msk.f32.gmra.mxu1 %vm20480_vm7, %v5180_v1  ;;  %v20482_v62 = vld [vmem:[#allocation30_spill] sm:$0xff]  ;;  %v4997_v37 = vadd.f32 %v16118_v3, %v4555_v63  ;;  %v7661_v3 = vld [vmem:[%s17062_s5 + $0x5e8] sm:$0xff]  ;;  %vm20503_vm7 = vmmov %vm20486_vm5 }
 0x680   :  { %6275 = vmatpush.msra.mxu2 %v7630_v21  ;;  %6308 = vmatpush.msra.mxu3 %v7639_v11  ;;  %v3272_v24 = vadd.f32 %v20482_v62, %v20481_v8  ;;  %v7652_v11 = vld [vmem:[%s17062_s5 + $0x5a8] sm:$0xff]  ;;  %v16380_v8 = vpop.f32.mrf.mxu0  ;;  %v20487_v62 = vld [vmem:[#allocation22_spill] sm:$0xff] }
 0x681   :  { %v5568_v42 = vmax.f32 %v5526_v55, 0.0  ;;  %v5181_v55 = vsel %vm5139_vm14, %v20211_v17, 0.0  ;;  %v5098_v17 = vsel %vm5056_vm0, 1, %v17671_v61  ;;  %vm20512_vm0 = vmmov %vm20486_vm5 }
 0x682   :  { %6276 = vmatpush.msra.mxu2 %v7629_v28  ;;  %6309 = vmatpush.msra.mxu3 %v7638_v54  ;;  %v3588_v60 = vadd.f32 %v20483_v44, %v3272_v24  ;;  %v7651_v28 = vld [vmem:[%s17062_s5 + $0x5a0] sm:$0xff]  ;;  %vm5140_vm3 = vcmp.eq.s32.totalorder %v5098_v17, 1  ;;  %v20494_v17 = vld [vmem:[#allocation188_spill] sm:$0xff]  ;;  %vm20518_vm2 = vmmov %vm20512_vm0 }
 0x683   :  { %7628 = vmatmul.msk.f32.vlgmr.msrb.gmra.mxu3 %vm5608_vm10, %v5568_v42  ;;  %v20488_v24 = vld [vmem:[#allocation190_spill] sm:$0xff]  ;;  %vm20525_vm9 = vmmov %vm20512_vm0 }
 0x684   :  { %6335 = vmatpush.msrb.mxu2 %v7654_v14  ;;  %v5395_v21 = vpop.f32.mrf.mxu1  ;;  %6368 = vmatpush.msrb.mxu3 %v7663_v52  ;;  %v4030_v54 = vadd.f32 %v15429_v53, %v3588_v60  ;;  %v3273_v63 = vadd.f32 %v20488_v24, %v20487_v62  ;;  %v7659_v52 = vld [vmem:[%s17062_s5 + $0x5d8] sm:$0xff] }
 0x685   :  { %v5481_v12 = vadd.f32 %v5395_v21, %v4997_v37  ;;  %v7658_v37 = vld [vmem:[%s17062_s5 + $0x5d0] sm:$0xff] }
 0x686   :  { %6336 = vmatpush.msrb.mxu2 %v7653_v43  ;;  %v5717_v0 = vpop.f32.mrf.mxu3  ;;  %6369 = vmatpush.msrb.mxu3 %v7662_v40  ;;  %v4556_v53 = vadd.f32 %v15435_v30, %v4030_v54  ;;  %v20489_v43 = vld [vmem:[#allocation147_spill] sm:$0xff]  ;;  %v7649_v30 = vld [vmem:[%s17062_s5 + $0x590] sm:$0xff] }
 0x687   :  { %v5527_v5 = vadd.f32 %v16293_v45, %v5481_v12  ;;  %v5720_v14 = vadd.f32 %v5717_v0, %v5687_v38  ;;  %7451 = vmatmul.msk.f32.gmra.mxu1 %vm20486_vm5, %v5181_v55  ;;  %v7650_v38 = vld [vmem:[%s17062_s5 + $0x598] sm:$0xff]  ;;  %v3589_v44 = vadd.f32 %v20489_v43, %v3273_v63  ;;  %v7657_v12 = vld [vmem:[%s17062_s5 + $0x5c8] sm:$0xff] }
 0x688   :  { %6337 = vmatpush.msrb.mxu2 %v7652_v11  ;;  %6370 = vmatpush.msrb.mxu3 %v7661_v3  ;;  %v4998_v60 = vadd.f32 %v16168_v10, %v4556_v53  ;;  %v7648_v10 = vld [vmem:[%s17062_s5 + $0x588] sm:$0xff]  ;;  %v20492_v3 = vld [vmem:[#allocation70_spill] sm:$0xff]  ;;  %v7681_v53 = vld [vmem:[%s17062_s5 + $0x678] sm:$0xff] }
 0x689   :  { %v5569_v42 = vmax.f32 %v5527_v5, 0.0  ;;  %v5182_v0 = vsel %vm5140_vm3, %v20492_v3, 0.0  ;;  %v4031_v55 = vadd.f32 %v15447_v36, %v3589_v44  ;;  %v7656_v5 = vld [vmem:[%s17062_s5 + $0x5c0] sm:$0xff]  ;;  %v7672_v36 = vld [vmem:[%s17062_s5 + $0x638] sm:$0xff] }
 0x68a   :  { %6338 = vmatpush.msrb.mxu2 %v7651_v28  ;;  %6371 = vmatpush.msrb.mxu3 %v7660_v22  ;;  %v5099_v22 = vsel %vm5057_vm13, 1, %v17671_v61  ;;  %v20502_v3 = vld [vmem:[#allocation134_spill] sm:$0xff] }
 0x68b   :  { %7637 = vmatmul.msk.f32.vlgmr.msra.gmra.mxu2 %vm5608_vm10, %v5569_v42  ;;  %v4557_v24 = vadd.f32 %v15450_v7, %v4031_v55  ;;  %v16431_v42 = vpop.f32.mrf.mxu0  ;;  %vm5141_vm15 = vcmp.eq.s32.totalorder %v5099_v22, 1  ;;  %v7680_v7 = vld [vmem:[%s17062_s5 + $0x670] sm:$0xff]  ;;  %v20504_v22 = vld [vmem:[#allocation26_spill] sm:$0xff] }
 0x68c   :  { %v5398_v40 = vpop.f32.mrf.mxu1  ;;  %6339 = vmatpush.msrb.mxu2 %v7650_v38  ;;  %6372 = vmatpush.msrb.mxu3 %v7659_v52  ;;  %v7671_v38 = vld [vmem:[%s17062_s5 + $0x630] sm:$0xff]  ;;  %v20496_v52 = vld [vmem:[#allocation162_spill] sm:$0xff] }
 0x68d   :  { %v5482_v21 = vadd.f32 %v5398_v40, %v4998_v60  ;;  %v4999_v44 = vadd.f32 %v16218_v31, %v4557_v24  ;;  %v20497_v40 = vld [vmem:[#allocation184_spill] sm:$0xff]  ;;  %v7679_v31 = vld [vmem:[%s17062_s5 + $0x668] sm:$0xff] }
 0x68e   :  { %v5750_v1 = vpop.f32.mrf.mxu2  ;;  %6340 = vmatpush.msrb.mxu2 %v7649_v30  ;;  %6373 = vmatpush.msrb.mxu3 %v7658_v37  ;;  %v7670_v30 = vld [vmem:[%s17062_s5 + $0x628] sm:$0xff]  ;;  %vm20498_vm1 = vnez %v20497_v40 }
 0x68f   :  { %v5528_v28 = vadd.f32 %v16293_v45, %v5482_v21  ;;  %v5753_v54 = vadd.f32 %v5750_v1, %v5720_v14  ;;  %7452 = vmatmul.msk.f32.gmra.mxu1 %vm20493_vm6, %v5182_v0  ;;  %v20495_v14 = vld [vmem:[#allocation191_spill] sm:$0xff]  ;;  %v7669_v1 = vld [vmem:[%s17062_s5 + $0x620] sm:$0xff] }
 0x690   :  { %6341 = vmatpush.msrb.mxu2 %v7648_v10  ;;  %6374 = vmatpush.msrb.mxu3 %v7657_v12  ;;  %v3274_v62 = vadd.f32 %v20495_v14, %v20494_v17  ;;  %v20499_v21 = vld [vmem:[#allocation163_spill] sm:$0xff]  ;;  %v20501_v10 = vld [vmem:[#allocation73_spill] sm:$0xff] }
 0x691   :  { %v5570_v63 = vmax.f32 %v5528_v28, 0.0  ;;  %vm20500_vm8 = vcmp.lt.s32.totalorder %v20499_v21, 35  ;;  %v5183_v12 = vsel %vm5141_vm15, %v20501_v10, 0.0  ;;  %v20506_v14 = vld [vmem:[#allocation7_spill] sm:$0xff] }
 0x692   :  { %6342 = vmatpush.msrb.mxu2 %v7647_v29  ;;  %6375 = vmatpush.msrb.mxu3 %v7656_v5  ;;  %v3590_v43 = vadd.f32 %v20496_v52, %v3274_v62  ;;  %vm5058_vm4 = vmand %vm20500_vm8, %vm20498_vm1  ;;  %v7678_v29 = vld [vmem:[%s17062_s5 + $0x660] sm:$0xff]  ;;  %v7666_v40 = vld [vmem:[%s17062_s5 + $0x608] sm:$0xff] }
 0x693   :  { %7646 = vmatmul.msk.f32.vlgmr.msra.gmra.mxu3 %vm5608_vm10, %v5570_v63  ;;  %v5100_v5 = vsel %vm5058_vm4, 1, %v17671_v61  ;;  %v7677_v63 = vld [vmem:[%s17062_s5 + $0x658] sm:$0xff]  ;;  %v7675_v21 = vld [vmem:[%s17062_s5 + $0x648] sm:$0xff] }
 0x694   :  { %6401 = vmatpush.msra.mxu2 %v7672_v36  ;;  %v5401_v60 = vpop.f32.mrf.mxu1  ;;  %6434 = vmatpush.msra.mxu3 %v7681_v53  ;;  %v4032_v0 = vadd.f32 %v20502_v3, %v3590_v43  ;;  %v20505_v36 = vld [vmem:[#allocation89_spill] sm:$0xff]  ;;  %v20507_v53 = vld [vmem:[#allocation114_spill] sm:$0xff]  ;;  %vm5142_vm14 = vcmp.eq.s32.totalorder %v5100_v5, 1  ;;  %v7667_v43 = vld [vmem:[%s17062_s5 + $0x610] sm:$0xff]  ;;  %v5101_v5 = vsel %vm5059_vm12, 1, %v17671_v61 }
 0x695   :  { %v5483_v37 = vadd.f32 %v5401_v60, %v4999_v44  ;;  %v3275_v17 = vadd.f32 %v20505_v36, %v20504_v22  ;;  %v7676_v44 = vld [vmem:[%s17062_s5 + $0x650] sm:$0xff]  ;;  %v7690_v22 = vld [vmem:[%s17062_s5 + $0x6b8] sm:$0xff]  ;;  %v20513_v36 = vld [vmem:[#allocation23_spill] sm:$0xff]  ;;  %vm5143_vm11 = vcmp.eq.s32.totalorder %v5101_v5, 1 }
 0x696   :  { %6402 = vmatpush.msra.mxu2 %v7671_v38  ;;  %v5783_v11 = vpop.f32.mrf.mxu3  ;;  %6435 = vmatpush.msra.mxu3 %v7680_v7  ;;  %v4558_v62 = vadd.f32 %v20506_v14, %v4032_v0  ;;  %v16481_v7 = vpop.f32.mrf.mxu0  ;;  %v20515_v14 = vld [vmem:[#allocation166_spill] sm:$0xff]  ;;  %v20522_v5 = vld [vmem:[#allocation192_spill] sm:$0xff] }
 0x697   :  { %v5529_v55 = vadd.f32 %v16293_v45, %v5483_v37  ;;  %v5786_v28 = vadd.f32 %v5783_v11, %v5753_v54  ;;  %7453 = vmatmul.msk.f32.gmra.mxu1 %vm20503_vm7, %v5183_v12  ;;  %v7668_v54 = vld [vmem:[%s17062_s5 + $0x618] sm:$0xff]  ;;  %v3591_v38 = vadd.f32 %v20507_v53, %v3275_v17  ;;  %v20511_v12 = vld [vmem:[#allocation140_spill] sm:$0xff]  ;;  %v20516_v53 = vld [vmem:[#allocation150_spill] sm:$0xff] }
 0x698   :  { %6403 = vmatpush.msra.mxu2 %v7670_v30  ;;  %6436 = vmatpush.msra.mxu3 %v7679_v31  ;;  %v5000_v52 = vadd.f32 %v16273_v56, %v4558_v62  ;;  %v20510_v11 = vld [vmem:[#allocation77_spill] sm:$0xff] }
 0x699   :  { %v5571_v24 = vmax.f32 %v5529_v55, 0.0  ;;  %v5184_v10 = vsel %vm5142_vm14, %v20510_v11, 0.0  ;;  %v7665_v55 = vld [vmem:[%s17062_s5 + $0x600] sm:$0xff] }
 0x69a   :  { %6404 = vmatpush.msra.mxu2 %v7669_v1  ;;  %6437 = vmatpush.msra.mxu3 %v7678_v29  ;;  %v4033_v1 = vadd.f32 %v20511_v12, %v3591_v38  ;;  %v7674_v29 = vld [vmem:[%s17062_s5 + $0x640] sm:$0xff] }
 0x69b   :  { %7655 = vmatmul.msk.f32.vlgmr.msrb.gmra.mxu2 %vm5608_vm10, %v5571_v24 }
 0x69c   :  { %v5404_v60 = vpop.f32.mrf.mxu1  ;;  %6405 = vmatpush.msra.mxu2 %v7668_v54  ;;  %6438 = vmatpush.msra.mxu3 %v7677_v63  ;;  %v4559_v62 = vadd.f32 %v20515_v14, %v4033_v1  ;;  %v7699_v54 = vld [vmem:[%s17062_s5 + $0x6f8] sm:$0xff]  ;;  %v7689_v63 = vld [vmem:[%s17062_s5 + $0x6b0] sm:$0xff]  ;;  %v7696_v1 = vld [vmem:[%s17062_s5 + $0x6e0] sm:$0xff] }
 0x69d   :  { %v5484_v30 = vadd.f32 %v5404_v60, %v5000_v52  ;;  %v7688_v60 = vld [vmem:[%s17062_s5 + $0x6a8] sm:$0xff] }
 0x69e   :  { %v5816_v31 = vpop.f32.mrf.mxu2  ;;  %6406 = vmatpush.msra.mxu2 %v7667_v43  ;;  %6439 = vmatpush.msra.mxu3 %v7676_v44  ;;  %v5001_v52 = vadd.f32 %v16329_v58, %v4559_v62  ;;  %v7698_v43 = vld [vmem:[%s17062_s5 + $0x6f0] sm:$0xff]  ;;  %v7697_v58 = vld [vmem:[%s17062_s5 + $0x6e8] sm:$0xff]  ;;  %v16528_v37 = vpop.f32.mrf.mxu0 }
 0x69f   :  { %v5530_v3 = vadd.f32 %v16293_v45, %v5484_v30  ;;  %v5819_v0 = vadd.f32 %v5816_v31, %v5786_v28  ;;  %7454 = vmatmul.msk.f32.gmra.mxu1 %vm20512_vm0, %v5184_v10  ;;  %v20514_v28 = vld [vmem:[#allocation93_spill] sm:$0xff]  ;;  %v7687_v31 = vld [vmem:[%s17062_s5 + $0x6a0] sm:$0xff]  ;;  %v7694_v62 = vld [vmem:[%s17062_s5 + $0x6d0] sm:$0xff] }
 0x6a0   :  { %6407 = vmatpush.msra.mxu2 %v7666_v40  ;;  %6440 = vmatpush.msra.mxu3 %v7675_v21  ;;  %v3276_v17 = vadd.f32 %v20514_v28, %v20513_v36  ;;  %v20517_v40 = vld [vmem:[#allocation81_spill] sm:$0xff] }
 0x6a1   :  { %v5572_v24 = vmax.f32 %v5530_v3, 0.0  ;;  %v5185_v21 = vsel %vm5143_vm11, %v20517_v40, 0.0  ;;  %v20519_v3 = vld [vmem:[#allocation181_spill] sm:$0xff] }
 0x6a2   :  { %6408 = vmatpush.msra.mxu2 %v7665_v55  ;;  %6441 = vmatpush.msra.mxu3 %v7674_v29  ;;  %v3592_v38 = vadd.f32 %v20516_v53, %v3276_v17  ;;  %vm20520_vm5 = vnez %v20519_v3  ;;  %v20521_v29 = vld [vmem:[#allocation34_spill] sm:$0xff]  ;;  %v7695_v28 = vld [vmem:[%s17062_s5 + $0x6d8] sm:$0xff]  ;;  %v20523_v17 = vld [vmem:[#allocation164_spill] sm:$0xff] }
 0x6a3   :  { %7664 = vmatmul.msk.f32.vlgmr.msrb.gmra.mxu3 %vm5608_vm10, %v5572_v24  ;;  %v5102_v55 = vsel %vm20520_vm5, 1, %v17671_v61  ;;  %v20526_v40 = vld [vmem:[#allocation25_spill] sm:$0xff]  ;;  %v7707_v3 = vld [vmem:[%s17062_s5 + $0x730] sm:$0xff] }
 0x6a4   :  { %6467 = vmatpush.msrb.mxu2 %v7690_v22  ;;  %v5407_v44 = vpop.f32.mrf.mxu1  ;;  %6500 = vmatpush.msrb.mxu3 %v7699_v54  ;;  %v4034_v11 = vadd.f32 %v15508_v13, %v3592_v38  ;;  %v3277_v22 = vadd.f32 %v20522_v5, %v20521_v29  ;;  %vm5144_vm3 = vcmp.eq.s32.totalorder %v5102_v55, 1  ;;  %v20524_v38 = vld [vmem:[#allocation85_spill] sm:$0xff]  ;;  %v20529_v55 = vld [vmem:[#allocation99_spill] sm:$0xff] }
 0x6a5   :  { %v5485_v30 = vadd.f32 %v5407_v44, %v5001_v52  ;;  %v5186_v52 = vsel %vm5144_vm3, %v20524_v38, 0.0 }
 0x6a6   :  { %6468 = vmatpush.msrb.mxu2 %v7689_v63  ;;  %v5849_v56 = vpop.f32.mrf.mxu3  ;;  %6501 = vmatpush.msrb.mxu3 %v7698_v43  ;;  %v4560_v13 = vadd.f32 %v15520_v20, %v4034_v11  ;;  %v3593_v14 = vadd.f32 %v20523_v17, %v3277_v22  ;;  %v7685_v20 = vld [vmem:[%s17062_s5 + $0x690] sm:$0xff]  ;;  %v7684_v63 = vld [vmem:[%s17062_s5 + $0x688] sm:$0xff]  ;;  %v7705_v17 = vld [vmem:[%s17062_s5 + $0x720] sm:$0xff] }
 0x6a7   :  { %v5531_v10 = vadd.f32 %v16293_v45, %v5485_v30  ;;  %v5852_v12 = vadd.f32 %v5849_v56, %v5819_v0  ;;  %7455 = vmatmul.msk.f32.gmra.mxu1 %vm20518_vm2, %v5185_v21  ;;  %v7686_v0 = vld [vmem:[%s17062_s5 + $0x698] sm:$0xff]  ;;  %v7683_v30 = vld [vmem:[%s17062_s5 + $0x680] sm:$0xff]  ;;  %v16577_v56 = vpop.f32.mrf.mxu0  ;;  %v20527_v21 = vld [vmem:[#allocation100_spill] sm:$0xff] }
 0x6a8   :  { %6469 = vmatpush.msrb.mxu2 %v7688_v60  ;;  %6502 = vmatpush.msrb.mxu3 %v7697_v58  ;;  %v5002_v61 = vadd.f32 %v16380_v8, %v4560_v13  ;;  %v7693_v8 = vld [vmem:[%s17062_s5 + $0x6c8] sm:$0xff]  ;;  %v4035_v43 = vadd.f32 %v15544_v49, %v3593_v14  ;;  %v7692_v58 = vld [vmem:[%s17062_s5 + $0x6c0] sm:$0xff]  ;;  %v7708_v49 = vld [vmem:[%s17062_s5 + $0x738] sm:$0xff] }
 0x6a9   :  { %v5573_v36 = vmax.f32 %v5531_v10, 0.0  ;;  %v20528_v11 = vld [vmem:[#allocation171_spill] sm:$0xff]  ;;  %v7716_v22 = vld [vmem:[%s17062_s5 + $0x770] sm:$0xff] }
 0x6aa   :  { %6470 = vmatpush.msrb.mxu2 %v7687_v31  ;;  %6503 = vmatpush.msrb.mxu3 %v7696_v1  ;;  %v3278_v31 = vadd.f32 %v20527_v21, %v20526_v40  ;;  %v4561_v10 = vadd.f32 %v20528_v11, %v4035_v43  ;;  %v7717_v1 = vld [vmem:[%s17062_s5 + $0x778] sm:$0xff]  ;;  %v20530_v14 = vld [vmem:[#allocation167_spill] sm:$0xff]  ;;  %v7703_v40 = vld [vmem:[%s17062_s5 + $0x710] sm:$0xff] }
 0x6ab   :  { %7673 = vmatmul.msk.f32.vlgmr.msra.gmra.mxu2 %vm5608_vm10, %v5573_v36  ;;  %v7706_v36 = vld [vmem:[%s17062_s5 + $0x728] sm:$0xff]  ;;  %v7704_v43 = vld [vmem:[%s17062_s5 + $0x718] sm:$0xff]  ;;  %v7712_v21 = vld [vmem:[%s17062_s5 + $0x750] sm:$0xff] }
 0x6ac   :  { %v5410_v24 = vpop.f32.mrf.mxu1  ;;  %6471 = vmatpush.msrb.mxu2 %v7686_v0  ;;  %6504 = vmatpush.msrb.mxu3 %v7695_v28  ;;  %v3594_v29 = vadd.f32 %v20529_v55, %v3278_v31  ;;  %v5003_v5 = vadd.f32 %v16431_v42, %v4561_v10  ;;  %v7715_v28 = vld [vmem:[%s17062_s5 + $0x768] sm:$0xff]  ;;  %v7710_v55 = vld [vmem:[%s17062_s5 + $0x740] sm:$0xff] }
 0x6ad   :  { %v5486_v54 = vadd.f32 %v5410_v24, %v5002_v61  ;;  %v7714_v24 = vld [vmem:[%s17062_s5 + $0x760] sm:$0xff]  ;;  %v7702_v10 = vld [vmem:[%s17062_s5 + $0x708] sm:$0xff] }
 0x6ae   :  { %v5882_v53 = vpop.f32.mrf.mxu2  ;;  %6472 = vmatpush.msrb.mxu2 %v7685_v20  ;;  %6505 = vmatpush.msrb.mxu3 %v7694_v62  ;;  %v4036_v61 = vadd.f32 %v20530_v14, %v3594_v29  ;;  %v7726_v29 = vld [vmem:[%s17062_s5 + $0x7b8] sm:$0xff] }
 0x6af   :  { %v5532_v44 = vadd.f32 %v16293_v45, %v5486_v54  ;;  %v5885_v60 = vadd.f32 %v5882_v53, %v5852_v12  ;;  %7456 = vmatmul.msk.f32.gmra.mxu1 %vm20525_vm9, %v5186_v52  ;;  %v20531_v54 = vld [vmem:[#allocation29_spill] sm:$0xff]  ;;  %v20533_v53 = vld [vmem:[#allocation156_spill] sm:$0xff] }
 0x6b0   :  { %6473 = vmatpush.msrb.mxu2 %v7684_v63  ;;  %6506 = vmatpush.msrb.mxu3 %v7693_v8  ;;  %v20532_v63 = vld [vmem:[#allocation44_spill] sm:$0xff]  ;;  %v4562_v38 = vadd.f32 %v20533_v53, %v4036_v61 }
 0x6b1   :  { %v5574_v12 = vmax.f32 %v5532_v44, 0.0  ;;  %v3279_v8 = vadd.f32 %v20532_v63, %v20531_v54  ;;  %v7713_v44 = vld [vmem:[%s17062_s5 + $0x758] sm:$0xff]  ;;  %v7723_v63 = vld [vmem:[%s17062_s5 + $0x7a0] sm:$0xff] }
 0x6b2   :  { %6474 = vmatpush.msrb.mxu2 %v7683_v30  ;;  %6507 = vmatpush.msrb.mxu3 %v7692_v58  ;;  %v20534_v30 = vld [vmem:[#allocation118_spill] sm:$0xff] }
 0x6b3   :  { %7682 = vmatmul.msk.f32.vlgmr.msra.gmra.mxu3 %vm5608_vm10, %v5574_v12  ;;  %v3595_v58 = vadd.f32 %v20534_v30, %v3279_v8 }
 0x6b4   :  { %6533 = vmatpush.msra.mxu2 %v7708_v49  ;;  %v5413_v13 = vpop.f32.mrf.mxu1  ;;  %6566 = vmatpush.msra.mxu3 %v7717_v1  ;;  %v5004_v49 = vadd.f32 %v16481_v7, %v4562_v38  ;;  %v7711_v7 = vld [vmem:[%s17062_s5 + $0x748] sm:$0xff]  ;;  %v7732_v38 = vld [vmem:[%s17062_s5 + $0x7e0] sm:$0xff] }
 0x6b5   :  { %v5487_v0 = vadd.f32 %v5413_v13, %v5003_v5  ;;  %v4037_v12 = vadd.f32 %v15619_v47, %v3595_v58  ;;  %v20535_v5 = vld [vmem:[#allocation32_spill] sm:$0xff] }
 0x6b6   :  { %6534 = vmatpush.msra.mxu2 %v7707_v3  ;;  %v5915_v42 = vpop.f32.mrf.mxu3  ;;  %6567 = vmatpush.msra.mxu3 %v7716_v22  ;;  %v7701_v3 = vld [vmem:[%s17062_s5 + $0x700] sm:$0xff] }
 0x6b7   :  { %v5533_v20 = vadd.f32 %v16293_v45, %v5487_v0  ;;  %v16608_v62 = vadd.f32 %v5915_v42, %v5885_v60  ;;  %v16622_v60 = vpop.f32.mrf.mxu0  ;;  %v20536_v22 = vld [vmem:[#allocation50_spill] sm:$0xff]  ;;  %v4563_v47 = vadd.f32 %v15625_v39, %v4037_v12  ;;  %v7735_v0 = vld [vmem:[%s17062_s5 + $0x7f8] sm:$0xff]  ;;  %v7734_v39 = vld [vmem:[%s17062_s5 + $0x7f0] sm:$0xff] }
 0x6b8   :  { %6535 = vmatpush.msra.mxu2 %v7706_v36  ;;  %6568 = vmatpush.msra.mxu3 %v7715_v28  ;;  %v3280_v13 = vadd.f32 %v20536_v22, %v20535_v5  ;;  %v7725_v28 = vld [vmem:[%s17062_s5 + $0x7b0] sm:$0xff]  ;;  %v20537_v42 = vld [vmem:[#allocation154_spill] sm:$0xff]  ;;  %v7720_v12 = vld [vmem:[%s17062_s5 + $0x788] sm:$0xff] }
 0x6b9   :  { %v5575_v52 = vmax.f32 %v5533_v20, 0.0  ;;  %v5005_v14 = vadd.f32 %v16528_v37, %v4563_v47  ;;  %v7733_v37 = vld [vmem:[%s17062_s5 + $0x7e8] sm:$0xff]  ;;  %v7728_v5 = vld [vmem:[%s17062_s5 + $0x7c0] sm:$0xff]  ;;  %v7744_v22 = vld [vmem:[%s17062_s5 + $0x838] sm:$0xff] }
 0x6ba   :  { %6536 = vmatpush.msra.mxu2 %v7705_v17  ;;  %6569 = vmatpush.msra.mxu3 %v7714_v24  ;;  %v3596_v17 = vadd.f32 %v20537_v42, %v3280_v13  ;;  %v7724_v24 = vld [vmem:[%s17062_s5 + $0x7a8] sm:$0xff]  ;;  %v20541_v13 = vld [vmem:[#allocation40_spill] sm:$0xff]  ;;  %v7753_v42 = vld [vmem:[%s17062_s5 + $0x878] sm:$0xff] }
 0x6bb   :  { %7691 = vmatmul.msk.f32.vlgmr.msrb.gmra.mxu2 %vm5608_vm10, %v5575_v52  ;;  %v20538_v52 = vld [vmem:[#allocation36_spill] sm:$0xff]  ;;  %v20542_v47 = vld [vmem:[#allocation63_spill] sm:$0xff] }
 0x6bc   :  { %v5416_v31 = vpop.f32.mrf.mxu1  ;;  %6537 = vmatpush.msra.mxu2 %v7704_v43  ;;  %6570 = vmatpush.msra.mxu3 %v7713_v44  ;;  %v4038_v8 = vadd.f32 %v15656_v25, %v3596_v17  ;;  %v20539_v43 = vld [vmem:[#allocation37_spill] sm:$0xff]  ;;  %v7743_v17 = vld [vmem:[%s17062_s5 + $0x830] sm:$0xff] }
 0x6bd   :  { %v5488_v11 = vadd.f32 %v5416_v31, %v5004_v49  ;;  %v3281_v44 = vadd.f32 %v20539_v43, %v20538_v52  ;;  %v7722_v49 = vld [vmem:[%s17062_s5 + $0x798] sm:$0xff]  ;;  %v7750_v52 = vld [vmem:[%s17062_s5 + $0x860] sm:$0xff] }
 0x6be   :  { %6538 = vmatpush.msra.mxu2 %v7703_v40  ;;  %6571 = vmatpush.msra.mxu3 %v7712_v21  ;;  %v4564_v30 = vadd.f32 %v15668_v41, %v4038_v8  ;;  %v7731_v25 = vld [vmem:[%s17062_s5 + $0x7d8] sm:$0xff]  ;;  %v20540_v40 = vld [vmem:[#allocation104_spill] sm:$0xff]  ;;  %v7751_v8 = vld [vmem:[%s17062_s5 + $0x868] sm:$0xff] }
 0x6bf   :  { %v5534_v1 = vadd.f32 %v16293_v45, %v5488_v11  ;;  %v16665_v61 = vpop.f32.mrf.mxu0  ;;  %v3597_v21 = vadd.f32 %v20540_v40, %v3281_v44  ;;  %v7721_v41 = vld [vmem:[%s17062_s5 + $0x790] sm:$0xff]  ;;  %v20545_v44 = vld [vmem:[#allocation45_spill] sm:$0xff] }
 0x6c0   :  { %6539 = vmatpush.msra.mxu2 %v7702_v10  ;;  %6572 = vmatpush.msra.mxu3 %v7711_v7  ;;  %v5006_v31 = vadd.f32 %v16577_v56, %v4564_v30  ;;  %v7730_v11 = vld [vmem:[%s17062_s5 + $0x7d0] sm:$0xff]  ;;  %v7729_v56 = vld [vmem:[%s17062_s5 + $0x7c8] sm:$0xff]  ;;  %v7749_v40 = vld [vmem:[%s17062_s5 + $0x858] sm:$0xff] }
 0x6c1   :  { %v5576_v36 = vmax.f32 %v5534_v1, 0.0  ;;  %v20546_v30 = vld [vmem:[#allocation67_spill] sm:$0xff] }
 0x6c2   :  { %6540 = vmatpush.msra.mxu2 %v7701_v3  ;;  %6573 = vmatpush.msra.mxu3 %v7710_v55  ;;  %v4039_v3 = vadd.f32 %v15697_v18, %v3597_v21  ;;  %v20543_v18 = vld [vmem:[#allocation170_spill] sm:$0xff]  ;;  %v20547_v21 = vld [vmem:[#allocation157_spill] sm:$0xff] }
 0x6c3   :  { %7700 = vmatmul.msk.f32.vlgmr.msrb.gmra.mxu3 %vm5608_vm10, %v5576_v36  ;;  %v3282_v36 = vadd.f32 %v20542_v47, %v20541_v13  ;;  %v20549_v13 = vld [vmem:[#allocation196_spill] sm:$0xff] }
 0x6c4   :  { %6599 = vmatpush.msrb.mxu2 %v7726_v29  ;;  %v5419_v20 = vpop.f32.mrf.mxu1  ;;  %6632 = vmatpush.msrb.mxu3 %v7735_v0  ;;  %v7719_v29 = vld [vmem:[%s17062_s5 + $0x780] sm:$0xff]  ;;  %v4565_v0 = vadd.f32 %v20543_v18, %v4039_v3  ;;  %v7771_v18 = vld [vmem:[%s17062_s5 + $0x8f8] sm:$0xff] }
 0x6c5   :  { %v5489_v54 = vadd.f32 %v5419_v20, %v5005_v14  ;;  %v20544_v14 = vld [vmem:[#allocation124_spill] sm:$0xff] }
 0x6c6   :  { %6600 = vmatpush.msrb.mxu2 %v7725_v28  ;;  %6633 = vmatpush.msrb.mxu3 %v7734_v39  ;;  %v3598_v39 = vadd.f32 %v20544_v14, %v3282_v36  ;;  %v5007_v20 = vadd.f32 %v16622_v60, %v4565_v0  ;;  %v7741_v60 = vld [vmem:[%s17062_s5 + $0x820] sm:$0xff] }
 0x6c7   :  { %v5535_v53 = vadd.f32 %v16293_v45, %v5489_v54  ;;  %v16705_v1 = vpop.f32.mrf.mxu0 }
 0x6c8   :  { %6601 = vmatpush.msrb.mxu2 %v7724_v24  ;;  %6634 = vmatpush.msrb.mxu3 %v7733_v37  ;;  %v7752_v24 = vld [vmem:[%s17062_s5 + $0x870] sm:$0xff]  ;;  %v7742_v37 = vld [vmem:[%s17062_s5 + $0x828] sm:$0xff] }
 0x6c9   :  { %v5577_v58 = vmax.f32 %v5535_v53, 0.0  ;;  %v4040_v53 = vadd.f32 %v15742_v6, %v3598_v39  ;;  %v7740_v6 = vld [vmem:[%s17062_s5 + $0x818] sm:$0xff] }
 0x6ca   :  { %6602 = vmatpush.msrb.mxu2 %v7723_v63  ;;  %6635 = vmatpush.msrb.mxu3 %v7732_v38 }
 0x6cb   :  { %7709 = vmatmul.msk.f32.vlgmr.msra.gmra.mxu2 %vm5608_vm10, %v5577_v58  ;;  %v3283_v58 = vadd.f32 %v20546_v30, %v20545_v44  ;;  %v7758_v30 = vld [vmem:[%s17062_s5 + $0x898] sm:$0xff] }
 0x6cc   :  { %v5422_v10 = vpop.f32.mrf.mxu1  ;;  %6603 = vmatpush.msrb.mxu2 %v7722_v49  ;;  %6636 = vmatpush.msrb.mxu3 %v7731_v25  ;;  %v4566_v49 = vadd.f32 %v15750_v32, %v4040_v53  ;;  %v7739_v32 = vld [vmem:[%s17062_s5 + $0x810] sm:$0xff]  ;;  %v20552_v53 = vld [vmem:[#allocation103_spill] sm:$0xff] }
 0x6cd   :  { %v5490_v7 = vadd.f32 %v5422_v10, %v5006_v31  ;;  %v3599_v31 = vadd.f32 %v20547_v21, %v3283_v58  ;;  %v20553_v58 = vld [vmem:[#allocation128_spill] sm:$0xff] }
 0x6ce   :  { %6604 = vmatpush.msrb.mxu2 %v7721_v41  ;;  %6637 = vmatpush.msrb.mxu3 %v7730_v11  ;;  %v5008_v41 = vadd.f32 %v16665_v61, %v4566_v49  ;;  %v7748_v11 = vld [vmem:[%s17062_s5 + $0x850] sm:$0xff]  ;;  %v7747_v61 = vld [vmem:[%s17062_s5 + $0x848] sm:$0xff] }
 0x6cf   :  { %v5536_v55 = vadd.f32 %v16293_v45, %v5490_v7  ;;  %v16747_v43 = vpop.f32.mrf.mxu0 }
 0x6d0   :  { %6605 = vmatpush.msrb.mxu2 %v7720_v12  ;;  %6638 = vmatpush.msrb.mxu3 %v7729_v56  ;;  %v7738_v12 = vld [vmem:[%s17062_s5 + $0x808] sm:$0xff]  ;;  %v4041_v56 = vadd.f32 %v15792_v46, %v3599_v31 }
 0x6d1   :  { %v5578_v28 = vmax.f32 %v5536_v55, 0.0  ;;  %v7737_v55 = vld [vmem:[%s17062_s5 + $0x800] sm:$0xff] }
 0x6d2   :  { %6606 = vmatpush.msrb.mxu2 %v7719_v29  ;;  %6639 = vmatpush.msrb.mxu3 %v7728_v5  ;;  %v7746_v29 = vld [vmem:[%s17062_s5 + $0x840] sm:$0xff]  ;;  %v7762_v5 = vld [vmem:[%s17062_s5 + $0x8b8] sm:$0xff]  ;;  %v4567_v46 = vadd.f32 %v15798_v27, %v4041_v56  ;;  %v7770_v27 = vld [vmem:[%s17062_s5 + $0x8f0] sm:$0xff] }
 0x6d3   :  { %7718 = vmatmul.msk.f32.vlgmr.msra.gmra.mxu3 %vm5608_vm10, %v5578_v28  ;;  %v7761_v28 = vld [vmem:[%s17062_s5 + $0x8b0] sm:$0xff]  ;;  %v20555_v56 = vld [vmem:[#allocation78_spill] sm:$0xff] }
 0x6d4   :  { %6665 = vmatpush.msra.mxu2 %v7744_v22  ;;  %v5425_v54 = vpop.f32.mrf.mxu1  ;;  %6698 = vmatpush.msra.mxu3 %v7753_v42  ;;  %v20548_v22 = vld [vmem:[#allocation193_spill] sm:$0xff]  ;;  %v20550_v42 = vld [vmem:[#allocation108_spill] sm:$0xff]  ;;  %v5009_v14 = vadd.f32 %v16705_v1, %v4567_v46  ;;  %v7759_v1 = vld [vmem:[%s17062_s5 + $0x8a0] sm:$0xff] }
 0x6d5   :  { %v5491_v63 = vadd.f32 %v5425_v54, %v5007_v20  ;;  %v3284_v47 = vadd.f32 %v20549_v13, %v20548_v22  ;;  %v7760_v20 = vld [vmem:[%s17062_s5 + $0x8a8] sm:$0xff]  ;;  %v20556_v22 = vld [vmem:[#allocation6_spill] sm:$0xff] }
 0x6d6   :  { %6666 = vmatpush.msra.mxu2 %v7743_v17  ;;  %6699 = vmatpush.msra.mxu3 %v7752_v24  ;;  %v7769_v54 = vld [vmem:[%s17062_s5 + $0x8e8] sm:$0xff] }
 0x6d7   :  { %v5537_v38 = vadd.f32 %v16293_v45, %v5491_v63  ;;  %v4953_v0 = vpop.f32.mrf.mxu0  ;;  %v3600_v17 = vadd.f32 %v20550_v42, %v3284_v47  ;;  %v7777_v42 = vld [vmem:[%s17062_s5 + $0x920] sm:$0xff] }
 0x6d8   :  { %6667 = vmatpush.msra.mxu2 %v7742_v37  ;;  %6700 = vmatpush.msra.mxu3 %v7751_v8  ;;  %v7768_v8 = vld [vmem:[%s17062_s5 + $0x8e0] sm:$0xff] }
 0x6d9   :  { %v5579_v25 = vmax.f32 %v5537_v38, 0.0  ;;  %v4042_v37 = vadd.f32 %v15835_v23, %v3600_v17  ;;  %v7767_v23 = vld [vmem:[%s17062_s5 + $0x8d8] sm:$0xff] }
 0x6da   :  { %6668 = vmatpush.msra.mxu2 %v7741_v60  ;;  %6701 = vmatpush.msra.mxu3 %v7750_v52  ;;  %v20551_v60 = vld [vmem:[#allocation33_spill] sm:$0xff] }
 0x6db   :  { %7727 = vmatmul.msk.f32.vlgmr.msrb.gmra.mxu2 %vm5608_vm10, %v5579_v25  ;;  %v3285_v38 = vadd.f32 %v20552_v53, %v20551_v60  ;;  %v4568_v52 = vadd.f32 %v15847_v16, %v4042_v37  ;;  %v7757_v16 = vld [vmem:[%s17062_s5 + $0x890] sm:$0xff]  ;;  %v7776_v37 = vld [vmem:[%s17062_s5 + $0x918] sm:$0xff] }
 0x6dc   :  { %v5428_v10 = vpop.f32.mrf.mxu1  ;;  %6669 = vmatpush.msra.mxu2 %v7740_v6  ;;  %6702 = vmatpush.msra.mxu3 %v7749_v40  ;;  %v7766_v6 = vld [vmem:[%s17062_s5 + $0x8d0] sm:$0xff] }
 0x6dd   :  { %v5492_v7 = vadd.f32 %v5428_v10, %v5008_v41  ;;  %v3601_v49 = vadd.f32 %v20553_v58, %v3285_v38  ;;  %v5010_v25 = vadd.f32 %v16747_v43, %v4568_v52  ;;  %v7756_v41 = vld [vmem:[%s17062_s5 + $0x888] sm:$0xff]  ;;  %v7755_v10 = vld [vmem:[%s17062_s5 + $0x880] sm:$0xff]  ;;  %v7784_v53 = vld [vmem:[%s17062_s5 + $0x950] sm:$0xff] }
 0x6de   :  { %6670 = vmatpush.msra.mxu2 %v7739_v32  ;;  %6703 = vmatpush.msra.mxu3 %v7748_v11  ;;  %v7765_v43 = vld [vmem:[%s17062_s5 + $0x8c8] sm:$0xff] }
 0x6df   :  { %v5538_v3 = vadd.f32 %v16293_v45, %v5492_v7  ;;  %v4956_v40 = vpop.f32.mrf.mxu0  ;;  %v4043_v32 = vadd.f32 %v15888_v2, %v3601_v49  ;;  %v7764_v7 = vld [vmem:[%s17062_s5 + $0x8c0] sm:$0xff] }
 0x6e0   :  { %6671 = vmatpush.msra.mxu2 %v7738_v12  ;;  %6704 = vmatpush.msra.mxu3 %v7747_v61  ;;  %v7780_v12 = vld [vmem:[%s17062_s5 + $0x938] sm:$0xff]  ;;  %v20554_v61 = vld [vmem:[#allocation54_spill] sm:$0xff] }
 0x6e1   :  { %v5580_v36 = vmax.f32 %v5538_v3, 0.0  ;;  %v3286_v3 = vadd.f32 %v20555_v56, %v20554_v61  ;;  %v4569_v2 = vadd.f32 %v15895_v4, %v4043_v32  ;;  %v7788_v4 = vld [vmem:[%s17062_s5 + $0x970] sm:$0xff]  ;;  %v7773_v49 = vld [vmem:[%s17062_s5 + $0x900] sm:$0xff]  ;;  %v7805_v56 = vld [vmem:[%s17062_s5 + $0x9e8] sm:$0xff] }
 0x6e2   :  { %6672 = vmatpush.msra.mxu2 %v7737_v55  ;;  %6705 = vmatpush.msra.mxu3 %v7746_v29  ;;  %v7789_v29 = vld [vmem:[%s17062_s5 + $0x978] sm:$0xff]  ;;  %v20562_v32 = vld [vmem:[#allocation176_spill] sm:$0xff] }
 0x6e3   :  { %7736 = vmatmul.msk.f32.vlgmr.msrb.gmra.mxu3 %vm5608_vm10, %v5580_v36  ;;  %v3602_v13 = vadd.f32 %v20556_v22, %v3286_v3  ;;  %v5011_v47 = vadd.f32 %v4953_v0, %v4569_v2  ;;  %v7778_v36 = vld [vmem:[%s17062_s5 + $0x928] sm:$0xff]  ;;  %v7795_v3 = vld [vmem:[%s17062_s5 + $0x9a0] sm:$0xff] }
 0x6e4   :  { %6731 = vmatpush.msrb.mxu2 %v7762_v5  ;;  %v5431_v39 = vpop.f32.mrf.mxu1  ;;  %6764 = vmatpush.msrb.mxu3 %v7771_v18  ;;  %v7779_v5 = vld [vmem:[%s17062_s5 + $0x930] sm:$0xff]  ;;  %v20563_v22 = vld [vmem:[#allocation195_spill] sm:$0xff] }
 0x6e5   :  { %v5493_v24 = vadd.f32 %v5431_v39, %v5009_v14  ;;  %v4044_v17 = vadd.f32 %v15936_v35, %v3602_v13  ;;  %v20557_v39 = vld [vmem:[#allocation59_spill] sm:$0xff]  ;;  %v7785_v35 = vld [vmem:[%s17062_s5 + $0x958] sm:$0xff]  ;;  %v20564_v13 = vld [vmem:[#allocation86_spill] sm:$0xff] }
 0x6e6   :  { %6732 = vmatpush.msrb.mxu2 %v7761_v28  ;;  %6765 = vmatpush.msrb.mxu3 %v7770_v27  ;;  %v7787_v28 = vld [vmem:[%s17062_s5 + $0x968] sm:$0xff]  ;;  %v7786_v27 = vld [vmem:[%s17062_s5 + $0x960] sm:$0xff] }
 0x6e7   :  { %v5539_v63 = vadd.f32 %v16293_v45, %v5493_v24  ;;  %v4959_v0 = vpop.f32.mrf.mxu0 }
 0x6e8   :  { %6733 = vmatpush.msrb.mxu2 %v7760_v20  ;;  %6766 = vmatpush.msrb.mxu3 %v7769_v54  ;;  %v20558_v20 = vld [vmem:[#allocation127_spill] sm:$0xff]  ;;  %v4570_v54 = vadd.f32 %v15941_v15, %v4044_v17  ;;  %v7775_v15 = vld [vmem:[%s17062_s5 + $0x910] sm:$0xff] }
 0x6e9   :  { %v5581_v44 = vmax.f32 %v5539_v63, 0.0  ;;  %v3287_v24 = vadd.f32 %v20558_v20, %v20557_v39  ;;  %v20559_v63 = vld [vmem:[#allocation112_spill] sm:$0xff]  ;;  %v7792_v39 = vld [vmem:[%s17062_s5 + $0x988] sm:$0xff] }
 0x6ea   :  { %6734 = vmatpush.msrb.mxu2 %v7759_v1  ;;  %6767 = vmatpush.msrb.mxu3 %v7768_v8  ;;  %v5012_v60 = vadd.f32 %v4956_v40, %v4570_v54  ;;  %v20560_v40 = vld [vmem:[#allocation194_spill] sm:$0xff]  ;;  %v7802_v17 = vld [vmem:[%s17062_s5 + $0x9d0] sm:$0xff]  ;;  %v7801_v20 = vld [vmem:[%s17062_s5 + $0x9c8] sm:$0xff] }
 0x6eb   :  { %7745 = vmatmul.msk.f32.vlgmr.msra.gmra.mxu2 %vm5608_vm10, %v5581_v44  ;;  %v3603_v8 = vadd.f32 %v20559_v63, %v3287_v24  ;;  %v7774_v44 = vld [vmem:[%s17062_s5 + $0x908] sm:$0xff]  ;;  %v20566_v63 = vld [vmem:[#allocation197_spill] sm:$0xff] }
 0x6ec   :  { %v5434_v21 = vpop.f32.mrf.mxu1  ;;  %6735 = vmatpush.msrb.mxu2 %v7758_v30  ;;  %6768 = vmatpush.msrb.mxu3 %v7767_v23  ;;  %v7783_v30 = vld [vmem:[%s17062_s5 + $0x948] sm:$0xff] }
 0x6ed   :  { %v5494_v31 = vadd.f32 %v5434_v21, %v5010_v25  ;;  %v4045_v23 = vadd.f32 %v15980_v57, %v3603_v8  ;;  %v7782_v25 = vld [vmem:[%s17062_s5 + $0x940] sm:$0xff]  ;;  %v20561_v21 = vld [vmem:[#allocation151_spill] sm:$0xff]  ;;  %v20567_v8 = vld [vmem:[#allocation116_spill] sm:$0xff] }
 0x6ee   :  { %6736 = vmatpush.msrb.mxu2 %v7757_v16  ;;  %6769 = vmatpush.msrb.mxu3 %v7766_v6  ;;  %v7798_v6 = vld [vmem:[%s17062_s5 + $0x9b8] sm:$0xff]  ;;  %v3288_v57 = vadd.f32 %v20561_v21, %v20560_v40 }
 0x6ef   :  { %v5540_v11 = vadd.f32 %v16293_v45, %v5494_v31  ;;  %v4962_v16 = vpop.f32.mrf.mxu0 }
 0x6f0   :  { %6737 = vmatpush.msrb.mxu2 %v7756_v41  ;;  %6770 = vmatpush.msrb.mxu3 %v7765_v43  ;;  %v7807_v41 = vld [vmem:[%s17062_s5 + $0x9f8] sm:$0xff]  ;;  %v7797_v43 = vld [vmem:[%s17062_s5 + $0x9b0] sm:$0xff] }
 0x6f1   :  { %v5582_v55 = vmax.f32 %v5540_v11, 0.0  ;;  %v3604_v11 = vadd.f32 %v20562_v32, %v3288_v57  ;;  %v7822_v57 = vld [vmem:[%s17062_s5 + $0xa60] sm:$0xff] }
 0x6f2   :  { %6738 = vmatpush.msrb.mxu2 %v7755_v10  ;;  %6771 = vmatpush.msrb.mxu3 %v7764_v7 }
 0x6f3   :  { %7754 = vmatmul.msk.f32.vlgmr.msra.gmra.mxu3 %vm5608_vm10, %v5582_v55  ;;  %v4046_v2 = vadd.f32 %v16031_v59, %v3604_v11  ;;  %v16937_v55 = vld [vmem:[%s17063_s4] ss:$0 sm:$0xff]  ;;  %v7794_v59 = vld [vmem:[%s17062_s5 + $0x998] sm:$0xff] }
 0x6f4   :  { %6797 = vmatpush.msra.mxu2 %v7780_v12  ;;  %v5437_v46 = vpop.f32.mrf.mxu1  ;;  %6830 = vmatpush.msra.mxu3 %v7789_v29  ;;  %v7796_v12 = vld [vmem:[%s17062_s5 + $0x9a8] sm:$0xff]  ;;  %v7812_v11 = vld [vmem:[%s17062_s5 + $0xa18] sm:$0xff] }
 0x6f5   :  { %v5495_v18 = vadd.f32 %v5437_v46, %v5011_v47  ;;  %v3289_v47 = vadd.f32 %v20564_v13, %v20563_v22  ;;  %v7809_v13 = vld [vmem:[%s17062_s5 + $0xa00] sm:$0xff] }
 0x6f6   :  { %6798 = vmatpush.msra.mxu2 %v7779_v5  ;;  %6831 = vmatpush.msra.mxu3 %v7788_v4  ;;  %v7804_v5 = vld [vmem:[%s17062_s5 + $0x9e0] sm:$0xff]  ;;  %v4572_v4 = vadd.f32 %v16040_v19, %v4046_v2  ;;  %v7793_v19 = vld [vmem:[%s17062_s5 + $0x990] sm:$0xff]  ;;  %v7819_v2 = vld [vmem:[%s17062_s5 + $0xa48] sm:$0xff] }
 0x6f7   :  { %v5541_v14 = vadd.f32 %v16293_v45, %v5495_v18  ;;  %v4965_v18 = vpop.f32.mrf.mxu0 }
 0x6f8   :  { %6799 = vmatpush.msra.mxu2 %v7778_v36  ;;  %6832 = vmatpush.msra.mxu3 %v7787_v28  ;;  %v7803_v36 = vld [vmem:[%s17062_s5 + $0x9d8] sm:$0xff]  ;;  %v20565_v28 = vld [vmem:[#allocation182_spill] sm:$0xff] }
 0x6f9   :  { %v5583_v1 = vmax.f32 %v5541_v14, 0.0 }
 0x6fa   :  { %6800 = vmatpush.msra.mxu2 %v7777_v42  ;;  %6833 = vmatpush.msra.mxu3 %v7786_v27  ;;  %v5014_v42 = vadd.f32 %v4962_v16, %v4572_v4  ;;  %v7823_v16 = vld [vmem:[%s17062_s5 + $0xa68] sm:$0xff]  ;;  %v20572_v4 = vld [vmem:[#allocation122_spill] sm:$0xff] }
 0x6fb   :  { %7763 = vmatmul.msk.f32.vlgmr.msrb.gmra.mxu2 %vm5608_vm10, %v5583_v1  ;;  %v7791_v1 = vld [vmem:[%s17062_s5 + $0x980] sm:$0xff] }
 0x6fc   :  { %v5440_v38 = vpop.f32.mrf.mxu1  ;;  %6801 = vmatpush.msra.mxu2 %v7776_v37  ;;  %6834 = vmatpush.msra.mxu3 %v7785_v35  ;;  %v7800_v37 = vld [vmem:[%s17062_s5 + $0x9c0] sm:$0xff]  ;;  %v7816_v35 = vld [vmem:[%s17062_s5 + $0xa38] sm:$0xff] }
 0x6fd   :  { %v5496_v52 = vadd.f32 %v5440_v38, %v5012_v60  ;;  %v3290_v60 = vadd.f32 %v20567_v8, %v20566_v63  ;;  %v7815_v38 = vld [vmem:[%s17062_s5 + $0xa30] sm:$0xff] }
 0x6fe   :  { %6802 = vmatpush.msra.mxu2 %v7775_v15  ;;  %6835 = vmatpush.msra.mxu3 %v7784_v53  ;;  %v7825_v53 = vld [vmem:[%s17062_s5 + $0xa78] sm:$0xff] }
 0x6ff   :  { %v5542_v58 = vadd.f32 %v16293_v45, %v5496_v52  ;;  %v4571_v45 = vadd.f32 %v15989_v26, %v4045_v23  ;;  %v7806_v26 = vld [vmem:[%s17062_s5 + $0x9f0] sm:$0xff]  ;;  %v20568_v52 = vld [vmem:[#allocation145_spill] sm:$0xff]  ;;  %v4968_v23 = vpop.f32.mrf.mxu0 }
 0x700   :  { %6803 = vmatpush.msra.mxu2 %v7774_v44  ;;  %6836 = vmatpush.msra.mxu3 %v7783_v30  ;;  %v3606_v44 = vadd.f32 %v20568_v52, %v3290_v60  ;;  %v5948_v60 = vpop.f32.mrf.mxu2 }
 0x701   :  { %v5584_v31 = vmax.f32 %v5542_v58, 0.0  ;;  %v5013_v10 = vadd.f32 %v4959_v0, %v4571_v45  ;;  %v3605_v0 = vadd.f32 %v20565_v28, %v3289_v47  ;;  %v20569_v45 = vld [vmem:[#allocation74_spill] sm:$0xff] }
 0x702   :  { %6804 = vmatpush.msra.mxu2 %v7773_v49  ;;  %6837 = vmatpush.msra.mxu3 %v7782_v25  ;;  %v7814_v49 = vld [vmem:[%s17062_s5 + $0xa28] sm:$0xff]  ;;  %v4048_v40 = vadd.f32 %v16130_v9, %v3606_v44  ;;  %v7821_v9 = vld [vmem:[%s17062_s5 + $0xa58] sm:$0xff]  ;;  %v7818_v47 = vld [vmem:[%s17062_s5 + $0xa40] sm:$0xff] }
 0x703   :  { %7772 = vmatmul.msk.f32.vlgmr.msrb.gmra.mxu3 %vm5608_vm10, %v5584_v31  ;;  %v4047_v24 = vadd.f32 %v16080_v51, %v3605_v0  ;;  %v20570_v31 = vld [vmem:[#allocation90_spill] sm:$0xff] }
 0x704   :  { %6863 = vmatpush.msrb.mxu2 %v7798_v6  ;;  %v5443_v7 = vpop.f32.mrf.mxu1  ;;  %6896 = vmatpush.msrb.mxu3 %v7807_v41  ;;  %v7813_v6 = vld [vmem:[%s17062_s5 + $0xa20] sm:$0xff]  ;;  %v3291_v41 = vadd.f32 %v20570_v31, %v20569_v45 }
 0x705   :  { %v5497_v61 = vadd.f32 %v5443_v7, %v5013_v10  ;;  %v4573_v51 = vadd.f32 %v16090_v50, %v4047_v24  ;;  %v7824_v50 = vld [vmem:[%s17062_s5 + $0xa70] sm:$0xff]  ;;  %v20571_v10 = vld [vmem:[#allocation169_spill] sm:$0xff] }
 0x706   :  { %6864 = vmatpush.msrb.mxu2 %v7797_v43  ;;  %6897 = vmatpush.msrb.mxu3 %v7806_v26  ;;  %v4574_v43 = vadd.f32 %v16138_v33, %v4048_v40  ;;  %v3607_v26 = vadd.f32 %v20571_v10, %v3291_v41  ;;  %v7811_v33 = vld [vmem:[%s17062_s5 + $0xa10] sm:$0xff] }
 0x707   :  { %v5543_v29 = vadd.f32 %v16937_v55, %v5497_v61  ;;  %v5015_v30 = vadd.f32 %v4965_v18, %v4573_v51  ;;  %v5981_v51 = vpop.f32.mrf.mxu3 }
 0x708   :  { %6865 = vmatpush.msrb.mxu2 %v7796_v12  ;;  %6898 = vmatpush.msrb.mxu3 %v7805_v56  ;;  %v5016_v7 = vadd.f32 %v4968_v23, %v4574_v43  ;;  %v7820_v12 = vld [vmem:[%s17062_s5 + $0xa50] sm:$0xff] }
 0x709   :  { %v5585_v46 = vmax.f32 %v5543_v29, 0.0  ;;  %v4971_v29 = vpop.f32.mrf.mxu0 }
 0x70a   :  { %6866 = vmatpush.msrb.mxu2 %v7795_v3  ;;  %6899 = vmatpush.msrb.mxu3 %v7804_v5  ;;  %v7810_v3 = vld [vmem:[%s17062_s5 + $0xa08] sm:$0xff]  ;;  %v4049_v5 = vadd.f32 %v16182_v34, %v3607_v26  ;;  %v20575_v34 = vld [vmem:[#allocation153_spill] sm:$0xff] }
 0x70b   :  { %7781 = vmatmul.msk.f32.vlgmr.msra.gmra.mxu2 %vm5608_vm10, %v5585_v46  ;;  %v20573_v46 = vld [vmem:[#allocation121_spill] sm:$0xff] }
 0x70c   :  { %v5446_v14 = vpop.f32.mrf.mxu1  ;;  %6867 = vmatpush.msrb.mxu2 %v7794_v59  ;;  %6900 = vmatpush.msrb.mxu3 %v7803_v36  ;;  %v3292_v59 = vadd.f32 %v20573_v46, %v20572_v4  ;;  %v20574_v36 = vld [vmem:[#allocation160_spill] sm:$0xff] }
 0x70d   :  { %v5498_v27 = vadd.f32 %v5446_v14, %v5014_v42  ;;  %v4575_v18 = vadd.f32 %v20574_v36, %v4049_v5 }
 0x70e   :  { %6868 = vmatpush.msrb.mxu2 %v7793_v19  ;;  %6901 = vmatpush.msrb.mxu3 %v7802_v17  ;;  %v3608_v0 = vadd.f32 %v20575_v34, %v3292_v59 }
 0x70f   :  { %v5544_v54 = vadd.f32 %v16937_v55, %v5498_v27  ;;  %v5017_v42 = vadd.f32 %v4971_v29, %v4575_v18 }
 0x710   :  { %6869 = vmatpush.msrb.mxu2 %v7792_v39  ;;  %6902 = vmatpush.msrb.mxu3 %v7801_v20  ;;  %v4050_v14 = vadd.f32 %v16240_v48, %v3608_v0  ;;  %v20576_v20 = vld [vmem:[#allocation172_spill] sm:$0xff]  ;;  %v6047_v48 = vpop.f32.mrf.mxu3 }
 0x711   :  { %v5586_v15 = vmax.f32 %v5544_v54, 0.0  ;;  %v4974_v39 = vpop.f32.mrf.mxu0 }
 0x712   :  { %6870 = vmatpush.msrb.mxu2 %v7791_v1  ;;  %6903 = vmatpush.msrb.mxu3 %v7800_v37  ;;  %v4576_v24 = vadd.f32 %v20576_v20, %v4050_v14 }
 0x713   :  { %7790 = vmatmul.msk.f32.vlgmr.msra.gmra.mxu3 %vm5608_vm10, %v5586_v15  ;;  %v6014_v15 = vpop.f32.mrf.mxu2 }
 0x714   :  { %6929 = vmatpush.msra.mxu2 %v7816_v35  ;;  %v5449_v58 = vpop.f32.mrf.mxu1  ;;  %6962 = vmatpush.msra.mxu3 %v7825_v53  ;;  %v5018_v1 = vadd.f32 %v4974_v39, %v4576_v24 }
 0x715   :  { %v5499_v25 = vadd.f32 %v5449_v58, %v5015_v30 }
 0x716   :  { %6930 = vmatpush.msra.mxu2 %v7815_v38  ;;  %6963 = vmatpush.msra.mxu3 %v7824_v50 }
 0x717   :  { %v5545_v21 = vadd.f32 %v16937_v55, %v5499_v25 }
 0x718   :  { %6931 = vmatpush.msra.mxu2 %v7814_v49  ;;  %6964 = vmatpush.msra.mxu3 %v7823_v16  ;;  %v6113_v38 = vpop.f32.mrf.mxu3 }
 0x719   :  { %v5587_v32 = vmax.f32 %v5545_v21, 0.0 }
 0x71a   :  { %6932 = vmatpush.msra.mxu2 %v7813_v6  ;;  %6965 = vmatpush.msra.mxu3 %v7822_v57 }
 0x71b   :  { %7799 = vmatmul.msk.f32.vlgmr.msrb.gmra.mxu2 %vm5608_vm10, %v5587_v32  ;;  %v6080_v53 = vpop.f32.mrf.mxu2 }
 0x71c   :  { %v5452_v61 = vpop.f32.mrf.mxu1  ;;  %6933 = vmatpush.msra.mxu2 %v7812_v11  ;;  %6966 = vmatpush.msra.mxu3 %v7821_v9 }
 0x71d   :  { %v5500_v56 = vadd.f32 %v5452_v61, %v5016_v7 }
 0x71e   :  { %6934 = vmatpush.msra.mxu2 %v7811_v33  ;;  %6967 = vmatpush.msra.mxu3 %v7820_v12 }
 0x71f   :  { %v5546_v22 = vadd.f32 %v16937_v55, %v5500_v56 }
 0x720   :  { %6935 = vmatpush.msra.mxu2 %v7810_v3  ;;  %6968 = vmatpush.msra.mxu3 %v7819_v2  ;;  %v6179_v44 = vpop.f32.mrf.mxu3 }
 0x721   :  { %v5588_v28 = vmax.f32 %v5546_v22, 0.0 }
 0x722   :  { %6936 = vmatpush.msra.mxu2 %v7809_v13  ;;  %6969 = vmatpush.msra.mxu3 %v7818_v47 }
 0x723   :  { %7808 = vmatmul.msk.f32.vlgmr.msrb.gmra.mxu3 %vm5608_vm10, %v5588_v28  ;;  %v6146_v52 = vpop.f32.mrf.mxu2 }
 0x724   :  { %v5455_v19 = vpop.f32.mrf.mxu1 }
 0x725   :  { %v5501_v17 = vadd.f32 %v5455_v19, %v5017_v42 }
 0x727   :  { %v5547_v27 = vadd.f32 %v16937_v55, %v5501_v17 }
 0x728   :  { %v6245_v50 = vpop.f32.mrf.mxu3 }
 0x729   :  { %v5589_v54 = vmax.f32 %v5547_v27, 0.0 }
 0x72b   :  { %7817 = vmatmul.msk.f32.vlgmr.msra.gmra.mxu2 %vm5608_vm10, %v5589_v54  ;;  %v6212_v30 = vpop.f32.mrf.mxu2 }
 0x72c   :  { %v5458_v37 = vpop.f32.mrf.mxu1 }
 0x72d   :  { %v5502_v35 = vadd.f32 %v5458_v37, %v5018_v1 }
 0x72f   :  { %v5548_v63 = vadd.f32 %v16937_v55, %v5502_v35  ;;  %v5951_v55 = vadd.f32 %v5948_v60, %v16608_v62  ;;  %v20577_v35 = vlaneseq  ;;  %v7831_v60 = vld [vmem:[%s17064_s6] ss:$0 sm:$0xff] }
 0x730   :  { %v6311_v58 = vpop.f32.mrf.mxu3 }
 0x731   :  { %v5590_v8 = vmax.f32 %v5548_v63, 0.0  ;;  %v5984_v21 = vadd.f32 %v5981_v51, %v5951_v55  ;;  %v6981_v63 = vand.u32 127, %v20577_v35 }
 0x733   :  { %7826 = vmatmul.msk.f32.vlgmr.msra.gmra.mxu3 %vm5608_vm10, %v5590_v8  ;;  %v6278_v23 = vpop.f32.mrf.mxu2  ;;  %v6017_v57 = vadd.f32 %v6014_v15, %v5984_v21  ;;  %vm6982_vm10 = vcmp.lt.s32.totalorder %v6981_v63, 7  ;;  %vm6995_vm13 = vcmp.eq.s32.totalorder %v6981_v63, 7 }
 0x735   :  { %v6050_v31 = vadd.f32 %v6047_v48, %v6017_v57 }
 0x737   :  { %v6083_v41 = vadd.f32 %v6080_v53, %v6050_v31 }
 0x738   :  { %v6377_v25 = vpop.f32.mrf.mxu3 }
 0x739   :  { %v6116_v32 = vadd.f32 %v6113_v38, %v6083_v41 }
 0x73b   :  { %v6344_v49 = vpop.f32.mrf.mxu2  ;;  %v6149_v11 = vadd.f32 %v6146_v52, %v6116_v32 }
 0x73d   :  { %v6182_v10 = vadd.f32 %v6179_v44, %v6149_v11 }
 0x73f   :  { %v6215_v26 = vadd.f32 %v6212_v30, %v6182_v10 }
 0x740   :  { %v6443_v6 = vpop.f32.mrf.mxu3 }
 0x741   :  { %v6248_v33 = vadd.f32 %v6245_v50, %v6215_v26 }
 0x743   :  { %v6410_v16 = vpop.f32.mrf.mxu2  ;;  %v6281_v12 = vadd.f32 %v6278_v23, %v6248_v33 }
 0x745   :  { %v6314_v56 = vadd.f32 %v6311_v58, %v6281_v12 }
 0x747   :  { %v6347_v3 = vadd.f32 %v6344_v49, %v6314_v56 }
 0x748   :  { %v6509_v45 = vpop.f32.mrf.mxu3 }
 0x749   :  { %v6380_v62 = vadd.f32 %v6377_v25, %v6347_v3 }
 0x74b   :  { %v6476_v40 = vpop.f32.mrf.mxu2  ;;  %v6413_v29 = vadd.f32 %v6410_v16, %v6380_v62 }
 0x74d   :  { %v6446_v22 = vadd.f32 %v6443_v6, %v6413_v29 }
 0x74f   :  { %v6479_v13 = vadd.f32 %v6476_v40, %v6446_v22 }
 0x751   :  { %v6512_v4 = vadd.f32 %v6509_v45, %v6479_v13 }
 0x753   :  { %v6542_v43 = vpop.f32.mrf.mxu2 }
 0x754   :  { %v6545_v46 = vadd.f32 %v6542_v43, %v6512_v4 }
 0x756   :  { %v6575_v9 = vpop.f32.mrf.mxu3 }
 0x757   :  { %v6578_v36 = vadd.f32 %v6575_v9, %v6545_v46 }
 0x75e   :  { %v6608_v7 = vpop.f32.mrf.mxu2 }
 0x75f   :  { %v6611_v18 = vadd.f32 %v6608_v7, %v6578_v36 }
 0x766   :  { %v6641_v61 = vpop.f32.mrf.mxu3 }
 0x767   :  { %v6644_v34 = vadd.f32 %v6641_v61, %v6611_v18 }
 0x76e   :  { %v6674_v2 = vpop.f32.mrf.mxu2 }
 0x76f   :  { %v6677_v0 = vadd.f32 %v6674_v2, %v6644_v34 }
 0x776   :  { %v6707_v5 = vpop.f32.mrf.mxu3 }
 0x777   :  { %v6710_v19 = vadd.f32 %v6707_v5, %v6677_v0 }
 0x77e   :  { %v6740_v47 = vpop.f32.mrf.mxu2 }
 0x77f   :  { %v6743_v17 = vadd.f32 %v6740_v47, %v6710_v19 }
 0x786   :  { %v6773_v59 = vpop.f32.mrf.mxu3 }
 0x787   :  { %v6776_v27 = vadd.f32 %v6773_v59, %v6743_v17 }
 0x78e   :  { %v6806_v28 = vpop.f32.mrf.mxu2 }
 0x78f   :  { %v6809_v39 = vadd.f32 %v6806_v28, %v6776_v27 }
 0x796   :  { %v6839_v42 = vpop.f32.mrf.mxu3 }
 0x797   :  { %v6842_v24 = vadd.f32 %v6839_v42, %v6809_v39 }
 0x79e   :  { %v6872_v14 = vpop.f32.mrf.mxu2 }
 0x79f   :  { %v6875_v54 = vadd.f32 %v6872_v14, %v6842_v24 }
 0x7a6   :  { %v6905_v20 = vpop.f32.mrf.mxu3 }
 0x7a7   :  { %v6908_v37 = vadd.f32 %v6905_v20, %v6875_v54 }
 0x7ae   :  { %v6938_v1 = vpop.f32.mrf.mxu2 }
 0x7af   :  { %v6941_v8 = vadd.f32 %v6938_v1, %v6908_v37 }
 0x7b6   :  { %v6971_v51 = vpop.f32.mrf.mxu3 }
 0x7b7   :  { %v6974_v15 = vadd.f32 %v6971_v51, %v6941_v8 }
 0x7b9   :  { %v6979_v48 = vadd.f32 %v7831_v60, %v6974_v15 }
 0x7bb   :  { %v6983_v53 = vsel %vm6982_vm10, %v6979_v48, -1e+30 }
 0x7bc   :  { %6984 = vmax.xlane.f32.xlu0 %v6983_v53 }
 0x82f   :  { %v6985_v38 = vpop.xlane.xlu0 %6984 }
 0x830   :  { %v6986_v52 = vsub.f32 %v6979_v48, %v6985_v38 }
 0x832   :  { %v6987_v44 = vsel %vm6982_vm10, %v6986_v52, -1e+30 }
 0x833   :  { %v6988_v30 = vmul.f32 1.442695, %v6987_v44 }
 0x835   :  { %7832 = vpow2.f32 %v6988_v30 }
 0x83b   :  { %v7833_v50 = vpop.eup %7832 }
 0x83c   :  { %6990 = vadd.xlane.f32.xlu0 %v7833_v50 }
 0x8af   :  { %v6991_v23 = vpop.xlane.xlu0 %6990 }
 0x8b0   :  { %7834 = vlog2.f32 %v6991_v23 }
 0x8b1   :  { %7836 = vtanh.f32 %v6979_v48 }
 0x8b6   :  { %v7835_v58 = vpop.eup %7834 }
 0x8b7   :  { %v7837_v49 = vpop.eup %7836  ;;  %v6993_v25 = vmul.f32 0.6931472, %v7835_v58 }
 0x8b8   :  { %v6997_v6 = vsel %vm6995_vm13, %v7837_v49, 0.0 }
 0x8b9   :  { %v6994_v16 = vsub.f32 %v6986_v52, %v6993_v25 }
 0x8bb   :  { %v6998_v55 = vsel %vm6982_vm10, %v6994_v16, %v6997_v6 }
 0x8bc   :  { %6999 = vst [vmem:[%s17065_s7] sm:$0xff] %v6998_v55 }

</bundles_post_ra>
